<compile_context>
chip_gen: v7x
topology: tpu7x:2x2x1
jax: 0.10.0
libtpu: 0.0.40
codegen_flags: <defaults>
</compile_context>

<pallas_src>
import functools
import numpy as np

import jax
import jax.numpy as jnp
from jax.experimental import pallas as pl
from jax.experimental.pallas import tpu as pltpu

BN_EPS = 1e-5   # nn.SyncBatchNorm default eps
IN_EPS = 1e-3   # nn.InstanceNorm1d(eps=0.001)

_COMPILER_PARAMS = pltpu.CompilerParams(
    dimension_semantics=("parallel",),          # batch axis -> both TCs on v7x
    vmem_limit_bytes=32 * 1024 * 1024,          # safe on v5e/v6e/v7x at these sizes
)

# Ordered parameter keys (kernel ref order == these lists).
ATTN_KEYS = ('qw', 'qb', 'kw', 'kb', 'vw', 'vb', 'mhw', 'mhb',
             'cw1a', 'cw1b', 'cb1', 'cw2', 'cb2')
CLUSTER_KEYS = ('clw1a', 'clw1b', 'clb1', 'clw2a', 'clw2b', 'clb2a', 'clb2b')
CONF_KEYS = ('s1a', 't1a', 's1b', 't1b', 'w1a', 'w1b', 'b1',
             's2', 't2', 'w2', 'b2', 'wsa', 'wsb', 'bs')


# --------------------------------------------------------------------------
# In-kernel building blocks (operate on loaded f32 values for one batch elem)
# --------------------------------------------------------------------------

def _load(keys, refs):
    return {k: r[...] for k, r in zip(keys, refs)}


def _attn_prop(x1, x2, w, head, scale, wv=None):
    """attention_propagantion: x1 (N1,C) = query source, x2 (N2,C) = key/value source."""
    q = jnp.dot(x1, w['qw'], preferred_element_type=jnp.float32) + w['qb']
    k = jnp.dot(x2, w['kw'], preferred_element_type=jnp.float32) + w['kb']
    v = jnp.dot(x2, w['vw'], preferred_element_type=jnp.float32) + w['vb']
    if wv is not None:
        v = v * wv                                   # (N2,1) broadcast over channels
    C = q.shape[-1]
    Dh = C // head
    outs = []
    for h in range(head):                            # static unroll over heads
        qh = q[:, h * Dh:(h + 1) * Dh]
        kh = k[:, h * Dh:(h + 1) * Dh]
        vh = v[:, h * Dh:(h + 1) * Dh]
        s = jax.lax.dot_general(qh, kh, (((1,), (1,)), ((), ())),
                                preferred_element_type=jnp.float32) * scale
        s = s - jnp.max(s, axis=-1, keepdims=True)
        p = jnp.exp(s)
        p = p * pl.reciprocal(jnp.sum(p, axis=-1, keepdims=True), approx=True)
        outs.append(jnp.dot(p, vh, preferred_element_type=jnp.float32))
    add = jnp.concatenate(outs, axis=-1)             # (N1, C)
    add = jnp.dot(add, w['mhw'], preferred_element_type=jnp.float32) + w['mhb']
    # cat_filter: concat([x1, add]) @ W1 == x1 @ W1[:C] + add @ W1[C:]  (eval-BN folded)
    hid = (jnp.dot(x1, w['cw1a'], preferred_element_type=jnp.float32)
           + jnp.dot(add, w['cw1b'], preferred_element_type=jnp.float32)
           + w['cb1'])
    hid = jnp.maximum(hid, 0.0)
    delta = jnp.dot(hid, w['cw2'], preferred_element_type=jnp.float32) + w['cb2']
    return x1 + delta


def _instance_norm(z):
    """InstanceNorm1d over points (axis 0), biased variance, no affine."""
    mu = jnp.mean(z, axis=0, keepdims=True)
    var = jnp.mean((z - mu) * (z - mu), axis=0, keepdims=True)
    return (z - mu) * jax.lax.rsqrt(var + IN_EPS)


# --------------------------------------------------------------------------
# Kernel 1: attention_block_down (both pairs) + cluster_filter
# --------------------------------------------------------------------------

def _down_cluster_kernel(*refs, head, scale):
    na, nc = len(ATTN_KEYS), len(CLUSTER_KEYS)
    cl1_ref, cl2_ref, d1_ref, d2_ref = refs[:4]
    wd = _load(ATTN_KEYS, refs[4:4 + na])
    wc = _load(CLUSTER_KEYS, refs[4 + na:4 + na + nc])
    o1_ref, o2_ref = refs[4 + na + nc:]

    c1 = _attn_prop(cl1_ref[0].astype(jnp.float32),
                    d1_ref[0].astype(jnp.float32), wd, head, scale)
    c2 = _attn_prop(cl2_ref[0].astype(jnp.float32),
                    d2_ref[0].astype(jnp.float32), wd, head, scale)

    # cluster_filter: conv(2C->2C)+eval-BN(folded)+ReLU+conv(2C->2C); concat virtual.
    hid = (jnp.dot(c1, wc['clw1a'], preferred_element_type=jnp.float32)
           + jnp.dot(c2, wc['clw1b'], preferred_element_type=jnp.float32)
           + wc['clb1'])
    hid = jnp.maximum(hid, 0.0)
    o1_ref[0] = (jnp.dot(hid, wc['clw2a'], preferred_element_type=jnp.float32)
                 + wc['clb2a']).astype(o1_ref.dtype)
    o2_ref[0] = (jnp.dot(hid, wc['clw2b'], preferred_element_type=jnp.float32)
                 + wc['clb2b']).astype(o2_ref.dtype)


# --------------------------------------------------------------------------
# Kernel 2: cross_filter (both dirs) + attention_block_self (both)
#           + PointCN(2C->1) confidence head + sigmoid
# --------------------------------------------------------------------------

def _cross_self_conf_kernel(*refs, head, scale):
    na, nf = len(ATTN_KEYS), len(CONF_KEYS)
    c1_ref, c2_ref = refs[:2]
    i = 2
    wx = _load(ATTN_KEYS, refs[i:i + na]); i += na
    ws = _load(ATTN_KEYS, refs[i:i + na]); i += na
    wf = _load(CONF_KEYS, refs[i:i + nf]); i += nf
    o1_ref, o2_ref, ow_ref = refs[i:i + 3]

    c1 = c1_ref[0].astype(jnp.float32)
    c2 = c2_ref[0].astype(jnp.float32)

    u1 = _attn_prop(c1, c2, wx, head, scale)     # cross_filter
    u2 = _attn_prop(c2, c1, wx, head, scale)
    v1 = _attn_prop(u1, u1, ws, head, scale)     # attention_block_self
    v2 = _attn_prop(u2, u2, ws, head, scale)
    o1_ref[0] = v1.astype(o1_ref.dtype)
    o2_ref[0] = v2.astype(o2_ref.dtype)

    # PointCN confidence head (input concat kept virtual as two C-wide halves;
    # InstanceNorm is per-channel so the split is exact) + fused sigmoid.
    h1 = jnp.maximum(_instance_norm(v1) * wf['s1a'] + wf['t1a'], 0.0)
    h2 = jnp.maximum(_instance_norm(v2) * wf['s1b'] + wf['t1b'], 0.0)
    hid = (jnp.dot(h1, wf['w1a'], preferred_element_type=jnp.float32)
           + jnp.dot(h2, wf['w1b'], preferred_element_type=jnp.float32)
           + wf['b1'])
    hid = jnp.maximum(_instance_norm(hid) * wf['s2'] + wf['t2'], 0.0)
    out = jnp.dot(hid, wf['w2'], preferred_element_type=jnp.float32) + wf['b2']
    sc = (jnp.dot(v1, wf['wsa'], preferred_element_type=jnp.float32)
          + jnp.dot(v2, wf['wsb'], preferred_element_type=jnp.float32)
          + wf['bs'])
    z = out + sc
    ow_ref[0] = (1.0 / (1.0 + jnp.exp(-z))).astype(ow_ref.dtype)


# --------------------------------------------------------------------------
# Kernel 3: attention_block_up on both (desc, cluster) pairs with seed weights
# --------------------------------------------------------------------------

def _up_kernel(*refs, head, scale):
    na = len(ATTN_KEYS)
    d1_ref, d2_ref, c1_ref, c2_ref, wv_ref = refs[:5]
    wu = _load(ATTN_KEYS, refs[5:5 + na])
    o1_ref, o2_ref = refs[5 + na:]

    wv = wv_ref[0].astype(jnp.float32)           # (S, 1) seed weights
    c1 = c1_ref[0].astype(jnp.float32)
    c2 = c2_ref[0].astype(jnp.float32)
    o1_ref[0] = _attn_prop(d1_ref[0].astype(jnp.float32), c1, wu, head, scale,
                           wv=wv).astype(o1_ref.dtype)
    o2_ref[0] = _attn_prop(d2_ref[0].astype(jnp.float32), c2, wu, head, scale,
                           wv=wv).astype(o2_ref.dtype)


# --------------------------------------------------------------------------
# pallas_call wrappers
# --------------------------------------------------------------------------

def _tensor_spec(shape):
    _, n, c = shape
    return pl.BlockSpec((1, n, c), lambda i: (i, 0, 0))


def _weight_spec(arr):
    zero = (0,) * arr.ndim
    return pl.BlockSpec(arr.shape, lambda i, _z=zero: _z)


def _param_args(p, keys):
    arrs = [p[k] for k in keys]
    return arrs, [_weight_spec(a) for a in arrs]


def down_and_cluster(params, cl1, cl2, desc1, desc2, head):
    B, S, C = cl1.shape
    scale = 1.0 / np.sqrt(C // head)
    wa, sa = _param_args(params['down'], ATTN_KEYS)
    wc, sc_ = _param_args(params['cluster'], CLUSTER_KEYS)
    in_specs = [_tensor_spec(cl1.shape), _tensor_spec(cl2.shape),
                _tensor_spec(desc1.shape), _tensor_spec(desc2.shape)] + sa + sc_
    kern = functools.partial(_down_cluster_kernel, head=head, scale=scale)
    return pl.pallas_call(
        kern,
        out_shape=(jax.ShapeDtypeStruct((B, S, C), cl1.dtype),
                   jax.ShapeDtypeStruct((B, S, C), cl2.dtype)),
        grid=(B,),
        in_specs=in_specs,
        out_specs=(pl.BlockSpec((1, S, C), lambda i: (i, 0, 0)),
                   pl.BlockSpec((1, S, C), lambda i: (i, 0, 0))),
        compiler_params=_COMPILER_PARAMS,
    )(cl1, cl2, desc1, desc2, *wa, *wc)


def cross_self_conf(params, c1, c2, head):
    B, S, C = c1.shape
    scale = 1.0 / np.sqrt(C // head)
    wx, sx = _param_args(params['cross'], ATTN_KEYS)
    ws_, ss = _param_args(params['self'], ATTN_KEYS)
    wf, sf = _param_args(params['conf'], CONF_KEYS)
    in_specs = [_tensor_spec(c1.shape), _tensor_spec(c2.shape)] + sx + ss + sf
    kern = functools.partial(_cross_self_conf_kernel, head=head, scale=scale)
    return pl.pallas_call(
        kern,
        out_shape=(jax.ShapeDtypeStruct((B, S, C), c1.dtype),
                   jax.ShapeDtypeStruct((B, S, C), c2.dtype),
                   jax.ShapeDtypeStruct((B, S, 1), c1.dtype)),
        grid=(B,),
        in_specs=in_specs,
        out_specs=(pl.BlockSpec((1, S, C), lambda i: (i, 0, 0)),
                   pl.BlockSpec((1, S, C), lambda i: (i, 0, 0)),
                   pl.BlockSpec((1, S, 1), lambda i: (i, 0, 0))),
        compiler_params=_COMPILER_PARAMS,
    )(c1, c2, *wx, *ws_, *wf)


def up_propagation(params, desc1, desc2, cluster1, cluster2, seed_w, head):
    B, N, C = desc1.shape
    S = cluster1.shape[1]
    scale = 1.0 / np.sqrt(C // head)
    wu, su = _param_args(params['up'], ATTN_KEYS)
    in_specs = [_tensor_spec(desc1.shape), _tensor_spec(desc2.shape),
                _tensor_spec(cluster1.shape), _tensor_spec(cluster2.shape),
                pl.BlockSpec((1, S, 1), lambda i: (i, 0, 0))] + su
    kern = functools.partial(_up_kernel, head=head, scale=scale)
    return pl.pallas_call(
        kern,
        out_shape=(jax.ShapeDtypeStruct((B, N, C), desc1.dtype),
                   jax.ShapeDtypeStruct((B, N, C), desc2.dtype)),
        grid=(B,),
        in_specs=in_specs,
        out_specs=(pl.BlockSpec((1, N, C), lambda i: (i, 0, 0)),
                   pl.BlockSpec((1, N, C), lambda i: (i, 0, 0))),
        compiler_params=_COMPILER_PARAMS,
    )(desc1, desc2, cluster1, cluster2, seed_w, *wu)


# --------------------------------------------------------------------------
# hybrid_block forward (gather glue in XLA, all compute in 3 fused kernels)
# --------------------------------------------------------------------------

def hybrid_block_forward(params, desc1, desc2, seed_index1, seed_index2, head):
    # seed gather stays in XLA (data-dependent gather, trivial bytes)
    cl1 = jnp.take_along_axis(desc1, seed_index1[:, :, None], axis=1)
    cl2 = jnp.take_along_axis(desc2, seed_index2[:, :, None], axis=1)

    c1, c2 = down_and_cluster(params, cl1, cl2, desc1, desc2, head)
    cluster1, cluster2, seed_w3 = cross_self_conf(params, c1, c2, head)
    d1, d2 = up_propagation(params, desc1, desc2, cluster1, cluster2, seed_w3, head)
    return d1, d2, seed_w3[..., 0]


# --------------------------------------------------------------------------
# Deterministic synthetic parameters (module shapes), with eval-BN folding and
# concat-weight splitting done once at prep time (zero runtime cost).
# --------------------------------------------------------------------------

def _conv_params(key, cin, cout):
    kw, kb = jax.random.split(key)
    bound = 1.0 / np.sqrt(cin)
    w = jax.random.uniform(kw, (cin, cout), jnp.float32, -bound, bound)
    b = jax.random.uniform(kb, (1, cout), jnp.float32, -bound, bound)
    return w, b


def _bn_params(c):
    # eval-mode SyncBatchNorm, default init: gamma=1, beta=0, rm=0, rv=1
    scale = jnp.full((1, c), 1.0 / np.sqrt(1.0 + BN_EPS), jnp.float32)
    shift = jnp.zeros((1, c), jnp.float32)
    return scale, shift


def _fold_bn(w, b, scale, shift):
    # Conv -> eval BN:  (x @ w + b) * scale + shift == x @ (w*scale) + (b*scale+shift)
    return w * scale, b * scale + shift


def init_attention_params(key, C):
    ks = jax.random.split(key, 6)
    p = {}
    p['qw'], p['qb'] = _conv_params(ks[0], C, C)
    p['kw'], p['kb'] = _conv_params(ks[1], C, C)
    p['vw'], p['vb'] = _conv_params(ks[2], C, C)
    p['mhw'], p['mhb'] = _conv_params(ks[3], C, C)
    cw1, cb1 = _conv_params(ks[4], 2 * C, 2 * C)
    s, t = _bn_params(2 * C)
    cw1, cb1 = _fold_bn(cw1, cb1, s, t)
    p['cw1a'], p['cw1b'], p['cb1'] = cw1[:C, :], cw1[C:, :], cb1
    p['cw2'], p['cb2'] = _conv_params(ks[5], 2 * C, C)
    return p


def init_hybrid_params(key, C):
    ks = jax.random.split(key, 9)
    p = {'down': init_attention_params(ks[0], C),
         'cross': init_attention_params(ks[1], C),
         'self': init_attention_params(ks[2], C),
         'up': init_attention_params(ks[3], C)}

    cl = {}
    w1, b1 = _conv_params(ks[4], 2 * C, 2 * C)
    s, t = _bn_params(2 * C)
    w1, b1 = _fold_bn(w1, b1, s, t)
    cl['clw1a'], cl['clw1b'], cl['clb1'] = w1[:C, :], w1[C:, :], b1
    w2, b2 = _conv_params(ks[5], 2 * C, 2 * C)
    cl['clw2a'], cl['clw2b'] = w2[:, :C], w2[:, C:]
    cl['clb2a'], cl['clb2b'] = b2[:, :C], b2[:, C:]
    p['cluster'] = cl

    conf = {}
    s1, t1 = _bn_params(2 * C)              # BN after IN: cannot fold into a conv
    conf['s1a'], conf['s1b'] = s1[:, :C], s1[:, C:]
    conf['t1a'], conf['t1b'] = t1[:, :C], t1[:, C:]
    w1, b1 = _conv_params(ks[6], 2 * C, 2 * C)
    conf['w1a'], conf['w1b'], conf['b1'] = w1[:C, :], w1[C:, :], b1
    conf['s2'], conf['t2'] = _bn_params(2 * C)
    conf['w2'], conf['b2'] = _conv_params(ks[7], 2 * C, 1)
    ws, bs = _conv_params(ks[8], 2 * C, 1)
    conf['wsa'], conf['wsb'], conf['bs'] = ws[:C, :], ws[C:, :], bs
    p['conf'] = conf
    return p


# --------------------------------------------------------------------------

if __name__ == "__main__":
    B, C, N, S, HEAD = 2, 32, 16, 8, 4
    key = jax.random.PRNGKey(0)
    kp, k1, k2, k3, k4 = jax.random.split(key, 5)

    params = init_hybrid_params(kp, C)
    desc1 = jax.random.normal(k1, (B, N, C), jnp.float32)
    desc2 = jax.random.normal(k2, (B, N, C), jnp.float32)
    seed_index1 = jax.random.randint(k3, (B, S), 0, N)
    seed_index2 = jax.random.randint(k4, (B, S), 0, N)

    # TODO(synk): at production point counts (N~2000) the per-head (S,N)/(N,S)
    # score matrices should be tiled with an online softmax to respect v7x's
    # 64 MiB VMEM; at these shapes everything fits comfortably per batch step.
    fwd = jax.jit(functools.partial(hybrid_block_forward, head=HEAD))
    d1, d2, w = fwd(params, desc1, desc2, seed_index1, seed_index2)
    jax.block_until_ready((d1, d2, w))

    assert d1.shape == (B, N, C) and d2.shape == (B, N, C) and w.shape == (B, S)
    print("KERNEL_OK")
</pallas_src>

<mosaic_0001>
module attributes {stable_mosaic.version = 11 : i64} {
  func.func @_down_cluster_kernel(%arg0: i32, %arg1: memref<1x8x32xf32, #tpu.memory_space<vmem>>, %arg2: memref<1x8x32xf32, #tpu.memory_space<vmem>>, %arg3: memref<1x16x32xf32, #tpu.memory_space<vmem>>, %arg4: memref<1x16x32xf32, #tpu.memory_space<vmem>>, %arg5: memref<32x32xf32, #tpu.memory_space<vmem>>, %arg6: memref<1x32xf32, #tpu.memory_space<vmem>>, %arg7: memref<32x32xf32, #tpu.memory_space<vmem>>, %arg8: memref<1x32xf32, #tpu.memory_space<vmem>>, %arg9: memref<32x32xf32, #tpu.memory_space<vmem>>, %arg10: memref<1x32xf32, #tpu.memory_space<vmem>>, %arg11: memref<32x32xf32, #tpu.memory_space<vmem>>, %arg12: memref<1x32xf32, #tpu.memory_space<vmem>>, %arg13: memref<32x64xf32, #tpu.memory_space<vmem>>, %arg14: memref<32x64xf32, #tpu.memory_space<vmem>>, %arg15: memref<1x64xf32, #tpu.memory_space<vmem>>, %arg16: memref<64x32xf32, #tpu.memory_space<vmem>>, %arg17: memref<1x32xf32, #tpu.memory_space<vmem>>, %arg18: memref<32x64xf32, #tpu.memory_space<vmem>>, %arg19: memref<32x64xf32, #tpu.memory_space<vmem>>, %arg20: memref<1x64xf32, #tpu.memory_space<vmem>>, %arg21: memref<64x32xf32, #tpu.memory_space<vmem>>, %arg22: memref<64x32xf32, #tpu.memory_space<vmem>>, %arg23: memref<1x32xf32, #tpu.memory_space<vmem>>, %arg24: memref<1x32xf32, #tpu.memory_space<vmem>>, %arg25: memref<1x8x32xf32, #tpu.memory_space<vmem>>, %arg26: memref<1x8x32xf32, #tpu.memory_space<vmem>>) attributes {dimension_semantics = [#tpu.dimension_semantics<parallel>], iteration_bounds = array<i64: 2>, scalar_prefetch = 0 : i64, scratch_operands = 0 : i64, tpu.core_type = #tpu.core_type<tc>, window_params = [{transform_indices = @transform_0, window_bounds = array<i64: 1, 8, 32>}, {transform_indices = @transform_1, window_bounds = array<i64: 1, 8, 32>}, {transform_indices = @transform_2, window_bounds = array<i64: 1, 16, 32>}, {transform_indices = @transform_3, window_bounds = array<i64: 1, 16, 32>}, {pipeline_mode = #tpu.pipeline_mode<synchronous>, transform_indices = @transform_4, window_bounds = array<i64: 32, 32>}, {pipeline_mode = #tpu.pipeline_mode<synchronous>, transform_indices = @transform_5, window_bounds = array<i64: 1, 32>}, {pipeline_mode = #tpu.pipeline_mode<synchronous>, transform_indices = @transform_6, window_bounds = array<i64: 32, 32>}, {pipeline_mode = #tpu.pipeline_mode<synchronous>, transform_indices = @transform_7, window_bounds = array<i64: 1, 32>}, {pipeline_mode = #tpu.pipeline_mode<synchronous>, transform_indices = @transform_8, window_bounds = array<i64: 32, 32>}, {pipeline_mode = #tpu.pipeline_mode<synchronous>, transform_indices = @transform_9, window_bounds = array<i64: 1, 32>}, {pipeline_mode = #tpu.pipeline_mode<synchronous>, transform_indices = @transform_10, window_bounds = array<i64: 32, 32>}, {pipeline_mode = #tpu.pipeline_mode<synchronous>, transform_indices = @transform_11, window_bounds = array<i64: 1, 32>}, {pipeline_mode = #tpu.pipeline_mode<synchronous>, transform_indices = @transform_12, window_bounds = array<i64: 32, 64>}, {pipeline_mode = #tpu.pipeline_mode<synchronous>, transform_indices = @transform_13, window_bounds = array<i64: 32, 64>}, {pipeline_mode = #tpu.pipeline_mode<synchronous>, transform_indices = @transform_14, window_bounds = array<i64: 1, 64>}, {pipeline_mode = #tpu.pipeline_mode<synchronous>, transform_indices = @transform_15, window_bounds = array<i64: 64, 32>}, {pipeline_mode = #tpu.pipeline_mode<synchronous>, transform_indices = @transform_16, window_bounds = array<i64: 1, 32>}, {pipeline_mode = #tpu.pipeline_mode<synchronous>, transform_indices = @transform_17, window_bounds = array<i64: 32, 64>}, {pipeline_mode = #tpu.pipeline_mode<synchronous>, transform_indices = @transform_18, window_bounds = array<i64: 32, 64>}, {pipeline_mode = #tpu.pipeline_mode<synchronous>, transform_indices = @transform_19, window_bounds = array<i64: 1, 64>}, {pipeline_mode = #tpu.pipeline_mode<synchronous>, transform_indices = @transform_20, window_bounds = array<i64: 64, 32>}, {pipeline_mode = #tpu.pipeline_mode<synchronous>, transform_indices = @transform_21, window_bounds = array<i64: 64, 32>}, {pipeline_mode = #tpu.pipeline_mode<synchronous>, transform_indices = @transform_22, window_bounds = array<i64: 1, 32>}, {pipeline_mode = #tpu.pipeline_mode<synchronous>, transform_indices = @transform_23, window_bounds = array<i64: 1, 32>}, {transform_indices = @transform_24, window_bounds = array<i64: 1, 8, 32>}, {transform_indices = @transform_25, window_bounds = array<i64: 1, 8, 32>}]} {
    %c0 = arith.constant 0 : index
    %c0_0 = arith.constant 0 : index
    %0 = vector.load %arg5[%c0, %c0_0] : memref<32x32xf32, #tpu.memory_space<vmem>>, vector<32x32xf32>
    %c0_1 = arith.constant 0 : index
    %c0_2 = arith.constant 0 : index
    %1 = vector.load %arg6[%c0_1, %c0_2] : memref<1x32xf32, #tpu.memory_space<vmem>>, vector<1x32xf32>
    %c0_3 = arith.constant 0 : index
    %c0_4 = arith.constant 0 : index
    %2 = vector.load %arg7[%c0_3, %c0_4] : memref<32x32xf32, #tpu.memory_space<vmem>>, vector<32x32xf32>
    %c0_5 = arith.constant 0 : index
    %c0_6 = arith.constant 0 : index
    %3 = vector.load %arg8[%c0_5, %c0_6] : memref<1x32xf32, #tpu.memory_space<vmem>>, vector<1x32xf32>
    %c0_7 = arith.constant 0 : index
    %c0_8 = arith.constant 0 : index
    %4 = vector.load %arg9[%c0_7, %c0_8] : memref<32x32xf32, #tpu.memory_space<vmem>>, vector<32x32xf32>
    %c0_9 = arith.constant 0 : index
    %c0_10 = arith.constant 0 : index
    %5 = vector.load %arg10[%c0_9, %c0_10] : memref<1x32xf32, #tpu.memory_space<vmem>>, vector<1x32xf32>
    %c0_11 = arith.constant 0 : index
    %c0_12 = arith.constant 0 : index
    %6 = vector.load %arg11[%c0_11, %c0_12] : memref<32x32xf32, #tpu.memory_space<vmem>>, vector<32x32xf32>
    %c0_13 = arith.constant 0 : index
    %c0_14 = arith.constant 0 : index
    %7 = vector.load %arg12[%c0_13, %c0_14] : memref<1x32xf32, #tpu.memory_space<vmem>>, vector<1x32xf32>
    %c0_15 = arith.constant 0 : index
    %c0_16 = arith.constant 0 : index
    %8 = vector.load %arg13[%c0_15, %c0_16] : memref<32x64xf32, #tpu.memory_space<vmem>>, vector<32x64xf32>
    %c0_17 = arith.constant 0 : index
    %c0_18 = arith.constant 0 : index
    %9 = vector.load %arg14[%c0_17, %c0_18] : memref<32x64xf32, #tpu.memory_space<vmem>>, vector<32x64xf32>
    %c0_19 = arith.constant 0 : index
    %c0_20 = arith.constant 0 : index
    %10 = vector.load %arg15[%c0_19, %c0_20] : memref<1x64xf32, #tpu.memory_space<vmem>>, vector<1x64xf32>
    %c0_21 = arith.constant 0 : index
    %c0_22 = arith.constant 0 : index
    %11 = vector.load %arg16[%c0_21, %c0_22] : memref<64x32xf32, #tpu.memory_space<vmem>>, vector<64x32xf32>
    %c0_23 = arith.constant 0 : index
    %c0_24 = arith.constant 0 : index
    %12 = vector.load %arg17[%c0_23, %c0_24] : memref<1x32xf32, #tpu.memory_space<vmem>>, vector<1x32xf32>
    %c0_25 = arith.constant 0 : index
    %c0_26 = arith.constant 0 : index
    %13 = vector.load %arg18[%c0_25, %c0_26] : memref<32x64xf32, #tpu.memory_space<vmem>>, vector<32x64xf32>
    %c0_27 = arith.constant 0 : index
    %c0_28 = arith.constant 0 : index
    %14 = vector.load %arg19[%c0_27, %c0_28] : memref<32x64xf32, #tpu.memory_space<vmem>>, vector<32x64xf32>
    %c0_29 = arith.constant 0 : index
    %c0_30 = arith.constant 0 : index
    %15 = vector.load %arg20[%c0_29, %c0_30] : memref<1x64xf32, #tpu.memory_space<vmem>>, vector<1x64xf32>
    %c0_31 = arith.constant 0 : index
    %c0_32 = arith.constant 0 : index
    %16 = vector.load %arg21[%c0_31, %c0_32] : memref<64x32xf32, #tpu.memory_space<vmem>>, vector<64x32xf32>
    %c0_33 = arith.constant 0 : index
    %c0_34 = arith.constant 0 : index
    %17 = vector.load %arg22[%c0_33, %c0_34] : memref<64x32xf32, #tpu.memory_space<vmem>>, vector<64x32xf32>
    %c0_35 = arith.constant 0 : index
    %c0_36 = arith.constant 0 : index
    %18 = vector.load %arg23[%c0_35, %c0_36] : memref<1x32xf32, #tpu.memory_space<vmem>>, vector<1x32xf32>
    %c0_37 = arith.constant 0 : index
    %c0_38 = arith.constant 0 : index
    %19 = vector.load %arg24[%c0_37, %c0_38] : memref<1x32xf32, #tpu.memory_space<vmem>>, vector<1x32xf32>
    %c0_39 = arith.constant 0 : index
    %c0_40 = arith.constant 0 : index
    %c0_41 = arith.constant 0 : index
    %20 = vector.load %arg1[%c0_39, %c0_40, %c0_41] : memref<1x8x32xf32, #tpu.memory_space<vmem>>, vector<1x8x32xf32>
    %21 = vector.shape_cast %20 : vector<1x8x32xf32> to vector<8x32xf32>
    %c0_42 = arith.constant 0 : index
    %c0_43 = arith.constant 0 : index
    %c0_44 = arith.constant 0 : index
    %22 = vector.load %arg3[%c0_42, %c0_43, %c0_44] : memref<1x16x32xf32, #tpu.memory_space<vmem>>, vector<1x16x32xf32>
    %23 = vector.shape_cast %22 : vector<1x16x32xf32> to vector<16x32xf32>
    %cst = arith.constant dense<0.000000e+00> : vector<8x32xf32>
    %24 = tpu.matmul %21, %0, %cst {dimension_numbers = #tpu.dot_dimension_numbers<[1], [0], [0], [1], [0, 0, 1, 1], [], []>} : vector<8x32xf32>, vector<32x32xf32>, vector<8x32xf32> -> vector<8x32xf32>
    %25 = vector.broadcast %1 : vector<1x32xf32> to vector<8x32xf32>
    %26 = arith.addf %24, %25 : vector<8x32xf32>
    %cst_45 = arith.constant dense<0.000000e+00> : vector<16x32xf32>
    %27 = tpu.matmul %23, %2, %cst_45 {dimension_numbers = #tpu.dot_dimension_numbers<[1], [0], [0], [1], [0, 0, 1, 1], [], []>} : vector<16x32xf32>, vector<32x32xf32>, vector<16x32xf32> -> vector<16x32xf32>
    %28 = vector.broadcast %3 : vector<1x32xf32> to vector<16x32xf32>
    %29 = arith.addf %27, %28 : vector<16x32xf32>
    %cst_46 = arith.constant dense<0.000000e+00> : vector<16x32xf32>
    %30 = tpu.matmul %23, %4, %cst_46 {dimension_numbers = #tpu.dot_dimension_numbers<[1], [0], [0], [1], [0, 0, 1, 1], [], []>} : vector<16x32xf32>, vector<32x32xf32>, vector<16x32xf32> -> vector<16x32xf32>
    %31 = vector.broadcast %5 : vector<1x32xf32> to vector<16x32xf32>
    %32 = arith.addf %30, %31 : vector<16x32xf32>
    %33 = vector.extract_strided_slice %26 {offsets = [0, 0], sizes = [8, 8], strides = [1, 1]} : vector<8x32xf32> to vector<8x8xf32>
    %34 = vector.extract_strided_slice %29 {offsets = [0, 0], sizes = [16, 8], strides = [1, 1]} : vector<16x32xf32> to vector<16x8xf32>
    %35 = vector.extract_strided_slice %32 {offsets = [0, 0], sizes = [16, 8], strides = [1, 1]} : vector<16x32xf32> to vector<16x8xf32>
    %cst_47 = arith.constant dense<0.000000e+00> : vector<8x16xf32>
    %36 = tpu.matmul %33, %34, %cst_47 {dimension_numbers = #tpu.dot_dimension_numbers<[1], [1], [0], [0], [0, 0, 1, 0], [], []>} : vector<8x8xf32>, vector<16x8xf32>, vector<8x16xf32> -> vector<8x16xf32>
    %cst_48 = arith.constant 0.353553385 : f32
    %37 = vector.broadcast %cst_48 : f32 to vector<8x16xf32>
    %38 = arith.mulf %36, %37 : vector<8x16xf32>
    %cst_49 = arith.constant dense<0xFF800000> : vector<8xf32>
    %39 = vector.multi_reduction <maximumf>, %38, %cst_49 [1] : vector<8x16xf32> to vector<8xf32>
    %40 = vector.shape_cast %39 : vector<8xf32> to vector<8x1xf32>
    %41 = vector.broadcast %40 : vector<8x1xf32> to vector<8x16xf32>
    %42 = arith.subf %38, %41 : vector<8x16xf32>
    %43 = math.exp %42 : vector<8x16xf32>
    %cst_50 = arith.constant dense<0.000000e+00> : vector<8xf32>
    %44 = vector.multi_reduction <add>, %43, %cst_50 [1] : vector<8x16xf32> to vector<8xf32>
    %45 = vector.shape_cast %44 : vector<8xf32> to vector<8x1xf32>
    %46 = tpu.reciprocal %45 {approx = true} : vector<8x1xf32> -> vector<8x1xf32>
    %47 = vector.broadcast %46 : vector<8x1xf32> to vector<8x16xf32>
    %48 = arith.mulf %43, %47 : vector<8x16xf32>
    %cst_51 = arith.constant dense<0.000000e+00> : vector<8x8xf32>
    %49 = tpu.matmul %48, %35, %cst_51 {dimension_numbers = #tpu.dot_dimension_numbers<[1], [0], [0], [1], [0, 0, 1, 1], [], []>} : vector<8x16xf32>, vector<16x8xf32>, vector<8x8xf32> -> vector<8x8xf32>
    %50 = vector.extract_strided_slice %26 {offsets = [0, 8], sizes = [8, 8], strides = [1, 1]} : vector<8x32xf32> to vector<8x8xf32>
    %51 = vector.extract_strided_slice %29 {offsets = [0, 8], sizes = [16, 8], strides = [1, 1]} : vector<16x32xf32> to vector<16x8xf32>
    %52 = vector.extract_strided_slice %32 {offsets = [0, 8], sizes = [16, 8], strides = [1, 1]} : vector<16x32xf32> to vector<16x8xf32>
    %cst_52 = arith.constant dense<0.000000e+00> : vector<8x16xf32>
    %53 = tpu.matmul %50, %51, %cst_52 {dimension_numbers = #tpu.dot_dimension_numbers<[1], [1], [0], [0], [0, 0, 1, 0], [], []>} : vector<8x8xf32>, vector<16x8xf32>, vector<8x16xf32> -> vector<8x16xf32>
    %cst_53 = arith.constant 0.353553385 : f32
    %54 = vector.broadcast %cst_53 : f32 to vector<8x16xf32>
    %55 = arith.mulf %53, %54 : vector<8x16xf32>
    %cst_54 = arith.constant dense<0xFF800000> : vector<8xf32>
    %56 = vector.multi_reduction <maximumf>, %55, %cst_54 [1] : vector<8x16xf32> to vector<8xf32>
    %57 = vector.shape_cast %56 : vector<8xf32> to vector<8x1xf32>
    %58 = vector.broadcast %57 : vector<8x1xf32> to vector<8x16xf32>
    %59 = arith.subf %55, %58 : vector<8x16xf32>
    %60 = math.exp %59 : vector<8x16xf32>
    %cst_55 = arith.constant dense<0.000000e+00> : vector<8xf32>
    %61 = vector.multi_reduction <add>, %60, %cst_55 [1] : vector<8x16xf32> to vector<8xf32>
    %62 = vector.shape_cast %61 : vector<8xf32> to vector<8x1xf32>
    %63 = tpu.reciprocal %62 {approx = true} : vector<8x1xf32> -> vector<8x1xf32>
    %64 = vector.broadcast %63 : vector<8x1xf32> to vector<8x16xf32>
    %65 = arith.mulf %60, %64 : vector<8x16xf32>
    %cst_56 = arith.constant dense<0.000000e+00> : vector<8x8xf32>
    %66 = tpu.matmul %65, %52, %cst_56 {dimension_numbers = #tpu.dot_dimension_numbers<[1], [0], [0], [1], [0, 0, 1, 1], [], []>} : vector<8x16xf32>, vector<16x8xf32>, vector<8x8xf32> -> vector<8x8xf32>
    %67 = vector.extract_strided_slice %26 {offsets = [0, 16], sizes = [8, 8], strides = [1, 1]} : vector<8x32xf32> to vector<8x8xf32>
    %68 = vector.extract_strided_slice %29 {offsets = [0, 16], sizes = [16, 8], strides = [1, 1]} : vector<16x32xf32> to vector<16x8xf32>
    %69 = vector.extract_strided_slice %32 {offsets = [0, 16], sizes = [16, 8], strides = [1, 1]} : vector<16x32xf32> to vector<16x8xf32>
    %cst_57 = arith.constant dense<0.000000e+00> : vector<8x16xf32>
    %70 = tpu.matmul %67, %68, %cst_57 {dimension_numbers = #tpu.dot_dimension_numbers<[1], [1], [0], [0], [0, 0, 1, 0], [], []>} : vector<8x8xf32>, vector<16x8xf32>, vector<8x16xf32> -> vector<8x16xf32>
    %cst_58 = arith.constant 0.353553385 : f32
    %71 = vector.broadcast %cst_58 : f32 to vector<8x16xf32>
    %72 = arith.mulf %70, %71 : vector<8x16xf32>
    %cst_59 = arith.constant dense<0xFF800000> : vector<8xf32>
    %73 = vector.multi_reduction <maximumf>, %72, %cst_59 [1] : vector<8x16xf32> to vector<8xf32>
    %74 = vector.shape_cast %73 : vector<8xf32> to vector<8x1xf32>
    %75 = vector.broadcast %74 : vector<8x1xf32> to vector<8x16xf32>
    %76 = arith.subf %72, %75 : vector<8x16xf32>
    %77 = math.exp %76 : vector<8x16xf32>
    %cst_60 = arith.constant dense<0.000000e+00> : vector<8xf32>
    %78 = vector.multi_reduction <add>, %77, %cst_60 [1] : vector<8x16xf32> to vector<8xf32>
    %79 = vector.shape_cast %78 : vector<8xf32> to vector<8x1xf32>
    %80 = tpu.reciprocal %79 {approx = true} : vector<8x1xf32> -> vector<8x1xf32>
    %81 = vector.broadcast %80 : vector<8x1xf32> to vector<8x16xf32>
    %82 = arith.mulf %77, %81 : vector<8x16xf32>
    %cst_61 = arith.constant dense<0.000000e+00> : vector<8x8xf32>
    %83 = tpu.matmul %82, %69, %cst_61 {dimension_numbers = #tpu.dot_dimension_numbers<[1], [0], [0], [1], [0, 0, 1, 1], [], []>} : vector<8x16xf32>, vector<16x8xf32>, vector<8x8xf32> -> vector<8x8xf32>
    %84 = vector.extract_strided_slice %26 {offsets = [0, 24], sizes = [8, 8], strides = [1, 1]} : vector<8x32xf32> to vector<8x8xf32>
    %85 = vector.extract_strided_slice %29 {offsets = [0, 24], sizes = [16, 8], strides = [1, 1]} : vector<16x32xf32> to vector<16x8xf32>
    %86 = vector.extract_strided_slice %32 {offsets = [0, 24], sizes = [16, 8], strides = [1, 1]} : vector<16x32xf32> to vector<16x8xf32>
    %cst_62 = arith.constant dense<0.000000e+00> : vector<8x16xf32>
    %87 = tpu.matmul %84, %85, %cst_62 {dimension_numbers = #tpu.dot_dimension_numbers<[1], [1], [0], [0], [0, 0, 1, 0], [], []>} : vector<8x8xf32>, vector<16x8xf32>, vector<8x16xf32> -> vector<8x16xf32>
    %cst_63 = arith.constant 0.353553385 : f32
    %88 = vector.broadcast %cst_63 : f32 to vector<8x16xf32>
    %89 = arith.mulf %87, %88 : vector<8x16xf32>
    %cst_64 = arith.constant dense<0xFF800000> : vector<8xf32>
    %90 = vector.multi_reduction <maximumf>, %89, %cst_64 [1] : vector<8x16xf32> to vector<8xf32>
    %91 = vector.shape_cast %90 : vector<8xf32> to vector<8x1xf32>
    %92 = vector.broadcast %91 : vector<8x1xf32> to vector<8x16xf32>
    %93 = arith.subf %89, %92 : vector<8x16xf32>
    %94 = math.exp %93 : vector<8x16xf32>
    %cst_65 = arith.constant dense<0.000000e+00> : vector<8xf32>
    %95 = vector.multi_reduction <add>, %94, %cst_65 [1] : vector<8x16xf32> to vector<8xf32>
    %96 = vector.shape_cast %95 : vector<8xf32> to vector<8x1xf32>
    %97 = tpu.reciprocal %96 {approx = true} : vector<8x1xf32> -> vector<8x1xf32>
    %98 = vector.broadcast %97 : vector<8x1xf32> to vector<8x16xf32>
    %99 = arith.mulf %94, %98 : vector<8x16xf32>
    %cst_66 = arith.constant dense<0.000000e+00> : vector<8x8xf32>
    %100 = tpu.matmul %99, %86, %cst_66 {dimension_numbers = #tpu.dot_dimension_numbers<[1], [0], [0], [1], [0, 0, 1, 1], [], []>} : vector<8x16xf32>, vector<16x8xf32>, vector<8x8xf32> -> vector<8x8xf32>
    %101 = tpu.concatenate %49, %66, %83, %100 in 1 : vector<8x8xf32>, vector<8x8xf32>, vector<8x8xf32>, vector<8x8xf32> -> vector<8x32xf32>
    %cst_67 = arith.constant dense<0.000000e+00> : vector<8x32xf32>
    %102 = tpu.matmul %101, %6, %cst_67 {dimension_numbers = #tpu.dot_dimension_numbers<[1], [0], [0], [1], [0, 0, 1, 1], [], []>} : vector<8x32xf32>, vector<32x32xf32>, vector<8x32xf32> -> vector<8x32xf32>
    %103 = vector.broadcast %7 : vector<1x32xf32> to vector<8x32xf32>
    %104 = arith.addf %102, %103 : vector<8x32xf32>
    %cst_68 = arith.constant dense<0.000000e+00> : vector<8x64xf32>
    %105 = tpu.matmul %21, %8, %cst_68 {dimension_numbers = #tpu.dot_dimension_numbers<[1], [0], [0], [1], [0, 0, 1, 1], [], []>} : vector<8x32xf32>, vector<32x64xf32>, vector<8x64xf32> -> vector<8x64xf32>
    %cst_69 = arith.constant dense<0.000000e+00> : vector<8x64xf32>
    %106 = tpu.matmul %104, %9, %cst_69 {dimension_numbers = #tpu.dot_dimension_numbers<[1], [0], [0], [1], [0, 0, 1, 1], [], []>} : vector<8x32xf32>, vector<32x64xf32>, vector<8x64xf32> -> vector<8x64xf32>
    %107 = arith.addf %105, %106 : vector<8x64xf32>
    %108 = vector.broadcast %10 : vector<1x64xf32> to vector<8x64xf32>
    %109 = arith.addf %107, %108 : vector<8x64xf32>
    %cst_70 = arith.constant 0.000000e+00 : f32
    %110 = vector.broadcast %cst_70 : f32 to vector<8x64xf32>
    %111 = arith.maximumf %109, %110 : vector<8x64xf32>
    %cst_71 = arith.constant dense<0.000000e+00> : vector<8x32xf32>
    %112 = tpu.matmul %111, %11, %cst_71 {dimension_numbers = #tpu.dot_dimension_numbers<[1], [0], [0], [1], [0, 0, 1, 1], [], []>} : vector<8x64xf32>, vector<64x32xf32>, vector<8x32xf32> -> vector<8x32xf32>
    %113 = vector.broadcast %12 : vector<1x32xf32> to vector<8x32xf32>
    %114 = arith.addf %112, %113 : vector<8x32xf32>
    %115 = arith.addf %21, %114 : vector<8x32xf32>
    %c0_72 = arith.constant 0 : index
    %c0_73 = arith.constant 0 : index
    %c0_74 = arith.constant 0 : index
    %116 = vector.load %arg2[%c0_72, %c0_73, %c0_74] : memref<1x8x32xf32, #tpu.memory_space<vmem>>, vector<1x8x32xf32>
    %117 = vector.shape_cast %116 : vector<1x8x32xf32> to vector<8x32xf32>
    %c0_75 = arith.constant 0 : index
    %c0_76 = arith.constant 0 : index
    %c0_77 = arith.constant 0 : index
    %118 = vector.load %arg4[%c0_75, %c0_76, %c0_77] : memref<1x16x32xf32, #tpu.memory_space<vmem>>, vector<1x16x32xf32>
    %119 = vector.shape_cast %118 : vector<1x16x32xf32> to vector<16x32xf32>
    %cst_78 = arith.constant dense<0.000000e+00> : vector<8x32xf32>
    %120 = tpu.matmul %117, %0, %cst_78 {dimension_numbers = #tpu.dot_dimension_numbers<[1], [0], [0], [1], [0, 0, 1, 1], [], []>} : vector<8x32xf32>, vector<32x32xf32>, vector<8x32xf32> -> vector<8x32xf32>
    %121 = vector.broadcast %1 : vector<1x32xf32> to vector<8x32xf32>
    %122 = arith.addf %120, %121 : vector<8x32xf32>
    %cst_79 = arith.constant dense<0.000000e+00> : vector<16x32xf32>
    %123 = tpu.matmul %119, %2, %cst_79 {dimension_numbers = #tpu.dot_dimension_numbers<[1], [0], [0], [1], [0, 0, 1, 1], [], []>} : vector<16x32xf32>, vector<32x32xf32>, vector<16x32xf32> -> vector<16x32xf32>
    %124 = vector.broadcast %3 : vector<1x32xf32> to vector<16x32xf32>
    %125 = arith.addf %123, %124 : vector<16x32xf32>
    %cst_80 = arith.constant dense<0.000000e+00> : vector<16x32xf32>
    %126 = tpu.matmul %119, %4, %cst_80 {dimension_numbers = #tpu.dot_dimension_numbers<[1], [0], [0], [1], [0, 0, 1, 1], [], []>} : vector<16x32xf32>, vector<32x32xf32>, vector<16x32xf32> -> vector<16x32xf32>
    %127 = vector.broadcast %5 : vector<1x32xf32> to vector<16x32xf32>
    %128 = arith.addf %126, %127 : vector<16x32xf32>
    %129 = vector.extract_strided_slice %122 {offsets = [0, 0], sizes = [8, 8], strides = [1, 1]} : vector<8x32xf32> to vector<8x8xf32>
    %130 = vector.extract_strided_slice %125 {offsets = [0, 0], sizes = [16, 8], strides = [1, 1]} : vector<16x32xf32> to vector<16x8xf32>
    %131 = vector.extract_strided_slice %128 {offsets = [0, 0], sizes = [16, 8], strides = [1, 1]} : vector<16x32xf32> to vector<16x8xf32>
    %cst_81 = arith.constant dense<0.000000e+00> : vector<8x16xf32>
    %132 = tpu.matmul %129, %130, %cst_81 {dimension_numbers = #tpu.dot_dimension_numbers<[1], [1], [0], [0], [0, 0, 1, 0], [], []>} : vector<8x8xf32>, vector<16x8xf32>, vector<8x16xf32> -> vector<8x16xf32>
    %cst_82 = arith.constant 0.353553385 : f32
    %133 = vector.broadcast %cst_82 : f32 to vector<8x16xf32>
    %134 = arith.mulf %132, %133 : vector<8x16xf32>
    %cst_83 = arith.constant dense<0xFF800000> : vector<8xf32>
    %135 = vector.multi_reduction <maximumf>, %134, %cst_83 [1] : vector<8x16xf32> to vector<8xf32>
    %136 = vector.shape_cast %135 : vector<8xf32> to vector<8x1xf32>
    %137 = vector.broadcast %136 : vector<8x1xf32> to vector<8x16xf32>
    %138 = arith.subf %134, %137 : vector<8x16xf32>
    %139 = math.exp %138 : vector<8x16xf32>
    %cst_84 = arith.constant dense<0.000000e+00> : vector<8xf32>
    %140 = vector.multi_reduction <add>, %139, %cst_84 [1] : vector<8x16xf32> to vector<8xf32>
    %141 = vector.shape_cast %140 : vector<8xf32> to vector<8x1xf32>
    %142 = tpu.reciprocal %141 {approx = true} : vector<8x1xf32> -> vector<8x1xf32>
    %143 = vector.broadcast %142 : vector<8x1xf32> to vector<8x16xf32>
    %144 = arith.mulf %139, %143 : vector<8x16xf32>
    %cst_85 = arith.constant dense<0.000000e+00> : vector<8x8xf32>
    %145 = tpu.matmul %144, %131, %cst_85 {dimension_numbers = #tpu.dot_dimension_numbers<[1], [0], [0], [1], [0, 0, 1, 1], [], []>} : vector<8x16xf32>, vector<16x8xf32>, vector<8x8xf32> -> vector<8x8xf32>
    %146 = vector.extract_strided_slice %122 {offsets = [0, 8], sizes = [8, 8], strides = [1, 1]} : vector<8x32xf32> to vector<8x8xf32>
    %147 = vector.extract_strided_slice %125 {offsets = [0, 8], sizes = [16, 8], strides = [1, 1]} : vector<16x32xf32> to vector<16x8xf32>
    %148 = vector.extract_strided_slice %128 {offsets = [0, 8], sizes = [16, 8], strides = [1, 1]} : vector<16x32xf32> to vector<16x8xf32>
    %cst_86 = arith.constant dense<0.000000e+00> : vector<8x16xf32>
    %149 = tpu.matmul %146, %147, %cst_86 {dimension_numbers = #tpu.dot_dimension_numbers<[1], [1], [0], [0], [0, 0, 1, 0], [], []>} : vector<8x8xf32>, vector<16x8xf32>, vector<8x16xf32> -> vector<8x16xf32>
    %cst_87 = arith.constant 0.353553385 : f32
    %150 = vector.broadcast %cst_87 : f32 to vector<8x16xf32>
    %151 = arith.mulf %149, %150 : vector<8x16xf32>
    %cst_88 = arith.constant dense<0xFF800000> : vector<8xf32>
    %152 = vector.multi_reduction <maximumf>, %151, %cst_88 [1] : vector<8x16xf32> to vector<8xf32>
    %153 = vector.shape_cast %152 : vector<8xf32> to vector<8x1xf32>
    %154 = vector.broadcast %153 : vector<8x1xf32> to vector<8x16xf32>
    %155 = arith.subf %151, %154 : vector<8x16xf32>
    %156 = math.exp %155 : vector<8x16xf32>
    %cst_89 = arith.constant dense<0.000000e+00> : vector<8xf32>
    %157 = vector.multi_reduction <add>, %156, %cst_89 [1] : vector<8x16xf32> to vector<8xf32>
    %158 = vector.shape_cast %157 : vector<8xf32> to vector<8x1xf32>
    %159 = tpu.reciprocal %158 {approx = true} : vector<8x1xf32> -> vector<8x1xf32>
    %160 = vector.broadcast %159 : vector<8x1xf32> to vector<8x16xf32>
    %161 = arith.mulf %156, %160 : vector<8x16xf32>
    %cst_90 = arith.constant dense<0.000000e+00> : vector<8x8xf32>
    %162 = tpu.matmul %161, %148, %cst_90 {dimension_numbers = #tpu.dot_dimension_numbers<[1], [0], [0], [1], [0, 0, 1, 1], [], []>} : vector<8x16xf32>, vector<16x8xf32>, vector<8x8xf32> -> vector<8x8xf32>
    %163 = vector.extract_strided_slice %122 {offsets = [0, 16], sizes = [8, 8], strides = [1, 1]} : vector<8x32xf32> to vector<8x8xf32>
    %164 = vector.extract_strided_slice %125 {offsets = [0, 16], sizes = [16, 8], strides = [1, 1]} : vector<16x32xf32> to vector<16x8xf32>
    %165 = vector.extract_strided_slice %128 {offsets = [0, 16], sizes = [16, 8], strides = [1, 1]} : vector<16x32xf32> to vector<16x8xf32>
    %cst_91 = arith.constant dense<0.000000e+00> : vector<8x16xf32>
    %166 = tpu.matmul %163, %164, %cst_91 {dimension_numbers = #tpu.dot_dimension_numbers<[1], [1], [0], [0], [0, 0, 1, 0], [], []>} : vector<8x8xf32>, vector<16x8xf32>, vector<8x16xf32> -> vector<8x16xf32>
    %cst_92 = arith.constant 0.353553385 : f32
    %167 = vector.broadcast %cst_92 : f32 to vector<8x16xf32>
    %168 = arith.mulf %166, %167 : vector<8x16xf32>
    %cst_93 = arith.constant dense<0xFF800000> : vector<8xf32>
    %169 = vector.multi_reduction <maximumf>, %168, %cst_93 [1] : vector<8x16xf32> to vector<8xf32>
    %170 = vector.shape_cast %169 : vector<8xf32> to vector<8x1xf32>
    %171 = vector.broadcast %170 : vector<8x1xf32> to vector<8x16xf32>
    %172 = arith.subf %168, %171 : vector<8x16xf32>
    %173 = math.exp %172 : vector<8x16xf32>
    %cst_94 = arith.constant dense<0.000000e+00> : vector<8xf32>
    %174 = vector.multi_reduction <add>, %173, %cst_94 [1] : vector<8x16xf32> to vector<8xf32>
    %175 = vector.shape_cast %174 : vector<8xf32> to vector<8x1xf32>
    %176 = tpu.reciprocal %175 {approx = true} : vector<8x1xf32> -> vector<8x1xf32>
    %177 = vector.broadcast %176 : vector<8x1xf32> to vector<8x16xf32>
    %178 = arith.mulf %173, %177 : vector<8x16xf32>
    %cst_95 = arith.constant dense<0.000000e+00> : vector<8x8xf32>
    %179 = tpu.matmul %178, %165, %cst_95 {dimension_numbers = #tpu.dot_dimension_numbers<[1], [0], [0], [1], [0, 0, 1, 1], [], []>} : vector<8x16xf32>, vector<16x8xf32>, vector<8x8xf32> -> vector<8x8xf32>
    %180 = vector.extract_strided_slice %122 {offsets = [0, 24], sizes = [8, 8], strides = [1, 1]} : vector<8x32xf32> to vector<8x8xf32>
    %181 = vector.extract_strided_slice %125 {offsets = [0, 24], sizes = [16, 8], strides = [1, 1]} : vector<16x32xf32> to vector<16x8xf32>
    %182 = vector.extract_strided_slice %128 {offsets = [0, 24], sizes = [16, 8], strides = [1, 1]} : vector<16x32xf32> to vector<16x8xf32>
    %cst_96 = arith.constant dense<0.000000e+00> : vector<8x16xf32>
    %183 = tpu.matmul %180, %181, %cst_96 {dimension_numbers = #tpu.dot_dimension_numbers<[1], [1], [0], [0], [0, 0, 1, 0], [], []>} : vector<8x8xf32>, vector<16x8xf32>, vector<8x16xf32> -> vector<8x16xf32>
    %cst_97 = arith.constant 0.353553385 : f32
    %184 = vector.broadcast %cst_97 : f32 to vector<8x16xf32>
    %185 = arith.mulf %183, %184 : vector<8x16xf32>
    %cst_98 = arith.constant dense<0xFF800000> : vector<8xf32>
    %186 = vector.multi_reduction <maximumf>, %185, %cst_98 [1] : vector<8x16xf32> to vector<8xf32>
    %187 = vector.shape_cast %186 : vector<8xf32> to vector<8x1xf32>
    %188 = vector.broadcast %187 : vector<8x1xf32> to vector<8x16xf32>
    %189 = arith.subf %185, %188 : vector<8x16xf32>
    %190 = math.exp %189 : vector<8x16xf32>
    %cst_99 = arith.constant dense<0.000000e+00> : vector<8xf32>
    %191 = vector.multi_reduction <add>, %190, %cst_99 [1] : vector<8x16xf32> to vector<8xf32>
    %192 = vector.shape_cast %191 : vector<8xf32> to vector<8x1xf32>
    %193 = tpu.reciprocal %192 {approx = true} : vector<8x1xf32> -> vector<8x1xf32>
    %194 = vector.broadcast %193 : vector<8x1xf32> to vector<8x16xf32>
    %195 = arith.mulf %190, %194 : vector<8x16xf32>
    %cst_100 = arith.constant dense<0.000000e+00> : vector<8x8xf32>
    %196 = tpu.matmul %195, %182, %cst_100 {dimension_numbers = #tpu.dot_dimension_numbers<[1], [0], [0], [1], [0, 0, 1, 1], [], []>} : vector<8x16xf32>, vector<16x8xf32>, vector<8x8xf32> -> vector<8x8xf32>
    %197 = tpu.concatenate %145, %162, %179, %196 in 1 : vector<8x8xf32>, vector<8x8xf32>, vector<8x8xf32>, vector<8x8xf32> -> vector<8x32xf32>
    %cst_101 = arith.constant dense<0.000000e+00> : vector<8x32xf32>
    %198 = tpu.matmul %197, %6, %cst_101 {dimension_numbers = #tpu.dot_dimension_numbers<[1], [0], [0], [1], [0, 0, 1, 1], [], []>} : vector<8x32xf32>, vector<32x32xf32>, vector<8x32xf32> -> vector<8x32xf32>
    %199 = vector.broadcast %7 : vector<1x32xf32> to vector<8x32xf32>
    %200 = arith.addf %198, %199 : vector<8x32xf32>
    %cst_102 = arith.constant dense<0.000000e+00> : vector<8x64xf32>
    %201 = tpu.matmul %117, %8, %cst_102 {dimension_numbers = #tpu.dot_dimension_numbers<[1], [0], [0], [1], [0, 0, 1, 1], [], []>} : vector<8x32xf32>, vector<32x64xf32>, vector<8x64xf32> -> vector<8x64xf32>
    %cst_103 = arith.constant dense<0.000000e+00> : vector<8x64xf32>
    %202 = tpu.matmul %200, %9, %cst_103 {dimension_numbers = #tpu.dot_dimension_numbers<[1], [0], [0], [1], [0, 0, 1, 1], [], []>} : vector<8x32xf32>, vector<32x64xf32>, vector<8x64xf32> -> vector<8x64xf32>
    %203 = arith.addf %201, %202 : vector<8x64xf32>
    %204 = vector.broadcast %10 : vector<1x64xf32> to vector<8x64xf32>
    %205 = arith.addf %203, %204 : vector<8x64xf32>
    %cst_104 = arith.constant 0.000000e+00 : f32
    %206 = vector.broadcast %cst_104 : f32 to vector<8x64xf32>
    %207 = arith.maximumf %205, %206 : vector<8x64xf32>
    %cst_105 = arith.constant dense<0.000000e+00> : vector<8x32xf32>
    %208 = tpu.matmul %207, %11, %cst_105 {dimension_numbers = #tpu.dot_dimension_numbers<[1], [0], [0], [1], [0, 0, 1, 1], [], []>} : vector<8x64xf32>, vector<64x32xf32>, vector<8x32xf32> -> vector<8x32xf32>
    %209 = vector.broadcast %12 : vector<1x32xf32> to vector<8x32xf32>
    %210 = arith.addf %208, %209 : vector<8x32xf32>
    %211 = arith.addf %117, %210 : vector<8x32xf32>
    %cst_106 = arith.constant dense<0.000000e+00> : vector<8x64xf32>
    %212 = tpu.matmul %115, %13, %cst_106 {dimension_numbers = #tpu.dot_dimension_numbers<[1], [0], [0], [1], [0, 0, 1, 1], [], []>} : vector<8x32xf32>, vector<32x64xf32>, vector<8x64xf32> -> vector<8x64xf32>
    %cst_107 = arith.constant dense<0.000000e+00> : vector<8x64xf32>
    %213 = tpu.matmul %211, %14, %cst_107 {dimension_numbers = #tpu.dot_dimension_numbers<[1], [0], [0], [1], [0, 0, 1, 1], [], []>} : vector<8x32xf32>, vector<32x64xf32>, vector<8x64xf32> -> vector<8x64xf32>
    %214 = arith.addf %212, %213 : vector<8x64xf32>
    %215 = vector.broadcast %15 : vector<1x64xf32> to vector<8x64xf32>
    %216 = arith.addf %214, %215 : vector<8x64xf32>
    %cst_108 = arith.constant 0.000000e+00 : f32
    %217 = vector.broadcast %cst_108 : f32 to vector<8x64xf32>
    %218 = arith.maximumf %216, %217 : vector<8x64xf32>
    %cst_109 = arith.constant dense<0.000000e+00> : vector<8x32xf32>
    %219 = tpu.matmul %218, %16, %cst_109 {dimension_numbers = #tpu.dot_dimension_numbers<[1], [0], [0], [1], [0, 0, 1, 1], [], []>} : vector<8x64xf32>, vector<64x32xf32>, vector<8x32xf32> -> vector<8x32xf32>
    %220 = vector.broadcast %18 : vector<1x32xf32> to vector<8x32xf32>
    %221 = arith.addf %219, %220 : vector<8x32xf32>
    %c0_110 = arith.constant 0 : index
    %c0_111 = arith.constant 0 : index
    %c0_112 = arith.constant 0 : index
    %222 = vector.load %arg25[%c0_110, %c0_111, %c0_112] : memref<1x8x32xf32, #tpu.memory_space<vmem>>, vector<1x8x32xf32>
    %223 = vector.shape_cast %222 : vector<1x8x32xf32> to vector<8x32xf32>
    %224 = vector.shape_cast %221 : vector<8x32xf32> to vector<1x8x32xf32>
    tpu.vector_store %arg25[%c0_110, %c0_111, %c0_112], %224 {strides = array<i32>} : memref<1x8x32xf32, #tpu.memory_space<vmem>>, vector<1x8x32xf32>,
    %cst_113 = arith.constant dense<0.000000e+00> : vector<8x32xf32>
    %225 = tpu.matmul %218, %17, %cst_113 {dimension_numbers = #tpu.dot_dimension_numbers<[1], [0], [0], [1], [0, 0, 1, 1], [], []>} : vector<8x64xf32>, vector<64x32xf32>, vector<8x32xf32> -> vector<8x32xf32>
    %226 = vector.broadcast %19 : vector<1x32xf32> to vector<8x32xf32>
    %227 = arith.addf %225, %226 : vector<8x32xf32>
    %c0_114 = arith.constant 0 : index
    %c0_115 = arith.constant 0 : index
    %c0_116 = arith.constant 0 : index
    %228 = vector.load %arg26[%c0_114, %c0_115, %c0_116] : memref<1x8x32xf32, #tpu.memory_space<vmem>>, vector<1x8x32xf32>
    %229 = vector.shape_cast %228 : vector<1x8x32xf32> to vector<8x32xf32>
    %230 = vector.shape_cast %227 : vector<8x32xf32> to vector<1x8x32xf32>
    tpu.vector_store %arg26[%c0_114, %c0_115, %c0_116], %230 {strides = array<i32>} : memref<1x8x32xf32, #tpu.memory_space<vmem>>, vector<1x8x32xf32>,
    return
  }
  func.func @transform_0(%arg0: i32) -> (i32, i32, i32) {
    %c0_i32 = arith.constant 0 : i32
    %c0_i32_0 = arith.constant 0 : i32
    %c0_i32_1 = arith.constant 0 : i32
    return %arg0, %c0_i32, %c0_i32_0 : i32, i32, i32
  }
  func.func @transform_1(%arg0: i32) -> (i32, i32, i32) {
    %c0_i32 = arith.constant 0 : i32
    %c0_i32_0 = arith.constant 0 : i32
    %c0_i32_1 = arith.constant 0 : i32
    return %arg0, %c0_i32, %c0_i32_0 : i32, i32, i32
  }
  func.func @transform_2(%arg0: i32) -> (i32, i32, i32) {
    %c0_i32 = arith.constant 0 : i32
    %c0_i32_0 = arith.constant 0 : i32
    %c0_i32_1 = arith.constant 0 : i32
    return %arg0, %c0_i32, %c0_i32_0 : i32, i32, i32
  }
  func.func @transform_3(%arg0: i32) -> (i32, i32, i32) {
    %c0_i32 = arith.constant 0 : i32
    %c0_i32_0 = arith.constant 0 : i32
    %c0_i32_1 = arith.constant 0 : i32
    return %arg0, %c0_i32, %c0_i32_0 : i32, i32, i32
  }
  func.func @transform_4(%arg0: i32) -> (i32, i32) {
    %c0_i32 = arith.constant 0 : i32
    %c0_i32_0 = arith.constant 0 : i32
    %c0_i32_1 = arith.constant 0 : i32
    return %c0_i32, %c0_i32_0 : i32, i32
  }
  func.func @transform_5(%arg0: i32) -> (i32, i32) {
    %c0_i32 = arith.constant 0 : i32
    %c0_i32_0 = arith.constant 0 : i32
    %c0_i32_1 = arith.constant 0 : i32
    return %c0_i32, %c0_i32_0 : i32, i32
  }
  func.func @transform_6(%arg0: i32) -> (i32, i32) {
    %c0_i32 = arith.constant 0 : i32
    %c0_i32_0 = arith.constant 0 : i32
    %c0_i32_1 = arith.constant 0 : i32
    return %c0_i32, %c0_i32_0 : i32, i32
  }
  func.func @transform_7(%arg0: i32) -> (i32, i32) {
    %c0_i32 = arith.constant 0 : i32
    %c0_i32_0 = arith.constant 0 : i32
    %c0_i32_1 = arith.constant 0 : i32
    return %c0_i32, %c0_i32_0 : i32, i32
  }
  func.func @transform_8(%arg0: i32) -> (i32, i32) {
    %c0_i32 = arith.constant 0 : i32
    %c0_i32_0 = arith.constant 0 : i32
    %c0_i32_1 = arith.constant 0 : i32
    return %c0_i32, %c0_i32_0 : i32, i32
  }
  func.func @transform_9(%arg0: i32) -> (i32, i32) {
    %c0_i32 = arith.constant 0 : i32
    %c0_i32_0 = arith.constant 0 : i32
    %c0_i32_1 = arith.constant 0 : i32
    return %c0_i32, %c0_i32_0 : i32, i32
  }
  func.func @transform_10(%arg0: i32) -> (i32, i32) {
    %c0_i32 = arith.constant 0 : i32
    %c0_i32_0 = arith.constant 0 : i32
    %c0_i32_1 = arith.constant 0 : i32
    return %c0_i32, %c0_i32_0 : i32, i32
  }
  func.func @transform_11(%arg0: i32) -> (i32, i32) {
    %c0_i32 = arith.constant 0 : i32
    %c0_i32_0 = arith.constant 0 : i32
    %c0_i32_1 = arith.constant 0 : i32
    return %c0_i32, %c0_i32_0 : i32, i32
  }
  func.func @transform_12(%arg0: i32) -> (i32, i32) {
    %c0_i32 = arith.constant 0 : i32
    %c0_i32_0 = arith.constant 0 : i32
    %c0_i32_1 = arith.constant 0 : i32
    return %c0_i32, %c0_i32_0 : i32, i32
  }
  func.func @transform_13(%arg0: i32) -> (i32, i32) {
    %c0_i32 = arith.constant 0 : i32
    %c0_i32_0 = arith.constant 0 : i32
    %c0_i32_1 = arith.constant 0 : i32
    return %c0_i32, %c0_i32_0 : i32, i32
  }
  func.func @transform_14(%arg0: i32) -> (i32, i32) {
    %c0_i32 = arith.constant 0 : i32
    %c0_i32_0 = arith.constant 0 : i32
    %c0_i32_1 = arith.constant 0 : i32
    return %c0_i32, %c0_i32_0 : i32, i32
  }
  func.func @transform_15(%arg0: i32) -> (i32, i32) {
    %c0_i32 = arith.constant 0 : i32
    %c0_i32_0 = arith.constant 0 : i32
    %c0_i32_1 = arith.constant 0 : i32
    return %c0_i32, %c0_i32_0 : i32, i32
  }
  func.func @transform_16(%arg0: i32) -> (i32, i32) {
    %c0_i32 = arith.constant 0 : i32
    %c0_i32_0 = arith.constant 0 : i32
    %c0_i32_1 = arith.constant 0 : i32
    return %c0_i32, %c0_i32_0 : i32, i32
  }
  func.func @transform_17(%arg0: i32) -> (i32, i32) {
    %c0_i32 = arith.constant 0 : i32
    %c0_i32_0 = arith.constant 0 : i32
    %c0_i32_1 = arith.constant 0 : i32
    return %c0_i32, %c0_i32_0 : i32, i32
  }
  func.func @transform_18(%arg0: i32) -> (i32, i32) {
    %c0_i32 = arith.constant 0 : i32
    %c0_i32_0 = arith.constant 0 : i32
    %c0_i32_1 = arith.constant 0 : i32
    return %c0_i32, %c0_i32_0 : i32, i32
  }
  func.func @transform_19(%arg0: i32) -> (i32, i32) {
    %c0_i32 = arith.constant 0 : i32
    %c0_i32_0 = arith.constant 0 : i32
    %c0_i32_1 = arith.constant 0 : i32
    return %c0_i32, %c0_i32_0 : i32, i32
  }
  func.func @transform_20(%arg0: i32) -> (i32, i32) {
    %c0_i32 = arith.constant 0 : i32
    %c0_i32_0 = arith.constant 0 : i32
    %c0_i32_1 = arith.constant 0 : i32
    return %c0_i32, %c0_i32_0 : i32, i32
  }
  func.func @transform_21(%arg0: i32) -> (i32, i32) {
    %c0_i32 = arith.constant 0 : i32
    %c0_i32_0 = arith.constant 0 : i32
    %c0_i32_1 = arith.constant 0 : i32
    return %c0_i32, %c0_i32_0 : i32, i32
  }
  func.func @transform_22(%arg0: i32) -> (i32, i32) {
    %c0_i32 = arith.constant 0 : i32
    %c0_i32_0 = arith.constant 0 : i32
    %c0_i32_1 = arith.constant 0 : i32
    return %c0_i32, %c0_i32_0 : i32, i32
  }
  func.func @transform_23(%arg0: i32) -> (i32, i32) {
    %c0_i32 = arith.constant 0 : i32
    %c0_i32_0 = arith.constant 0 : i32
    %c0_i32_1 = arith.constant 0 : i32
    return %c0_i32, %c0_i32_0 : i32, i32
  }
  func.func @transform_24(%arg0: i32) -> (i32, i32, i32) {
    %c0_i32 = arith.constant 0 : i32
    %c0_i32_0 = arith.constant 0 : i32
    %c0_i32_1 = arith.constant 0 : i32
    return %arg0, %c0_i32, %c0_i32_0 : i32, i32, i32
  }
  func.func @transform_25(%arg0: i32) -> (i32, i32, i32) {
    %c0_i32 = arith.constant 0 : i32
    %c0_i32_0 = arith.constant 0 : i32
    %c0_i32_1 = arith.constant 0 : i32
    return %arg0, %c0_i32, %c0_i32_0 : i32, i32, i32
  }
}

module attributes {stable_mosaic.version = 11 : i64} {
  func.func @_up_kernel(%arg0: i32, %arg1: memref<1x16x32xf32, #tpu.memory_space<vmem>>, %arg2: memref<1x16x32xf32, #tpu.memory_space<vmem>>, %arg3: memref<1x8x32xf32, #tpu.memory_space<vmem>>, %arg4: memref<1x8x32xf32, #tpu.memory_space<vmem>>, %arg5: memref<1x8x1xf32, #tpu.memory_space<vmem>>, %arg6: memref<32x32xf32, #tpu.memory_space<vmem>>, %arg7: memref<1x32xf32, #tpu.memory_space<vmem>>, %arg8: memref<32x32xf32, #tpu.memory_space<vmem>>, %arg9: memref<1x32xf32, #tpu.memory_space<vmem>>, %arg10: memref<32x32xf32, #tpu.memory_space<vmem>>, %arg11: memref<1x32xf32, #tpu.memory_space<vmem>>, %arg12: memref<32x32xf32, #tpu.memory_space<vmem>>, %arg13: memref<1x32xf32, #tpu.memory_space<vmem>>, %arg14: memref<32x64xf32, #tpu.memory_space<vmem>>, %arg15: memref<32x64xf32, #tpu.memory_space<vmem>>, %arg16: memref<1x64xf32, #tpu.memory_space<vmem>>, %arg17: memref<64x32xf32, #tpu.memory_space<vmem>>, %arg18: memref<1x32xf32, #tpu.memory_space<vmem>>, %arg19: memref<1x16x32xf32, #tpu.memory_space<vmem>>, %arg20: memref<1x16x32xf32, #tpu.memory_space<vmem>>) attributes {dimension_semantics = [#tpu.dimension_semantics<parallel>], iteration_bounds = array<i64: 2>, scalar_prefetch = 0 : i64, scratch_operands = 0 : i64, tpu.core_type = #tpu.core_type<tc>, window_params = [{transform_indices = @transform_0, window_bounds = array<i64: 1, 16, 32>}, {transform_indices = @transform_1, window_bounds = array<i64: 1, 16, 32>}, {transform_indices = @transform_2, window_bounds = array<i64: 1, 8, 32>}, {transform_indices = @transform_3, window_bounds = array<i64: 1, 8, 32>}, {transform_indices = @transform_4, window_bounds = array<i64: 1, 8, 1>}, {pipeline_mode = #tpu.pipeline_mode<synchronous>, transform_indices = @transform_5, window_bounds = array<i64: 32, 32>}, {pipeline_mode = #tpu.pipeline_mode<synchronous>, transform_indices = @transform_6, window_bounds = array<i64: 1, 32>}, {pipeline_mode = #tpu.pipeline_mode<synchronous>, transform_indices = @transform_7, window_bounds = array<i64: 32, 32>}, {pipeline_mode = #tpu.pipeline_mode<synchronous>, transform_indices = @transform_8, window_bounds = array<i64: 1, 32>}, {pipeline_mode = #tpu.pipeline_mode<synchronous>, transform_indices = @transform_9, window_bounds = array<i64: 32, 32>}, {pipeline_mode = #tpu.pipeline_mode<synchronous>, transform_indices = @transform_10, window_bounds = array<i64: 1, 32>}, {pipeline_mode = #tpu.pipeline_mode<synchronous>, transform_indices = @transform_11, window_bounds = array<i64: 32, 32>}, {pipeline_mode = #tpu.pipeline_mode<synchronous>, transform_indices = @transform_12, window_bounds = array<i64: 1, 32>}, {pipeline_mode = #tpu.pipeline_mode<synchronous>, transform_indices = @transform_13, window_bounds = array<i64: 32, 64>}, {pipeline_mode = #tpu.pipeline_mode<synchronous>, transform_indices = @transform_14, window_bounds = array<i64: 32, 64>}, {pipeline_mode = #tpu.pipeline_mode<synchronous>, transform_indices = @transform_15, window_bounds = array<i64: 1, 64>}, {pipeline_mode = #tpu.pipeline_mode<synchronous>, transform_indices = @transform_16, window_bounds = array<i64: 64, 32>}, {pipeline_mode = #tpu.pipeline_mode<synchronous>, transform_indices = @transform_17, window_bounds = array<i64: 1, 32>}, {transform_indices = @transform_18, window_bounds = array<i64: 1, 16, 32>}, {transform_indices = @transform_19, window_bounds = array<i64: 1, 16, 32>}]} {
    %c0 = arith.constant 0 : index
    %c0_0 = arith.constant 0 : index
    %0 = vector.load %arg6[%c0, %c0_0] : memref<32x32xf32, #tpu.memory_space<vmem>>, vector<32x32xf32>
    %c0_1 = arith.constant 0 : index
    %c0_2 = arith.constant 0 : index
    %1 = vector.load %arg7[%c0_1, %c0_2] : memref<1x32xf32, #tpu.memory_space<vmem>>, vector<1x32xf32>
    %c0_3 = arith.constant 0 : index
    %c0_4 = arith.constant 0 : index
    %2 = vector.load %arg8[%c0_3, %c0_4] : memref<32x32xf32, #tpu.memory_space<vmem>>, vector<32x32xf32>
    %c0_5 = arith.constant 0 : index
    %c0_6 = arith.constant 0 : index
    %3 = vector.load %arg9[%c0_5, %c0_6] : memref<1x32xf32, #tpu.memory_space<vmem>>, vector<1x32xf32>
    %c0_7 = arith.constant 0 : index
    %c0_8 = arith.constant 0 : index
    %4 = vector.load %arg10[%c0_7, %c0_8] : memref<32x32xf32, #tpu.memory_space<vmem>>, vector<32x32xf32>
    %c0_9 = arith.constant 0 : index
    %c0_10 = arith.constant 0 : index
    %5 = vector.load %arg11[%c0_9, %c0_10] : memref<1x32xf32, #tpu.memory_space<vmem>>, vector<1x32xf32>
    %c0_11 = arith.constant 0 : index
    %c0_12 = arith.constant 0 : index
    %6 = vector.load %arg12[%c0_11, %c0_12] : memref<32x32xf32, #tpu.memory_space<vmem>>, vector<32x32xf32>
    %c0_13 = arith.constant 0 : index
    %c0_14 = arith.constant 0 : index
    %7 = vector.load %arg13[%c0_13, %c0_14] : memref<1x32xf32, #tpu.memory_space<vmem>>, vector<1x32xf32>
    %c0_15 = arith.constant 0 : index
    %c0_16 = arith.constant 0 : index
    %8 = vector.load %arg14[%c0_15, %c0_16] : memref<32x64xf32, #tpu.memory_space<vmem>>, vector<32x64xf32>
    %c0_17 = arith.constant 0 : index
    %c0_18 = arith.constant 0 : index
    %9 = vector.load %arg15[%c0_17, %c0_18] : memref<32x64xf32, #tpu.memory_space<vmem>>, vector<32x64xf32>
    %c0_19 = arith.constant 0 : index
    %c0_20 = arith.constant 0 : index
    %10 = vector.load %arg16[%c0_19, %c0_20] : memref<1x64xf32, #tpu.memory_space<vmem>>, vector<1x64xf32>
    %c0_21 = arith.constant 0 : index
    %c0_22 = arith.constant 0 : index
    %11 = vector.load %arg17[%c0_21, %c0_22] : memref<64x32xf32, #tpu.memory_space<vmem>>, vector<64x32xf32>
    %c0_23 = arith.constant 0 : index
    %c0_24 = arith.constant 0 : index
    %12 = vector.load %arg18[%c0_23, %c0_24] : memref<1x32xf32, #tpu.memory_space<vmem>>, vector<1x32xf32>
    %c0_25 = arith.constant 0 : index
    %c0_26 = arith.constant 0 : index
    %c0_27 = arith.constant 0 : index
    %13 = vector.load %arg5[%c0_25, %c0_26, %c0_27] : memref<1x8x1xf32, #tpu.memory_space<vmem>>, vector<1x8x1xf32>
    %14 = vector.shape_cast %13 : vector<1x8x1xf32> to vector<8x1xf32>
    %c0_28 = arith.constant 0 : index
    %c0_29 = arith.constant 0 : index
    %c0_30 = arith.constant 0 : index
    %15 = vector.load %arg3[%c0_28, %c0_29, %c0_30] : memref<1x8x32xf32, #tpu.memory_space<vmem>>, vector<1x8x32xf32>
    %16 = vector.shape_cast %15 : vector<1x8x32xf32> to vector<8x32xf32>
    %c0_31 = arith.constant 0 : index
    %c0_32 = arith.constant 0 : index
    %c0_33 = arith.constant 0 : index
    %17 = vector.load %arg4[%c0_31, %c0_32, %c0_33] : memref<1x8x32xf32, #tpu.memory_space<vmem>>, vector<1x8x32xf32>
    %18 = vector.shape_cast %17 : vector<1x8x32xf32> to vector<8x32xf32>
    %c0_34 = arith.constant 0 : index
    %c0_35 = arith.constant 0 : index
    %c0_36 = arith.constant 0 : index
    %19 = vector.load %arg1[%c0_34, %c0_35, %c0_36] : memref<1x16x32xf32, #tpu.memory_space<vmem>>, vector<1x16x32xf32>
    %20 = vector.shape_cast %19 : vector<1x16x32xf32> to vector<16x32xf32>
    %cst = arith.constant dense<0.000000e+00> : vector<16x32xf32>
    %21 = tpu.matmul %20, %0, %cst {dimension_numbers = #tpu.dot_dimension_numbers<[1], [0], [0], [1], [0, 0, 1, 1], [], []>} : vector<16x32xf32>, vector<32x32xf32>, vector<16x32xf32> -> vector<16x32xf32>
    %22 = vector.broadcast %1 : vector<1x32xf32> to vector<16x32xf32>
    %23 = arith.addf %21, %22 : vector<16x32xf32>
    %cst_37 = arith.constant dense<0.000000e+00> : vector<8x32xf32>
    %24 = tpu.matmul %16, %2, %cst_37 {dimension_numbers = #tpu.dot_dimension_numbers<[1], [0], [0], [1], [0, 0, 1, 1], [], []>} : vector<8x32xf32>, vector<32x32xf32>, vector<8x32xf32> -> vector<8x32xf32>
    %25 = vector.broadcast %3 : vector<1x32xf32> to vector<8x32xf32>
    %26 = arith.addf %24, %25 : vector<8x32xf32>
    %cst_38 = arith.constant dense<0.000000e+00> : vector<8x32xf32>
    %27 = tpu.matmul %16, %4, %cst_38 {dimension_numbers = #tpu.dot_dimension_numbers<[1], [0], [0], [1], [0, 0, 1, 1], [], []>} : vector<8x32xf32>, vector<32x32xf32>, vector<8x32xf32> -> vector<8x32xf32>
    %28 = vector.broadcast %5 : vector<1x32xf32> to vector<8x32xf32>
    %29 = arith.addf %27, %28 : vector<8x32xf32>
    %30 = vector.broadcast %14 : vector<8x1xf32> to vector<8x32xf32>
    %31 = arith.mulf %29, %30 : vector<8x32xf32>
    %32 = vector.extract_strided_slice %23 {offsets = [0, 0], sizes = [16, 8], strides = [1, 1]} : vector<16x32xf32> to vector<16x8xf32>
    %33 = vector.extract_strided_slice %26 {offsets = [0, 0], sizes = [8, 8], strides = [1, 1]} : vector<8x32xf32> to vector<8x8xf32>
    %34 = vector.extract_strided_slice %31 {offsets = [0, 0], sizes = [8, 8], strides = [1, 1]} : vector<8x32xf32> to vector<8x8xf32>
    %cst_39 = arith.constant dense<0.000000e+00> : vector<16x8xf32>
    %35 = tpu.matmul %32, %33, %cst_39 {dimension_numbers = #tpu.dot_dimension_numbers<[1], [1], [0], [0], [0, 0, 1, 0], [], []>} : vector<16x8xf32>, vector<8x8xf32>, vector<16x8xf32> -> vector<16x8xf32>
    %cst_40 = arith.constant 0.353553385 : f32
    %36 = vector.broadcast %cst_40 : f32 to vector<16x8xf32>
    %37 = arith.mulf %35, %36 : vector<16x8xf32>
    %cst_41 = arith.constant dense<0xFF800000> : vector<16xf32>
    %38 = vector.multi_reduction <maximumf>, %37, %cst_41 [1] : vector<16x8xf32> to vector<16xf32>
    %39 = vector.shape_cast %38 : vector<16xf32> to vector<16x1xf32>
    %40 = vector.broadcast %39 : vector<16x1xf32> to vector<16x8xf32>
    %41 = arith.subf %37, %40 : vector<16x8xf32>
    %42 = math.exp %41 : vector<16x8xf32>
    %cst_42 = arith.constant dense<0.000000e+00> : vector<16xf32>
    %43 = vector.multi_reduction <add>, %42, %cst_42 [1] : vector<16x8xf32> to vector<16xf32>
    %44 = vector.shape_cast %43 : vector<16xf32> to vector<16x1xf32>
    %45 = tpu.reciprocal %44 {approx = true} : vector<16x1xf32> -> vector<16x1xf32>
    %46 = vector.broadcast %45 : vector<16x1xf32> to vector<16x8xf32>
    %47 = arith.mulf %42, %46 : vector<16x8xf32>
    %cst_43 = arith.constant dense<0.000000e+00> : vector<16x8xf32>
    %48 = tpu.matmul %47, %34, %cst_43 {dimension_numbers = #tpu.dot_dimension_numbers<[1], [0], [0], [1], [0, 0, 1, 1], [], []>} : vector<16x8xf32>, vector<8x8xf32>, vector<16x8xf32> -> vector<16x8xf32>
    %49 = vector.extract_strided_slice %23 {offsets = [0, 8], sizes = [16, 8], strides = [1, 1]} : vector<16x32xf32> to vector<16x8xf32>
    %50 = vector.extract_strided_slice %26 {offsets = [0, 8], sizes = [8, 8], strides = [1, 1]} : vector<8x32xf32> to vector<8x8xf32>
    %51 = vector.extract_strided_slice %31 {offsets = [0, 8], sizes = [8, 8], strides = [1, 1]} : vector<8x32xf32> to vector<8x8xf32>
    %cst_44 = arith.constant dense<0.000000e+00> : vector<16x8xf32>
    %52 = tpu.matmul %49, %50, %cst_44 {dimension_numbers = #tpu.dot_dimension_numbers<[1], [1], [0], [0], [0, 0, 1, 0], [], []>} : vector<16x8xf32>, vector<8x8xf32>, vector<16x8xf32> -> vector<16x8xf32>
    %cst_45 = arith.constant 0.353553385 : f32
    %53 = vector.broadcast %cst_45 : f32 to vector<16x8xf32>
    %54 = arith.mulf %52, %53 : vector<16x8xf32>
    %cst_46 = arith.constant dense<0xFF800000> : vector<16xf32>
    %55 = vector.multi_reduction <maximumf>, %54, %cst_46 [1] : vector<16x8xf32> to vector<16xf32>
    %56 = vector.shape_cast %55 : vector<16xf32> to vector<16x1xf32>
    %57 = vector.broadcast %56 : vector<16x1xf32> to vector<16x8xf32>
    %58 = arith.subf %54, %57 : vector<16x8xf32>
    %59 = math.exp %58 : vector<16x8xf32>
    %cst_47 = arith.constant dense<0.000000e+00> : vector<16xf32>
    %60 = vector.multi_reduction <add>, %59, %cst_47 [1] : vector<16x8xf32> to vector<16xf32>
    %61 = vector.shape_cast %60 : vector<16xf32> to vector<16x1xf32>
    %62 = tpu.reciprocal %61 {approx = true} : vector<16x1xf32> -> vector<16x1xf32>
    %63 = vector.broadcast %62 : vector<16x1xf32> to vector<16x8xf32>
    %64 = arith.mulf %59, %63 : vector<16x8xf32>
    %cst_48 = arith.constant dense<0.000000e+00> : vector<16x8xf32>
    %65 = tpu.matmul %64, %51, %cst_48 {dimension_numbers = #tpu.dot_dimension_numbers<[1], [0], [0], [1], [0, 0, 1, 1], [], []>} : vector<16x8xf32>, vector<8x8xf32>, vector<16x8xf32> -> vector<16x8xf32>
    %66 = vector.extract_strided_slice %23 {offsets = [0, 16], sizes = [16, 8], strides = [1, 1]} : vector<16x32xf32> to vector<16x8xf32>
    %67 = vector.extract_strided_slice %26 {offsets = [0, 16], sizes = [8, 8], strides = [1, 1]} : vector<8x32xf32> to vector<8x8xf32>
    %68 = vector.extract_strided_slice %31 {offsets = [0, 16], sizes = [8, 8], strides = [1, 1]} : vector<8x32xf32> to vector<8x8xf32>
    %cst_49 = arith.constant dense<0.000000e+00> : vector<16x8xf32>
    %69 = tpu.matmul %66, %67, %cst_49 {dimension_numbers = #tpu.dot_dimension_numbers<[1], [1], [0], [0], [0, 0, 1, 0], [], []>} : vector<16x8xf32>, vector<8x8xf32>, vector<16x8xf32> -> vector<16x8xf32>
    %cst_50 = arith.constant 0.353553385 : f32
    %70 = vector.broadcast %cst_50 : f32 to vector<16x8xf32>
    %71 = arith.mulf %69, %70 : vector<16x8xf32>
    %cst_51 = arith.constant dense<0xFF800000> : vector<16xf32>
    %72 = vector.multi_reduction <maximumf>, %71, %cst_51 [1] : vector<16x8xf32> to vector<16xf32>
    %73 = vector.shape_cast %72 : vector<16xf32> to vector<16x1xf32>
    %74 = vector.broadcast %73 : vector<16x1xf32> to vector<16x8xf32>
    %75 = arith.subf %71, %74 : vector<16x8xf32>
    %76 = math.exp %75 : vector<16x8xf32>
    %cst_52 = arith.constant dense<0.000000e+00> : vector<16xf32>
    %77 = vector.multi_reduction <add>, %76, %cst_52 [1] : vector<16x8xf32> to vector<16xf32>
    %78 = vector.shape_cast %77 : vector<16xf32> to vector<16x1xf32>
    %79 = tpu.reciprocal %78 {approx = true} : vector<16x1xf32> -> vector<16x1xf32>
    %80 = vector.broadcast %79 : vector<16x1xf32> to vector<16x8xf32>
    %81 = arith.mulf %76, %80 : vector<16x8xf32>
    %cst_53 = arith.constant dense<0.000000e+00> : vector<16x8xf32>
    %82 = tpu.matmul %81, %68, %cst_53 {dimension_numbers = #tpu.dot_dimension_numbers<[1], [0], [0], [1], [0, 0, 1, 1], [], []>} : vector<16x8xf32>, vector<8x8xf32>, vector<16x8xf32> -> vector<16x8xf32>
    %83 = vector.extract_strided_slice %23 {offsets = [0, 24], sizes = [16, 8], strides = [1, 1]} : vector<16x32xf32> to vector<16x8xf32>
    %84 = vector.extract_strided_slice %26 {offsets = [0, 24], sizes = [8, 8], strides = [1, 1]} : vector<8x32xf32> to vector<8x8xf32>
    %85 = vector.extract_strided_slice %31 {offsets = [0, 24], sizes = [8, 8], strides = [1, 1]} : vector<8x32xf32> to vector<8x8xf32>
    %cst_54 = arith.constant dense<0.000000e+00> : vector<16x8xf32>
    %86 = tpu.matmul %83, %84, %cst_54 {dimension_numbers = #tpu.dot_dimension_numbers<[1], [1], [0], [0], [0, 0, 1, 0], [], []>} : vector<16x8xf32>, vector<8x8xf32>, vector<16x8xf32> -> vector<16x8xf32>
    %cst_55 = arith.constant 0.353553385 : f32
    %87 = vector.broadcast %cst_55 : f32 to vector<16x8xf32>
    %88 = arith.mulf %86, %87 : vector<16x8xf32>
    %cst_56 = arith.constant dense<0xFF800000> : vector<16xf32>
    %89 = vector.multi_reduction <maximumf>, %88, %cst_56 [1] : vector<16x8xf32> to vector<16xf32>
    %90 = vector.shape_cast %89 : vector<16xf32> to vector<16x1xf32>
    %91 = vector.broadcast %90 : vector<16x1xf32> to vector<16x8xf32>
    %92 = arith.subf %88, %91 : vector<16x8xf32>
    %93 = math.exp %92 : vector<16x8xf32>
    %cst_57 = arith.constant dense<0.000000e+00> : vector<16xf32>
    %94 = vector.multi_reduction <add>, %93, %cst_57 [1] : vector<16x8xf32> to vector<16xf32>
    %95 = vector.shape_cast %94 : vector<16xf32> to vector<16x1xf32>
    %96 = tpu.reciprocal %95 {approx = true} : vector<16x1xf32> -> vector<16x1xf32>
    %97 = vector.broadcast %96 : vector<16x1xf32> to vector<16x8xf32>
    %98 = arith.mulf %93, %97 : vector<16x8xf32>
    %cst_58 = arith.constant dense<0.000000e+00> : vector<16x8xf32>
    %99 = tpu.matmul %98, %85, %cst_58 {dimension_numbers = #tpu.dot_dimension_numbers<[1], [0], [0], [1], [0, 0, 1, 1], [], []>} : vector<16x8xf32>, vector<8x8xf32>, vector<16x8xf32> -> vector<16x8xf32>
    %100 = tpu.concatenate %48, %65, %82, %99 in 1 : vector<16x8xf32>, vector<16x8xf32>, vector<16x8xf32>, vector<16x8xf32> -> vector<16x32xf32>
    %cst_59 = arith.constant dense<0.000000e+00> : vector<16x32xf32>
    %101 = tpu.matmul %100, %6, %cst_59 {dimension_numbers = #tpu.dot_dimension_numbers<[1], [0], [0], [1], [0, 0, 1, 1], [], []>} : vector<16x32xf32>, vector<32x32xf32>, vector<16x32xf32> -> vector<16x32xf32>
    %102 = vector.broadcast %7 : vector<1x32xf32> to vector<16x32xf32>
    %103 = arith.addf %101, %102 : vector<16x32xf32>
    %cst_60 = arith.constant dense<0.000000e+00> : vector<16x64xf32>
    %104 = tpu.matmul %20, %8, %cst_60 {dimension_numbers = #tpu.dot_dimension_numbers<[1], [0], [0], [1], [0, 0, 1, 1], [], []>} : vector<16x32xf32>, vector<32x64xf32>, vector<16x64xf32> -> vector<16x64xf32>
    %cst_61 = arith.constant dense<0.000000e+00> : vector<16x64xf32>
    %105 = tpu.matmul %103, %9, %cst_61 {dimension_numbers = #tpu.dot_dimension_numbers<[1], [0], [0], [1], [0, 0, 1, 1], [], []>} : vector<16x32xf32>, vector<32x64xf32>, vector<16x64xf32> -> vector<16x64xf32>
    %106 = arith.addf %104, %105 : vector<16x64xf32>
    %107 = vector.broadcast %10 : vector<1x64xf32> to vector<16x64xf32>
    %108 = arith.addf %106, %107 : vector<16x64xf32>
    %cst_62 = arith.constant 0.000000e+00 : f32
    %109 = vector.broadcast %cst_62 : f32 to vector<16x64xf32>
    %110 = arith.maximumf %108, %109 : vector<16x64xf32>
    %cst_63 = arith.constant dense<0.000000e+00> : vector<16x32xf32>
    %111 = tpu.matmul %110, %11, %cst_63 {dimension_numbers = #tpu.dot_dimension_numbers<[1], [0], [0], [1], [0, 0, 1, 1], [], []>} : vector<16x64xf32>, vector<64x32xf32>, vector<16x32xf32> -> vector<16x32xf32>
    %112 = vector.broadcast %12 : vector<1x32xf32> to vector<16x32xf32>
    %113 = arith.addf %111, %112 : vector<16x32xf32>
    %114 = arith.addf %20, %113 : vector<16x32xf32>
    %c0_64 = arith.constant 0 : index
    %c0_65 = arith.constant 0 : index
    %c0_66 = arith.constant 0 : index
    %115 = vector.load %arg19[%c0_64, %c0_65, %c0_66] : memref<1x16x32xf32, #tpu.memory_space<vmem>>, vector<1x16x32xf32>
    %116 = vector.shape_cast %115 : vector<1x16x32xf32> to vector<16x32xf32>
    %117 = vector.shape_cast %114 : vector<16x32xf32> to vector<1x16x32xf32>
    tpu.vector_store %arg19[%c0_64, %c0_65, %c0_66], %117 {strides = array<i32>} : memref<1x16x32xf32, #tpu.memory_space<vmem>>, vector<1x16x32xf32>,
    %c0_67 = arith.constant 0 : index
    %c0_68 = arith.constant 0 : index
    %c0_69 = arith.constant 0 : index
    %118 = vector.load %arg2[%c0_67, %c0_68, %c0_69] : memref<1x16x32xf32, #tpu.memory_space<vmem>>, vector<1x16x32xf32>
    %119 = vector.shape_cast %118 : vector<1x16x32xf32> to vector<16x32xf32>
    %cst_70 = arith.constant dense<0.000000e+00> : vector<16x32xf32>
    %120 = tpu.matmul %119, %0, %cst_70 {dimension_numbers = #tpu.dot_dimension_numbers<[1], [0], [0], [1], [0, 0, 1, 1], [], []>} : vector<16x32xf32>, vector<32x32xf32>, vector<16x32xf32> -> vector<16x32xf32>
    %121 = vector.broadcast %1 : vector<1x32xf32> to vector<16x32xf32>
    %122 = arith.addf %120, %121 : vector<16x32xf32>
    %cst_71 = arith.constant dense<0.000000e+00> : vector<8x32xf32>
    %123 = tpu.matmul %18, %2, %cst_71 {dimension_numbers = #tpu.dot_dimension_numbers<[1], [0], [0], [1], [0, 0, 1, 1], [], []>} : vector<8x32xf32>, vector<32x32xf32>, vector<8x32xf32> -> vector<8x32xf32>
    %124 = vector.broadcast %3 : vector<1x32xf32> to vector<8x32xf32>
    %125 = arith.addf %123, %124 : vector<8x32xf32>
    %cst_72 = arith.constant dense<0.000000e+00> : vector<8x32xf32>
    %126 = tpu.matmul %18, %4, %cst_72 {dimension_numbers = #tpu.dot_dimension_numbers<[1], [0], [0], [1], [0, 0, 1, 1], [], []>} : vector<8x32xf32>, vector<32x32xf32>, vector<8x32xf32> -> vector<8x32xf32>
    %127 = vector.broadcast %5 : vector<1x32xf32> to vector<8x32xf32>
    %128 = arith.addf %126, %127 : vector<8x32xf32>
    %129 = vector.broadcast %14 : vector<8x1xf32> to vector<8x32xf32>
    %130 = arith.mulf %128, %129 : vector<8x32xf32>
    %131 = vector.extract_strided_slice %122 {offsets = [0, 0], sizes = [16, 8], strides = [1, 1]} : vector<16x32xf32> to vector<16x8xf32>
    %132 = vector.extract_strided_slice %125 {offsets = [0, 0], sizes = [8, 8], strides = [1, 1]} : vector<8x32xf32> to vector<8x8xf32>
    %133 = vector.extract_strided_slice %130 {offsets = [0, 0], sizes = [8, 8], strides = [1, 1]} : vector<8x32xf32> to vector<8x8xf32>
    %cst_73 = arith.constant dense<0.000000e+00> : vector<16x8xf32>
    %134 = tpu.matmul %131, %132, %cst_73 {dimension_numbers = #tpu.dot_dimension_numbers<[1], [1], [0], [0], [0, 0, 1, 0], [], []>} : vector<16x8xf32>, vector<8x8xf32>, vector<16x8xf32> -> vector<16x8xf32>
    %cst_74 = arith.constant 0.353553385 : f32
    %135 = vector.broadcast %cst_74 : f32 to vector<16x8xf32>
    %136 = arith.mulf %134, %135 : vector<16x8xf32>
    %cst_75 = arith.constant dense<0xFF800000> : vector<16xf32>
    %137 = vector.multi_reduction <maximumf>, %136, %cst_75 [1] : vector<16x8xf32> to vector<16xf32>
    %138 = vector.shape_cast %137 : vector<16xf32> to vector<16x1xf32>
    %139 = vector.broadcast %138 : vector<16x1xf32> to vector<16x8xf32>
    %140 = arith.subf %136, %139 : vector<16x8xf32>
    %141 = math.exp %140 : vector<16x8xf32>
    %cst_76 = arith.constant dense<0.000000e+00> : vector<16xf32>
    %142 = vector.multi_reduction <add>, %141, %cst_76 [1] : vector<16x8xf32> to vector<16xf32>
    %143 = vector.shape_cast %142 : vector<16xf32> to vector<16x1xf32>
    %144 = tpu.reciprocal %143 {approx = true} : vector<16x1xf32> -> vector<16x1xf32>
    %145 = vector.broadcast %144 : vector<16x1xf32> to vector<16x8xf32>
    %146 = arith.mulf %141, %145 : vector<16x8xf32>
    %cst_77 = arith.constant dense<0.000000e+00> : vector<16x8xf32>
    %147 = tpu.matmul %146, %133, %cst_77 {dimension_numbers = #tpu.dot_dimension_numbers<[1], [0], [0], [1], [0, 0, 1, 1], [], []>} : vector<16x8xf32>, vector<8x8xf32>, vector<16x8xf32> -> vector<16x8xf32>
    %148 = vector.extract_strided_slice %122 {offsets = [0, 8], sizes = [16, 8], strides = [1, 1]} : vector<16x32xf32> to vector<16x8xf32>
    %149 = vector.extract_strided_slice %125 {offsets = [0, 8], sizes = [8, 8], strides = [1, 1]} : vector<8x32xf32> to vector<8x8xf32>
    %150 = vector.extract_strided_slice %130 {offsets = [0, 8], sizes = [8, 8], strides = [1, 1]} : vector<8x32xf32> to vector<8x8xf32>
    %cst_78 = arith.constant dense<0.000000e+00> : vector<16x8xf32>
    %151 = tpu.matmul %148, %149, %cst_78 {dimension_numbers = #tpu.dot_dimension_numbers<[1], [1], [0], [0], [0, 0, 1, 0], [], []>} : vector<16x8xf32>, vector<8x8xf32>, vector<16x8xf32> -> vector<16x8xf32>
    %cst_79 = arith.constant 0.353553385 : f32
    %152 = vector.broadcast %cst_79 : f32 to vector<16x8xf32>
    %153 = arith.mulf %151, %152 : vector<16x8xf32>
    %cst_80 = arith.constant dense<0xFF800000> : vector<16xf32>
    %154 = vector.multi_reduction <maximumf>, %153, %cst_80 [1] : vector<16x8xf32> to vector<16xf32>
    %155 = vector.shape_cast %154 : vector<16xf32> to vector<16x1xf32>
    %156 = vector.broadcast %155 : vector<16x1xf32> to vector<16x8xf32>
    %157 = arith.subf %153, %156 : vector<16x8xf32>
    %158 = math.exp %157 : vector<16x8xf32>
    %cst_81 = arith.constant dense<0.000000e+00> : vector<16xf32>
    %159 = vector.multi_reduction <add>, %158, %cst_81 [1] : vector<16x8xf32> to vector<16xf32>
    %160 = vector.shape_cast %159 : vector<16xf32> to vector<16x1xf32>
    %161 = tpu.reciprocal %160 {approx = true} : vector<16x1xf32> -> vector<16x1xf32>
    %162 = vector.broadcast %161 : vector<16x1xf32> to vector<16x8xf32>
    %163 = arith.mulf %158, %162 : vector<16x8xf32>
    %cst_82 = arith.constant dense<0.000000e+00> : vector<16x8xf32>
    %164 = tpu.matmul %163, %150, %cst_82 {dimension_numbers = #tpu.dot_dimension_numbers<[1], [0], [0], [1], [0, 0, 1, 1], [], []>} : vector<16x8xf32>, vector<8x8xf32>, vector<16x8xf32> -> vector<16x8xf32>
    %165 = vector.extract_strided_slice %122 {offsets = [0, 16], sizes = [16, 8], strides = [1, 1]} : vector<16x32xf32> to vector<16x8xf32>
    %166 = vector.extract_strided_slice %125 {offsets = [0, 16], sizes = [8, 8], strides = [1, 1]} : vector<8x32xf32> to vector<8x8xf32>
    %167 = vector.extract_strided_slice %130 {offsets = [0, 16], sizes = [8, 8], strides = [1, 1]} : vector<8x32xf32> to vector<8x8xf32>
    %cst_83 = arith.constant dense<0.000000e+00> : vector<16x8xf32>
    %168 = tpu.matmul %165, %166, %cst_83 {dimension_numbers = #tpu.dot_dimension_numbers<[1], [1], [0], [0], [0, 0, 1, 0], [], []>} : vector<16x8xf32>, vector<8x8xf32>, vector<16x8xf32> -> vector<16x8xf32>
    %cst_84 = arith.constant 0.353553385 : f32
    %169 = vector.broadcast %cst_84 : f32 to vector<16x8xf32>
    %170 = arith.mulf %168, %169 : vector<16x8xf32>
    %cst_85 = arith.constant dense<0xFF800000> : vector<16xf32>
    %171 = vector.multi_reduction <maximumf>, %170, %cst_85 [1] : vector<16x8xf32> to vector<16xf32>
    %172 = vector.shape_cast %171 : vector<16xf32> to vector<16x1xf32>
    %173 = vector.broadcast %172 : vector<16x1xf32> to vector<16x8xf32>
    %174 = arith.subf %170, %173 : vector<16x8xf32>
    %175 = math.exp %174 : vector<16x8xf32>
    %cst_86 = arith.constant dense<0.000000e+00> : vector<16xf32>
    %176 = vector.multi_reduction <add>, %175, %cst_86 [1] : vector<16x8xf32> to vector<16xf32>
    %177 = vector.shape_cast %176 : vector<16xf32> to vector<16x1xf32>
    %178 = tpu.reciprocal %177 {approx = true} : vector<16x1xf32> -> vector<16x1xf32>
    %179 = vector.broadcast %178 : vector<16x1xf32> to vector<16x8xf32>
    %180 = arith.mulf %175, %179 : vector<16x8xf32>
    %cst_87 = arith.constant dense<0.000000e+00> : vector<16x8xf32>
    %181 = tpu.matmul %180, %167, %cst_87 {dimension_numbers = #tpu.dot_dimension_numbers<[1], [0], [0], [1], [0, 0, 1, 1], [], []>} : vector<16x8xf32>, vector<8x8xf32>, vector<16x8xf32> -> vector<16x8xf32>
    %182 = vector.extract_strided_slice %122 {offsets = [0, 24], sizes = [16, 8], strides = [1, 1]} : vector<16x32xf32> to vector<16x8xf32>
    %183 = vector.extract_strided_slice %125 {offsets = [0, 24], sizes = [8, 8], strides = [1, 1]} : vector<8x32xf32> to vector<8x8xf32>
    %184 = vector.extract_strided_slice %130 {offsets = [0, 24], sizes = [8, 8], strides = [1, 1]} : vector<8x32xf32> to vector<8x8xf32>
    %cst_88 = arith.constant dense<0.000000e+00> : vector<16x8xf32>
    %185 = tpu.matmul %182, %183, %cst_88 {dimension_numbers = #tpu.dot_dimension_numbers<[1], [1], [0], [0], [0, 0, 1, 0], [], []>} : vector<16x8xf32>, vector<8x8xf32>, vector<16x8xf32> -> vector<16x8xf32>
    %cst_89 = arith.constant 0.353553385 : f32
    %186 = vector.broadcast %cst_89 : f32 to vector<16x8xf32>
    %187 = arith.mulf %185, %186 : vector<16x8xf32>
    %cst_90 = arith.constant dense<0xFF800000> : vector<16xf32>
    %188 = vector.multi_reduction <maximumf>, %187, %cst_90 [1] : vector<16x8xf32> to vector<16xf32>
    %189 = vector.shape_cast %188 : vector<16xf32> to vector<16x1xf32>
    %190 = vector.broadcast %189 : vector<16x1xf32> to vector<16x8xf32>
    %191 = arith.subf %187, %190 : vector<16x8xf32>
    %192 = math.exp %191 : vector<16x8xf32>
    %cst_91 = arith.constant dense<0.000000e+00> : vector<16xf32>
    %193 = vector.multi_reduction <add>, %192, %cst_91 [1] : vector<16x8xf32> to vector<16xf32>
    %194 = vector.shape_cast %193 : vector<16xf32> to vector<16x1xf32>
    %195 = tpu.reciprocal %194 {approx = true} : vector<16x1xf32> -> vector<16x1xf32>
    %196 = vector.broadcast %195 : vector<16x1xf32> to vector<16x8xf32>
    %197 = arith.mulf %192, %196 : vector<16x8xf32>
    %cst_92 = arith.constant dense<0.000000e+00> : vector<16x8xf32>
    %198 = tpu.matmul %197, %184, %cst_92 {dimension_numbers = #tpu.dot_dimension_numbers<[1], [0], [0], [1], [0, 0, 1, 1], [], []>} : vector<16x8xf32>, vector<8x8xf32>, vector<16x8xf32> -> vector<16x8xf32>
    %199 = tpu.concatenate %147, %164, %181, %198 in 1 : vector<16x8xf32>, vector<16x8xf32>, vector<16x8xf32>, vector<16x8xf32> -> vector<16x32xf32>
    %cst_93 = arith.constant dense<0.000000e+00> : vector<16x32xf32>
    %200 = tpu.matmul %199, %6, %cst_93 {dimension_numbers = #tpu.dot_dimension_numbers<[1], [0], [0], [1], [0, 0, 1, 1], [], []>} : vector<16x32xf32>, vector<32x32xf32>, vector<16x32xf32> -> vector<16x32xf32>
    %201 = vector.broadcast %7 : vector<1x32xf32> to vector<16x32xf32>
    %202 = arith.addf %200, %201 : vector<16x32xf32>
    %cst_94 = arith.constant dense<0.000000e+00> : vector<16x64xf32>
    %203 = tpu.matmul %119, %8, %cst_94 {dimension_numbers = #tpu.dot_dimension_numbers<[1], [0], [0], [1], [0, 0, 1, 1], [], []>} : vector<16x32xf32>, vector<32x64xf32>, vector<16x64xf32> -> vector<16x64xf32>
    %cst_95 = arith.constant dense<0.000000e+00> : vector<16x64xf32>
    %204 = tpu.matmul %202, %9, %cst_95 {dimension_numbers = #tpu.dot_dimension_numbers<[1], [0], [0], [1], [0, 0, 1, 1], [], []>} : vector<16x32xf32>, vector<32x64xf32>, vector<16x64xf32> -> vector<16x64xf32>
    %205 = arith.addf %203, %204 : vector<16x64xf32>
    %206 = vector.broadcast %10 : vector<1x64xf32> to vector<16x64xf32>
    %207 = arith.addf %205, %206 : vector<16x64xf32>
    %cst_96 = arith.constant 0.000000e+00 : f32
    %208 = vector.broadcast %cst_96 : f32 to vector<16x64xf32>
    %209 = arith.maximumf %207, %208 : vector<16x64xf32>
    %cst_97 = arith.constant dense<0.000000e+00> : vector<16x32xf32>
    %210 = tpu.matmul %209, %11, %cst_97 {dimension_numbers = #tpu.dot_dimension_numbers<[1], [0], [0], [1], [0, 0, 1, 1], [], []>} : vector<16x64xf32>, vector<64x32xf32>, vector<16x32xf32> -> vector<16x32xf32>
    %211 = vector.broadcast %12 : vector<1x32xf32> to vector<16x32xf32>
    %212 = arith.addf %210, %211 : vector<16x32xf32>
    %213 = arith.addf %119, %212 : vector<16x32xf32>
    %c0_98 = arith.constant 0 : index
    %c0_99 = arith.constant 0 : index
    %c0_100 = arith.constant 0 : index
    %214 = vector.load %arg20[%c0_98, %c0_99, %c0_100] : memref<1x16x32xf32, #tpu.memory_space<vmem>>, vector<1x16x32xf32>
    %215 = vector.shape_cast %214 : vector<1x16x32xf32> to vector<16x32xf32>
    %216 = vector.shape_cast %213 : vector<16x32xf32> to vector<1x16x32xf32>
    tpu.vector_store %arg20[%c0_98, %c0_99, %c0_100], %216 {strides = array<i32>} : memref<1x16x32xf32, #tpu.memory_space<vmem>>, vector<1x16x32xf32>,
    return
  }
  func.func @transform_0(%arg0: i32) -> (i32, i32, i32) {
    %c0_i32 = arith.constant 0 : i32
    %c0_i32_0 = arith.constant 0 : i32
    %c0_i32_1 = arith.constant 0 : i32
    return %arg0, %c0_i32, %c0_i32_0 : i32, i32, i32
  }
  func.func @transform_1(%arg0: i32) -> (i32, i32, i32) {
    %c0_i32 = arith.constant 0 : i32
    %c0_i32_0 = arith.constant 0 : i32
    %c0_i32_1 = arith.constant 0 : i32
    return %arg0, %c0_i32, %c0_i32_0 : i32, i32, i32
  }
  func.func @transform_2(%arg0: i32) -> (i32, i32, i32) {
    %c0_i32 = arith.constant 0 : i32
    %c0_i32_0 = arith.constant 0 : i32
    %c0_i32_1 = arith.constant 0 : i32
    return %arg0, %c0_i32, %c0_i32_0 : i32, i32, i32
  }
  func.func @transform_3(%arg0: i32) -> (i32, i32, i32) {
    %c0_i32 = arith.constant 0 : i32
    %c0_i32_0 = arith.constant 0 : i32
    %c0_i32_1 = arith.constant 0 : i32
    return %arg0, %c0_i32, %c0_i32_0 : i32, i32, i32
  }
  func.func @transform_4(%arg0: i32) -> (i32, i32, i32) {
    %c0_i32 = arith.constant 0 : i32
    %c0_i32_0 = arith.constant 0 : i32
    %c0_i32_1 = arith.constant 0 : i32
    return %arg0, %c0_i32, %c0_i32_0 : i32, i32, i32
  }
  func.func @transform_5(%arg0: i32) -> (i32, i32) {
    %c0_i32 = arith.constant 0 : i32
    %c0_i32_0 = arith.constant 0 : i32
    %c0_i32_1 = arith.constant 0 : i32
    return %c0_i32, %c0_i32_0 : i32, i32
  }
  func.func @transform_6(%arg0: i32) -> (i32, i32) {
    %c0_i32 = arith.constant 0 : i32
    %c0_i32_0 = arith.constant 0 : i32
    %c0_i32_1 = arith.constant 0 : i32
    return %c0_i32, %c0_i32_0 : i32, i32
  }
  func.func @transform_7(%arg0: i32) -> (i32, i32) {
    %c0_i32 = arith.constant 0 : i32
    %c0_i32_0 = arith.constant 0 : i32
    %c0_i32_1 = arith.constant 0 : i32
    return %c0_i32, %c0_i32_0 : i32, i32
  }
  func.func @transform_8(%arg0: i32) -> (i32, i32) {
    %c0_i32 = arith.constant 0 : i32
    %c0_i32_0 = arith.constant 0 : i32
    %c0_i32_1 = arith.constant 0 : i32
    return %c0_i32, %c0_i32_0 : i32, i32
  }
  func.func @transform_9(%arg0: i32) -> (i32, i32) {
    %c0_i32 = arith.constant 0 : i32
    %c0_i32_0 = arith.constant 0 : i32
    %c0_i32_1 = arith.constant 0 : i32
    return %c0_i32, %c0_i32_0 : i32, i32
  }
  func.func @transform_10(%arg0: i32) -> (i32, i32) {
    %c0_i32 = arith.constant 0 : i32
    %c0_i32_0 = arith.constant 0 : i32
    %c0_i32_1 = arith.constant 0 : i32
    return %c0_i32, %c0_i32_0 : i32, i32
  }
  func.func @transform_11(%arg0: i32) -> (i32, i32) {
    %c0_i32 = arith.constant 0 : i32
    %c0_i32_0 = arith.constant 0 : i32
    %c0_i32_1 = arith.constant 0 : i32
    return %c0_i32, %c0_i32_0 : i32, i32
  }
  func.func @transform_12(%arg0: i32) -> (i32, i32) {
    %c0_i32 = arith.constant 0 : i32
    %c0_i32_0 = arith.constant 0 : i32
    %c0_i32_1 = arith.constant 0 : i32
    return %c0_i32, %c0_i32_0 : i32, i32
  }
  func.func @transform_13(%arg0: i32) -> (i32, i32) {
    %c0_i32 = arith.constant 0 : i32
    %c0_i32_0 = arith.constant 0 : i32
    %c0_i32_1 = arith.constant 0 : i32
    return %c0_i32, %c0_i32_0 : i32, i32
  }
  func.func @transform_14(%arg0: i32) -> (i32, i32) {
    %c0_i32 = arith.constant 0 : i32
    %c0_i32_0 = arith.constant 0 : i32
    %c0_i32_1 = arith.constant 0 : i32
    return %c0_i32, %c0_i32_0 : i32, i32
  }
  func.func @transform_15(%arg0: i32) -> (i32, i32) {
    %c0_i32 = arith.constant 0 : i32
    %c0_i32_0 = arith.constant 0 : i32
    %c0_i32_1 = arith.constant 0 : i32
    return %c0_i32, %c0_i32_0 : i32, i32
  }
  func.func @transform_16(%arg0: i32) -> (i32, i32) {
    %c0_i32 = arith.constant 0 : i32
    %c0_i32_0 = arith.constant 0 : i32
    %c0_i32_1 = arith.constant 0 : i32
    return %c0_i32, %c0_i32_0 : i32, i32
  }
  func.func @transform_17(%arg0: i32) -> (i32, i32) {
    %c0_i32 = arith.constant 0 : i32
    %c0_i32_0 = arith.constant 0 : i32
    %c0_i32_1 = arith.constant 0 : i32
    return %c0_i32, %c0_i32_0 : i32, i32
  }
  func.func @transform_18(%arg0: i32) -> (i32, i32, i32) {
    %c0_i32 = arith.constant 0 : i32
    %c0_i32_0 = arith.constant 0 : i32
    %c0_i32_1 = arith.constant 0 : i32
    return %arg0, %c0_i32, %c0_i32_0 : i32, i32, i32
  }
  func.func @transform_19(%arg0: i32) -> (i32, i32, i32) {
    %c0_i32 = arith.constant 0 : i32
    %c0_i32_0 = arith.constant 0 : i32
    %c0_i32_1 = arith.constant 0 : i32
    return %arg0, %c0_i32, %c0_i32_0 : i32, i32, i32
  }
}

module attributes {stable_mosaic.version = 11 : i64} {
  func.func @_cross_self_conf_kernel(%arg0: i32, %arg1: memref<1x8x32xf32, #tpu.memory_space<vmem>>, %arg2: memref<1x8x32xf32, #tpu.memory_space<vmem>>, %arg3: memref<32x32xf32, #tpu.memory_space<vmem>>, %arg4: memref<1x32xf32, #tpu.memory_space<vmem>>, %arg5: memref<32x32xf32, #tpu.memory_space<vmem>>, %arg6: memref<1x32xf32, #tpu.memory_space<vmem>>, %arg7: memref<32x32xf32, #tpu.memory_space<vmem>>, %arg8: memref<1x32xf32, #tpu.memory_space<vmem>>, %arg9: memref<32x32xf32, #tpu.memory_space<vmem>>, %arg10: memref<1x32xf32, #tpu.memory_space<vmem>>, %arg11: memref<32x64xf32, #tpu.memory_space<vmem>>, %arg12: memref<32x64xf32, #tpu.memory_space<vmem>>, %arg13: memref<1x64xf32, #tpu.memory_space<vmem>>, %arg14: memref<64x32xf32, #tpu.memory_space<vmem>>, %arg15: memref<1x32xf32, #tpu.memory_space<vmem>>, %arg16: memref<32x32xf32, #tpu.memory_space<vmem>>, %arg17: memref<1x32xf32, #tpu.memory_space<vmem>>, %arg18: memref<32x32xf32, #tpu.memory_space<vmem>>, %arg19: memref<1x32xf32, #tpu.memory_space<vmem>>, %arg20: memref<32x32xf32, #tpu.memory_space<vmem>>, %arg21: memref<1x32xf32, #tpu.memory_space<vmem>>, %arg22: memref<32x32xf32, #tpu.memory_space<vmem>>, %arg23: memref<1x32xf32, #tpu.memory_space<vmem>>, %arg24: memref<32x64xf32, #tpu.memory_space<vmem>>, %arg25: memref<32x64xf32, #tpu.memory_space<vmem>>, %arg26: memref<1x64xf32, #tpu.memory_space<vmem>>, %arg27: memref<64x32xf32, #tpu.memory_space<vmem>>, %arg28: memref<1x32xf32, #tpu.memory_space<vmem>>, %arg29: memref<1x32xf32, #tpu.memory_space<vmem>>, %arg30: memref<1x32xf32, #tpu.memory_space<vmem>>, %arg31: memref<1x32xf32, #tpu.memory_space<vmem>>, %arg32: memref<1x32xf32, #tpu.memory_space<vmem>>, %arg33: memref<32x64xf32, #tpu.memory_space<vmem>>, %arg34: memref<32x64xf32, #tpu.memory_space<vmem>>, %arg35: memref<1x64xf32, #tpu.memory_space<vmem>>, %arg36: memref<1x64xf32, #tpu.memory_space<vmem>>, %arg37: memref<1x64xf32, #tpu.memory_space<vmem>>, %arg38: memref<64x1xf32, #tpu.memory_space<vmem>>, %arg39: memref<1x1xf32, #tpu.memory_space<vmem>>, %arg40: memref<32x1xf32, #tpu.memory_space<vmem>>, %arg41: memref<32x1xf32, #tpu.memory_space<vmem>>, %arg42: memref<1x1xf32, #tpu.memory_space<vmem>>, %arg43: memref<1x8x32xf32, #tpu.memory_space<vmem>>, %arg44: memref<1x8x32xf32, #tpu.memory_space<vmem>>, %arg45: memref<1x8x1xf32, #tpu.memory_space<vmem>>) attributes {dimension_semantics = [#tpu.dimension_semantics<parallel>], iteration_bounds = array<i64: 2>, scalar_prefetch = 0 : i64, scratch_operands = 0 : i64, tpu.core_type = #tpu.core_type<tc>, window_params = [{transform_indices = @transform_0, window_bounds = array<i64: 1, 8, 32>}, {transform_indices = @transform_1, window_bounds = array<i64: 1, 8, 32>}, {pipeline_mode = #tpu.pipeline_mode<synchronous>, transform_indices = @transform_2, window_bounds = array<i64: 32, 32>}, {pipeline_mode = #tpu.pipeline_mode<synchronous>, transform_indices = @transform_3, window_bounds = array<i64: 1, 32>}, {pipeline_mode = #tpu.pipeline_mode<synchronous>, transform_indices = @transform_4, window_bounds = array<i64: 32, 32>}, {pipeline_mode = #tpu.pipeline_mode<synchronous>, transform_indices = @transform_5, window_bounds = array<i64: 1, 32>}, {pipeline_mode = #tpu.pipeline_mode<synchronous>, transform_indices = @transform_6, window_bounds = array<i64: 32, 32>}, {pipeline_mode = #tpu.pipeline_mode<synchronous>, transform_indices = @transform_7, window_bounds = array<i64: 1, 32>}, {pipeline_mode = #tpu.pipeline_mode<synchronous>, transform_indices = @transform_8, window_bounds = array<i64: 32, 32>}, {pipeline_mode = #tpu.pipeline_mode<synchronous>, transform_indices = @transform_9, window_bounds = array<i64: 1, 32>}, {pipeline_mode = #tpu.pipeline_mode<synchronous>, transform_indices = @transform_10, window_bounds = array<i64: 32, 64>}, {pipeline_mode = #tpu.pipeline_mode<synchronous>, transform_indices = @transform_11, window_bounds = array<i64: 32, 64>}, {pipeline_mode = #tpu.pipeline_mode<synchronous>, transform_indices = @transform_12, window_bounds = array<i64: 1, 64>}, {pipeline_mode = #tpu.pipeline_mode<synchronous>, transform_indices = @transform_13, window_bounds = array<i64: 64, 32>}, {pipeline_mode = #tpu.pipeline_mode<synchronous>, transform_indices = @transform_14, window_bounds = array<i64: 1, 32>}, {pipeline_mode = #tpu.pipeline_mode<synchronous>, transform_indices = @transform_15, window_bounds = array<i64: 32, 32>}, {pipeline_mode = #tpu.pipeline_mode<synchronous>, transform_indices = @transform_16, window_bounds = array<i64: 1, 32>}, {pipeline_mode = #tpu.pipeline_mode<synchronous>, transform_indices = @transform_17, window_bounds = array<i64: 32, 32>}, {pipeline_mode = #tpu.pipeline_mode<synchronous>, transform_indices = @transform_18, window_bounds = array<i64: 1, 32>}, {pipeline_mode = #tpu.pipeline_mode<synchronous>, transform_indices = @transform_19, window_bounds = array<i64: 32, 32>}, {pipeline_mode = #tpu.pipeline_mode<synchronous>, transform_indices = @transform_20, window_bounds = array<i64: 1, 32>}, {pipeline_mode = #tpu.pipeline_mode<synchronous>, transform_indices = @transform_21, window_bounds = array<i64: 32, 32>}, {pipeline_mode = #tpu.pipeline_mode<synchronous>, transform_indices = @transform_22, window_bounds = array<i64: 1, 32>}, {pipeline_mode = #tpu.pipeline_mode<synchronous>, transform_indices = @transform_23, window_bounds = array<i64: 32, 64>}, {pipeline_mode = #tpu.pipeline_mode<synchronous>, transform_indices = @transform_24, window_bounds = array<i64: 32, 64>}, {pipeline_mode = #tpu.pipeline_mode<synchronous>, transform_indices = @transform_25, window_bounds = array<i64: 1, 64>}, {pipeline_mode = #tpu.pipeline_mode<synchronous>, transform_indices = @transform_26, window_bounds = array<i64: 64, 32>}, {pipeline_mode = #tpu.pipeline_mode<synchronous>, transform_indices = @transform_27, window_bounds = array<i64: 1, 32>}, {pipeline_mode = #tpu.pipeline_mode<synchronous>, transform_indices = @transform_28, window_bounds = array<i64: 1, 32>}, {pipeline_mode = #tpu.pipeline_mode<synchronous>, transform_indices = @transform_29, window_bounds = array<i64: 1, 32>}, {pipeline_mode = #tpu.pipeline_mode<synchronous>, transform_indices = @transform_30, window_bounds = array<i64: 1, 32>}, {pipeline_mode = #tpu.pipeline_mode<synchronous>, transform_indices = @transform_31, window_bounds = array<i64: 1, 32>}, {pipeline_mode = #tpu.pipeline_mode<synchronous>, transform_indices = @transform_32, window_bounds = array<i64: 32, 64>}, {pipeline_mode = #tpu.pipeline_mode<synchronous>, transform_indices = @transform_33, window_bounds = array<i64: 32, 64>}, {pipeline_mode = #tpu.pipeline_mode<synchronous>, transform_indices = @transform_34, window_bounds = array<i64: 1, 64>}, {pipeline_mode = #tpu.pipeline_mode<synchronous>, transform_indices = @transform_35, window_bounds = array<i64: 1, 64>}, {pipeline_mode = #tpu.pipeline_mode<synchronous>, transform_indices = @transform_36, window_bounds = array<i64: 1, 64>}, {pipeline_mode = #tpu.pipeline_mode<synchronous>, transform_indices = @transform_37, window_bounds = array<i64: 64, 1>}, {pipeline_mode = #tpu.pipeline_mode<synchronous>, transform_indices = @transform_38, window_bounds = array<i64: 1, 1>}, {pipeline_mode = #tpu.pipeline_mode<synchronous>, transform_indices = @transform_39, window_bounds = array<i64: 32, 1>}, {pipeline_mode = #tpu.pipeline_mode<synchronous>, transform_indices = @transform_40, window_bounds = array<i64: 32, 1>}, {pipeline_mode = #tpu.pipeline_mode<synchronous>, transform_indices = @transform_41, window_bounds = array<i64: 1, 1>}, {transform_indices = @transform_42, window_bounds = array<i64: 1, 8, 32>}, {transform_indices = @transform_43, window_bounds = array<i64: 1, 8, 32>}, {transform_indices = @transform_44, window_bounds = array<i64: 1, 8, 1>}]} {
    %c0 = arith.constant 0 : index
    %c0_0 = arith.constant 0 : index
    %0 = vector.load %arg3[%c0, %c0_0] : memref<32x32xf32, #tpu.memory_space<vmem>>, vector<32x32xf32>
    %c0_1 = arith.constant 0 : index
    %c0_2 = arith.constant 0 : index
    %1 = vector.load %arg4[%c0_1, %c0_2] : memref<1x32xf32, #tpu.memory_space<vmem>>, vector<1x32xf32>
    %c0_3 = arith.constant 0 : index
    %c0_4 = arith.constant 0 : index
    %2 = vector.load %arg5[%c0_3, %c0_4] : memref<32x32xf32, #tpu.memory_space<vmem>>, vector<32x32xf32>
    %c0_5 = arith.constant 0 : index
    %c0_6 = arith.constant 0 : index
    %3 = vector.load %arg6[%c0_5, %c0_6] : memref<1x32xf32, #tpu.memory_space<vmem>>, vector<1x32xf32>
    %c0_7 = arith.constant 0 : index
    %c0_8 = arith.constant 0 : index
    %4 = vector.load %arg7[%c0_7, %c0_8] : memref<32x32xf32, #tpu.memory_space<vmem>>, vector<32x32xf32>
    %c0_9 = arith.constant 0 : index
    %c0_10 = arith.constant 0 : index
    %5 = vector.load %arg8[%c0_9, %c0_10] : memref<1x32xf32, #tpu.memory_space<vmem>>, vector<1x32xf32>
    %c0_11 = arith.constant 0 : index
    %c0_12 = arith.constant 0 : index
    %6 = vector.load %arg9[%c0_11, %c0_12] : memref<32x32xf32, #tpu.memory_space<vmem>>, vector<32x32xf32>
    %c0_13 = arith.constant 0 : index
    %c0_14 = arith.constant 0 : index
    %7 = vector.load %arg10[%c0_13, %c0_14] : memref<1x32xf32, #tpu.memory_space<vmem>>, vector<1x32xf32>
    %c0_15 = arith.constant 0 : index
    %c0_16 = arith.constant 0 : index
    %8 = vector.load %arg11[%c0_15, %c0_16] : memref<32x64xf32, #tpu.memory_space<vmem>>, vector<32x64xf32>
    %c0_17 = arith.constant 0 : index
    %c0_18 = arith.constant 0 : index
    %9 = vector.load %arg12[%c0_17, %c0_18] : memref<32x64xf32, #tpu.memory_space<vmem>>, vector<32x64xf32>
    %c0_19 = arith.constant 0 : index
    %c0_20 = arith.constant 0 : index
    %10 = vector.load %arg13[%c0_19, %c0_20] : memref<1x64xf32, #tpu.memory_space<vmem>>, vector<1x64xf32>
    %c0_21 = arith.constant 0 : index
    %c0_22 = arith.constant 0 : index
    %11 = vector.load %arg14[%c0_21, %c0_22] : memref<64x32xf32, #tpu.memory_space<vmem>>, vector<64x32xf32>
    %c0_23 = arith.constant 0 : index
    %c0_24 = arith.constant 0 : index
    %12 = vector.load %arg15[%c0_23, %c0_24] : memref<1x32xf32, #tpu.memory_space<vmem>>, vector<1x32xf32>
    %c0_25 = arith.constant 0 : index
    %c0_26 = arith.constant 0 : index
    %13 = vector.load %arg16[%c0_25, %c0_26] : memref<32x32xf32, #tpu.memory_space<vmem>>, vector<32x32xf32>
    %c0_27 = arith.constant 0 : index
    %c0_28 = arith.constant 0 : index
    %14 = vector.load %arg17[%c0_27, %c0_28] : memref<1x32xf32, #tpu.memory_space<vmem>>, vector<1x32xf32>
    %c0_29 = arith.constant 0 : index
    %c0_30 = arith.constant 0 : index
    %15 = vector.load %arg18[%c0_29, %c0_30] : memref<32x32xf32, #tpu.memory_space<vmem>>, vector<32x32xf32>
    %c0_31 = arith.constant 0 : index
    %c0_32 = arith.constant 0 : index
    %16 = vector.load %arg19[%c0_31, %c0_32] : memref<1x32xf32, #tpu.memory_space<vmem>>, vector<1x32xf32>
    %c0_33 = arith.constant 0 : index
    %c0_34 = arith.constant 0 : index
    %17 = vector.load %arg20[%c0_33, %c0_34] : memref<32x32xf32, #tpu.memory_space<vmem>>, vector<32x32xf32>
    %c0_35 = arith.constant 0 : index
    %c0_36 = arith.constant 0 : index
    %18 = vector.load %arg21[%c0_35, %c0_36] : memref<1x32xf32, #tpu.memory_space<vmem>>, vector<1x32xf32>
    %c0_37 = arith.constant 0 : index
    %c0_38 = arith.constant 0 : index
    %19 = vector.load %arg22[%c0_37, %c0_38] : memref<32x32xf32, #tpu.memory_space<vmem>>, vector<32x32xf32>
    %c0_39 = arith.constant 0 : index
    %c0_40 = arith.constant 0 : index
    %20 = vector.load %arg23[%c0_39, %c0_40] : memref<1x32xf32, #tpu.memory_space<vmem>>, vector<1x32xf32>
    %c0_41 = arith.constant 0 : index
    %c0_42 = arith.constant 0 : index
    %21 = vector.load %arg24[%c0_41, %c0_42] : memref<32x64xf32, #tpu.memory_space<vmem>>, vector<32x64xf32>
    %c0_43 = arith.constant 0 : index
    %c0_44 = arith.constant 0 : index
    %22 = vector.load %arg25[%c0_43, %c0_44] : memref<32x64xf32, #tpu.memory_space<vmem>>, vector<32x64xf32>
    %c0_45 = arith.constant 0 : index
    %c0_46 = arith.constant 0 : index
    %23 = vector.load %arg26[%c0_45, %c0_46] : memref<1x64xf32, #tpu.memory_space<vmem>>, vector<1x64xf32>
    %c0_47 = arith.constant 0 : index
    %c0_48 = arith.constant 0 : index
    %24 = vector.load %arg27[%c0_47, %c0_48] : memref<64x32xf32, #tpu.memory_space<vmem>>, vector<64x32xf32>
    %c0_49 = arith.constant 0 : index
    %c0_50 = arith.constant 0 : index
    %25 = vector.load %arg28[%c0_49, %c0_50] : memref<1x32xf32, #tpu.memory_space<vmem>>, vector<1x32xf32>
    %c0_51 = arith.constant 0 : index
    %c0_52 = arith.constant 0 : index
    %26 = vector.load %arg29[%c0_51, %c0_52] : memref<1x32xf32, #tpu.memory_space<vmem>>, vector<1x32xf32>
    %c0_53 = arith.constant 0 : index
    %c0_54 = arith.constant 0 : index
    %27 = vector.load %arg30[%c0_53, %c0_54] : memref<1x32xf32, #tpu.memory_space<vmem>>, vector<1x32xf32>
    %c0_55 = arith.constant 0 : index
    %c0_56 = arith.constant 0 : index
    %28 = vector.load %arg31[%c0_55, %c0_56] : memref<1x32xf32, #tpu.memory_space<vmem>>, vector<1x32xf32>
    %c0_57 = arith.constant 0 : index
    %c0_58 = arith.constant 0 : index
    %29 = vector.load %arg32[%c0_57, %c0_58] : memref<1x32xf32, #tpu.memory_space<vmem>>, vector<1x32xf32>
    %c0_59 = arith.constant 0 : index
    %c0_60 = arith.constant 0 : index
    %30 = vector.load %arg33[%c0_59, %c0_60] : memref<32x64xf32, #tpu.memory_space<vmem>>, vector<32x64xf32>
    %c0_61 = arith.constant 0 : index
    %c0_62 = arith.constant 0 : index
    %31 = vector.load %arg34[%c0_61, %c0_62] : memref<32x64xf32, #tpu.memory_space<vmem>>, vector<32x64xf32>
    %c0_63 = arith.constant 0 : index
    %c0_64 = arith.constant 0 : index
    %32 = vector.load %arg35[%c0_63, %c0_64] : memref<1x64xf32, #tpu.memory_space<vmem>>, vector<1x64xf32>
    %c0_65 = arith.constant 0 : index
    %c0_66 = arith.constant 0 : index
    %33 = vector.load %arg36[%c0_65, %c0_66] : memref<1x64xf32, #tpu.memory_space<vmem>>, vector<1x64xf32>
    %c0_67 = arith.constant 0 : index
    %c0_68 = arith.constant 0 : index
    %34 = vector.load %arg37[%c0_67, %c0_68] : memref<1x64xf32, #tpu.memory_space<vmem>>, vector<1x64xf32>
    %c0_69 = arith.constant 0 : index
    %c0_70 = arith.constant 0 : index
    %35 = vector.load %arg38[%c0_69, %c0_70] : memref<64x1xf32, #tpu.memory_space<vmem>>, vector<64x1xf32>
    %c0_71 = arith.constant 0 : index
    %c0_72 = arith.constant 0 : index
    %36 = vector.load %arg39[%c0_71, %c0_72] : memref<1x1xf32, #tpu.memory_space<vmem>>, vector<1x1xf32>
    %c0_73 = arith.constant 0 : index
    %c0_74 = arith.constant 0 : index
    %37 = vector.load %arg40[%c0_73, %c0_74] : memref<32x1xf32, #tpu.memory_space<vmem>>, vector<32x1xf32>
    %c0_75 = arith.constant 0 : index
    %c0_76 = arith.constant 0 : index
    %38 = vector.load %arg41[%c0_75, %c0_76] : memref<32x1xf32, #tpu.memory_space<vmem>>, vector<32x1xf32>
    %c0_77 = arith.constant 0 : index
    %c0_78 = arith.constant 0 : index
    %39 = vector.load %arg42[%c0_77, %c0_78] : memref<1x1xf32, #tpu.memory_space<vmem>>, vector<1x1xf32>
    %c0_79 = arith.constant 0 : index
    %c0_80 = arith.constant 0 : index
    %c0_81 = arith.constant 0 : index
    %40 = vector.load %arg1[%c0_79, %c0_80, %c0_81] : memref<1x8x32xf32, #tpu.memory_space<vmem>>, vector<1x8x32xf32>
    %41 = vector.shape_cast %40 : vector<1x8x32xf32> to vector<8x32xf32>
    %c0_82 = arith.constant 0 : index
    %c0_83 = arith.constant 0 : index
    %c0_84 = arith.constant 0 : index
    %42 = vector.load %arg2[%c0_82, %c0_83, %c0_84] : memref<1x8x32xf32, #tpu.memory_space<vmem>>, vector<1x8x32xf32>
    %43 = vector.shape_cast %42 : vector<1x8x32xf32> to vector<8x32xf32>
    %cst = arith.constant dense<0.000000e+00> : vector<8x32xf32>
    %44 = tpu.matmul %41, %0, %cst {dimension_numbers = #tpu.dot_dimension_numbers<[1], [0], [0], [1], [0, 0, 1, 1], [], []>} : vector<8x32xf32>, vector<32x32xf32>, vector<8x32xf32> -> vector<8x32xf32>
    %45 = vector.broadcast %1 : vector<1x32xf32> to vector<8x32xf32>
    %46 = arith.addf %44, %45 : vector<8x32xf32>
    %cst_85 = arith.constant dense<0.000000e+00> : vector<8x32xf32>
    %47 = tpu.matmul %43, %2, %cst_85 {dimension_numbers = #tpu.dot_dimension_numbers<[1], [0], [0], [1], [0, 0, 1, 1], [], []>} : vector<8x32xf32>, vector<32x32xf32>, vector<8x32xf32> -> vector<8x32xf32>
    %48 = vector.broadcast %3 : vector<1x32xf32> to vector<8x32xf32>
    %49 = arith.addf %47, %48 : vector<8x32xf32>
    %cst_86 = arith.constant dense<0.000000e+00> : vector<8x32xf32>
    %50 = tpu.matmul %43, %4, %cst_86 {dimension_numbers = #tpu.dot_dimension_numbers<[1], [0], [0], [1], [0, 0, 1, 1], [], []>} : vector<8x32xf32>, vector<32x32xf32>, vector<8x32xf32> -> vector<8x32xf32>
    %51 = vector.broadcast %5 : vector<1x32xf32> to vector<8x32xf32>
    %52 = arith.addf %50, %51 : vector<8x32xf32>
    %53 = vector.extract_strided_slice %46 {offsets = [0, 0], sizes = [8, 8], strides = [1, 1]} : vector<8x32xf32> to vector<8x8xf32>
    %54 = vector.extract_strided_slice %49 {offsets = [0, 0], sizes = [8, 8], strides = [1, 1]} : vector<8x32xf32> to vector<8x8xf32>
    %55 = vector.extract_strided_slice %52 {offsets = [0, 0], sizes = [8, 8], strides = [1, 1]} : vector<8x32xf32> to vector<8x8xf32>
    %cst_87 = arith.constant dense<0.000000e+00> : vector<8x8xf32>
    %56 = tpu.matmul %53, %54, %cst_87 {dimension_numbers = #tpu.dot_dimension_numbers<[1], [1], [0], [0], [0, 0, 1, 0], [], []>} : vector<8x8xf32>, vector<8x8xf32>, vector<8x8xf32> -> vector<8x8xf32>
    %cst_88 = arith.constant 0.353553385 : f32
    %57 = vector.broadcast %cst_88 : f32 to vector<8x8xf32>
    %58 = arith.mulf %56, %57 : vector<8x8xf32>
    %cst_89 = arith.constant dense<0xFF800000> : vector<8xf32>
    %59 = vector.multi_reduction <maximumf>, %58, %cst_89 [1] : vector<8x8xf32> to vector<8xf32>
    %60 = vector.shape_cast %59 : vector<8xf32> to vector<8x1xf32>
    %61 = vector.broadcast %60 : vector<8x1xf32> to vector<8x8xf32>
    %62 = arith.subf %58, %61 : vector<8x8xf32>
    %63 = math.exp %62 : vector<8x8xf32>
    %cst_90 = arith.constant dense<0.000000e+00> : vector<8xf32>
    %64 = vector.multi_reduction <add>, %63, %cst_90 [1] : vector<8x8xf32> to vector<8xf32>
    %65 = vector.shape_cast %64 : vector<8xf32> to vector<8x1xf32>
    %66 = tpu.reciprocal %65 {approx = true} : vector<8x1xf32> -> vector<8x1xf32>
    %67 = vector.broadcast %66 : vector<8x1xf32> to vector<8x8xf32>
    %68 = arith.mulf %63, %67 : vector<8x8xf32>
    %cst_91 = arith.constant dense<0.000000e+00> : vector<8x8xf32>
    %69 = tpu.matmul %68, %55, %cst_91 {dimension_numbers = #tpu.dot_dimension_numbers<[1], [0], [0], [1], [0, 0, 1, 1], [], []>} : vector<8x8xf32>, vector<8x8xf32>, vector<8x8xf32> -> vector<8x8xf32>
    %70 = vector.extract_strided_slice %46 {offsets = [0, 8], sizes = [8, 8], strides = [1, 1]} : vector<8x32xf32> to vector<8x8xf32>
    %71 = vector.extract_strided_slice %49 {offsets = [0, 8], sizes = [8, 8], strides = [1, 1]} : vector<8x32xf32> to vector<8x8xf32>
    %72 = vector.extract_strided_slice %52 {offsets = [0, 8], sizes = [8, 8], strides = [1, 1]} : vector<8x32xf32> to vector<8x8xf32>
    %cst_92 = arith.constant dense<0.000000e+00> : vector<8x8xf32>
    %73 = tpu.matmul %70, %71, %cst_92 {dimension_numbers = #tpu.dot_dimension_numbers<[1], [1], [0], [0], [0, 0, 1, 0], [], []>} : vector<8x8xf32>, vector<8x8xf32>, vector<8x8xf32> -> vector<8x8xf32>
    %cst_93 = arith.constant 0.353553385 : f32
    %74 = vector.broadcast %cst_93 : f32 to vector<8x8xf32>
    %75 = arith.mulf %73, %74 : vector<8x8xf32>
    %cst_94 = arith.constant dense<0xFF800000> : vector<8xf32>
    %76 = vector.multi_reduction <maximumf>, %75, %cst_94 [1] : vector<8x8xf32> to vector<8xf32>
    %77 = vector.shape_cast %76 : vector<8xf32> to vector<8x1xf32>
    %78 = vector.broadcast %77 : vector<8x1xf32> to vector<8x8xf32>
    %79 = arith.subf %75, %78 : vector<8x8xf32>
    %80 = math.exp %79 : vector<8x8xf32>
    %cst_95 = arith.constant dense<0.000000e+00> : vector<8xf32>
    %81 = vector.multi_reduction <add>, %80, %cst_95 [1] : vector<8x8xf32> to vector<8xf32>
    %82 = vector.shape_cast %81 : vector<8xf32> to vector<8x1xf32>
    %83 = tpu.reciprocal %82 {approx = true} : vector<8x1xf32> -> vector<8x1xf32>
    %84 = vector.broadcast %83 : vector<8x1xf32> to vector<8x8xf32>
    %85 = arith.mulf %80, %84 : vector<8x8xf32>
    %cst_96 = arith.constant dense<0.000000e+00> : vector<8x8xf32>
    %86 = tpu.matmul %85, %72, %cst_96 {dimension_numbers = #tpu.dot_dimension_numbers<[1], [0], [0], [1], [0, 0, 1, 1], [], []>} : vector<8x8xf32>, vector<8x8xf32>, vector<8x8xf32> -> vector<8x8xf32>
    %87 = vector.extract_strided_slice %46 {offsets = [0, 16], sizes = [8, 8], strides = [1, 1]} : vector<8x32xf32> to vector<8x8xf32>
    %88 = vector.extract_strided_slice %49 {offsets = [0, 16], sizes = [8, 8], strides = [1, 1]} : vector<8x32xf32> to vector<8x8xf32>
    %89 = vector.extract_strided_slice %52 {offsets = [0, 16], sizes = [8, 8], strides = [1, 1]} : vector<8x32xf32> to vector<8x8xf32>
    %cst_97 = arith.constant dense<0.000000e+00> : vector<8x8xf32>
    %90 = tpu.matmul %87, %88, %cst_97 {dimension_numbers = #tpu.dot_dimension_numbers<[1], [1], [0], [0], [0, 0, 1, 0], [], []>} : vector<8x8xf32>, vector<8x8xf32>, vector<8x8xf32> -> vector<8x8xf32>
    %cst_98 = arith.constant 0.353553385 : f32
    %91 = vector.broadcast %cst_98 : f32 to vector<8x8xf32>
    %92 = arith.mulf %90, %91 : vector<8x8xf32>
    %cst_99 = arith.constant dense<0xFF800000> : vector<8xf32>
    %93 = vector.multi_reduction <maximumf>, %92, %cst_99 [1] : vector<8x8xf32> to vector<8xf32>
    %94 = vector.shape_cast %93 : vector<8xf32> to vector<8x1xf32>
    %95 = vector.broadcast %94 : vector<8x1xf32> to vector<8x8xf32>
    %96 = arith.subf %92, %95 : vector<8x8xf32>
    %97 = math.exp %96 : vector<8x8xf32>
    %cst_100 = arith.constant dense<0.000000e+00> : vector<8xf32>
    %98 = vector.multi_reduction <add>, %97, %cst_100 [1] : vector<8x8xf32> to vector<8xf32>
    %99 = vector.shape_cast %98 : vector<8xf32> to vector<8x1xf32>
    %100 = tpu.reciprocal %99 {approx = true} : vector<8x1xf32> -> vector<8x1xf32>
    %101 = vector.broadcast %100 : vector<8x1xf32> to vector<8x8xf32>
    %102 = arith.mulf %97, %101 : vector<8x8xf32>
    %cst_101 = arith.constant dense<0.000000e+00> : vector<8x8xf32>
    %103 = tpu.matmul %102, %89, %cst_101 {dimension_numbers = #tpu.dot_dimension_numbers<[1], [0], [0], [1], [0, 0, 1, 1], [], []>} : vector<8x8xf32>, vector<8x8xf32>, vector<8x8xf32> -> vector<8x8xf32>
    %104 = vector.extract_strided_slice %46 {offsets = [0, 24], sizes = [8, 8], strides = [1, 1]} : vector<8x32xf32> to vector<8x8xf32>
    %105 = vector.extract_strided_slice %49 {offsets = [0, 24], sizes = [8, 8], strides = [1, 1]} : vector<8x32xf32> to vector<8x8xf32>
    %106 = vector.extract_strided_slice %52 {offsets = [0, 24], sizes = [8, 8], strides = [1, 1]} : vector<8x32xf32> to vector<8x8xf32>
    %cst_102 = arith.constant dense<0.000000e+00> : vector<8x8xf32>
    %107 = tpu.matmul %104, %105, %cst_102 {dimension_numbers = #tpu.dot_dimension_numbers<[1], [1], [0], [0], [0, 0, 1, 0], [], []>} : vector<8x8xf32>, vector<8x8xf32>, vector<8x8xf32> -> vector<8x8xf32>
    %cst_103 = arith.constant 0.353553385 : f32
    %108 = vector.broadcast %cst_103 : f32 to vector<8x8xf32>
    %109 = arith.mulf %107, %108 : vector<8x8xf32>
    %cst_104 = arith.constant dense<0xFF800000> : vector<8xf32>
    %110 = vector.multi_reduction <maximumf>, %109, %cst_104 [1] : vector<8x8xf32> to vector<8xf32>
    %111 = vector.shape_cast %110 : vector<8xf32> to vector<8x1xf32>
    %112 = vector.broadcast %111 : vector<8x1xf32> to vector<8x8xf32>
    %113 = arith.subf %109, %112 : vector<8x8xf32>
    %114 = math.exp %113 : vector<8x8xf32>
    %cst_105 = arith.constant dense<0.000000e+00> : vector<8xf32>
    %115 = vector.multi_reduction <add>, %114, %cst_105 [1] : vector<8x8xf32> to vector<8xf32>
    %116 = vector.shape_cast %115 : vector<8xf32> to vector<8x1xf32>
    %117 = tpu.reciprocal %116 {approx = true} : vector<8x1xf32> -> vector<8x1xf32>
    %118 = vector.broadcast %117 : vector<8x1xf32> to vector<8x8xf32>
    %119 = arith.mulf %114, %118 : vector<8x8xf32>
    %cst_106 = arith.constant dense<0.000000e+00> : vector<8x8xf32>
    %120 = tpu.matmul %119, %106, %cst_106 {dimension_numbers = #tpu.dot_dimension_numbers<[1], [0], [0], [1], [0, 0, 1, 1], [], []>} : vector<8x8xf32>, vector<8x8xf32>, vector<8x8xf32> -> vector<8x8xf32>
    %121 = tpu.concatenate %69, %86, %103, %120 in 1 : vector<8x8xf32>, vector<8x8xf32>, vector<8x8xf32>, vector<8x8xf32> -> vector<8x32xf32>
    %cst_107 = arith.constant dense<0.000000e+00> : vector<8x32xf32>
    %122 = tpu.matmul %121, %6, %cst_107 {dimension_numbers = #tpu.dot_dimension_numbers<[1], [0], [0], [1], [0, 0, 1, 1], [], []>} : vector<8x32xf32>, vector<32x32xf32>, vector<8x32xf32> -> vector<8x32xf32>
    %123 = vector.broadcast %7 : vector<1x32xf32> to vector<8x32xf32>
    %124 = arith.addf %122, %123 : vector<8x32xf32>
    %cst_108 = arith.constant dense<0.000000e+00> : vector<8x64xf32>
    %125 = tpu.matmul %41, %8, %cst_108 {dimension_numbers = #tpu.dot_dimension_numbers<[1], [0], [0], [1], [0, 0, 1, 1], [], []>} : vector<8x32xf32>, vector<32x64xf32>, vector<8x64xf32> -> vector<8x64xf32>
    %cst_109 = arith.constant dense<0.000000e+00> : vector<8x64xf32>
    %126 = tpu.matmul %124, %9, %cst_109 {dimension_numbers = #tpu.dot_dimension_numbers<[1], [0], [0], [1], [0, 0, 1, 1], [], []>} : vector<8x32xf32>, vector<32x64xf32>, vector<8x64xf32> -> vector<8x64xf32>
    %127 = arith.addf %125, %126 : vector<8x64xf32>
    %128 = vector.broadcast %10 : vector<1x64xf32> to vector<8x64xf32>
    %129 = arith.addf %127, %128 : vector<8x64xf32>
    %cst_110 = arith.constant 0.000000e+00 : f32
    %130 = vector.broadcast %cst_110 : f32 to vector<8x64xf32>
    %131 = arith.maximumf %129, %130 : vector<8x64xf32>
    %cst_111 = arith.constant dense<0.000000e+00> : vector<8x32xf32>
    %132 = tpu.matmul %131, %11, %cst_111 {dimension_numbers = #tpu.dot_dimension_numbers<[1], [0], [0], [1], [0, 0, 1, 1], [], []>} : vector<8x64xf32>, vector<64x32xf32>, vector<8x32xf32> -> vector<8x32xf32>
    %133 = vector.broadcast %12 : vector<1x32xf32> to vector<8x32xf32>
    %134 = arith.addf %132, %133 : vector<8x32xf32>
    %135 = arith.addf %41, %134 : vector<8x32xf32>
    %cst_112 = arith.constant dense<0.000000e+00> : vector<8x32xf32>
    %136 = tpu.matmul %43, %0, %cst_112 {dimension_numbers = #tpu.dot_dimension_numbers<[1], [0], [0], [1], [0, 0, 1, 1], [], []>} : vector<8x32xf32>, vector<32x32xf32>, vector<8x32xf32> -> vector<8x32xf32>
    %137 = vector.broadcast %1 : vector<1x32xf32> to vector<8x32xf32>
    %138 = arith.addf %136, %137 : vector<8x32xf32>
    %cst_113 = arith.constant dense<0.000000e+00> : vector<8x32xf32>
    %139 = tpu.matmul %41, %2, %cst_113 {dimension_numbers = #tpu.dot_dimension_numbers<[1], [0], [0], [1], [0, 0, 1, 1], [], []>} : vector<8x32xf32>, vector<32x32xf32>, vector<8x32xf32> -> vector<8x32xf32>
    %140 = vector.broadcast %3 : vector<1x32xf32> to vector<8x32xf32>
    %141 = arith.addf %139, %140 : vector<8x32xf32>
    %cst_114 = arith.constant dense<0.000000e+00> : vector<8x32xf32>
    %142 = tpu.matmul %41, %4, %cst_114 {dimension_numbers = #tpu.dot_dimension_numbers<[1], [0], [0], [1], [0, 0, 1, 1], [], []>} : vector<8x32xf32>, vector<32x32xf32>, vector<8x32xf32> -> vector<8x32xf32>
    %143 = vector.broadcast %5 : vector<1x32xf32> to vector<8x32xf32>
    %144 = arith.addf %142, %143 : vector<8x32xf32>
    %145 = vector.extract_strided_slice %138 {offsets = [0, 0], sizes = [8, 8], strides = [1, 1]} : vector<8x32xf32> to vector<8x8xf32>
    %146 = vector.extract_strided_slice %141 {offsets = [0, 0], sizes = [8, 8], strides = [1, 1]} : vector<8x32xf32> to vector<8x8xf32>
    %147 = vector.extract_strided_slice %144 {offsets = [0, 0], sizes = [8, 8], strides = [1, 1]} : vector<8x32xf32> to vector<8x8xf32>
    %cst_115 = arith.constant dense<0.000000e+00> : vector<8x8xf32>
    %148 = tpu.matmul %145, %146, %cst_115 {dimension_numbers = #tpu.dot_dimension_numbers<[1], [1], [0], [0], [0, 0, 1, 0], [], []>} : vector<8x8xf32>, vector<8x8xf32>, vector<8x8xf32> -> vector<8x8xf32>
    %cst_116 = arith.constant 0.353553385 : f32
    %149 = vector.broadcast %cst_116 : f32 to vector<8x8xf32>
    %150 = arith.mulf %148, %149 : vector<8x8xf32>
    %cst_117 = arith.constant dense<0xFF800000> : vector<8xf32>
    %151 = vector.multi_reduction <maximumf>, %150, %cst_117 [1] : vector<8x8xf32> to vector<8xf32>
    %152 = vector.shape_cast %151 : vector<8xf32> to vector<8x1xf32>
    %153 = vector.broadcast %152 : vector<8x1xf32> to vector<8x8xf32>
    %154 = arith.subf %150, %153 : vector<8x8xf32>
    %155 = math.exp %154 : vector<8x8xf32>
    %cst_118 = arith.constant dense<0.000000e+00> : vector<8xf32>
    %156 = vector.multi_reduction <add>, %155, %cst_118 [1] : vector<8x8xf32> to vector<8xf32>
    %157 = vector.shape_cast %156 : vector<8xf32> to vector<8x1xf32>
    %158 = tpu.reciprocal %157 {approx = true} : vector<8x1xf32> -> vector<8x1xf32>
    %159 = vector.broadcast %158 : vector<8x1xf32> to vector<8x8xf32>
    %160 = arith.mulf %155, %159 : vector<8x8xf32>
    %cst_119 = arith.constant dense<0.000000e+00> : vector<8x8xf32>
    %161 = tpu.matmul %160, %147, %cst_119 {dimension_numbers = #tpu.dot_dimension_numbers<[1], [0], [0], [1], [0, 0, 1, 1], [], []>} : vector<8x8xf32>, vector<8x8xf32>, vector<8x8xf32> -> vector<8x8xf32>
    %162 = vector.extract_strided_slice %138 {offsets = [0, 8], sizes = [8, 8], strides = [1, 1]} : vector<8x32xf32> to vector<8x8xf32>
    %163 = vector.extract_strided_slice %141 {offsets = [0, 8], sizes = [8, 8], strides = [1, 1]} : vector<8x32xf32> to vector<8x8xf32>
    %164 = vector.extract_strided_slice %144 {offsets = [0, 8], sizes = [8, 8], strides = [1, 1]} : vector<8x32xf32> to vector<8x8xf32>
    %cst_120 = arith.constant dense<0.000000e+00> : vector<8x8xf32>
    %165 = tpu.matmul %162, %163, %cst_120 {dimension_numbers = #tpu.dot_dimension_numbers<[1], [1], [0], [0], [0, 0, 1, 0], [], []>} : vector<8x8xf32>, vector<8x8xf32>, vector<8x8xf32> -> vector<8x8xf32>
    %cst_121 = arith.constant 0.353553385 : f32
    %166 = vector.broadcast %cst_121 : f32 to vector<8x8xf32>
    %167 = arith.mulf %165, %166 : vector<8x8xf32>
    %cst_122 = arith.constant dense<0xFF800000> : vector<8xf32>
    %168 = vector.multi_reduction <maximumf>, %167, %cst_122 [1] : vector<8x8xf32> to vector<8xf32>
    %169 = vector.shape_cast %168 : vector<8xf32> to vector<8x1xf32>
    %170 = vector.broadcast %169 : vector<8x1xf32> to vector<8x8xf32>
    %171 = arith.subf %167, %170 : vector<8x8xf32>
    %172 = math.exp %171 : vector<8x8xf32>
    %cst_123 = arith.constant dense<0.000000e+00> : vector<8xf32>
    %173 = vector.multi_reduction <add>, %172, %cst_123 [1] : vector<8x8xf32> to vector<8xf32>
    %174 = vector.shape_cast %173 : vector<8xf32> to vector<8x1xf32>
    %175 = tpu.reciprocal %174 {approx = true} : vector<8x1xf32> -> vector<8x1xf32>
    %176 = vector.broadcast %175 : vector<8x1xf32> to vector<8x8xf32>
    %177 = arith.mulf %172, %176 : vector<8x8xf32>
    %cst_124 = arith.constant dense<0.000000e+00> : vector<8x8xf32>
    %178 = tpu.matmul %177, %164, %cst_124 {dimension_numbers = #tpu.dot_dimension_numbers<[1], [0], [0], [1], [0, 0, 1, 1], [], []>} : vector<8x8xf32>, vector<8x8xf32>, vector<8x8xf32> -> vector<8x8xf32>
    %179 = vector.extract_strided_slice %138 {offsets = [0, 16], sizes = [8, 8], strides = [1, 1]} : vector<8x32xf32> to vector<8x8xf32>
    %180 = vector.extract_strided_slice %141 {offsets = [0, 16], sizes = [8, 8], strides = [1, 1]} : vector<8x32xf32> to vector<8x8xf32>
    %181 = vector.extract_strided_slice %144 {offsets = [0, 16], sizes = [8, 8], strides = [1, 1]} : vector<8x32xf32> to vector<8x8xf32>
    %cst_125 = arith.constant dense<0.000000e+00> : vector<8x8xf32>
    %182 = tpu.matmul %179, %180, %cst_125 {dimension_numbers = #tpu.dot_dimension_numbers<[1], [1], [0], [0], [0, 0, 1, 0], [], []>} : vector<8x8xf32>, vector<8x8xf32>, vector<8x8xf32> -> vector<8x8xf32>
    %cst_126 = arith.constant 0.353553385 : f32
    %183 = vector.broadcast %cst_126 : f32 to vector<8x8xf32>
    %184 = arith.mulf %182, %183 : vector<8x8xf32>
    %cst_127 = arith.constant dense<0xFF800000> : vector<8xf32>
    %185 = vector.multi_reduction <maximumf>, %184, %cst_127 [1] : vector<8x8xf32> to vector<8xf32>
    %186 = vector.shape_cast %185 : vector<8xf32> to vector<8x1xf32>
    %187 = vector.broadcast %186 : vector<8x1xf32> to vector<8x8xf32>
    %188 = arith.subf %184, %187 : vector<8x8xf32>
    %189 = math.exp %188 : vector<8x8xf32>
    %cst_128 = arith.constant dense<0.000000e+00> : vector<8xf32>
    %190 = vector.multi_reduction <add>, %189, %cst_128 [1] : vector<8x8xf32> to vector<8xf32>
    %191 = vector.shape_cast %190 : vector<8xf32> to vector<8x1xf32>
    %192 = tpu.reciprocal %191 {approx = true} : vector<8x1xf32> -> vector<8x1xf32>
    %193 = vector.broadcast %192 : vector<8x1xf32> to vector<8x8xf32>
    %194 = arith.mulf %189, %193 : vector<8x8xf32>
    %cst_129 = arith.constant dense<0.000000e+00> : vector<8x8xf32>
    %195 = tpu.matmul %194, %181, %cst_129 {dimension_numbers = #tpu.dot_dimension_numbers<[1], [0], [0], [1], [0, 0, 1, 1], [], []>} : vector<8x8xf32>, vector<8x8xf32>, vector<8x8xf32> -> vector<8x8xf32>
    %196 = vector.extract_strided_slice %138 {offsets = [0, 24], sizes = [8, 8], strides = [1, 1]} : vector<8x32xf32> to vector<8x8xf32>
    %197 = vector.extract_strided_slice %141 {offsets = [0, 24], sizes = [8, 8], strides = [1, 1]} : vector<8x32xf32> to vector<8x8xf32>
    %198 = vector.extract_strided_slice %144 {offsets = [0, 24], sizes = [8, 8], strides = [1, 1]} : vector<8x32xf32> to vector<8x8xf32>
    %cst_130 = arith.constant dense<0.000000e+00> : vector<8x8xf32>
    %199 = tpu.matmul %196, %197, %cst_130 {dimension_numbers = #tpu.dot_dimension_numbers<[1], [1], [0], [0], [0, 0, 1, 0], [], []>} : vector<8x8xf32>, vector<8x8xf32>, vector<8x8xf32> -> vector<8x8xf32>
    %cst_131 = arith.constant 0.353553385 : f32
    %200 = vector.broadcast %cst_131 : f32 to vector<8x8xf32>
    %201 = arith.mulf %199, %200 : vector<8x8xf32>
    %cst_132 = arith.constant dense<0xFF800000> : vector<8xf32>
    %202 = vector.multi_reduction <maximumf>, %201, %cst_132 [1] : vector<8x8xf32> to vector<8xf32>
    %203 = vector.shape_cast %202 : vector<8xf32> to vector<8x1xf32>
    %204 = vector.broadcast %203 : vector<8x1xf32> to vector<8x8xf32>
    %205 = arith.subf %201, %204 : vector<8x8xf32>
    %206 = math.exp %205 : vector<8x8xf32>
    %cst_133 = arith.constant dense<0.000000e+00> : vector<8xf32>
    %207 = vector.multi_reduction <add>, %206, %cst_133 [1] : vector<8x8xf32> to vector<8xf32>
    %208 = vector.shape_cast %207 : vector<8xf32> to vector<8x1xf32>
    %209 = tpu.reciprocal %208 {approx = true} : vector<8x1xf32> -> vector<8x1xf32>
    %210 = vector.broadcast %209 : vector<8x1xf32> to vector<8x8xf32>
    %211 = arith.mulf %206, %210 : vector<8x8xf32>
    %cst_134 = arith.constant dense<0.000000e+00> : vector<8x8xf32>
    %212 = tpu.matmul %211, %198, %cst_134 {dimension_numbers = #tpu.dot_dimension_numbers<[1], [0], [0], [1], [0, 0, 1, 1], [], []>} : vector<8x8xf32>, vector<8x8xf32>, vector<8x8xf32> -> vector<8x8xf32>
    %213 = tpu.concatenate %161, %178, %195, %212 in 1 : vector<8x8xf32>, vector<8x8xf32>, vector<8x8xf32>, vector<8x8xf32> -> vector<8x32xf32>
    %cst_135 = arith.constant dense<0.000000e+00> : vector<8x32xf32>
    %214 = tpu.matmul %213, %6, %cst_135 {dimension_numbers = #tpu.dot_dimension_numbers<[1], [0], [0], [1], [0, 0, 1, 1], [], []>} : vector<8x32xf32>, vector<32x32xf32>, vector<8x32xf32> -> vector<8x32xf32>
    %215 = vector.broadcast %7 : vector<1x32xf32> to vector<8x32xf32>
    %216 = arith.addf %214, %215 : vector<8x32xf32>
    %cst_136 = arith.constant dense<0.000000e+00> : vector<8x64xf32>
    %217 = tpu.matmul %43, %8, %cst_136 {dimension_numbers = #tpu.dot_dimension_numbers<[1], [0], [0], [1], [0, 0, 1, 1], [], []>} : vector<8x32xf32>, vector<32x64xf32>, vector<8x64xf32> -> vector<8x64xf32>
    %cst_137 = arith.constant dense<0.000000e+00> : vector<8x64xf32>
    %218 = tpu.matmul %216, %9, %cst_137 {dimension_numbers = #tpu.dot_dimension_numbers<[1], [0], [0], [1], [0, 0, 1, 1], [], []>} : vector<8x32xf32>, vector<32x64xf32>, vector<8x64xf32> -> vector<8x64xf32>
    %219 = arith.addf %217, %218 : vector<8x64xf32>
    %220 = vector.broadcast %10 : vector<1x64xf32> to vector<8x64xf32>
    %221 = arith.addf %219, %220 : vector<8x64xf32>
    %cst_138 = arith.constant 0.000000e+00 : f32
    %222 = vector.broadcast %cst_138 : f32 to vector<8x64xf32>
    %223 = arith.maximumf %221, %222 : vector<8x64xf32>
    %cst_139 = arith.constant dense<0.000000e+00> : vector<8x32xf32>
    %224 = tpu.matmul %223, %11, %cst_139 {dimension_numbers = #tpu.dot_dimension_numbers<[1], [0], [0], [1], [0, 0, 1, 1], [], []>} : vector<8x64xf32>, vector<64x32xf32>, vector<8x32xf32> -> vector<8x32xf32>
    %225 = vector.broadcast %12 : vector<1x32xf32> to vector<8x32xf32>
    %226 = arith.addf %224, %225 : vector<8x32xf32>
    %227 = arith.addf %43, %226 : vector<8x32xf32>
    %cst_140 = arith.constant dense<0.000000e+00> : vector<8x32xf32>
    %228 = tpu.matmul %135, %13, %cst_140 {dimension_numbers = #tpu.dot_dimension_numbers<[1], [0], [0], [1], [0, 0, 1, 1], [], []>} : vector<8x32xf32>, vector<32x32xf32>, vector<8x32xf32> -> vector<8x32xf32>
    %229 = vector.broadcast %14 : vector<1x32xf32> to vector<8x32xf32>
    %230 = arith.addf %228, %229 : vector<8x32xf32>
    %cst_141 = arith.constant dense<0.000000e+00> : vector<8x32xf32>
    %231 = tpu.matmul %135, %15, %cst_141 {dimension_numbers = #tpu.dot_dimension_numbers<[1], [0], [0], [1], [0, 0, 1, 1], [], []>} : vector<8x32xf32>, vector<32x32xf32>, vector<8x32xf32> -> vector<8x32xf32>
    %232 = vector.broadcast %16 : vector<1x32xf32> to vector<8x32xf32>
    %233 = arith.addf %231, %232 : vector<8x32xf32>
    %cst_142 = arith.constant dense<0.000000e+00> : vector<8x32xf32>
    %234 = tpu.matmul %135, %17, %cst_142 {dimension_numbers = #tpu.dot_dimension_numbers<[1], [0], [0], [1], [0, 0, 1, 1], [], []>} : vector<8x32xf32>, vector<32x32xf32>, vector<8x32xf32> -> vector<8x32xf32>
    %235 = vector.broadcast %18 : vector<1x32xf32> to vector<8x32xf32>
    %236 = arith.addf %234, %235 : vector<8x32xf32>
    %237 = vector.extract_strided_slice %230 {offsets = [0, 0], sizes = [8, 8], strides = [1, 1]} : vector<8x32xf32> to vector<8x8xf32>
    %238 = vector.extract_strided_slice %233 {offsets = [0, 0], sizes = [8, 8], strides = [1, 1]} : vector<8x32xf32> to vector<8x8xf32>
    %239 = vector.extract_strided_slice %236 {offsets = [0, 0], sizes = [8, 8], strides = [1, 1]} : vector<8x32xf32> to vector<8x8xf32>
    %cst_143 = arith.constant dense<0.000000e+00> : vector<8x8xf32>
    %240 = tpu.matmul %237, %238, %cst_143 {dimension_numbers = #tpu.dot_dimension_numbers<[1], [1], [0], [0], [0, 0, 1, 0], [], []>} : vector<8x8xf32>, vector<8x8xf32>, vector<8x8xf32> -> vector<8x8xf32>
    %cst_144 = arith.constant 0.353553385 : f32
    %241 = vector.broadcast %cst_144 : f32 to vector<8x8xf32>
    %242 = arith.mulf %240, %241 : vector<8x8xf32>
    %cst_145 = arith.constant dense<0xFF800000> : vector<8xf32>
    %243 = vector.multi_reduction <maximumf>, %242, %cst_145 [1] : vector<8x8xf32> to vector<8xf32>
    %244 = vector.shape_cast %243 : vector<8xf32> to vector<8x1xf32>
    %245 = vector.broadcast %244 : vector<8x1xf32> to vector<8x8xf32>
    %246 = arith.subf %242, %245 : vector<8x8xf32>
    %247 = math.exp %246 : vector<8x8xf32>
    %cst_146 = arith.constant dense<0.000000e+00> : vector<8xf32>
    %248 = vector.multi_reduction <add>, %247, %cst_146 [1] : vector<8x8xf32> to vector<8xf32>
    %249 = vector.shape_cast %248 : vector<8xf32> to vector<8x1xf32>
    %250 = tpu.reciprocal %249 {approx = true} : vector<8x1xf32> -> vector<8x1xf32>
    %251 = vector.broadcast %250 : vector<8x1xf32> to vector<8x8xf32>
    %252 = arith.mulf %247, %251 : vector<8x8xf32>
    %cst_147 = arith.constant dense<0.000000e+00> : vector<8x8xf32>
    %253 = tpu.matmul %252, %239, %cst_147 {dimension_numbers = #tpu.dot_dimension_numbers<[1], [0], [0], [1], [0, 0, 1, 1], [], []>} : vector<8x8xf32>, vector<8x8xf32>, vector<8x8xf32> -> vector<8x8xf32>
    %254 = vector.extract_strided_slice %230 {offsets = [0, 8], sizes = [8, 8], strides = [1, 1]} : vector<8x32xf32> to vector<8x8xf32>
    %255 = vector.extract_strided_slice %233 {offsets = [0, 8], sizes = [8, 8], strides = [1, 1]} : vector<8x32xf32> to vector<8x8xf32>
    %256 = vector.extract_strided_slice %236 {offsets = [0, 8], sizes = [8, 8], strides = [1, 1]} : vector<8x32xf32> to vector<8x8xf32>
    %cst_148 = arith.constant dense<0.000000e+00> : vector<8x8xf32>
    %257 = tpu.matmul %254, %255, %cst_148 {dimension_numbers = #tpu.dot_dimension_numbers<[1], [1], [0], [0], [0, 0, 1, 0], [], []>} : vector<8x8xf32>, vector<8x8xf32>, vector<8x8xf32> -> vector<8x8xf32>
    %cst_149 = arith.constant 0.353553385 : f32
    %258 = vector.broadcast %cst_149 : f32 to vector<8x8xf32>
    %259 = arith.mulf %257, %258 : vector<8x8xf32>
    %cst_150 = arith.constant dense<0xFF800000> : vector<8xf32>
    %260 = vector.multi_reduction <maximumf>, %259, %cst_150 [1] : vector<8x8xf32> to vector<8xf32>
    %261 = vector.shape_cast %260 : vector<8xf32> to vector<8x1xf32>
    %262 = vector.broadcast %261 : vector<8x1xf32> to vector<8x8xf32>
    %263 = arith.subf %259, %262 : vector<8x8xf32>
    %264 = math.exp %263 : vector<8x8xf32>
    %cst_151 = arith.constant dense<0.000000e+00> : vector<8xf32>
    %265 = vector.multi_reduction <add>, %264, %cst_151 [1] : vector<8x8xf32> to vector<8xf32>
    %266 = vector.shape_cast %265 : vector<8xf32> to vector<8x1xf32>
    %267 = tpu.reciprocal %266 {approx = true} : vector<8x1xf32> -> vector<8x1xf32>
    %268 = vector.broadcast %267 : vector<8x1xf32> to vector<8x8xf32>
    %269 = arith.mulf %264, %268 : vector<8x8xf32>
    %cst_152 = arith.constant dense<0.000000e+00> : vector<8x8xf32>
    %270 = tpu.matmul %269, %256, %cst_152 {dimension_numbers = #tpu.dot_dimension_numbers<[1], [0], [0], [1], [0, 0, 1, 1], [], []>} : vector<8x8xf32>, vector<8x8xf32>, vector<8x8xf32> -> vector<8x8xf32>
    %271 = vector.extract_strided_slice %230 {offsets = [0, 16], sizes = [8, 8], strides = [1, 1]} : vector<8x32xf32> to vector<8x8xf32>
    %272 = vector.extract_strided_slice %233 {offsets = [0, 16], sizes = [8, 8], strides = [1, 1]} : vector<8x32xf32> to vector<8x8xf32>
    %273 = vector.extract_strided_slice %236 {offsets = [0, 16], sizes = [8, 8], strides = [1, 1]} : vector<8x32xf32> to vector<8x8xf32>
    %cst_153 = arith.constant dense<0.000000e+00> : vector<8x8xf32>
    %274 = tpu.matmul %271, %272, %cst_153 {dimension_numbers = #tpu.dot_dimension_numbers<[1], [1], [0], [0], [0, 0, 1, 0], [], []>} : vector<8x8xf32>, vector<8x8xf32>, vector<8x8xf32> -> vector<8x8xf32>
    %cst_154 = arith.constant 0.353553385 : f32
    %275 = vector.broadcast %cst_154 : f32 to vector<8x8xf32>
    %276 = arith.mulf %274, %275 : vector<8x8xf32>
    %cst_155 = arith.constant dense<0xFF800000> : vector<8xf32>
    %277 = vector.multi_reduction <maximumf>, %276, %cst_155 [1] : vector<8x8xf32> to vector<8xf32>
    %278 = vector.shape_cast %277 : vector<8xf32> to vector<8x1xf32>
    %279 = vector.broadcast %278 : vector<8x1xf32> to vector<8x8xf32>
    %280 = arith.subf %276, %279 : vector<8x8xf32>
    %281 = math.exp %280 : vector<8x8xf32>
    %cst_156 = arith.constant dense<0.000000e+00> : vector<8xf32>
    %282 = vector.multi_reduction <add>, %281, %cst_156 [1] : vector<8x8xf32> to vector<8xf32>
    %283 = vector.shape_cast %282 : vector<8xf32> to vector<8x1xf32>
    %284 = tpu.reciprocal %283 {approx = true} : vector<8x1xf32> -> vector<8x1xf32>
    %285 = vector.broadcast %284 : vector<8x1xf32> to vector<8x8xf32>
    %286 = arith.mulf %281, %285 : vector<8x8xf32>
    %cst_157 = arith.constant dense<0.000000e+00> : vector<8x8xf32>
    %287 = tpu.matmul %286, %273, %cst_157 {dimension_numbers = #tpu.dot_dimension_numbers<[1], [0], [0], [1], [0, 0, 1, 1], [], []>} : vector<8x8xf32>, vector<8x8xf32>, vector<8x8xf32> -> vector<8x8xf32>
    %288 = vector.extract_strided_slice %230 {offsets = [0, 24], sizes = [8, 8], strides = [1, 1]} : vector<8x32xf32> to vector<8x8xf32>
    %289 = vector.extract_strided_slice %233 {offsets = [0, 24], sizes = [8, 8], strides = [1, 1]} : vector<8x32xf32> to vector<8x8xf32>
    %290 = vector.extract_strided_slice %236 {offsets = [0, 24], sizes = [8, 8], strides = [1, 1]} : vector<8x32xf32> to vector<8x8xf32>
    %cst_158 = arith.constant dense<0.000000e+00> : vector<8x8xf32>
    %291 = tpu.matmul %288, %289, %cst_158 {dimension_numbers = #tpu.dot_dimension_numbers<[1], [1], [0], [0], [0, 0, 1, 0], [], []>} : vector<8x8xf32>, vector<8x8xf32>, vector<8x8xf32> -> vector<8x8xf32>
    %cst_159 = arith.constant 0.353553385 : f32
    %292 = vector.broadcast %cst_159 : f32 to vector<8x8xf32>
    %293 = arith.mulf %291, %292 : vector<8x8xf32>
    %cst_160 = arith.constant dense<0xFF800000> : vector<8xf32>
    %294 = vector.multi_reduction <maximumf>, %293, %cst_160 [1] : vector<8x8xf32> to vector<8xf32>
    %295 = vector.shape_cast %294 : vector<8xf32> to vector<8x1xf32>
    %296 = vector.broadcast %295 : vector<8x1xf32> to vector<8x8xf32>
    %297 = arith.subf %293, %296 : vector<8x8xf32>
    %298 = math.exp %297 : vector<8x8xf32>
    %cst_161 = arith.constant dense<0.000000e+00> : vector<8xf32>
    %299 = vector.multi_reduction <add>, %298, %cst_161 [1] : vector<8x8xf32> to vector<8xf32>
    %300 = vector.shape_cast %299 : vector<8xf32> to vector<8x1xf32>
    %301 = tpu.reciprocal %300 {approx = true} : vector<8x1xf32> -> vector<8x1xf32>
    %302 = vector.broadcast %301 : vector<8x1xf32> to vector<8x8xf32>
    %303 = arith.mulf %298, %302 : vector<8x8xf32>
    %cst_162 = arith.constant dense<0.000000e+00> : vector<8x8xf32>
    %304 = tpu.matmul %303, %290, %cst_162 {dimension_numbers = #tpu.dot_dimension_numbers<[1], [0], [0], [1], [0, 0, 1, 1], [], []>} : vector<8x8xf32>, vector<8x8xf32>, vector<8x8xf32> -> vector<8x8xf32>
    %305 = tpu.concatenate %253, %270, %287, %304 in 1 : vector<8x8xf32>, vector<8x8xf32>, vector<8x8xf32>, vector<8x8xf32> -> vector<8x32xf32>
    %cst_163 = arith.constant dense<0.000000e+00> : vector<8x32xf32>
    %306 = tpu.matmul %305, %19, %cst_163 {dimension_numbers = #tpu.dot_dimension_numbers<[1], [0], [0], [1], [0, 0, 1, 1], [], []>} : vector<8x32xf32>, vector<32x32xf32>, vector<8x32xf32> -> vector<8x32xf32>
    %307 = vector.broadcast %20 : vector<1x32xf32> to vector<8x32xf32>
    %308 = arith.addf %306, %307 : vector<8x32xf32>
    %cst_164 = arith.constant dense<0.000000e+00> : vector<8x64xf32>
    %309 = tpu.matmul %135, %21, %cst_164 {dimension_numbers = #tpu.dot_dimension_numbers<[1], [0], [0], [1], [0, 0, 1, 1], [], []>} : vector<8x32xf32>, vector<32x64xf32>, vector<8x64xf32> -> vector<8x64xf32>
    %cst_165 = arith.constant dense<0.000000e+00> : vector<8x64xf32>
    %310 = tpu.matmul %308, %22, %cst_165 {dimension_numbers = #tpu.dot_dimension_numbers<[1], [0], [0], [1], [0, 0, 1, 1], [], []>} : vector<8x32xf32>, vector<32x64xf32>, vector<8x64xf32> -> vector<8x64xf32>
    %311 = arith.addf %309, %310 : vector<8x64xf32>
    %312 = vector.broadcast %23 : vector<1x64xf32> to vector<8x64xf32>
    %313 = arith.addf %311, %312 : vector<8x64xf32>
    %cst_166 = arith.constant 0.000000e+00 : f32
    %314 = vector.broadcast %cst_166 : f32 to vector<8x64xf32>
    %315 = arith.maximumf %313, %314 : vector<8x64xf32>
    %cst_167 = arith.constant dense<0.000000e+00> : vector<8x32xf32>
    %316 = tpu.matmul %315, %24, %cst_167 {dimension_numbers = #tpu.dot_dimension_numbers<[1], [0], [0], [1], [0, 0, 1, 1], [], []>} : vector<8x64xf32>, vector<64x32xf32>, vector<8x32xf32> -> vector<8x32xf32>
    %317 = vector.broadcast %25 : vector<1x32xf32> to vector<8x32xf32>
    %318 = arith.addf %316, %317 : vector<8x32xf32>
    %319 = arith.addf %135, %318 : vector<8x32xf32>
    %cst_168 = arith.constant dense<0.000000e+00> : vector<8x32xf32>
    %320 = tpu.matmul %227, %13, %cst_168 {dimension_numbers = #tpu.dot_dimension_numbers<[1], [0], [0], [1], [0, 0, 1, 1], [], []>} : vector<8x32xf32>, vector<32x32xf32>, vector<8x32xf32> -> vector<8x32xf32>
    %321 = vector.broadcast %14 : vector<1x32xf32> to vector<8x32xf32>
    %322 = arith.addf %320, %321 : vector<8x32xf32>
    %cst_169 = arith.constant dense<0.000000e+00> : vector<8x32xf32>
    %323 = tpu.matmul %227, %15, %cst_169 {dimension_numbers = #tpu.dot_dimension_numbers<[1], [0], [0], [1], [0, 0, 1, 1], [], []>} : vector<8x32xf32>, vector<32x32xf32>, vector<8x32xf32> -> vector<8x32xf32>
    %324 = vector.broadcast %16 : vector<1x32xf32> to vector<8x32xf32>
    %325 = arith.addf %323, %324 : vector<8x32xf32>
    %cst_170 = arith.constant dense<0.000000e+00> : vector<8x32xf32>
    %326 = tpu.matmul %227, %17, %cst_170 {dimension_numbers = #tpu.dot_dimension_numbers<[1], [0], [0], [1], [0, 0, 1, 1], [], []>} : vector<8x32xf32>, vector<32x32xf32>, vector<8x32xf32> -> vector<8x32xf32>
    %327 = vector.broadcast %18 : vector<1x32xf32> to vector<8x32xf32>
    %328 = arith.addf %326, %327 : vector<8x32xf32>
    %329 = vector.extract_strided_slice %322 {offsets = [0, 0], sizes = [8, 8], strides = [1, 1]} : vector<8x32xf32> to vector<8x8xf32>
    %330 = vector.extract_strided_slice %325 {offsets = [0, 0], sizes = [8, 8], strides = [1, 1]} : vector<8x32xf32> to vector<8x8xf32>
    %331 = vector.extract_strided_slice %328 {offsets = [0, 0], sizes = [8, 8], strides = [1, 1]} : vector<8x32xf32> to vector<8x8xf32>
    %cst_171 = arith.constant dense<0.000000e+00> : vector<8x8xf32>
    %332 = tpu.matmul %329, %330, %cst_171 {dimension_numbers = #tpu.dot_dimension_numbers<[1], [1], [0], [0], [0, 0, 1, 0], [], []>} : vector<8x8xf32>, vector<8x8xf32>, vector<8x8xf32> -> vector<8x8xf32>
    %cst_172 = arith.constant 0.353553385 : f32
    %333 = vector.broadcast %cst_172 : f32 to vector<8x8xf32>
    %334 = arith.mulf %332, %333 : vector<8x8xf32>
    %cst_173 = arith.constant dense<0xFF800000> : vector<8xf32>
    %335 = vector.multi_reduction <maximumf>, %334, %cst_173 [1] : vector<8x8xf32> to vector<8xf32>
    %336 = vector.shape_cast %335 : vector<8xf32> to vector<8x1xf32>
    %337 = vector.broadcast %336 : vector<8x1xf32> to vector<8x8xf32>
    %338 = arith.subf %334, %337 : vector<8x8xf32>
    %339 = math.exp %338 : vector<8x8xf32>
    %cst_174 = arith.constant dense<0.000000e+00> : vector<8xf32>
    %340 = vector.multi_reduction <add>, %339, %cst_174 [1] : vector<8x8xf32> to vector<8xf32>
    %341 = vector.shape_cast %340 : vector<8xf32> to vector<8x1xf32>
    %342 = tpu.reciprocal %341 {approx = true} : vector<8x1xf32> -> vector<8x1xf32>
    %343 = vector.broadcast %342 : vector<8x1xf32> to vector<8x8xf32>
    %344 = arith.mulf %339, %343 : vector<8x8xf32>
    %cst_175 = arith.constant dense<0.000000e+00> : vector<8x8xf32>
    %345 = tpu.matmul %344, %331, %cst_175 {dimension_numbers = #tpu.dot_dimension_numbers<[1], [0], [0], [1], [0, 0, 1, 1], [], []>} : vector<8x8xf32>, vector<8x8xf32>, vector<8x8xf32> -> vector<8x8xf32>
    %346 = vector.extract_strided_slice %322 {offsets = [0, 8], sizes = [8, 8], strides = [1, 1]} : vector<8x32xf32> to vector<8x8xf32>
    %347 = vector.extract_strided_slice %325 {offsets = [0, 8], sizes = [8, 8], strides = [1, 1]} : vector<8x32xf32> to vector<8x8xf32>
    %348 = vector.extract_strided_slice %328 {offsets = [0, 8], sizes = [8, 8], strides = [1, 1]} : vector<8x32xf32> to vector<8x8xf32>
    %cst_176 = arith.constant dense<0.000000e+00> : vector<8x8xf32>
    %349 = tpu.matmul %346, %347, %cst_176 {dimension_numbers = #tpu.dot_dimension_numbers<[1], [1], [0], [0], [0, 0, 1, 0], [], []>} : vector<8x8xf32>, vector<8x8xf32>, vector<8x8xf32> -> vector<8x8xf32>
    %cst_177 = arith.constant 0.353553385 : f32
    %350 = vector.broadcast %cst_177 : f32 to vector<8x8xf32>
    %351 = arith.mulf %349, %350 : vector<8x8xf32>
    %cst_178 = arith.constant dense<0xFF800000> : vector<8xf32>
    %352 = vector.multi_reduction <maximumf>, %351, %cst_178 [1] : vector<8x8xf32> to vector<8xf32>
    %353 = vector.shape_cast %352 : vector<8xf32> to vector<8x1xf32>
    %354 = vector.broadcast %353 : vector<8x1xf32> to vector<8x8xf32>
    %355 = arith.subf %351, %354 : vector<8x8xf32>
    %356 = math.exp %355 : vector<8x8xf32>
    %cst_179 = arith.constant dense<0.000000e+00> : vector<8xf32>
    %357 = vector.multi_reduction <add>, %356, %cst_179 [1] : vector<8x8xf32> to vector<8xf32>
    %358 = vector.shape_cast %357 : vector<8xf32> to vector<8x1xf32>
    %359 = tpu.reciprocal %358 {approx = true} : vector<8x1xf32> -> vector<8x1xf32>
    %360 = vector.broadcast %359 : vector<8x1xf32> to vector<8x8xf32>
    %361 = arith.mulf %356, %360 : vector<8x8xf32>
    %cst_180 = arith.constant dense<0.000000e+00> : vector<8x8xf32>
    %362 = tpu.matmul %361, %348, %cst_180 {dimension_numbers = #tpu.dot_dimension_numbers<[1], [0], [0], [1], [0, 0, 1, 1], [], []>} : vector<8x8xf32>, vector<8x8xf32>, vector<8x8xf32> -> vector<8x8xf32>
    %363 = vector.extract_strided_slice %322 {offsets = [0, 16], sizes = [8, 8], strides = [1, 1]} : vector<8x32xf32> to vector<8x8xf32>
    %364 = vector.extract_strided_slice %325 {offsets = [0, 16], sizes = [8, 8], strides = [1, 1]} : vector<8x32xf32> to vector<8x8xf32>
    %365 = vector.extract_strided_slice %328 {offsets = [0, 16], sizes = [8, 8], strides = [1, 1]} : vector<8x32xf32> to vector<8x8xf32>
    %cst_181 = arith.constant dense<0.000000e+00> : vector<8x8xf32>
    %366 = tpu.matmul %363, %364, %cst_181 {dimension_numbers = #tpu.dot_dimension_numbers<[1], [1], [0], [0], [0, 0, 1, 0], [], []>} : vector<8x8xf32>, vector<8x8xf32>, vector<8x8xf32> -> vector<8x8xf32>
    %cst_182 = arith.constant 0.353553385 : f32
    %367 = vector.broadcast %cst_182 : f32 to vector<8x8xf32>
    %368 = arith.mulf %366, %367 : vector<8x8xf32>
    %cst_183 = arith.constant dense<0xFF800000> : vector<8xf32>
    %369 = vector.multi_reduction <maximumf>, %368, %cst_183 [1] : vector<8x8xf32> to vector<8xf32>
    %370 = vector.shape_cast %369 : vector<8xf32> to vector<8x1xf32>
    %371 = vector.broadcast %370 : vector<8x1xf32> to vector<8x8xf32>
    %372 = arith.subf %368, %371 : vector<8x8xf32>
    %373 = math.exp %372 : vector<8x8xf32>
    %cst_184 = arith.constant dense<0.000000e+00> : vector<8xf32>
    %374 = vector.multi_reduction <add>, %373, %cst_184 [1] : vector<8x8xf32> to vector<8xf32>
    %375 = vector.shape_cast %374 : vector<8xf32> to vector<8x1xf32>
    %376 = tpu.reciprocal %375 {approx = true} : vector<8x1xf32> -> vector<8x1xf32>
    %377 = vector.broadcast %376 : vector<8x1xf32> to vector<8x8xf32>
    %378 = arith.mulf %373, %377 : vector<8x8xf32>
    %cst_185 = arith.constant dense<0.000000e+00> : vector<8x8xf32>
    %379 = tpu.matmul %378, %365, %cst_185 {dimension_numbers = #tpu.dot_dimension_numbers<[1], [0], [0], [1], [0, 0, 1, 1], [], []>} : vector<8x8xf32>, vector<8x8xf32>, vector<8x8xf32> -> vector<8x8xf32>
    %380 = vector.extract_strided_slice %322 {offsets = [0, 24], sizes = [8, 8], strides = [1, 1]} : vector<8x32xf32> to vector<8x8xf32>
    %381 = vector.extract_strided_slice %325 {offsets = [0, 24], sizes = [8, 8], strides = [1, 1]} : vector<8x32xf32> to vector<8x8xf32>
    %382 = vector.extract_strided_slice %328 {offsets = [0, 24], sizes = [8, 8], strides = [1, 1]} : vector<8x32xf32> to vector<8x8xf32>
    %cst_186 = arith.constant dense<0.000000e+00> : vector<8x8xf32>
    %383 = tpu.matmul %380, %381, %cst_186 {dimension_numbers = #tpu.dot_dimension_numbers<[1], [1], [0], [0], [0, 0, 1, 0], [], []>} : vector<8x8xf32>, vector<8x8xf32>, vector<8x8xf32> -> vector<8x8xf32>
    %cst_187 = arith.constant 0.353553385 : f32
    %384 = vector.broadcast %cst_187 : f32 to vector<8x8xf32>
    %385 = arith.mulf %383, %384 : vector<8x8xf32>
    %cst_188 = arith.constant dense<0xFF800000> : vector<8xf32>
    %386 = vector.multi_reduction <maximumf>, %385, %cst_188 [1] : vector<8x8xf32> to vector<8xf32>
    %387 = vector.shape_cast %386 : vector<8xf32> to vector<8x1xf32>
    %388 = vector.broadcast %387 : vector<8x1xf32> to vector<8x8xf32>
    %389 = arith.subf %385, %388 : vector<8x8xf32>
    %390 = math.exp %389 : vector<8x8xf32>
    %cst_189 = arith.constant dense<0.000000e+00> : vector<8xf32>
    %391 = vector.multi_reduction <add>, %390, %cst_189 [1] : vector<8x8xf32> to vector<8xf32>
    %392 = vector.shape_cast %391 : vector<8xf32> to vector<8x1xf32>
    %393 = tpu.reciprocal %392 {approx = true} : vector<8x1xf32> -> vector<8x1xf32>
    %394 = vector.broadcast %393 : vector<8x1xf32> to vector<8x8xf32>
    %395 = arith.mulf %390, %394 : vector<8x8xf32>
    %cst_190 = arith.constant dense<0.000000e+00> : vector<8x8xf32>
    %396 = tpu.matmul %395, %382, %cst_190 {dimension_numbers = #tpu.dot_dimension_numbers<[1], [0], [0], [1], [0, 0, 1, 1], [], []>} : vector<8x8xf32>, vector<8x8xf32>, vector<8x8xf32> -> vector<8x8xf32>
    %397 = tpu.concatenate %345, %362, %379, %396 in 1 : vector<8x8xf32>, vector<8x8xf32>, vector<8x8xf32>, vector<8x8xf32> -> vector<8x32xf32>
    %cst_191 = arith.constant dense<0.000000e+00> : vector<8x32xf32>
    %398 = tpu.matmul %397, %19, %cst_191 {dimension_numbers = #tpu.dot_dimension_numbers<[1], [0], [0], [1], [0, 0, 1, 1], [], []>} : vector<8x32xf32>, vector<32x32xf32>, vector<8x32xf32> -> vector<8x32xf32>
    %399 = vector.broadcast %20 : vector<1x32xf32> to vector<8x32xf32>
    %400 = arith.addf %398, %399 : vector<8x32xf32>
    %cst_192 = arith.constant dense<0.000000e+00> : vector<8x64xf32>
    %401 = tpu.matmul %227, %21, %cst_192 {dimension_numbers = #tpu.dot_dimension_numbers<[1], [0], [0], [1], [0, 0, 1, 1], [], []>} : vector<8x32xf32>, vector<32x64xf32>, vector<8x64xf32> -> vector<8x64xf32>
    %cst_193 = arith.constant dense<0.000000e+00> : vector<8x64xf32>
    %402 = tpu.matmul %400, %22, %cst_193 {dimension_numbers = #tpu.dot_dimension_numbers<[1], [0], [0], [1], [0, 0, 1, 1], [], []>} : vector<8x32xf32>, vector<32x64xf32>, vector<8x64xf32> -> vector<8x64xf32>
    %403 = arith.addf %401, %402 : vector<8x64xf32>
    %404 = vector.broadcast %23 : vector<1x64xf32> to vector<8x64xf32>
    %405 = arith.addf %403, %404 : vector<8x64xf32>
    %cst_194 = arith.constant 0.000000e+00 : f32
    %406 = vector.broadcast %cst_194 : f32 to vector<8x64xf32>
    %407 = arith.maximumf %405, %406 : vector<8x64xf32>
    %cst_195 = arith.constant dense<0.000000e+00> : vector<8x32xf32>
    %408 = tpu.matmul %407, %24, %cst_195 {dimension_numbers = #tpu.dot_dimension_numbers<[1], [0], [0], [1], [0, 0, 1, 1], [], []>} : vector<8x64xf32>, vector<64x32xf32>, vector<8x32xf32> -> vector<8x32xf32>
    %409 = vector.broadcast %25 : vector<1x32xf32> to vector<8x32xf32>
    %410 = arith.addf %408, %409 : vector<8x32xf32>
    %411 = arith.addf %227, %410 : vector<8x32xf32>
    %c0_196 = arith.constant 0 : index
    %c0_197 = arith.constant 0 : index
    %c0_198 = arith.constant 0 : index
    %412 = vector.load %arg43[%c0_196, %c0_197, %c0_198] : memref<1x8x32xf32, #tpu.memory_space<vmem>>, vector<1x8x32xf32>
    %413 = vector.shape_cast %412 : vector<1x8x32xf32> to vector<8x32xf32>
    %414 = vector.shape_cast %319 : vector<8x32xf32> to vector<1x8x32xf32>
    tpu.vector_store %arg43[%c0_196, %c0_197, %c0_198], %414 {strides = array<i32>} : memref<1x8x32xf32, #tpu.memory_space<vmem>>, vector<1x8x32xf32>,
    %c0_199 = arith.constant 0 : index
    %c0_200 = arith.constant 0 : index
    %c0_201 = arith.constant 0 : index
    %415 = vector.load %arg44[%c0_199, %c0_200, %c0_201] : memref<1x8x32xf32, #tpu.memory_space<vmem>>, vector<1x8x32xf32>
    %416 = vector.shape_cast %415 : vector<1x8x32xf32> to vector<8x32xf32>
    %417 = vector.shape_cast %411 : vector<8x32xf32> to vector<1x8x32xf32>
    tpu.vector_store %arg44[%c0_199, %c0_200, %c0_201], %417 {strides = array<i32>} : memref<1x8x32xf32, #tpu.memory_space<vmem>>, vector<1x8x32xf32>,
    %cst_202 = arith.constant dense<0.000000e+00> : vector<32xf32>
    %418 = vector.multi_reduction <add>, %319, %cst_202 [0] : vector<8x32xf32> to vector<32xf32>
    %419 = vector.shape_cast %418 : vector<32xf32> to vector<1x32xf32>
    %cst_203 = arith.constant 8.000000e+00 : f32
    %420 = vector.broadcast %cst_203 : f32 to vector<1x32xf32>
    %421 = arith.divf %419, %420 : vector<1x32xf32>
    %422 = vector.broadcast %421 : vector<1x32xf32> to vector<8x32xf32>
    %423 = arith.subf %319, %422 : vector<8x32xf32>
    %424 = vector.broadcast %421 : vector<1x32xf32> to vector<8x32xf32>
    %425 = arith.subf %319, %424 : vector<8x32xf32>
    %426 = arith.mulf %423, %425 : vector<8x32xf32>
    %cst_204 = arith.constant dense<0.000000e+00> : vector<32xf32>
    %427 = vector.multi_reduction <add>, %426, %cst_204 [0] : vector<8x32xf32> to vector<32xf32>
    %428 = vector.shape_cast %427 : vector<32xf32> to vector<1x32xf32>
    %cst_205 = arith.constant 8.000000e+00 : f32
    %429 = vector.broadcast %cst_205 : f32 to vector<1x32xf32>
    %430 = arith.divf %428, %429 : vector<1x32xf32>
    %431 = vector.broadcast %421 : vector<1x32xf32> to vector<8x32xf32>
    %432 = arith.subf %319, %431 : vector<8x32xf32>
    %cst_206 = arith.constant 1.000000e-03 : f32
    %433 = vector.broadcast %cst_206 : f32 to vector<1x32xf32>
    %434 = arith.addf %430, %433 : vector<1x32xf32>
    %435 = math.rsqrt %434 : vector<1x32xf32>
    %436 = vector.broadcast %435 : vector<1x32xf32> to vector<8x32xf32>
    %437 = arith.mulf %432, %436 : vector<8x32xf32>
    %438 = vector.broadcast %26 : vector<1x32xf32> to vector<8x32xf32>
    %439 = arith.mulf %437, %438 : vector<8x32xf32>
    %440 = vector.broadcast %27 : vector<1x32xf32> to vector<8x32xf32>
    %441 = arith.addf %439, %440 : vector<8x32xf32>
    %cst_207 = arith.constant 0.000000e+00 : f32
    %442 = vector.broadcast %cst_207 : f32 to vector<8x32xf32>
    %443 = arith.maximumf %441, %442 : vector<8x32xf32>
    %cst_208 = arith.constant dense<0.000000e+00> : vector<32xf32>
    %444 = vector.multi_reduction <add>, %411, %cst_208 [0] : vector<8x32xf32> to vector<32xf32>
    %445 = vector.shape_cast %444 : vector<32xf32> to vector<1x32xf32>
    %cst_209 = arith.constant 8.000000e+00 : f32
    %446 = vector.broadcast %cst_209 : f32 to vector<1x32xf32>
    %447 = arith.divf %445, %446 : vector<1x32xf32>
    %448 = vector.broadcast %447 : vector<1x32xf32> to vector<8x32xf32>
    %449 = arith.subf %411, %448 : vector<8x32xf32>
    %450 = vector.broadcast %447 : vector<1x32xf32> to vector<8x32xf32>
    %451 = arith.subf %411, %450 : vector<8x32xf32>
    %452 = arith.mulf %449, %451 : vector<8x32xf32>
    %cst_210 = arith.constant dense<0.000000e+00> : vector<32xf32>
    %453 = vector.multi_reduction <add>, %452, %cst_210 [0] : vector<8x32xf32> to vector<32xf32>
    %454 = vector.shape_cast %453 : vector<32xf32> to vector<1x32xf32>
    %cst_211 = arith.constant 8.000000e+00 : f32
    %455 = vector.broadcast %cst_211 : f32 to vector<1x32xf32>
    %456 = arith.divf %454, %455 : vector<1x32xf32>
    %457 = vector.broadcast %447 : vector<1x32xf32> to vector<8x32xf32>
    %458 = arith.subf %411, %457 : vector<8x32xf32>
    %cst_212 = arith.constant 1.000000e-03 : f32
    %459 = vector.broadcast %cst_212 : f32 to vector<1x32xf32>
    %460 = arith.addf %456, %459 : vector<1x32xf32>
    %461 = math.rsqrt %460 : vector<1x32xf32>
    %462 = vector.broadcast %461 : vector<1x32xf32> to vector<8x32xf32>
    %463 = arith.mulf %458, %462 : vector<8x32xf32>
    %464 = vector.broadcast %28 : vector<1x32xf32> to vector<8x32xf32>
    %465 = arith.mulf %463, %464 : vector<8x32xf32>
    %466 = vector.broadcast %29 : vector<1x32xf32> to vector<8x32xf32>
    %467 = arith.addf %465, %466 : vector<8x32xf32>
    %cst_213 = arith.constant 0.000000e+00 : f32
    %468 = vector.broadcast %cst_213 : f32 to vector<8x32xf32>
    %469 = arith.maximumf %467, %468 : vector<8x32xf32>
    %cst_214 = arith.constant dense<0.000000e+00> : vector<8x64xf32>
    %470 = tpu.matmul %443, %30, %cst_214 {dimension_numbers = #tpu.dot_dimension_numbers<[1], [0], [0], [1], [0, 0, 1, 1], [], []>} : vector<8x32xf32>, vector<32x64xf32>, vector<8x64xf32> -> vector<8x64xf32>
    %cst_215 = arith.constant dense<0.000000e+00> : vector<8x64xf32>
    %471 = tpu.matmul %469, %31, %cst_215 {dimension_numbers = #tpu.dot_dimension_numbers<[1], [0], [0], [1], [0, 0, 1, 1], [], []>} : vector<8x32xf32>, vector<32x64xf32>, vector<8x64xf32> -> vector<8x64xf32>
    %472 = arith.addf %470, %471 : vector<8x64xf32>
    %473 = vector.broadcast %32 : vector<1x64xf32> to vector<8x64xf32>
    %474 = arith.addf %472, %473 : vector<8x64xf32>
    %cst_216 = arith.constant dense<0.000000e+00> : vector<64xf32>
    %475 = vector.multi_reduction <add>, %474, %cst_216 [0] : vector<8x64xf32> to vector<64xf32>
    %476 = vector.shape_cast %475 : vector<64xf32> to vector<1x64xf32>
    %cst_217 = arith.constant 8.000000e+00 : f32
    %477 = vector.broadcast %cst_217 : f32 to vector<1x64xf32>
    %478 = arith.divf %476, %477 : vector<1x64xf32>
    %479 = vector.broadcast %478 : vector<1x64xf32> to vector<8x64xf32>
    %480 = arith.subf %474, %479 : vector<8x64xf32>
    %481 = vector.broadcast %478 : vector<1x64xf32> to vector<8x64xf32>
    %482 = arith.subf %474, %481 : vector<8x64xf32>
    %483 = arith.mulf %480, %482 : vector<8x64xf32>
    %cst_218 = arith.constant dense<0.000000e+00> : vector<64xf32>
    %484 = vector.multi_reduction <add>, %483, %cst_218 [0] : vector<8x64xf32> to vector<64xf32>
    %485 = vector.shape_cast %484 : vector<64xf32> to vector<1x64xf32>
    %cst_219 = arith.constant 8.000000e+00 : f32
    %486 = vector.broadcast %cst_219 : f32 to vector<1x64xf32>
    %487 = arith.divf %485, %486 : vector<1x64xf32>
    %488 = vector.broadcast %478 : vector<1x64xf32> to vector<8x64xf32>
    %489 = arith.subf %474, %488 : vector<8x64xf32>
    %cst_220 = arith.constant 1.000000e-03 : f32
    %490 = vector.broadcast %cst_220 : f32 to vector<1x64xf32>
    %491 = arith.addf %487, %490 : vector<1x64xf32>
    %492 = math.rsqrt %491 : vector<1x64xf32>
    %493 = vector.broadcast %492 : vector<1x64xf32> to vector<8x64xf32>
    %494 = arith.mulf %489, %493 : vector<8x64xf32>
    %495 = vector.broadcast %33 : vector<1x64xf32> to vector<8x64xf32>
    %496 = arith.mulf %494, %495 : vector<8x64xf32>
    %497 = vector.broadcast %34 : vector<1x64xf32> to vector<8x64xf32>
    %498 = arith.addf %496, %497 : vector<8x64xf32>
    %cst_221 = arith.constant 0.000000e+00 : f32
    %499 = vector.broadcast %cst_221 : f32 to vector<8x64xf32>
    %500 = arith.maximumf %498, %499 : vector<8x64xf32>
    %cst_222 = arith.constant dense<0.000000e+00> : vector<8x1xf32>
    %501 = tpu.matmul %500, %35, %cst_222 {dimension_numbers = #tpu.dot_dimension_numbers<[1], [0], [0], [1], [0, 0, 1, 1], [], []>} : vector<8x64xf32>, vector<64x1xf32>, vector<8x1xf32> -> vector<8x1xf32>
    %502 = vector.broadcast %36 : vector<1x1xf32> to vector<8x1xf32>
    %503 = arith.addf %501, %502 : vector<8x1xf32>
    %cst_223 = arith.constant dense<0.000000e+00> : vector<8x1xf32>
    %504 = tpu.matmul %319, %37, %cst_223 {dimension_numbers = #tpu.dot_dimension_numbers<[1], [0], [0], [1], [0, 0, 1, 1], [], []>} : vector<8x32xf32>, vector<32x1xf32>, vector<8x1xf32> -> vector<8x1xf32>
    %cst_224 = arith.constant dense<0.000000e+00> : vector<8x1xf32>
    %505 = tpu.matmul %411, %38, %cst_224 {dimension_numbers = #tpu.dot_dimension_numbers<[1], [0], [0], [1], [0, 0, 1, 1], [], []>} : vector<8x32xf32>, vector<32x1xf32>, vector<8x1xf32> -> vector<8x1xf32>
    %506 = arith.addf %504, %505 : vector<8x1xf32>
    %507 = vector.broadcast %39 : vector<1x1xf32> to vector<8x1xf32>
    %508 = arith.addf %506, %507 : vector<8x1xf32>
    %509 = arith.addf %503, %508 : vector<8x1xf32>
    %cst_225 = arith.constant 0.000000e+00 : f32
    %510 = vector.broadcast %cst_225 : f32 to vector<8x1xf32>
    %511 = arith.subf %510, %509 : vector<8x1xf32>
    %512 = math.exp %511 : vector<8x1xf32>
    %cst_226 = arith.constant 1.000000e+00 : f32
    %513 = vector.broadcast %cst_226 : f32 to vector<8x1xf32>
    %514 = arith.addf %513, %512 : vector<8x1xf32>
    %cst_227 = arith.constant 1.000000e+00 : f32
    %515 = vector.broadcast %cst_227 : f32 to vector<8x1xf32>
    %516 = arith.divf %515, %514 : vector<8x1xf32>
    %c0_228 = arith.constant 0 : index
    %c0_229 = arith.constant 0 : index
    %c0_230 = arith.constant 0 : index
    %517 = vector.load %arg45[%c0_228, %c0_229, %c0_230] : memref<1x8x1xf32, #tpu.memory_space<vmem>>, vector<1x8x1xf32>
    %518 = vector.shape_cast %517 : vector<1x8x1xf32> to vector<8x1xf32>
    %519 = vector.shape_cast %516 : vector<8x1xf32> to vector<1x8x1xf32>
    tpu.vector_store %arg45[%c0_228, %c0_229, %c0_230], %519 {strides = array<i32>} : memref<1x8x1xf32, #tpu.memory_space<vmem>>, vector<1x8x1xf32>,
    return
  }
  func.func @transform_0(%arg0: i32) -> (i32, i32, i32) {
    %c0_i32 = arith.constant 0 : i32
    %c0_i32_0 = arith.constant 0 : i32
    %c0_i32_1 = arith.constant 0 : i32
    return %arg0, %c0_i32, %c0_i32_0 : i32, i32, i32
  }
  func.func @transform_1(%arg0: i32) -> (i32, i32, i32) {
    %c0_i32 = arith.constant 0 : i32
    %c0_i32_0 = arith.constant 0 : i32
    %c0_i32_1 = arith.constant 0 : i32
    return %arg0, %c0_i32, %c0_i32_0 : i32, i32, i32
  }
  func.func @transform_2(%arg0: i32) -> (i32, i32) {
    %c0_i32 = arith.constant 0 : i32
    %c0_i32_0 = arith.constant 0 : i32
    %c0_i32_1 = arith.constant 0 : i32
    return %c0_i32, %c0_i32_0 : i32, i32
  }
  func.func @transform_3(%arg0: i32) -> (i32, i32) {
    %c0_i32 = arith.constant 0 : i32
    %c0_i32_0 = arith.constant 0 : i32
    %c0_i32_1 = arith.constant 0 : i32
    return %c0_i32, %c0_i32_0 : i32, i32
  }
  func.func @transform_4(%arg0: i32) -> (i32, i32) {
    %c0_i32 = arith.constant 0 : i32
    %c0_i32_0 = arith.constant 0 : i32
    %c0_i32_1 = arith.constant 0 : i32
    return %c0_i32, %c0_i32_0 : i32, i32
  }
  func.func @transform_5(%arg0: i32) -> (i32, i32) {
    %c0_i32 = arith.constant 0 : i32
    %c0_i32_0 = arith.constant 0 : i32
    %c0_i32_1 = arith.constant 0 : i32
    return %c0_i32, %c0_i32_0 : i32, i32
  }
  func.func @transform_6(%arg0: i32) -> (i32, i32) {
    %c0_i32 = arith.constant 0 : i32
    %c0_i32_0 = arith.constant 0 : i32
    %c0_i32_1 = arith.constant 0 : i32
    return %c0_i32, %c0_i32_0 : i32, i32
  }
  func.func @transform_7(%arg0: i32) -> (i32, i32) {
    %c0_i32 = arith.constant 0 : i32
    %c0_i32_0 = arith.constant 0 : i32
    %c0_i32_1 = arith.constant 0 : i32
    return %c0_i32, %c0_i32_0 : i32, i32
  }
  func.func @transform_8(%arg0: i32) -> (i32, i32) {
    %c0_i32 = arith.constant 0 : i32
    %c0_i32_0 = arith.constant 0 : i32
    %c0_i32_1 = arith.constant 0 : i32
    return %c0_i32, %c0_i32_0 : i32, i32
  }
  func.func @transform_9(%arg0: i32) -> (i32, i32) {
    %c0_i32 = arith.constant 0 : i32
    %c0_i32_0 = arith.constant 0 : i32
    %c0_i32_1 = arith.constant 0 : i32
    return %c0_i32, %c0_i32_0 : i32, i32
  }
  func.func @transform_10(%arg0: i32) -> (i32, i32) {
    %c0_i32 = arith.constant 0 : i32
    %c0_i32_0 = arith.constant 0 : i32
    %c0_i32_1 = arith.constant 0 : i32
    return %c0_i32, %c0_i32_0 : i32, i32
  }
  func.func @transform_11(%arg0: i32) -> (i32, i32) {
    %c0_i32 = arith.constant 0 : i32
    %c0_i32_0 = arith.constant 0 : i32
    %c0_i32_1 = arith.constant 0 : i32
    return %c0_i32, %c0_i32_0 : i32, i32
  }
  func.func @transform_12(%arg0: i32) -> (i32, i32) {
    %c0_i32 = arith.constant 0 : i32
    %c0_i32_0 = arith.constant 0 : i32
    %c0_i32_1 = arith.constant 0 : i32
    return %c0_i32, %c0_i32_0 : i32, i32
  }
  func.func @transform_13(%arg0: i32) -> (i32, i32) {
    %c0_i32 = arith.constant 0 : i32
    %c0_i32_0 = arith.constant 0 : i32
    %c0_i32_1 = arith.constant 0 : i32
    return %c0_i32, %c0_i32_0 : i32, i32
  }
  func.func @transform_14(%arg0: i32) -> (i32, i32) {
    %c0_i32 = arith.constant 0 : i32
    %c0_i32_0 = arith.constant 0 : i32
    %c0_i32_1 = arith.constant 0 : i32
    return %c0_i32, %c0_i32_0 : i32, i32
  }
  func.func @transform_15(%arg0: i32) -> (i32, i32) {
    %c0_i32 = arith.constant 0 : i32
    %c0_i32_0 = arith.constant 0 : i32
    %c0_i32_1 = arith.constant 0 : i32
    return %c0_i32, %c0_i32_0 : i32, i32
  }
  func.func @transform_16(%arg0: i32) -> (i32, i32) {
    %c0_i32 = arith.constant 0 : i32
    %c0_i32_0 = arith.constant 0 : i32
    %c0_i32_1 = arith.constant 0 : i32
    return %c0_i32, %c0_i32_0 : i32, i32
  }
  func.func @transform_17(%arg0: i32) -> (i32, i32) {
    %c0_i32 = arith.constant 0 : i32
    %c0_i32_0 = arith.constant 0 : i32
    %c0_i32_1 = arith.constant 0 : i32
    return %c0_i32, %c0_i32_0 : i32, i32
  }
  func.func @transform_18(%arg0: i32) -> (i32, i32) {
    %c0_i32 = arith.constant 0 : i32
    %c0_i32_0 = arith.constant 0 : i32
    %c0_i32_1 = arith.constant 0 : i32
    return %c0_i32, %c0_i32_0 : i32, i32
  }
  func.func @transform_19(%arg0: i32) -> (i32, i32) {
    %c0_i32 = arith.constant 0 : i32
    %c0_i32_0 = arith.constant 0 : i32
    %c0_i32_1 = arith.constant 0 : i32
    return %c0_i32, %c0_i32_0 : i32, i32
  }
  func.func @transform_20(%arg0: i32) -> (i32, i32) {
    %c0_i32 = arith.constant 0 : i32
    %c0_i32_0 = arith.constant 0 : i32
    %c0_i32_1 = arith.constant 0 : i32
    return %c0_i32, %c0_i32_0 : i32, i32
  }
  func.func @transform_21(%arg0: i32) -> (i32, i32) {
    %c0_i32 = arith.constant 0 : i32
    %c0_i32_0 = arith.constant 0 : i32
    %c0_i32_1 = arith.constant 0 : i32
    return %c0_i32, %c0_i32_0 : i32, i32
  }
  func.func @transform_22(%arg0: i32) -> (i32, i32) {
    %c0_i32 = arith.constant 0 : i32
    %c0_i32_0 = arith.constant 0 : i32
    %c0_i32_1 = arith.constant 0 : i32
    return %c0_i32, %c0_i32_0 : i32, i32
  }
  func.func @transform_23(%arg0: i32) -> (i32, i32) {
    %c0_i32 = arith.constant 0 : i32
    %c0_i32_0 = arith.constant 0 : i32
    %c0_i32_1 = arith.constant 0 : i32
    return %c0_i32, %c0_i32_0 : i32, i32
  }
  func.func @transform_24(%arg0: i32) -> (i32, i32) {
    %c0_i32 = arith.constant 0 : i32
    %c0_i32_0 = arith.constant 0 : i32
    %c0_i32_1 = arith.constant 0 : i32
    return %c0_i32, %c0_i32_0 : i32, i32
  }
  func.func @transform_25(%arg0: i32) -> (i32, i32) {
    %c0_i32 = arith.constant 0 : i32
    %c0_i32_0 = arith.constant 0 : i32
    %c0_i32_1 = arith.constant 0 : i32
    return %c0_i32, %c0_i32_0 : i32, i32
  }
  func.func @transform_26(%arg0: i32) -> (i32, i32) {
    %c0_i32 = arith.constant 0 : i32
    %c0_i32_0 = arith.constant 0 : i32
    %c0_i32_1 = arith.constant 0 : i32
    return %c0_i32, %c0_i32_0 : i32, i32
  }
  func.func @transform_27(%arg0: i32) -> (i32, i32) {
    %c0_i32 = arith.constant 0 : i32
    %c0_i32_0 = arith.constant 0 : i32
    %c0_i32_1 = arith.constant 0 : i32
    return %c0_i32, %c0_i32_0 : i32, i32
  }
  func.func @transform_28(%arg0: i32) -> (i32, i32) {
    %c0_i32 = arith.constant 0 : i32
    %c0_i32_0 = arith.constant 0 : i32
    %c0_i32_1 = arith.constant 0 : i32
    return %c0_i32, %c0_i32_0 : i32, i32
  }
  func.func @transform_29(%arg0: i32) -> (i32, i32) {
    %c0_i32 = arith.constant 0 : i32
    %c0_i32_0 = arith.constant 0 : i32
    %c0_i32_1 = arith.constant 0 : i32
    return %c0_i32, %c0_i32_0 : i32, i32
  }
  func.func @transform_30(%arg0: i32) -> (i32, i32) {
    %c0_i32 = arith.constant 0 : i32
    %c0_i32_0 = arith.constant 0 : i32
    %c0_i32_1 = arith.constant 0 : i32
    return %c0_i32, %c0_i32_0 : i32, i32
  }
  func.func @transform_31(%arg0: i32) -> (i32, i32) {
    %c0_i32 = arith.constant 0 : i32
    %c0_i32_0 = arith.constant 0 : i32
    %c0_i32_1 = arith.constant 0 : i32
    return %c0_i32, %c0_i32_0 : i32, i32
  }
  func.func @transform_32(%arg0: i32) -> (i32, i32) {
    %c0_i32 = arith.constant 0 : i32
    %c0_i32_0 = arith.constant 0 : i32
    %c0_i32_1 = arith.constant 0 : i32
    return %c0_i32, %c0_i32_0 : i32, i32
  }
  func.func @transform_33(%arg0: i32) -> (i32, i32) {
    %c0_i32 = arith.constant 0 : i32
    %c0_i32_0 = arith.constant 0 : i32
    %c0_i32_1 = arith.constant 0 : i32
    return %c0_i32, %c0_i32_0 : i32, i32
  }
  func.func @transform_34(%arg0: i32) -> (i32, i32) {
    %c0_i32 = arith.constant 0 : i32
    %c0_i32_0 = arith.constant 0 : i32
    %c0_i32_1 = arith.constant 0 : i32
    return %c0_i32, %c0_i32_0 : i32, i32
  }
  func.func @transform_35(%arg0: i32) -> (i32, i32) {
    %c0_i32 = arith.constant 0 : i32
    %c0_i32_0 = arith.constant 0 : i32
    %c0_i32_1 = arith.constant 0 : i32
    return %c0_i32, %c0_i32_0 : i32, i32
  }
  func.func @transform_36(%arg0: i32) -> (i32, i32) {
    %c0_i32 = arith.constant 0 : i32
    %c0_i32_0 = arith.constant 0 : i32
    %c0_i32_1 = arith.constant 0 : i32
    return %c0_i32, %c0_i32_0 : i32, i32
  }
  func.func @transform_37(%arg0: i32) -> (i32, i32) {
    %c0_i32 = arith.constant 0 : i32
    %c0_i32_0 = arith.constant 0 : i32
    %c0_i32_1 = arith.constant 0 : i32
    return %c0_i32, %c0_i32_0 : i32, i32
  }
  func.func @transform_38(%arg0: i32) -> (i32, i32) {
    %c0_i32 = arith.constant 0 : i32
    %c0_i32_0 = arith.constant 0 : i32
    %c0_i32_1 = arith.constant 0 : i32
    return %c0_i32, %c0_i32_0 : i32, i32
  }
  func.func @transform_39(%arg0: i32) -> (i32, i32) {
    %c0_i32 = arith.constant 0 : i32
    %c0_i32_0 = arith.constant 0 : i32
    %c0_i32_1 = arith.constant 0 : i32
    return %c0_i32, %c0_i32_0 : i32, i32
  }
  func.func @transform_40(%arg0: i32) -> (i32, i32) {
    %c0_i32 = arith.constant 0 : i32
    %c0_i32_0 = arith.constant 0 : i32
    %c0_i32_1 = arith.constant 0 : i32
    return %c0_i32, %c0_i32_0 : i32, i32
  }
  func.func @transform_41(%arg0: i32) -> (i32, i32) {
    %c0_i32 = arith.constant 0 : i32
    %c0_i32_0 = arith.constant 0 : i32
    %c0_i32_1 = arith.constant 0 : i32
    return %c0_i32, %c0_i32_0 : i32, i32
  }
  func.func @transform_42(%arg0: i32) -> (i32, i32, i32) {
    %c0_i32 = arith.constant 0 : i32
    %c0_i32_0 = arith.constant 0 : i32
    %c0_i32_1 = arith.constant 0 : i32
    return %arg0, %c0_i32, %c0_i32_0 : i32, i32, i32
  }
  func.func @transform_43(%arg0: i32) -> (i32, i32, i32) {
    %c0_i32 = arith.constant 0 : i32
    %c0_i32_0 = arith.constant 0 : i32
    %c0_i32_1 = arith.constant 0 : i32
    return %arg0, %c0_i32, %c0_i32_0 : i32, i32, i32
  }
  func.func @transform_44(%arg0: i32) -> (i32, i32, i32) {
    %c0_i32 = arith.constant 0 : i32
    %c0_i32_0 = arith.constant 0 : i32
    %c0_i32_1 = arith.constant 0 : i32
    return %arg0, %c0_i32, %c0_i32_0 : i32, i32, i32
  }
}

</mosaic_0001>

<bundles_post_ra>
// kernel: hybrid_block_forward.5
= control target key start
LH: loop header
LB: loop body
LE: loop exit
PB: predicated region body
PF: predicated region fallthrough
CT: control target
= control target key end

     0   :  { %s5251_s0 = inlined_call_operand.vmem [shape: f32[2,16,32], index: 0, kind: input, shape index: {}]   ;;  %s5252_s1 = inlined_call_operand.vmem [shape: f32[2,16,32], index: 1, kind: input, shape index: {}]   ;;  %s5253_s2 = inlined_call_operand.vmem [shape: f32[2,8,32], index: 2, kind: input, shape index: {}]   ;;  %s5254_s3 = inlined_call_operand.vmem [shape: f32[2,8,32], index: 3, kind: input, shape index: {}]   ;;  %s5255_s4 = inlined_call_operand.vmem [shape: f32[2,8,1], index: 4, kind: input, shape index: {}]   ;;  %s5256_s5 = inlined_call_operand.vmem [shape: f32[32,32], index: 5, kind: input, shape index: {}]   ;;  %s5257_s6 = inlined_call_operand.vmem [shape: f32[1,32], index: 6, kind: input, shape index: {}]   ;;  %s5258_s7 = inlined_call_operand.vmem [shape: f32[32,32], index: 7, kind: input, shape index: {}]   ;;  %s5259_s8 = inlined_call_operand.vmem [shape: f32[1,32], index: 8, kind: input, shape index: {}]   ;;  %s5260_s9 = inlined_call_operand.vmem [shape: f32[32,32], index: 9, kind: input, shape index: {}]   ;;  %s5261_s10 = inlined_call_operand.vmem [shape: f32[1,32], index: 10, kind: input, shape index: {}]   ;;  %s5262_s11 = inlined_call_operand.vmem [shape: f32[32,32], index: 11, kind: input, shape index: {}]   ;;  %s5263_s12 = inlined_call_operand.vmem [shape: f32[1,32], index: 12, kind: input, shape index: {}]   ;;  %s5264_s13 = inlined_call_operand.vmem [shape: f32[32,64], index: 13, kind: input, shape index: {}]   ;;  %s5265_s14 = inlined_call_operand.vmem [shape: f32[32,64], index: 14, kind: input, shape index: {}]   ;;  %s5266_s15 = inlined_call_operand.vmem [shape: f32[1,64], index: 15, kind: input, shape index: {}]   ;;  %s5267_s16 = inlined_call_operand.vmem [shape: f32[64,32], index: 16, kind: input, shape index: {}]   ;;  %s5268_s17 = inlined_call_operand.vmem [shape: f32[1,32], index: 17, kind: input, shape index: {}]   ;;  %s5269_s18 = inlined_call_operand.hbm [shape: f32[2,16,32], index: 18, kind: output, shape index: {0}]   ;;  %s5270_s19 = inlined_call_operand.hbm [shape: f32[2,16,32], index: 19, kind: output, shape index: {1}]  }
   0x1   :  { %5289 = sst [smem:[#allocation11_spill]] %s5251_s0 }
   0x2   :  { %5290 = sst [smem:[#allocation12_spill]] %s5252_s1 }
   0x3   :  { %5291 = sst [smem:[#allocation13_spill]] %s5253_s2 }
   0x4   :  { %5292 = sst [smem:[#allocation14_spill]] %s5254_s3 }
   0x5   :  { %5293 = sst [smem:[#allocation15_spill]] %s5255_s4 }
   0x6   :  { %5294 = sst [smem:[#allocation16_spill]] %s5256_s5 }
   0x7   :  { %5295 = sst [smem:[#allocation17_spill]] %s5257_s6 }
   0x8   :  { %5296 = sst [smem:[#allocation18_spill]] %s5258_s7 }
   0x9   :  { %25 = vsyncpa [#allocation3], 0 }
   0xa   :  { %27 = vsyncpa [#allocation3 + $0x1], 0 }
   0xb   :  { %28 = vsyncpa [#allocation5], 0 }
   0xc   :  { %30 = vsyncpa [#allocation5 + $0x1], 0  ;;  %s4597_s0 = smov 0   ;;  %s4599_s30 = smov 0  }
   0xd   :  { %s4601_s20 = smov 0   ;;  %s4603_s21 = smov 0  }
   0xe LB: > { %5297 = sst [smem:[#allocation8_spill]] %s4478_s20  ;;  %s4618_s1 = sadd.s32 4294967295, %s4482_s21   ;;  %s4482_s21 = sphi %s4603_s21, %s5320_s21   ;;  %s4478_s20 = sphi %s4601_s20, %s5322_s20   ;;  %s4474_s30 = sphi %s4599_s30, %s5324_s30   ;;  %s4470_s0 = sphi %s4597_s0, %s5323_s0  }
   0xf   : > { %s3663_s22 = sadd.s32 4294967294, %s4482_s21   ;;  %s4622_s2 = sadd.s32 1, %s4482_s21  }
  0x10   : > { %5298 = sst [smem:[#allocation9_spill]] %s4622_s2  ;;  %s446_s23 = sadd.s32 1, %s4478_s20 }
  0x11   : > { %s443_s24 = ssub.s32 %s4482_s21, %s4622_s2  ;;  %p456_p0 = scmp.ne.s32.totalorder %s4478_s20, %s4474_s30 }
  0x12   : > { %p444_p1 = scmp.eq.s32.totalorder %s443_s24, 0  ;;  %p457_p2 = scmp.eq.s32.totalorder %s4618_s1, 1 }
  0x13   : > { %p462_p3 = scmp.ne.s32.totalorder %s4474_s30, %s4470_s0  ;;  %p463_p4 = scmp.eq.s32.totalorder %s3663_s22, 1 }
  0x14   : > { %s4633_s25 = scalar_select %p444_p1, %s4478_s20, %s446_s23  }
  0x15   : > { %p4635_p5 = por %p457_p2, %p456_p0  ;;  %p4639_p6 = por %p463_p4, %p462_p3 }
  0x16   : > { %5299 = sst [smem:[#allocation10_spill]] %s4633_s25  ;;  %p3666_p7 = scmp.ge.s32.totalorder %s4482_s21, 1 }
  0x17   : > { %p583_p8 = scmp.lt.s32.totalorder %s4482_s21, 3 }
  0x19   : > { %p584_p9 = pnand %p3666_p7, %p583_p8 }
  0x1a   : > { %s5302_s5 = sld [smem:[#allocation16_spill]] (!%p584_p9)  ;;  %s5303_s7 = sld [smem:[#allocation18_spill]] (!%p584_p9)  ;;  %v4484_v3 = vmov (!%p584_p9), 0.0|0.0   ;;  %vm4485_vm0 = vmmov (!%p584_p9), 0   ;;  %v4486_v8 = vmov (!%p584_p9), 0.0   ;;  %vm732_vm1 = vcmask (!%p584_p9), 261120  }
  0x1b   : > { %587 = sbr.rel (%p584_p9) target bundleno = 4006 (0xfa6), region = 92  ;;  %4152 = vmatprep.subr.bf16.mxu1 (!%p584_p9), %v4484_v3  ;;  %3913 = vmatprep.mubr.msk.f32.mxu1 (!%p584_p9), %vm4485_vm0, %v4486_v8  ;;  %p661_p10 = scmp.lt.s32.totalorder (!%p584_p9), %s4618_s1, 1  ;;  %v693_v17 = vld [vmem:[%s5260_s9] sm:$0xff] (!%p584_p9)  ;;  %v694_v18 = vld [vmem:[%s5260_s9 + $0x8] sm:$0xff] (!%p584_p9)  ;;  %v695_v20 = vld [vmem:[%s5260_s9 + $0x10] sm:$0xff] (!%p584_p9)  ;;  %vm975_vm2 = vcmask (!%p584_p9), 64512  }
  0x1c   : > { %s5304_s25 = sld [smem:[#allocation11_spill]] (!%p584_p9)  ;;  %v4722_v19 = vpack.c.bf16 (!%p584_p9), %v694_v18, %v693_v17  ;;  %v696_v21 = vld [vmem:[%s5260_s9 + $0x18] sm:$0xff] (!%p584_p9)  ;;  %v4739_v23 = vld [vmem:[%s5259_s8] ss:$0 sm:$0xff] (!%p584_p9)  ;;  %s5306_s6 = sld [smem:[#allocation17_spill]] (!%p584_p9)  ;;  %v4489_v32 = vmov (!%p584_p9), 0  }
  0x1d   : > { %v4732_v22 = vpack.c.bf16 (!%p584_p9), %v696_v21, %v695_v20  ;;  %s5278_s20 = smov (!%p584_p9), 120   ;;  %4323 = vset.pattern.permute.xlu0 (!%p584_p9), %v4489_v32  ;;  %s5307_s4 = sld [smem:[#allocation15_spill]] (!%p584_p9)  ;;  %v4790_v54 = vld [vmem:[%s5261_s10] ss:$0 sm:$0xff] (!%p584_p9)  ;;  %vm1777_vm3 = vcmask (!%p584_p9), 130048   ;;  %vm1780_vm4 = vcmask (!%p584_p9), 195584  }
  0x1e   : > { %s5310_s24 = sld [smem:[#allocation14_spill]] (!%p584_p9)  ;;  %vm2042_vm5 = vcmask (!%p584_p9), 523264  }
  0x20   : > { %v683_v0 = vld [vmem:[%s5302_s5] sm:$0xff] (!%p584_p9)  ;;  %v684_v1 = vld [vmem:[%s5302_s5 + $0x8] sm:$0xff] (!%p584_p9)  ;;  %v685_v6 = vld [vmem:[%s5302_s5 + $0x10] sm:$0xff] (!%p584_p9) }
  0x21   : > { %v688_v2 = vld [vmem:[%s5303_s7] sm:$0xff] (!%p584_p9)  ;;  %v4655_v4 = vpack.c.bf16 (!%p584_p9), %v684_v1, %v683_v0  ;;  %v689_v5 = vld [vmem:[%s5303_s7 + $0x8] sm:$0xff] (!%p584_p9)  ;;  %v686_v7 = vld [vmem:[%s5302_s5 + $0x18] sm:$0xff] (!%p584_p9) }
  0x22   : > { %v4669_v9 = vpack.c.bf16 %v689_v5, %v688_v2  ;;  %v4671_v10 = vpack.c.bf16 %v686_v7, %v685_v6  ;;  %v690_v11 = vld [vmem:[%s5303_s7 + $0x10] sm:$0xff]  ;;  %v691_v12 = vld [vmem:[%s5303_s7 + $0x18] sm:$0xff]  ;;  %s4681_s27 = scalar_select %p661_p10, %s4618_s1, 1  ;;  %v4744_v24 = vld [vmem:[%s5306_s6] ss:$0 sm:$0xff] }
  0x23   : > { %4145 = vmatprep.subr.bf16.mxu0 %v4655_v4  ;;  %v4685_v13 = vpack.c.bf16 %v691_v12, %v690_v11  ;;  %s5305_s7 = sld [smem:[#allocation13_spill]] }
  0x24   : > { %4154 = vmatpush3.bf16.msra.mxu1 %v4669_v9  ;;  %4147 = vmatpush3.bf16.msra.mxu0 %v4655_v4  ;;  %s5286_s28 = sshll.u32 %s4681_s27, 4  ;;  %s4691_s29 = sshll.u32 %s4681_s27, 3 }
  0x25   : > { %4155 = vmatprep.subr.bf16.mxu1 %v4484_v3  ;;  %4149 = vmatprep.subr.bf16.mxu0 %v4671_v10  ;;  %s665_s23 = scalar_lea.vmem %s5304_s25, %s5286_s28  ;;  %s5276_s25 = smov 112  }
  0x26   : > { %v4702_v14 = vld [vmem:[%s665_s23] sm:$0xff]  ;;  %v4706_v16 = vld [vmem:[%s665_s23 + $0x8] sm:$0xff]  ;;  %s682_s5 = scalar_lea.vmem %s5307_s4, %s4691_s29  ;;  %s5309_s23 = sld [smem:[#allocation12_spill]] }
  0x27   : > { %3902 = vmatprep.mubr.msk.f32.mxu0 %vm732_vm1, %v4702_v14  ;;  %v721_v47 = vld [vmem:[%s682_s5] sm:$0xff]  ;;  %s678_s5 = scalar_lea.vmem %s5310_s24, %s4691_s29 }
  0x28   : > { %4157 = vmatpush3.bf16.msra.mxu1 %v4685_v13  ;;  %4151 = vmatpush3.bf16.msra.mxu0 %v4671_v10 }
  0x29   : > { %s674_s2 = scalar_lea.vmem %s5305_s7, %s4691_s29  ;;  %4158 = vmatprep.subr.bf16.mxu0 %v4484_v3  ;;  %s5274_s7 = smov 104  }
  0x2a   : > { %v722_v15 = vld [vmem:[%s674_s2] sm:$0xff]  ;;  %s5315_s2 = smov 16   ;;  %s5316_s29 = smov 24  }
  0x2b   : > { %3914 = vmatmul.mubr.msk.f32.vlgmr.msra.gmra.mrb[0].mxu1 %vm732_vm1, %v722_v15  ;;  %3903 = vmatmul.mubr.msk.f32.vlgmr.msra.gmra.mrb[0].mxu0 %vm732_vm1, %v4706_v16 }
  0x2c   : > { %3924 = vmatprep.mubr.msk.f32.mxu0 %vm4485_vm0, %v4486_v8  ;;  %4160 = vmatpush3.bf16.msra.mxu0 %v4722_v19 }
  0x2d   : > { %4161 = vmatprep.subr.bf16.mxu0 %v4484_v3 }
  0x30   : > { %4163 = vmatpush3.bf16.msra.mxu0 %v4732_v22 }
  0x33   : > { %3925 = vmatmul.mubr.msk.f32.vlgmr.msra.gmra.mrb[2].mxu0 %vm732_vm1, %v722_v15 }
  0xfe   : > { %v889_v25 = vpop.f32.mrb[0].mxu1  ;;  %v3904_v26 = vpop.f32.mrb[0].mxu0 }
  0xff   : > { %v4747_v27 = vadd.f32 %v4739_v23, %v889_v25  ;;  %v3915_v28 = vpop.f32.mrb[1].mxu1  ;;  %v805_v29 = vpop.f32.mrb[1].mxu0  ;;  %v811_v31 = vadd.f32 %v3904_v26, %v4744_v24 }
 0x100   : > { %v4750_v30 = vadd.f32 %v4744_v24, %v805_v29 }
 0x101   : > { %1169 = vrot.lane.b32.xlu1 %v4747_v27, %s5278_s20  ;;  %3927 = vmatprep.subr.msk.mxu1 %vm975_vm2, %v4747_v27 }
 0x102   : > { %3928 = vmatpush3.xpose.msk.msra.mxu1 %vm975_vm2, %v4747_v27  ;;  %3929 = vmatprep.mubr.msk.f32.mxu1 %vm975_vm2, %v4750_v30 }
 0x105   : > { %1165 = vrot.lane.b32.xlu1 %v4750_v30, %s5278_s20  ;;  %3930 = vmatmul.mubr.msk.f32.vlgmr.msra.gmra.mrb[2].mxu1 %vm975_vm2, %v811_v31 }
 0x106   : > { %v965_v39 = vpop.f32.mrb[2].mxu0 }
 0x107   : > { %v3926_v40 = vpop.f32.mrb[3].mxu0  ;;  %v966_v57 = vadd.f32 %v4790_v54, %v965_v39 }
 0x109   : > { %1167 = vrot.lane.b32.xlu1 %v811_v31, %s5278_s20 }
 0x10d   : > { %1365 = vrot.lane.b32.xlu1 %v4747_v27, %s5276_s25 }
 0x111   : > { %1361 = vrot.lane.b32.xlu1 %v4750_v30, %s5276_s25 }
 0x115   : > { %1363 = vrot.lane.b32.xlu1 %v811_v31, %s5276_s25 }
 0x173   : > { %v4770_v33 = vpop.permute.xlu1 %1169 }
 0x177   : > { %v4772_v34 = vpop.permute.xlu1 %1165 }
 0x17b   : > { %v4774_v35 = vpop.permute.xlu1 %1167 }
 0x17f   : > { %v1366_v36 = vpop.permute.xlu1 %1365 }
 0x180   : > { %3947 = vmatprep.subr.msk.mxu0 %vm975_vm2, %v1366_v36 }
 0x181   : > { %3948 = vmatpush3.xpose.msk.msra.mxu0 %vm975_vm2, %v1366_v36 }
 0x183   : > { %v1362_v37 = vpop.permute.xlu1 %1361 }
 0x184   : > { %3949 = vmatprep.mubr.msk.f32.mxu0 %vm975_vm2, %v1362_v37 }
 0x187   : > { %v1364_v38 = vpop.permute.xlu1 %1363 }
 0x188   : > { %3950 = vmatmul.mubr.msk.f32.vlgmr.msra.gmra.mrb[4].mxu0 %vm975_vm2, %v1364_v38 }
 0x1d8   : > { %v3931_v41 = vpop.f32.mrb[2].mxu1 }
 0x1d9   : > { %v1051_v42 = vpop.f32.mrb[3].mxu1  ;;  %v1061_v44 = vmul.f32 0.35355338, %v3931_v41 }
 0x1da   : > { %v1060_v43 = vmul.f32 0.35355338, %v1051_v42 }
 0x1db   : > { %v1065_v46 = vsel %vm975_vm2, %v1061_v44, -inf }
 0x1dc   : > { %v1062_v45 = vsel %vm975_vm2, %v1060_v43, -inf }
 0x1dd   : > { %1063 = vmax.xlane.f32.xlu0 %v1062_v45 }
 0x1e1   : > { %1066 = vmax.xlane.f32.xlu0 %v1065_v46 }
 0x1f7   : > { %971 = vperm.xlu0 %4323, %v721_v47  }
 0x1fb   : > { %1558 = vrot.lane.b32.xlu0 %v811_v31, %s5274_s7 }
 0x25b   : > { %v3951_v48 = vpop.f32.mrb[4].mxu0 }
 0x25c   : > { %v1439_v49 = vpop.f32.mrb[5].mxu0  ;;  %v1449_v31 = vmul.f32 0.35355338, %v3951_v48 }
 0x25d   : > { %v1448_v29 = vmul.f32 0.35355338, %v1439_v49 }
 0x25e   : > { %v1453_v36 = vsel %vm975_vm2, %v1449_v31, -inf }
 0x26a   : > { %v1064_v50 = vpop.xlane.xlu0 %1063 }
 0x26b   : > { %v1068_v51 = vsub.f32 %v1060_v43, %v1064_v50 }
 0x26d   : > { %v1070_v55 = vmul.f32 1.442695, %v1068_v51 }
 0x26e   : > { %v1067_v52 = vpop.xlane.xlu0 %1066 }
 0x26f   : > { %v1069_v53 = vsub.f32 %v1061_v44, %v1067_v52 }
 0x271   : > { %v1072_v56 = vmul.f32 1.442695, %v1069_v53 }
 0x273   : > { %4324 = vpow2.f32 %v1072_v56 }
 0x274   : > { %4326 = vpow2.f32 %v1070_v55 }
 0x276   : > { %v4793_v58 = vpop.permute.xlu0 %971 }
 0x277   : > { %v4796_v59 = vmul.f32 %v4793_v58, %v966_v57 }
 0x279   : > { %3932 = vmatprep.subr.mxu1 %v4796_v59 }
 0x27a   : > { %3933 = vmatpush3.msra.mxu1 %v4796_v59  ;;  %v1559_v6 = vpop.permute.xlu0 %1558 }
 0x27b   : > { %3937 = vmatprep.subr.msk.mxu1 %vm975_vm2, %v4770_v33 }
 0x27d   : > { %v4325_v60 = vpop.eup %4324 }
 0x27e   : > { %v1077_v61 = vsel %vm975_vm2, %v4325_v60, 0.0  ;;  %v4327_v62 = vpop.eup %4326 }
 0x27f   : > { %1078 = vadd.xlane.f32.xlu1 %v1077_v61  ;;  %v1074_v63 = vsel %vm975_vm2, %v4327_v62, 0.0 }
 0x283   : > { %1075 = vadd.xlane.f32.xlu1 %v1074_v63 }
 0x294   : > { %1560 = vrot.lane.b32.xlu1 %v4747_v27, %s5274_s7 }
 0x298   : > { %1556 = vrot.lane.b32.xlu1 %v4750_v30, %s5274_s7 }
 0x30c   : > { %v1079_v0 = vpop.xlane.xlu1 %1078 }
 0x30d   : > { %4328 = vrcp.f32 %v1079_v0 }
 0x310   : > { %v1076_v1 = vpop.xlane.xlu1 %1075 }
 0x311   : > { %4330 = vrcp.f32 %v1076_v1 }
 0x314   : > { %v1561_v2 = vpop.permute.xlu1 %1560 }
 0x315   : > { %3957 = vmatprep.subr.msk.mxu0 %vm975_vm2, %v1561_v2 }
 0x316   : > { %3958 = vmatpush3.xpose.msk.msra.mxu0 %vm975_vm2, %v1561_v2 }
 0x317   : > { %v4329_v7 = vpop.eup %4328 }
 0x318   : > { %v1557_v5 = vpop.permute.xlu1 %1556  ;;  %v1083_v15 = vmul.f32 %v4329_v7, %v4325_v60 }
 0x319   : > { %3959 = vmatprep.mubr.msk.f32.mxu0 %vm975_vm2, %v1557_v5 }
 0x31a   : > { %3960 = vmatmul.mubr.msk.f32.vlgmr.msra.gmra.mrb[6].mxu0 %vm975_vm2, %v1559_v6 }
 0x31b   : > { %v4331_v11 = vpop.eup %4330 }
 0x31c   : > { %v1082_v12 = vmul.f32 %v4331_v11, %v4327_v62 }
 0x31e   : > { %3934 = vmatprep.mubr.msk.f32.mxu1 %vm975_vm2, %v1082_v12 }
 0x31f   : > { %3935 = vmatmul.mubr.msk.f32.vlgmr.msra.gmra.mrb[4].mxu1 %vm975_vm2, %v1083_v15 }
 0x320   : > { %3938 = vmatpush3.xpose.msk.msra.mxu1 %vm975_vm2, %v4770_v33  ;;  %3939 = vmatprep.mubr.msk.f32.mxu1 %vm975_vm2, %v4772_v34  ;;  %v1450_v34 = vsel %vm975_vm2, %v1448_v29, -inf }
 0x323   : > { %3940 = vmatmul.mubr.msk.f32.vlgmr.msra.gmra.mrb[6].mxu1 %vm975_vm2, %v4774_v35 }
 0x3ed   : > { %v3961_v17 = vpop.f32.mrb[6].mxu0 }
 0x3ee   : > { %v1634_v18 = vpop.f32.mrb[7].mxu0  ;;  %v1644_v35 = vmul.f32 0.35355338, %v3961_v17 }
 0x3ef   : > { %v1643_v33 = vmul.f32 0.35355338, %v1634_v18 }
 0x3f0   : > { %v1648_v38 = vsel %vm975_vm2, %v1644_v35, -inf }
 0x3f1   : > { %v1645_v37 = vsel %vm975_vm2, %v1643_v33, -inf }
 0x3f2   : > { %v4820_v20 = vpop.f32.mrb[4].mxu1 }
 0x3f3   : > { %v4822_v21 = vpop.f32.mrb[5].mxu1 }
 0x3f6   : > { %v3941_v25 = vpop.f32.mrb[6].mxu1 }
 0x3f7   : > { %v1253_v26 = vmul.f32 0.35355338, %v3941_v25  ;;  %v1243_v27 = vpop.f32.mrb[7].mxu1 }
 0x3f8   : > { %v1252_v28 = vmul.f32 0.35355338, %v1243_v27 }
 0x3f9   : > { %v1257_v30 = vsel %vm975_vm2, %v1253_v26, -inf }
 0x3fa   : > { %1258 = vmax.xlane.f32.xlu0 %v1257_v30  ;;  %v1254_v32 = vsel %vm975_vm2, %v1252_v28, -inf }
 0x3fb   : > { %1255 = vmax.xlane.f32.xlu1 %v1254_v32 }
 0x3fe   : > { %1451 = vmax.xlane.f32.xlu0 %v1450_v34 }
 0x3ff   : > { %1454 = vmax.xlane.f32.xlu1 %v1453_v36 }
 0x402   : > { %1646 = vmax.xlane.f32.xlu0 %v1645_v37 }
 0x403   : > { %1649 = vmax.xlane.f32.xlu1 %v1648_v38 }
 0x487   : > { %v1259_v39 = vpop.xlane.xlu0 %1258 }
 0x488   : > { %v1256_v40 = vpop.xlane.xlu1 %1255  ;;  %v1261_v47 = vsub.f32 %v1253_v26, %v1259_v39 }
 0x489   : > { %v1260_v45 = vsub.f32 %v1252_v28, %v1256_v40 }
 0x48a   : > { %v1264_v56 = vmul.f32 1.442695, %v1261_v47 }
 0x48b   : > { %v1452_v41 = vpop.xlane.xlu0 %1451  ;;  %v1262_v53 = vmul.f32 1.442695, %v1260_v45  ;;  %v700_v45 = vld [vmem:[%s5262_s11 + $0x10] sm:$0xff] }
 0x48c   : > { %v1456_v42 = vsub.f32 %v1448_v29, %v1452_v41  ;;  %v1455_v43 = vpop.xlane.xlu1 %1454 }
 0x48d   : > { %v1457_v44 = vsub.f32 %v1449_v31, %v1455_v43  ;;  %v699_v43 = vld [vmem:[%s5262_s11 + $0x8] sm:$0xff] }
 0x48e   : > { %v1458_v46 = vmul.f32 1.442695, %v1456_v42  ;;  %v698_v42 = vld [vmem:[%s5262_s11] sm:$0xff] }
 0x48f   : > { %v1460_v48 = vmul.f32 1.442695, %v1457_v44  ;;  %v1647_v49 = vpop.xlane.xlu0 %1646  ;;  %v4854_v44 = vpack.c.bf16 %v699_v43, %v698_v42 }
 0x490   : > { %4332 = vpow2.f32 %v1458_v46  ;;  %v1651_v50 = vsub.f32 %v1643_v33, %v1647_v49  ;;  %v1650_v51 = vpop.xlane.xlu1 %1649  ;;  %v701_v46 = vld [vmem:[%s5262_s11 + $0x18] sm:$0xff]  ;;  %v708_v49 = vld [vmem:[%s5265_s14 + $0x8] sm:$0xff] }
 0x491   : > { %4334 = vpow2.f32 %v1460_v48  ;;  %v1652_v52 = vsub.f32 %v1644_v35, %v1650_v51  ;;  %4165 = vmatprep.subr.bf16.mxu0 %v4854_v44  ;;  %v4864_v47 = vpack.c.bf16 %v701_v46, %v700_v45  ;;  %v707_v48 = vld [vmem:[%s5265_s14] sm:$0xff] }
 0x492   : > { %v1653_v55 = vmul.f32 1.442695, %v1651_v50  ;;  %4167 = vmatpush3.bf16.msra.mxu0 %v4854_v44  ;;  %v4874_v51 = vpack.c.bf16 %v708_v49, %v707_v48 }
 0x493   : > { %v1655_v57 = vmul.f32 1.442695, %v1652_v52  ;;  %4169 = vmatprep.subr.bf16.mxu0 %v4864_v47 }
 0x494   : > { %4336 = vpow2.f32 %v1653_v55 }
 0x495   : > { %4338 = vpow2.f32 %v1655_v57 }
 0x496   : > { %4340 = vpow2.f32 %v1262_v53  ;;  %4171 = vmatpush3.bf16.msra.mxu0 %v4864_v47 }
 0x497   : > { %4342 = vpow2.f32 %v1264_v56 }
 0x49a   : > { %v4333_v60 = vpop.eup %4332 }
 0x49b   : > { %v4335_v61 = vpop.eup %4334  ;;  %v1462_v62 = vsel %vm975_vm2, %v4333_v60, 0.0 }
 0x49c   : > { %1463 = vadd.xlane.f32.xlu0 %v1462_v62  ;;  %v1465_v63 = vsel %vm975_vm2, %v4335_v61, 0.0 }
 0x49d   : > { %1466 = vadd.xlane.f32.xlu1 %v1465_v63 }
 0x49e   : > { %v4337_v0 = vpop.eup %4336 }
 0x49f   : > { %v4339_v1 = vpop.eup %4338  ;;  %v1657_v2 = vsel %vm975_vm2, %v4337_v0, 0.0 }
 0x4a0   : > { %v4341_v5 = vpop.eup %4340  ;;  %1658 = vadd.xlane.f32.xlu0 %v1657_v2  ;;  %v1660_v6 = vsel %vm975_vm2, %v4339_v1, 0.0 }
 0x4a1   : > { %v4343_v7 = vpop.eup %4342  ;;  %1661 = vadd.xlane.f32.xlu1 %v1660_v6  ;;  %v1266_v11 = vsel %vm975_vm2, %v4341_v5, 0.0 }
 0x4a2   : > { %v1269_v12 = vsel %vm975_vm2, %v4343_v7, 0.0 }
 0x4a4   : > { %1267 = vadd.xlane.f32.xlu0 %v1266_v11 }
 0x4a5   : > { %1270 = vadd.xlane.f32.xlu1 %v1269_v12 }
 0x4b6   : > { %1472 = vrot.lane.b32.xlu1 %v4796_v59, %s5276_s25  ;;  %s5280_s25 = smov 24  }
 0x4ba   : > { %1667 = vrot.lane.b32.xlu1 %v4796_v59, %s5274_s7  ;;  %1277 = vrot.lane.b32.xlu0 %v4796_v59, %s5278_s20  ;;  %s5284_s7 = smov 8   ;;  %s5282_s20 = smov 16  }
 0x529   : > { %v1464_v15 = vpop.xlane.xlu0 %1463 }
 0x52a   : > { %v1467_v17 = vpop.xlane.xlu1 %1466  ;;  %4344 = vrcp.f32 %v1464_v15 }
 0x52d   : > { %v1659_v18 = vpop.xlane.xlu0 %1658 }
 0x52e   : > { %v1662_v25 = vpop.xlane.xlu1 %1661 }
 0x531   : > { %v1268_v26 = vpop.xlane.xlu0 %1267 }
 0x532   : > { %4346 = vrcp.f32 %v1268_v26  ;;  %v1271_v27 = vpop.xlane.xlu1 %1270  ;;  %v712_v26 = vld [vmem:[%s5267_s16] sm:$0xff] }
 0x533   : > { %4348 = vrcp.f32 %v1271_v27  ;;  %v713_v27 = vld [vmem:[%s5267_s16 + $0x8] sm:$0xff] }
 0x534   : > { %4350 = vrcp.f32 %v1467_v17  ;;  %v4345_v30 = vpop.eup %4344  ;;  %v703_v17 = vld [vmem:[%s5264_s13] sm:$0xff] }
 0x535   : > { %v1278_v28 = vpop.permute.xlu0 %1277  ;;  %4352 = vrcp.f32 %v1659_v18  ;;  %v1470_v35 = vmul.f32 %v4345_v30, %v4333_v60  ;;  %v704_v18 = vld [vmem:[%s5264_s13 + $0x8] sm:$0xff]  ;;  %v715_v30 = vld [vmem:[%s5267_s16 + $0x18] sm:$0xff] }
 0x536   : > { %v1473_v29 = vpop.permute.xlu1 %1472  ;;  %3942 = vmatprep.subr.mxu1 %v1278_v28  ;;  %4354 = vrcp.f32 %v1662_v25  ;;  %v4910_v25 = vpack.c.bf16 %v704_v18, %v703_v17 }
 0x537   : > { %3943 = vmatpush3.msra.mxu1 %v1278_v28  ;;  %v714_v28 = vld [vmem:[%s5267_s16 + $0x10] sm:$0xff] }
 0x538   : > { %3952 = vmatprep.subr.mxu1 %v1473_v29 }
 0x53a   : > { %v1668_v37 = vpop.permute.xlu1 %1667 }
 0x53c   : > { %v4347_v31 = vpop.eup %4346 }
 0x53d   : > { %v4349_v59 = vpop.eup %4348  ;;  %v1274_v32 = vmul.f32 %v4347_v31, %v4341_v5  ;;  %v4927_v31 = vpack.c.bf16 %v715_v30, %v714_v28 }
 0x53e   : > { %v1275_v33 = vmul.f32 %v4349_v59, %v4343_v7  ;;  %v4351_v34 = vpop.eup %4350  ;;  %v716_v59 = vld [vmem:[%s5267_s16 + $0x20] sm:$0xff] }
 0x53f   : > { %3944 = vmatprep.mubr.msk.f32.mxu1 %vm975_vm2, %v1274_v32  ;;  %v4353_v36 = vpop.eup %4352  ;;  %v1471_v38 = vmul.f32 %v4351_v34, %v4335_v61  ;;  %v717_v32 = vld [vmem:[%s5267_s16 + $0x28] sm:$0xff]  ;;  %v4946_v34 = vld [vmem:[%s5263_s12] ss:$0 sm:$0xff] }
 0x540   : > { %3945 = vmatmul.mubr.msk.f32.vlgmr.msra.gmra.mrb[8].mxu1 %vm975_vm2, %v1275_v33  ;;  %v4355_v39 = vpop.eup %4354  ;;  %v1665_v40 = vmul.f32 %v4353_v36, %v4337_v0  ;;  %v4938_v33 = vpack.c.bf16 %v717_v32, %v716_v59  ;;  %v705_v36 = vld [vmem:[%s5264_s13 + $0x10] sm:$0xff] }
 0x541   : > { %3953 = vmatpush3.msra.mxu1 %v1473_v29  ;;  %3954 = vmatprep.mubr.msk.f32.mxu1 %vm975_vm2, %v1470_v35  ;;  %v1666_v41 = vmul.f32 %v4355_v39, %v4339_v1  ;;  %v4922_v29 = vpack.c.bf16 %v713_v27, %v712_v26 }
 0x542   : > { %3962 = vmatprep.subr.mxu1 %v1668_v37 }
 0x543   : > { %4189 = vmatprep.subr.bf16.mxu0 %v4922_v29 }
 0x544   : > { %3955 = vmatmul.mubr.msk.f32.vlgmr.msra.gmra.mrb[10].mxu1 %vm975_vm2, %v1471_v38 }
 0x545   : > { %3963 = vmatpush3.msra.mxu1 %v1668_v37  ;;  %3964 = vmatprep.mubr.msk.f32.mxu1 %vm975_vm2, %v1665_v40  ;;  %v706_v37 = vld [vmem:[%s5264_s13 + $0x18] sm:$0xff] }
 0x546   : > { %4173 = vmatprep.subr.bf16.mxu1 %v4874_v51 }
 0x548   : > { %3965 = vmatmul.mubr.msk.f32.vlgmr.msra.gmra.mrb[12].mxu1 %vm975_vm2, %v1666_v41  ;;  %v4956_v41 = vpack.c.bf16 %v706_v37, %v705_v36 }
 0x549   : > { %4175 = vmatpush3.bf16.msra.mxu1 %v4874_v51 }
 0x613   : > { %v3946_v50 = vpop.f32.mrb[8].mxu1 }
 0x614   : > { %1755 = vrot.lane.b32.xlu1 %v3946_v50, %s5284_s7  ;;  %v1352_v52 = vpop.f32.mrb[9].mxu1 }
 0x615   : > { %1753 = vrot.lane.b32.xlu0 %v1352_v52, %s5284_s7  ;;  %s5312_s7 = smov 112  }
 0x617   : > { %v3956_v53 = vpop.f32.mrb[10].mxu1 }
 0x618   : > { %1763 = vrot.lane.b32.xlu1 %v3956_v53, %s5282_s20  ;;  %v1547_v55 = vpop.f32.mrb[11].mxu1 }
 0x619   : > { %1761 = vrot.lane.b32.xlu0 %v1547_v55, %s5282_s20  ;;  %s5313_s20 = smov 104  }
 0x61b   : > { %v3966_v56 = vpop.f32.mrb[12].mxu1 }
 0x61c   : > { %1771 = vrot.lane.b32.xlu1 %v3966_v56, %s5280_s25  ;;  %v1742_v57 = vpop.f32.mrb[13].mxu1 }
 0x61d   : > { %1769 = vrot.lane.b32.xlu0 %v1742_v57, %s5280_s25  ;;  %s5308_s25 = sshll.u32 %s4681_s27, 4 }
 0x61e   : > { %s670_s4 = scalar_lea.vmem %s5309_s23, %s5308_s25  ;;  %s5311_s23 = smov 120  }
 0x61f   : > { %v4971_v42 = vld [vmem:[%s670_s4] sm:$0xff]  ;;  %v4980_v43 = vld [vmem:[%s670_s4 + $0x8] sm:$0xff]  ;;  %s5033_s4 = sand.u32 1, %s4474_s30   ;;  %s5314_s25 = smov 8  }
 0x620   : > { %s5287_s24 = sshll.u32 %s5033_s4, 4 }
 0x686   : > { %v1756_v60 = vpop.permute.xlu1 %1755 }
 0x687   : > { %v1754_v61 = vpop.permute.xlu0 %1753  ;;  %v1776_v2 = vsel %vm975_vm2, %v4820_v20, %v1756_v60  ;;  %v710_v20 = vld [vmem:[%s5265_s14 + $0x18] sm:$0xff] }
 0x688   : > { %v1775_v0 = vsel %vm975_vm2, %v4822_v21, %v1754_v61  ;;  %v709_v21 = vld [vmem:[%s5265_s14 + $0x10] sm:$0xff] }
 0x689   : > { %v4900_v15 = vpack.c.bf16 %v710_v20, %v709_v21 }
 0x68a   : > { %v1764_v62 = vpop.permute.xlu1 %1763 }
 0x68b   : > { %v1762_v63 = vpop.permute.xlu0 %1761  ;;  %v1779_v7 = vsel %vm1777_vm3, %v1776_v2, %v1764_v62  ;;  %4177 = vmatprep.subr.bf16.mxu1 %v4900_v15 }
 0x68c   : > { %v1778_v5 = vsel %vm1777_vm3, %v1775_v0, %v1762_v63  ;;  %4179 = vmatpush3.bf16.msra.mxu1 %v4900_v15 }
 0x68d   : > { %4181 = vmatprep.subr.bf16.mxu1 %v4910_v25 }
 0x68e   : > { %v1772_v1 = vpop.permute.xlu1 %1771 }
 0x68f   : > { %v1770_v6 = vpop.permute.xlu0 %1769  ;;  %v1782_v12 = vsel %vm1780_vm4, %v1779_v7, %v1772_v1 }
 0x690   : > { %v1781_v11 = vsel %vm1780_vm4, %v1778_v5, %v1770_v6 }
 0x691   : > { %3975 = vmatprep.mubr.msk.f32.mxu0 %vm732_vm1, %v1781_v11 }
 0x692   : > { %3976 = vmatmul.mubr.msk.f32.vlgmr.msra.gmra.mrb[8].mxu0 %vm732_vm1, %v1782_v12 }
 0x693   : > { %4191 = vmatpush3.bf16.msra.mxu0 %v4922_v29 }
 0x694   : > { %4193 = vmatprep.subr.bf16.mxu0 %v4927_v31 }
 0x697   : > { %4195 = vmatpush3.bf16.msra.mxu0 %v4927_v31 }
 0x698   : > { %4197 = vmatprep.subr.bf16.mxu0 %v4938_v33 }
 0x69b   : > { %4199 = vmatpush3.bf16.msra.mxu0 %v4938_v33 }
 0x765   : > { %v3977_v35 = vpop.f32.mrb[8].mxu0 }
 0x766   : > { %v1861_v38 = vpop.f32.mrb[9].mxu0  ;;  %v1867_v40 = vadd.f32 %v3977_v35, %v4946_v34 }
 0x767   : > { %v1862_v39 = vadd.f32 %v4946_v34, %v1861_v38 }
 0x769   : > { %3986 = vmatprep.mubr.msk.f32.mxu1 %vm732_vm1, %v1862_v39 }
 0x76a   : > { %3987 = vmatmul.mubr.msk.f32.vlgmr.msra.gmra.mrb[14].mxu1 %vm732_vm1, %v1867_v40 }
 0x76b   : > { %4183 = vmatpush3.bf16.msra.mxu1 %v4910_v25  ;;  %3997 = vmatprep.mubr.msk.f32.mxu1 %vm732_vm1, %v4702_v14 }
 0x76c   : > { %4185 = vmatprep.subr.bf16.mxu1 %v4956_v41 }
 0x76f   : > { %4187 = vmatpush3.bf16.msra.mxu1 %v4956_v41 }
 0x770   : > { %4205 = vmatprep.subr.bf16.mxu1 %v4655_v4 }
 0x772   : > { %3998 = vmatmul.mubr.msk.f32.vlgmr.msra.gmra.mrb[14].mxu1 %vm732_vm1, %v4706_v16 }
 0x773   : > { %4207 = vmatpush3.bf16.msra.mxu1 %v4655_v4  ;;  %4027 = vmatprep.mubr.msk.f32.mxu1 %vm732_vm1, %v4971_v42  ;;  %v723_v4 = vld [vmem:[%s678_s5] sm:$0xff]  ;;  %s5047_s5 = scalar_lea.vmem [#allocation2], %s5287_s24 }
 0x774   : > { %4209 = vmatprep.subr.bf16.mxu1 %v4671_v10  ;;  %s3505_s22 = sshll.u32 %s5047_s5, 4  ;;  %s5161_s22 = int_to_ptr.vmem [resolvable:$true] %s3505_s22 }
 0x777   : > { %4211 = vmatpush3.bf16.msra.mxu1 %v4671_v10  ;;  %v718_v10 = vld [vmem:[%s5267_s16 + $0x30] sm:$0xff] }
 0x778   : > { %4218 = vmatprep.subr.bf16.mxu1 %v4484_v3 }
 0x77a   : > { %4028 = vmatmul.mubr.msk.f32.vlgmr.msra.gmra.mrb[16].mxu1 %vm732_vm1, %v4980_v43 }
 0x77b   : > { %4220 = vmatpush3.bf16.msra.mxu1 %v4722_v19  ;;  %4049 = vmatprep.mubr.msk.f32.mxu1 %vm4485_vm0, %v4486_v8  ;;  %v719_v19 = vld [vmem:[%s5267_s16 + $0x38] sm:$0xff] }
 0x77c   : > { %4221 = vmatprep.subr.bf16.mxu1 %v4484_v3  ;;  %v5001_v45 = vpack.c.bf16 %v719_v19, %v718_v10 }
 0x77e   : > { %4201 = vmatprep.subr.bf16.mxu0 %v5001_v45 }
 0x77f   : > { %4223 = vmatpush3.bf16.msra.mxu1 %v4732_v22  ;;  %4203 = vmatpush3.bf16.msra.mxu0 %v5001_v45  ;;  %v5009_v22 = vld [vmem:[%s5266_s15] ss:$0 sm:$0xff] }
 0x780   : > { %4212 = vmatprep.subr.bf16.mxu0 %v4484_v3 }
 0x782   : > { %4050 = vmatmul.mubr.msk.f32.vlgmr.msra.gmra.mrb[18].mxu1 %vm732_vm1, %v723_v4 }
 0x845   : > { %v3999_v46 = vpop.f32.mrb[14].mxu1 }
 0x846   : > { %v2033_v48 = vadd.f32 %v3999_v46, %v5009_v22  ;;  %v2017_v49 = vpop.f32.mrb[15].mxu1 }
 0x847   : > { %v2032_v50 = vadd.f32 %v5009_v22, %v2017_v49 }
 0x848   : > { %v2035_v53 = vmax.f32 %v2033_v48, 0.0 }
 0x849   : > { %v2034_v52 = vmax.f32 %v2032_v50, 0.0 }
 0x84b   : > { %4016 = vmatprep.mubr.msk.f32.mxu0 %vm2042_vm5, %v2034_v52 }
 0x84c   : > { %4017 = vmatmul.mubr.msk.f32.vlgmr.msra.gmra.mrb[10].mxu0 %vm2042_vm5, %v2035_v53 }
 0x84d   : > { %4214 = vmatpush3.bf16.msra.mxu0 %v4669_v9  ;;  %v4029_v55 = vpop.f32.mrb[16].mxu1  ;;  %4038 = vmatprep.mubr.msk.f32.mxu0 %vm4485_vm0, %v4486_v8 }
 0x84e   : > { %4215 = vmatprep.subr.bf16.mxu0 %v4484_v3  ;;  %v2208_v56 = vadd.f32 %v4029_v55, %v4744_v24  ;;  %v2202_v57 = vpop.f32.mrb[17].mxu1 }
 0x84f   : > { %v2203_v60 = vadd.f32 %v4744_v24, %v2202_v57 }
 0x850   : > { %2546 = vrot.lane.b32.xlu0 %v2208_v56, %s5311_s23 }
 0x851   : > { %4217 = vmatpush3.bf16.msra.mxu0 %v4685_v13  ;;  %2544 = vrot.lane.b32.xlu1 %v2203_v60, %s5311_s23  ;;  %v5038_v13 = vld [vmem:[%s5268_s17] ss:$0 sm:$0xff] }
 0x854   : > { %4039 = vmatmul.mubr.msk.f32.vlgmr.msra.gmra.mrb[12].mxu0 %vm732_vm1, %v723_v4 }
 0x855   : > { %v2350_v9 = vpop.f32.mrb[18].mxu1  ;;  %4054 = vmatprep.mubr.msk.f32.mxu0 %vm975_vm2, %v2203_v60 }
 0x856   : > { %v2351_v8 = vadd.f32 %v4790_v54, %v2350_v9  ;;  %v4051_v61 = vpop.f32.mrb[19].mxu1 }
 0x858   : > { %v5028_v3 = vmul.f32 %v2351_v8, %v4793_v58 }
 0x85a   : > { %4057 = vmatprep.subr.mxu1 %v5028_v3 }
 0x85b   : > { %4058 = vmatpush3.msra.mxu1 %v5028_v3 }
 0x91f   : > { %v4018_v24 = vpop.f32.mrb[10].mxu0 }
 0x920   : > { %v2121_v54 = vadd.f32 %v4018_v24, %v5038_v13  ;;  %v2115_v62 = vpop.f32.mrb[11].mxu0 }
 0x921   : > { %v2116_v58 = vadd.f32 %v5038_v13, %v2115_v62 }
 0x922   : > { %v2125_v63 = vadd.f32 %v2121_v54, %v4706_v16  ;;  %v2547_v16 = vpop.permute.xlu0 %2546 }
 0x923   : > { %v2124_v0 = vadd.f32 %v2116_v58, %v4702_v14  ;;  %v2545_v14 = vpop.permute.xlu1 %2544 }
 0x924   : > { %2127 = vst.msk [vmem:[%s5047_s5 + $0x8] sm:$0xff] %vm732_vm1, %v2125_v63 }
 0x925   : > { %2126 = vst.msk [vmem:[%s5047_s5] sm:$0xff] %vm732_vm1, %v2124_v0 }
 0x927   : > { %v2280_v1 = vpop.f32.mrb[12].mxu0 }
 0x928   : > { %v2281_v2 = vadd.f32 %v4739_v23, %v2280_v1  ;;  %v4040_v5 = vpop.f32.mrb[13].mxu0 }
 0x92a   : > { %2744 = vrot.lane.b32.xlu1 %v2281_v2, %s5312_s7  ;;  %2548 = vrot.lane.b32.xlu0 %v2281_v2, %s5311_s23 }
 0x92b   : > { %4052 = vmatprep.subr.msk.mxu0 %vm975_vm2, %v2281_v2 }
 0x92c   : > { %4053 = vmatpush3.xpose.msk.msra.mxu0 %vm975_vm2, %v2281_v2 }
 0x92e   : > { %2742 = vrot.lane.b32.xlu1 %v2208_v56, %s5312_s7  ;;  %2740 = vrot.lane.b32.xlu0 %v2203_v60, %s5312_s7 }
 0x92f   : > { %4055 = vmatmul.mubr.msk.f32.vlgmr.msra.gmra.mrb[14].mxu0 %vm975_vm2, %v2208_v56 }
 0x930   : > { %4064 = vmatprep.mubr.msk.f32.mxu0 %vm975_vm2, %v2545_v14 }
 0x932   : > { %2935 = vrot.lane.b32.xlu1 %v2203_v60, %s5313_s20  ;;  %2939 = vrot.lane.b32.xlu0 %v2281_v2, %s5313_s20 }
 0x936   : > { %2937 = vrot.lane.b32.xlu0 %v2208_v56, %s5313_s20 }
 0x99c   : > { %v2745_v23 = vpop.permute.xlu1 %2744  ;;  %v2549_v6 = vpop.permute.xlu0 %2548 }
 0x99d   : > { %4062 = vmatprep.subr.msk.mxu0 %vm975_vm2, %v2549_v6 }
 0x99e   : > { %4063 = vmatpush3.xpose.msk.msra.mxu0 %vm975_vm2, %v2549_v6 }
 0x99f   : > { %4072 = vmatprep.subr.msk.mxu0 %vm975_vm2, %v2745_v23 }
 0x9a0   : > { %v2743_v7 = vpop.permute.xlu1 %2742  ;;  %v2741_v11 = vpop.permute.xlu0 %2740 }
 0x9a1   : > { %4065 = vmatmul.mubr.msk.f32.vlgmr.msra.gmra.mrb[16].mxu0 %vm975_vm2, %v2547_v16 }
 0x9a2   : > { %4073 = vmatpush3.xpose.msk.msra.mxu0 %vm975_vm2, %v2745_v23  ;;  %4074 = vmatprep.mubr.msk.f32.mxu0 %vm975_vm2, %v2741_v11 }
 0x9a4   : > { %v2936_v12 = vpop.permute.xlu1 %2935  ;;  %v2940_v21 = vpop.permute.xlu0 %2939 }
 0x9a5   : > { %4075 = vmatmul.mubr.msk.f32.vlgmr.msra.gmra.mrb[18].mxu0 %vm975_vm2, %v2743_v7  ;;  %4082 = vmatprep.subr.msk.mxu0 %vm975_vm2, %v2940_v21 }
 0x9a6   : > { %4083 = vmatpush3.xpose.msk.msra.mxu0 %vm975_vm2, %v2940_v21  ;;  %4084 = vmatprep.mubr.msk.f32.mxu0 %vm975_vm2, %v2936_v12 }
 0x9a7   : > { %4225 = vmatprep.subr.bf16.mxu0 %v4854_v44 }
 0x9a8   : > { %v2938_v20 = vpop.permute.xlu0 %2937 }
 0x9a9   : > { %4085 = vmatmul.mubr.msk.f32.vlgmr.msra.gmra.mrb[20].mxu0 %vm975_vm2, %v2938_v20 }
 0x9aa   : > { %4227 = vmatpush3.bf16.msra.mxu0 %v4854_v44 }
 0x9ab   : > { %4229 = vmatprep.subr.bf16.mxu0 %v4864_v47 }
 0x9ae   : > { %4231 = vmatpush3.bf16.msra.mxu0 %v4864_v47 }
 0x9af   : > { %4249 = vmatprep.subr.bf16.mxu0 %v4922_v29 }
 0xa02   : > { %v4056_v17 = vpop.f32.mrb[14].mxu0 }
 0xa03   : > { %v2440_v18 = vmul.f32 0.35355338, %v4056_v17  ;;  %v2430_v26 = vpop.f32.mrb[15].mxu0 }
 0xa04   : > { %v2439_v27 = vmul.f32 0.35355338, %v2430_v26 }
 0xa05   : > { %v2444_v28 = vsel %vm975_vm2, %v2440_v18, -inf }
 0xa06   : > { %2445 = vmax.xlane.f32.xlu0 %v2444_v28  ;;  %v2441_v30 = vsel %vm975_vm2, %v2439_v27, -inf }
 0xa07   : > { %2442 = vmax.xlane.f32.xlu1 %v2441_v30 }
 0xa74   : > { %v4066_v59 = vpop.f32.mrb[16].mxu0 }
 0xa75   : > { %v2632_v32 = vmul.f32 0.35355338, %v4066_v59  ;;  %v2622_v35 = vpop.f32.mrb[17].mxu0 }
 0xa76   : > { %v2631_v44 = vmul.f32 0.35355338, %v2622_v35 }
 0xa77   : > { %v2636_v36 = vsel %vm975_vm2, %v2632_v32, -inf }
 0xa78   : > { %v4076_v37 = vpop.f32.mrb[18].mxu0  ;;  %2637 = vmax.xlane.f32.xlu1 %v2636_v36  ;;  %v2633_v47 = vsel %vm975_vm2, %v2631_v44, -inf }
 0xa79   : > { %v2828_v38 = vmul.f32 0.35355338, %v4076_v37  ;;  %v2818_v39 = vpop.f32.mrb[19].mxu0  ;;  %2634 = vmax.xlane.f32.xlu0 %v2633_v47 }
 0xa7a   : > { %v2827_v40 = vmul.f32 0.35355338, %v2818_v39 }
 0xa7b   : > { %v2832_v4 = vsel %vm975_vm2, %v2828_v38, -inf }
 0xa7c   : > { %v4086_v10 = vpop.f32.mrb[20].mxu0  ;;  %2833 = vmax.xlane.f32.xlu1 %v2832_v4  ;;  %v2829_v19 = vsel %vm975_vm2, %v2827_v40, -inf }
 0xa7d   : > { %v3023_v46 = vmul.f32 0.35355338, %v4086_v10  ;;  %v3013_v48 = vpop.f32.mrb[21].mxu0  ;;  %2830 = vmax.xlane.f32.xlu0 %v2829_v19 }
 0xa7e   : > { %v3022_v49 = vmul.f32 0.35355338, %v3013_v48 }
 0xa7f   : > { %v3027_v50 = vsel %vm975_vm2, %v3023_v46, -inf }
 0xa80   : > { %3028 = vmax.xlane.f32.xlu1 %v3027_v50  ;;  %v3024_v52 = vsel %vm975_vm2, %v3022_v49, -inf }
 0xa81   : > { %3025 = vmax.xlane.f32.xlu0 %v3024_v52 }
 0xa93   : > { %v2446_v53 = vpop.xlane.xlu0 %2445 }
 0xa94   : > { %v2448_v55 = vsub.f32 %v2440_v18, %v2446_v53  ;;  %v2443_v56 = vpop.xlane.xlu1 %2442 }
 0xa95   : > { %v2447_v57 = vsub.f32 %v2439_v27, %v2443_v56 }
 0xa96   : > { %v2451_v60 = vmul.f32 1.442695, %v2448_v55 }
 0xa97   : > { %v2449_v9 = vmul.f32 1.442695, %v2447_v57 }
 0xa98   : > { %4356 = vpow2.f32 %v2451_v60 }
 0xa99   : > { %4358 = vpow2.f32 %v2449_v9 }
 0xaa2   : > { %v4357_v8 = vpop.eup %4356 }
 0xaa3   : > { %v4359_v61 = vpop.eup %4358  ;;  %v2456_v24 = vsel %vm975_vm2, %v4357_v8, 0.0 }
 0xaa4   : > { %2457 = vadd.xlane.f32.xlu1 %v2456_v24  ;;  %v2453_v54 = vsel %vm975_vm2, %v4359_v61, 0.0 }
 0xaa5   : > { %2454 = vadd.xlane.f32.xlu0 %v2453_v54 }
 0xb05   : > { %v2638_v62 = vpop.xlane.xlu1 %2637 }
 0xb06   : > { %v2640_v58 = vsub.f32 %v2632_v32, %v2638_v62  ;;  %v2635_v63 = vpop.xlane.xlu0 %2634 }
 0xb07   : > { %v2639_v0 = vsub.f32 %v2631_v44, %v2635_v63 }
 0xb08   : > { %v2643_v1 = vmul.f32 1.442695, %v2640_v58 }
 0xb09   : > { %v2641_v2 = vmul.f32 1.442695, %v2639_v0  ;;  %v2834_v5 = vpop.xlane.xlu1 %2833 }
 0xb0a   : > { %4360 = vpow2.f32 %v2643_v1  ;;  %v2836_v14 = vsub.f32 %v2828_v38, %v2834_v5  ;;  %v2831_v16 = vpop.xlane.xlu0 %2830 }
 0xb0b   : > { %4362 = vpow2.f32 %v2641_v2  ;;  %v2835_v23 = vsub.f32 %v2827_v40, %v2831_v16 }
 0xb0c   : > { %v2839_v6 = vmul.f32 1.442695, %v2836_v14 }
 0xb0d   : > { %v2837_v7 = vmul.f32 1.442695, %v2835_v23  ;;  %v3029_v11 = vpop.xlane.xlu1 %3028 }
 0xb0e   : > { %4364 = vpow2.f32 %v2839_v6  ;;  %v3031_v12 = vsub.f32 %v3023_v46, %v3029_v11  ;;  %v3026_v21 = vpop.xlane.xlu0 %3025 }
 0xb0f   : > { %4366 = vpow2.f32 %v2837_v7  ;;  %v3030_v20 = vsub.f32 %v3022_v49, %v3026_v21 }
 0xb10   : > { %v3034_v17 = vmul.f32 1.442695, %v3031_v12 }
 0xb11   : > { %v3032_v18 = vmul.f32 1.442695, %v3030_v20 }
 0xb12   : > { %4368 = vpow2.f32 %v3034_v17 }
 0xb13   : > { %4370 = vpow2.f32 %v3032_v18 }
 0xb14   : > { %v4361_v26 = vpop.eup %4360 }
 0xb15   : > { %v4363_v27 = vpop.eup %4362  ;;  %v2648_v28 = vsel %vm975_vm2, %v4361_v26, 0.0 }
 0xb16   : > { %2649 = vadd.xlane.f32.xlu1 %v2648_v28  ;;  %v2645_v30 = vsel %vm975_vm2, %v4363_v27, 0.0 }
 0xb17   : > { %2646 = vadd.xlane.f32.xlu0 %v2645_v30 }
 0xb18   : > { %v4365_v59 = vpop.eup %4364 }
 0xb19   : > { %v4367_v32 = vpop.eup %4366  ;;  %v2844_v35 = vsel %vm975_vm2, %v4365_v59, 0.0 }
 0xb1a   : > { %2845 = vadd.xlane.f32.xlu1 %v2844_v35  ;;  %v2841_v44 = vsel %vm975_vm2, %v4367_v32, 0.0 }
 0xb1b   : > { %2842 = vadd.xlane.f32.xlu0 %v2841_v44 }
 0xb1c   : > { %v4369_v36 = vpop.eup %4368 }
 0xb1d   : > { %v4371_v37 = vpop.eup %4370  ;;  %v3039_v47 = vsel %vm975_vm2, %v4369_v36, 0.0 }
 0xb1e   : > { %3040 = vadd.xlane.f32.xlu1 %v3039_v47  ;;  %v3036_v38 = vsel %vm975_vm2, %v4371_v37, 0.0 }
 0xb1f   : > { %3037 = vadd.xlane.f32.xlu0 %v3036_v38 }
 0xb2f   : > { %2851 = vrot.lane.b32.xlu1 %v5028_v3, %s5312_s7 }
 0xb31   : > { %v2458_v39 = vpop.xlane.xlu1 %2457 }
 0xb32   : > { %4372 = vrcp.f32 %v2458_v39  ;;  %v2455_v40 = vpop.xlane.xlu0 %2454 }
 0xb33   : > { %4374 = vrcp.f32 %v2455_v40  ;;  %3046 = vrot.lane.b32.xlu1 %v5028_v3, %s5313_s20 }
 0xb35   : > { %2656 = vrot.lane.b32.xlu0 %v5028_v3, %s5311_s23  ;;  %s5288_s23 = sshll.u32 %s4618_s1, 8 }
 0xb36   : > { %s5159_s7 = scalar_lea.hbm %s5269_s18, %s5288_s23 }
 0xb3c   : > { %v4373_v4 = vpop.eup %4372 }
 0xb3d   : > { %v4375_v10 = vpop.eup %4374  ;;  %v2462_v46 = vmul.f32 %v4373_v4, %v4357_v8 }
 0xb3e   : > { %v2461_v19 = vmul.f32 %v4375_v10, %v4359_v61 }
 0xb40   : > { %4059 = vmatprep.mubr.msk.f32.mxu1 %vm975_vm2, %v2461_v19 }
 0xb41   : > { %4060 = vmatmul.mubr.msk.f32.vlgmr.msra.gmra.mrb[20].mxu1 %vm975_vm2, %v2462_v46 }
 0xba3   : > { %v2650_v48 = vpop.xlane.xlu1 %2649 }
 0xba4   : > { %4376 = vrcp.f32 %v2650_v48  ;;  %v2647_v49 = vpop.xlane.xlu0 %2646 }
 0xba5   : > { %4378 = vrcp.f32 %v2647_v49 }
 0xba7   : > { %v2846_v50 = vpop.xlane.xlu1 %2845 }
 0xba8   : > { %4380 = vrcp.f32 %v2846_v50  ;;  %v2843_v52 = vpop.xlane.xlu0 %2842 }
 0xba9   : > { %4382 = vrcp.f32 %v2843_v52 }
 0xbab   : > { %v3041_v53 = vpop.xlane.xlu1 %3040 }
 0xbac   : > { %4384 = vrcp.f32 %v3041_v53  ;;  %v3038_v55 = vpop.xlane.xlu0 %3037 }
 0xbad   : > { %4386 = vrcp.f32 %v3038_v55 }
 0xbae   : > { %v4377_v3 = vpop.eup %4376 }
 0xbaf   : > { %v4379_v56 = vpop.eup %4378  ;;  %v2852_v57 = vpop.permute.xlu1 %2851  ;;  %v2654_v8 = vmul.f32 %v4377_v3, %v4361_v26 }
 0xbb0   : > { %v2657_v60 = vpop.permute.xlu0 %2656  ;;  %v2653_v9 = vmul.f32 %v4379_v56, %v4363_v27 }
 0xbb1   : > { %4067 = vmatprep.subr.mxu1 %v2657_v60 }
 0xbb2   : > { %v4381_v61 = vpop.eup %4380  ;;  %4068 = vmatpush3.msra.mxu1 %v2657_v60  ;;  %4069 = vmatprep.mubr.msk.f32.mxu1 %vm975_vm2, %v2653_v9 }
 0xbb3   : > { %v4383_v24 = vpop.eup %4382  ;;  %4070 = vmatmul.mubr.msk.f32.vlgmr.msra.gmra.mrb[22].mxu1 %vm975_vm2, %v2654_v8  ;;  %4077 = vmatprep.subr.mxu1 %v2852_v57  ;;  %v3047_v54 = vpop.permute.xlu1 %3046  ;;  %v2850_v58 = vmul.f32 %v4381_v61, %v4365_v59 }
 0xbb4   : > { %4078 = vmatpush3.msra.mxu1 %v2852_v57  ;;  %v2849_v62 = vmul.f32 %v4383_v24, %v4367_v32 }
 0xbb5   : > { %4087 = vmatprep.subr.mxu1 %v3047_v54 }
 0xbb6   : > { %v4385_v63 = vpop.eup %4384  ;;  %4079 = vmatprep.mubr.msk.f32.mxu1 %vm975_vm2, %v2849_v62 }
 0xbb7   : > { %v4387_v0 = vpop.eup %4386  ;;  %4080 = vmatmul.mubr.msk.f32.vlgmr.msra.gmra.mrb[24].mxu1 %vm975_vm2, %v2850_v58  ;;  %v3045_v2 = vmul.f32 %v4385_v63, %v4369_v36 }
 0xbb8   : > { %4088 = vmatpush3.msra.mxu1 %v3047_v54  ;;  %v3044_v1 = vmul.f32 %v4387_v0, %v4371_v37 }
 0xbb9   : > { %4233 = vmatprep.subr.bf16.mxu1 %v4874_v51 }
 0xbba   : > { %4089 = vmatprep.mubr.msk.f32.mxu1 %vm975_vm2, %v3044_v1 }
 0xbbb   : > { %4090 = vmatmul.mubr.msk.f32.vlgmr.msra.gmra.mrb[26].mxu1 %vm975_vm2, %v3045_v2 }
 0xbbc   : > { %4235 = vmatpush3.bf16.msra.mxu1 %v4874_v51 }
 0xbbd   : > { %4237 = vmatprep.subr.bf16.mxu1 %v4900_v15 }
 0xbc0   : > { %4239 = vmatpush3.bf16.msra.mxu1 %v4900_v15 }
 0xbc1   : > { %4241 = vmatprep.subr.bf16.mxu1 %v4910_v25 }
 0xc14   : > { %v4061_v5 = vpop.f32.mrb[20].mxu1 }
 0xc15   : > { %v2535_v14 = vpop.f32.mrb[21].mxu1 }
 0xc86   : > { %v4071_v16 = vpop.f32.mrb[22].mxu1 }
 0xc87   : > { %3134 = vrot.lane.b32.xlu1 %v4071_v16, %s5314_s25  ;;  %v2731_v23 = vpop.f32.mrb[23].mxu1 }
 0xc88   : > { %3132 = vrot.lane.b32.xlu0 %v2731_v23, %s5314_s25 }
 0xc8a   : > { %v4081_v6 = vpop.f32.mrb[24].mxu1 }
 0xc8b   : > { %3142 = vrot.lane.b32.xlu1 %v4081_v6, %s5315_s2  ;;  %v2926_v7 = vpop.f32.mrb[25].mxu1 }
 0xc8c   : > { %3140 = vrot.lane.b32.xlu0 %v2926_v7, %s5315_s2  ;;  %s4388_s2 = scalar_lea.vmem %s5161_s22, 256 }
 0xc8d   : > { %p4389_p11 = scmp.ne.s32.totalorder %s5161_s22, %s4388_s2 }
 0xc8e   : > { %v4091_v51 = vpop.f32.mrb[26].mxu1 }
 0xc8f   : > { %3150 = vrot.lane.b32.xlu1 %v4091_v51, %s5316_s29  ;;  %v3121_v15 = vpop.f32.mrb[27].mxu1  ;;  %p4390_p12 = pnand %p4389_p11, %p4635_p5 }
 0xc90   : > { %3148 = vrot.lane.b32.xlu0 %v3121_v15, %s5316_s29  ;;  %s4494_s29 = smov [#allocation2]  }
 0xc91   : > { %p4391_p13 = pneg %p4390_p12  ;;  %s4392_s5 = sshll.u32 %s4494_s29, 4  ;;  %s4393_s5 = int_to_ptr.vmem [resolvable:$false] %s4392_s5 }
 0xc92   : > { %s4394_s24 = scalar_lea.vmem %s4393_s5, 512  ;;  %p4395_p0 = scmp.lt.s32.totalorder %s5161_s22, %s4393_s5 }
 0xc93   : > { %p4396_p1 = scmp.lt.s32.totalorder %s4394_s24, %s4388_s2 }
 0xc95   : > { %p4397_p2 = por %p4396_p1, %p4395_p0 }
 0xc97   : > { %p4398_p3 = pnand %p4397_p2, %p4391_p13 }
 0xcf9   : > { %v3135_v11 = vpop.permute.xlu1 %3134 }
 0xcfa   : > { %v3133_v12 = vpop.permute.xlu0 %3132  ;;  %v3155_v26 = vsel %vm975_vm2, %v4061_v5, %v3135_v11 }
 0xcfb   : > { %v3154_v17 = vsel %vm975_vm2, %v2535_v14, %v3133_v12 }
 0xcfd   : > { %v3143_v21 = vpop.permute.xlu1 %3142 }
 0xcfe   : > { %v3141_v20 = vpop.permute.xlu0 %3140  ;;  %v3157_v30 = vsel %vm1777_vm3, %v3155_v26, %v3143_v21 }
 0xcff   : > { %v3156_v27 = vsel %vm1777_vm3, %v3154_v17, %v3141_v20 }
 0xd01   : > { %v3151_v18 = vpop.permute.xlu1 %3150 }
 0xd02   : > { %v3149_v28 = vpop.permute.xlu0 %3148  ;;  %v3159_v32 = vsel %vm1780_vm4, %v3157_v30, %v3151_v18 }
 0xd03   : > { %v3158_v59 = vsel %vm1780_vm4, %v3156_v27, %v3149_v28 }
 0xd04   : > { %4100 = vmatprep.mubr.msk.f32.mxu0 %vm732_vm1, %v3158_v59 }
 0xd05   : > { %4101 = vmatmul.mubr.msk.f32.vlgmr.msra.gmra.mrb[22].mxu0 %vm732_vm1, %v3159_v32 }
 0xd06   : > { %4251 = vmatpush3.bf16.msra.mxu0 %v4922_v29 }
 0xd07   : > { %4253 = vmatprep.subr.bf16.mxu0 %v4927_v31 }
 0xd0a   : > { %4255 = vmatpush3.bf16.msra.mxu0 %v4927_v31 }
 0xd0b   : > { %4257 = vmatprep.subr.bf16.mxu0 %v4938_v33 }
 0xd0e   : > { %4259 = vmatpush3.bf16.msra.mxu0 %v4938_v33 }
 0xd0f   : > { %4261 = vmatprep.subr.bf16.mxu0 %v5001_v45 }
 0xd12   : > { %4263 = vmatpush3.bf16.msra.mxu0 %v5001_v45 }
 0xdd8   : > { %v4102_v35 = vpop.f32.mrb[22].mxu0 }
 0xdd9   : > { %v3232_v44 = vpop.f32.mrb[23].mxu0  ;;  %v3238_v37 = vadd.f32 %v4102_v35, %v4946_v34 }
 0xdda   : > { %v3233_v36 = vadd.f32 %v4946_v34, %v3232_v44 }
 0xddc   : > { %4111 = vmatprep.mubr.msk.f32.mxu1 %vm732_vm1, %v3233_v36 }
 0xddd   : > { %4112 = vmatmul.mubr.msk.f32.vlgmr.msra.gmra.mrb[28].mxu1 %vm732_vm1, %v3238_v37 }
 0xdde   : > { %4243 = vmatpush3.bf16.msra.mxu1 %v4910_v25  ;;  %4122 = vmatprep.mubr.msk.f32.mxu1 %vm732_vm1, %v4971_v42 }
 0xddf   : > { %4245 = vmatprep.subr.bf16.mxu1 %v4956_v41 }
 0xde2   : > { %4247 = vmatpush3.bf16.msra.mxu1 %v4956_v41 }
 0xde5   : > { %4123 = vmatmul.mubr.msk.f32.vlgmr.msra.gmra.mrb[28].mxu1 %vm732_vm1, %v4980_v43 }
 0xeb8   : > { %v4124_v29 = vpop.f32.mrb[28].mxu1 }
 0xeb9   : > { %v3398_v31 = vadd.f32 %v4124_v29, %v5009_v22  ;;  %v3388_v33 = vpop.f32.mrb[29].mxu1 }
 0xeba   : > { %v3397_v34 = vadd.f32 %v5009_v22, %v3388_v33 }
 0xebb   : > { %v3400_v25 = vmax.f32 %v3398_v31, 0.0 }
 0xebc   : > { %v3399_v45 = vmax.f32 %v3397_v34, 0.0 }
 0xebe   : > { %4141 = vmatprep.mubr.msk.f32.mxu0 %vm2042_vm5, %v3399_v45 }
 0xebf   : > { %4142 = vmatmul.mubr.msk.f32.vlgmr.msra.gmra.mrb[24].mxu0 %vm2042_vm5, %v3400_v25 }
 0xec0   : > { %4401 = shalt.err (!%p4398_p3)
}
 0xec1   : > { %s4402_s27 = scalar_lea.hbm %s5159_s7, 256  ;;  %s4406_s29 = scalar_lea.hbm %s5269_s18, 512 }
 0xec2   : > { %p4403_p4 = scmp.ne.s32.totalorder %s5159_s7, %s4402_s27  ;;  %p4407_p9 = scmp.lt.u32.totalorder %s5159_s7, %s5269_s18 }
 0xec3   : > { %p4408_p10 = scmp.lt.u32.totalorder %s4406_s29, %s4402_s27  ;;  %p4410_p12 = scmp.lt.u32.totalorder %s4402_s27, %s5159_s7 }
 0xec4   : > { %p4404_p7 = pnand %p4403_p4, %p4635_p5 }
 0xec5   : > { %p4409_p11 = por %p4408_p10, %p4407_p9 }
 0xec6   : > { %p4405_p8 = pneg %p4404_p7 }
 0xec7   : > { %p4411_p13 = por %p4410_p12, %p4409_p11 }
 0xec9   : > { %p4412_p0 = pnand %p4411_p13, %p4405_p8 }
 0xecb   : > { %4415 = shalt.err (!%p4412_p0)
}
 0xecc   : > { %s4495_s24 = smov 128   ;;  %s5317_s2 = scalar_lea.sflag [#allocation3], %s5033_s4 }
 0xecd   : > { %4268 = dma.vmem_to_hbm [thread:$0]  (%p4635_p5), %s5161_s22, 256, %s5159_s7, %s5317_s2, %s4495_s24, %s4495_s24, %s5314_s25  }
 0xece   : > { %s5318_s23 = sshll.u32 %s5033_s4, 4  ;;  %s5319_s28 = sshll.u32 %s4618_s1, 8 }
 0xecf   : > { %s660_s20 = scalar_lea.vmem [#allocation4], %s5318_s23  ;;  %s5201_s6 = scalar_lea.hbm %s5270_s19, %s5319_s28 }
 0xed0   : > { %s3521_s27 = sshll.u32 %s660_s20, 4  ;;  %s3492_s22 = scalar_lea.sflag [#allocation5], %s5033_s4  ;;  %s5203_s27 = int_to_ptr.vmem [resolvable:$true] %s3521_s27 }
 0xed1   : > { %s4416_s7 = scalar_lea.vmem %s5203_s27, 256  ;;  %s4496_s1 = smov [#allocation4]  }
 0xed2   : > { %p4417_p1 = scmp.ne.s32.totalorder %s5203_s27, %s4416_s7  ;;  %s4420_s2 = sshll.u32 %s4496_s1, 4  ;;  %s4421_s2 = int_to_ptr.vmem [resolvable:$false] %s4420_s2 }
 0xed3   : > { %s4422_s23 = scalar_lea.vmem %s4421_s2, 512  ;;  %p4423_p4 = scmp.lt.s32.totalorder %s5203_s27, %s4421_s2 }
 0xed4   : > { %p4418_p2 = pnand %p4417_p1, %p4635_p5  ;;  %p4424_p7 = scmp.lt.s32.totalorder %s4422_s23, %s4416_s7 }
 0xed6   : > { %p4419_p3 = pneg %p4418_p2  ;;  %p4425_p8 = por %p4424_p7, %p4423_p4 }
 0xed8   : > { %p4426_p9 = pnand %p4425_p8, %p4419_p3 }
 0xf92   : > { %v4143_v41 = vpop.f32.mrb[24].mxu0 }
 0xf93   : > { %v3479_v22 = vadd.f32 %v4143_v41, %v5038_v13  ;;  %v3473_v47 = vpop.f32.mrb[25].mxu0 }
 0xf94   : > { %v3474_v38 = vadd.f32 %v5038_v13, %v3473_v47 }
 0xf95   : > { %v3483_v39 = vadd.f32 %v3479_v22, %v4980_v43 }
 0xf96   : > { %v3482_v40 = vadd.f32 %v3474_v38, %v4971_v42 }
 0xf97   : > { %3485 = vst.msk [vmem:[%s660_s20 + $0x8] sm:$0xff] %vm732_vm1, %v3483_v39 }
 0xf98   : > { %3484 = vst.msk [vmem:[%s660_s20] sm:$0xff] %vm732_vm1, %v3482_v40 }
 0xf99   : > { %4429 = shalt.err (!%p4426_p9)
}
 0xf9a   : > { %s4430_s20 = scalar_lea.hbm %s5201_s6, 256  ;;  %s4434_s5 = scalar_lea.hbm %s5270_s19, 512 }
 0xf9b   : > { %p4431_p10 = scmp.ne.s32.totalorder %s5201_s6, %s4430_s20  ;;  %p4435_p13 = scmp.lt.u32.totalorder %s5201_s6, %s5270_s19 }
 0xf9c   : > { %p4436_p0 = scmp.lt.u32.totalorder %s4434_s5, %s4430_s20  ;;  %p4438_p2 = scmp.lt.u32.totalorder %s4430_s20, %s5201_s6 }
 0xf9d   : > { %p4432_p11 = pnand %p4431_p10, %p4635_p5 }
 0xf9e   : > { %p4437_p1 = por %p4436_p0, %p4435_p13 }
 0xf9f   : > { %p4433_p12 = pneg %p4432_p11 }
 0xfa0   : > { %p4439_p3 = por %p4438_p2, %p4437_p1 }
 0xfa2   : > { %p4440_p4 = pnand %p4439_p3, %p4433_p12 }
 0xfa4   : > { %4443 = shalt.err (!%p4440_p4)
}
 0xfa5   : > { %4269 = dma.vmem_to_hbm [thread:$0]  (%p4635_p5), %s5203_s27, 256, %s5201_s6, %s3492_s22, %s4495_s24, %s4495_s24, %s5314_s25  }
 0xfa6 PF: > { %p4279_p7 = scmp.ge.s32.totalorder %s4482_s21, 2  ;;  %s3536_s7 = sand.u32 1, %s4470_s0  }
 0xfa7   : > { %s3537_s23 = scalar_lea.sflag [#allocation3], %s3536_s7 }
 0xfa8   : > { %p4273_p8 = pnand %p4279_p7, %p4639_p6 }
 0xfaa   : > { %4461 = dma.done.wait (!%p4273_p8), %s3537_s23, 256  }
 0xfab   : > { %4463 = vsyncadd (!%p4273_p8), %s3537_s23, 4294967040  ;;  %s3546_s3 = scalar_lea.sflag [#allocation5], %s3536_s7 }
 0xfac   : > { %4465 = dma.done.wait (!%p4273_p8), %s3546_s3, 256  }
 0xfad   : > { %4467 = vsyncadd (!%p4273_p8), %s3546_s3, 4294967040  ;;  %s5320_s21 = sld [smem:[#allocation9_spill]]  ;;  %s5321_s4 = sld [smem:[#allocation8_spill]] }
 0xfae   : > { %s5322_s20 = sld [smem:[#allocation10_spill]]  ;;  %s5323_s0 = smov %s4474_s30 }
 0xfb3   : > { %p33_p5 = scmp.ge.s32.totalorder %s5320_s21, 4   ;;  %s5324_s30 = smov %s5321_s4 }
 0xfb5   :  { %35 = sbr.rel (!%p33_p5) target bundleno = 14 (0xe), region = 156 }
 0xfbc   :  { %3551 = vsyncpa [#allocation3], 1 }
 0xfbd   :  { %3553 = vsyncpa [#allocation3 + $0x1], 1 }
 0xfbe   :  { %3554 = vsyncpa [#allocation5], 1 }
 0xfbf   :  { %3556 = vsyncpa [#allocation5 + $0x1], 1 }

// kernel: hybrid_block_forward.3
= control target key start
LH: loop header
LB: loop body
LE: loop exit
PB: predicated region body
PF: predicated region fallthrough
CT: control target
= control target key end

     0   :  { %s4846_s29 = smov 0   ;;  %s5465_s0 = inlined_call_operand.vmem [shape: f32[2,8,32], index: 0, kind: input, shape index: {}]   ;;  %s5466_s1 = inlined_call_operand.vmem [shape: f32[2,8,32], index: 1, kind: input, shape index: {}]   ;;  %s5467_s2 = inlined_call_operand.vmem [shape: f32[2,16,32], index: 2, kind: input, shape index: {}]   ;;  %s5468_s3 = inlined_call_operand.vmem [shape: f32[2,16,32], index: 3, kind: input, shape index: {}]   ;;  %s5469_s4 = inlined_call_operand.vmem [shape: f32[32,32], index: 4, kind: input, shape index: {}]   ;;  %s5470_s5 = inlined_call_operand.vmem [shape: f32[1,32], index: 5, kind: input, shape index: {}]   ;;  %s5471_s6 = inlined_call_operand.vmem [shape: f32[32,32], index: 6, kind: input, shape index: {}]   ;;  %s5472_s7 = inlined_call_operand.vmem [shape: f32[1,32], index: 7, kind: input, shape index: {}]   ;;  %s5473_s8 = inlined_call_operand.vmem [shape: f32[32,32], index: 8, kind: input, shape index: {}]   ;;  %s5474_s9 = inlined_call_operand.vmem [shape: f32[1,32], index: 9, kind: input, shape index: {}]   ;;  %s5475_s10 = inlined_call_operand.vmem [shape: f32[32,32], index: 10, kind: input, shape index: {}]   ;;  %s5476_s11 = inlined_call_operand.vmem [shape: f32[1,32], index: 11, kind: input, shape index: {}]   ;;  %s5477_s12 = inlined_call_operand.vmem [shape: f32[32,64], index: 12, kind: input, shape index: {}]   ;;  %s5478_s13 = inlined_call_operand.vmem [shape: f32[32,64], index: 13, kind: input, shape index: {}]   ;;  %s5479_s14 = inlined_call_operand.vmem [shape: f32[1,64], index: 14, kind: input, shape index: {}]   ;;  %s5480_s15 = inlined_call_operand.vmem [shape: f32[64,32], index: 15, kind: input, shape index: {}]   ;;  %s5481_s16 = inlined_call_operand.vmem [shape: f32[1,32], index: 16, kind: input, shape index: {}]   ;;  %s5482_s17 = inlined_call_operand.vmem [shape: f32[32,64], index: 17, kind: input, shape index: {}]   ;;  %s5483_s18 = inlined_call_operand.vmem [shape: f32[32,64], index: 18, kind: input, shape index: {}]   ;;  %s5484_s19 = inlined_call_operand.vmem [shape: f32[1,64], index: 19, kind: input, shape index: {}]   ;;  %s5485_s20 = inlined_call_operand.vmem [shape: f32[64,32], index: 20, kind: input, shape index: {}]   ;;  %s5486_s21 = inlined_call_operand.vmem [shape: f32[64,32], index: 21, kind: input, shape index: {}]   ;;  %s5487_s22 = inlined_call_operand.vmem [shape: f32[1,32], index: 22, kind: input, shape index: {}]   ;;  %s5488_s23 = inlined_call_operand.vmem [shape: f32[1,32], index: 23, kind: input, shape index: {}]   ;;  %s5489_s24 = inlined_call_operand.vmem [shape: f32[2,8,32], index: 24, kind: output, shape index: {0}]   ;;  %s5490_s25 = inlined_call_operand.vmem [shape: f32[2,8,32], index: 25, kind: output, shape index: {1}]  }
   0x1   :  { %5506 = sst [smem:[#allocation2_spill]] %s5465_s0 }
   0x2   :  { %5507 = sst [smem:[#allocation3_spill]] %s5466_s1 }
   0x3   :  { %5508 = sst [smem:[#allocation4_spill]] %s5467_s2 }
   0x4   :  { %5509 = sst [smem:[#allocation5_spill]] %s5468_s3 }
   0x5   :  { %5510 = sst [smem:[#allocation6_spill]] %s5469_s4 }
   0x6   :  { %5511 = sst [smem:[#allocation7_spill]] %s5470_s5 }
   0x7   :  { %5512 = sst [smem:[#allocation8_spill]] %s5471_s6 }
   0x8   :  { %5513 = sst [smem:[#allocation9_spill]] %s5472_s7 }
   0x9   :  { %5514 = sst [smem:[#allocation10_spill]] %s5473_s8 }
   0xa   :  { %5515 = sst [smem:[#allocation11_spill]] %s5474_s9 }
   0xb LB: > { %s3813_s2 = sadd.s32 4294967295, %s4705_s29   ;;  %p3817_p0 = scmp.ge.s32.totalorder %s4705_s29, 1  ;;  %s4705_s29 = sphi %s4846_s29, %s36_s29  }
   0xc   : > { %p718_p1 = scmp.lt.s32.totalorder %s4705_s29, 3 }
   0xe   : > { %p719_p2 = pnand %p3817_p0, %p718_p1 }
   0xf   : > { %s5516_s7 = sld [smem:[#allocation8_spill]] (!%p719_p2)  ;;  %p802_p3 = scmp.lt.s32.totalorder (!%p719_p2), %s3813_s2, 1  ;;  %v4707_v5 = vmov (!%p719_p2), 0.0|0.0   ;;  %vm4708_vm0 = vmmov (!%p719_p2), 0   ;;  %v4709_v12 = vmov (!%p719_p2), 0.0   ;;  %vm902_vm1 = vcmask (!%p719_p2), 261120  }
  0x10   : > { %722 = sbr.rel (%p719_p2) target bundleno = 6521 (0x1979), region = 116  ;;  %4393 = vmatprep.subr.bf16.mxu0 (!%p719_p2), %v4707_v5  ;;  %s5517_s5 = sld [smem:[#allocation6_spill]] (!%p719_p2)  ;;  %4059 = vmatprep.mubr.msk.f32.mxu0 (!%p719_p2), %vm4708_vm0, %v4709_v12  ;;  %vm1144_vm2 = vcmask (!%p719_p2), 64512   ;;  %vm1225_vm4 = vcmask (!%p719_p2), 130048   ;;  %vm1845_vm5 = vcmask (!%p719_p2), 195584   ;;  %vm2083_vm6 = vcmask (!%p719_p2), 523264  }
  0x11   : > { %s5518_s9 = sld [smem:[#allocation4_spill]] (!%p719_p2)  ;;  %s5519_s3 = sld [smem:[#allocation2_spill]] (!%p719_p2)  ;;  %vm4933_vm3 = vmpackc.low (!%p719_p2), %vm1144_vm2, %vm1144_vm2 }
  0x12   : > { %s5520_s28 = sld [smem:[#allocation9_spill]] (!%p719_p2)  ;;  %s5523_s6 = sld [smem:[#allocation7_spill]] (!%p719_p2) }
  0x13   : > { %s5495_s30 = smov (!%p719_p2), 120   ;;  %s5524_s4 = sld [smem:[#allocation10_spill]] (!%p719_p2) }
  0x14   : > { %s5526_s1 = smov (!%p719_p2), 120  }
  0x15   : > { %v833_v0 = vld [vmem:[%s5516_s7] sm:$0xff] (!%p719_p2)  ;;  %v834_v1 = vld [vmem:[%s5516_s7 + $0x8] sm:$0xff] (!%p719_p2)  ;;  %v835_v2 = vld [vmem:[%s5516_s7 + $0x10] sm:$0xff] (!%p719_p2) }
  0x16   : > { %v4863_v3 = vpack.c.bf16 (!%p719_p2), %v834_v1, %v833_v0  ;;  %v836_v4 = vld [vmem:[%s5516_s7 + $0x18] sm:$0xff] (!%p719_p2)  ;;  %v828_v6 = vld [vmem:[%s5517_s5] sm:$0xff] (!%p719_p2)  ;;  %v829_v7 = vld [vmem:[%s5517_s5 + $0x8] sm:$0xff] (!%p719_p2) }
  0x17   : > { %v4875_v8 = vpack.c.bf16 %v836_v4, %v835_v2  ;;  %s5536_s2 = smov (!%p802_p3, %s3813_s2), 1  ;;  %v4879_v9 = vpack.c.bf16 %v829_v7, %v828_v6  ;;  %v830_v10 = vld [vmem:[%s5517_s5 + $0x10] sm:$0xff]  ;;  %v831_v11 = vld [vmem:[%s5517_s5 + $0x18] sm:$0xff] }
  0x18   : > { %4400 = vmatprep.subr.bf16.mxu1 %v4863_v3  ;;  %s4892_s8 = sshll.u32 %s5536_s2, 3  ;;  %s5494_s27 = sshll.u32 %s5536_s2, 4  ;;  %v4896_v13 = vpack.c.bf16 %v831_v11, %v830_v10  ;;  %v4927_v17 = vld [vmem:[%s5520_s28] ss:$0 sm:$0xff] }
  0x19   : > { %4402 = vmatpush3.bf16.msra.mxu1 %v4863_v3  ;;  %4395 = vmatpush3.bf16.msra.mxu0 %v4879_v9  ;;  %s814_s0 = scalar_lea.vmem %s5518_s9, %s5494_s27  ;;  %s4909_s26 = scalar_lea.vmem %s5519_s3, %s4892_s8  ;;  %v4940_v25 = vld [vmem:[%s5523_s6] ss:$0 sm:$0xff]  ;;  %v839_v30 = vld [vmem:[%s5524_s4 + $0x8] sm:$0xff]  ;;  %v840_v31 = vld [vmem:[%s5524_s4 + $0x10] sm:$0xff] }
  0x1a   : > { %4404 = vmatprep.subr.bf16.mxu1 %v4875_v8  ;;  %4396 = vmatprep.subr.bf16.mxu0 %v4707_v5  ;;  %v894_v14 = vld [vmem:[%s814_s0] sm:$0xff]  ;;  %v895_v15 = vld [vmem:[%s814_s0 + $0x8] sm:$0xff]  ;;  %v841_v33 = vld [vmem:[%s5524_s4 + $0x18] sm:$0xff]  ;;  %s5525_s3 = sld [smem:[#allocation11_spill]]  ;;  %s5501_s28 = smov 112  }
  0x1b   : > { %4070 = vmatprep.mubr.msk.f32.mxu1 %vm902_vm1, %v894_v14  ;;  %v4915_v16 = vld [vmem:[%s4909_s26] sm:$0xff]  ;;  %v4972_v34 = vpack.c.bf16 %v841_v33, %v840_v31  ;;  %s5499_s9 = smov 104   ;;  %s5497_s0 = smov 8  }
  0x1c   : > { %v838_v29 = vld [vmem:[%s5524_s4] sm:$0xff]  ;;  %s5498_s6 = smov 16   ;;  %s823_s4 = scalar_lea.vmem %s5489_s24, %s4892_s8 }
  0x1d   : > { %4406 = vmatpush3.bf16.msra.mxu1 %v4875_v8  ;;  %4398 = vmatpush3.bf16.msra.mxu0 %v4896_v13  ;;  %v4967_v32 = vpack.c.bf16 %v839_v30, %v838_v29 }
  0x1e   : > { %4415 = vmatprep.subr.bf16.mxu1 %v4707_v5 }
  0x1f   : > { %4408 = vmatprep.subr.bf16.mxu0 %v4967_v32 }
  0x20   : > { %4071 = vmatmul.mubr.msk.f32.vlgmr.msra.gmra.mrb[0].mxu1 %vm902_vm1, %v895_v15  ;;  %4060 = vmatmul.mubr.msk.f32.vlgmr.msra.gmra.mrb[0].mxu0 %vm902_vm1, %v4915_v16  ;;  %v4987_v46 = vld [vmem:[%s5525_s3] ss:$0 sm:$0xff] }
  0x21   : > { %4088 = vmatprep.mubr.msk.f32.mxu1 %vm4708_vm0, %v4709_v12  ;;  %4081 = vmatprep.mubr.msk.f32.mxu0 %vm902_vm1, %v894_v14 }
  0x22   : > { %4410 = vmatpush3.bf16.msra.mxu0 %v4967_v32 }
  0x23   : > { %4412 = vmatprep.subr.bf16.mxu0 %v4972_v34 }
  0x26   : > { %4414 = vmatpush3.bf16.msra.mxu0 %v4972_v34 }
  0x27   : > { %4426 = vmatprep.subr.bf16.mxu0 %v4707_v5 }
  0x29   : > { %4082 = vmatmul.mubr.msk.f32.vlgmr.msra.gmra.mrb[2].mxu0 %vm902_vm1, %v895_v15 }
  0x2a   : > { %4109 = vmatprep.mubr.msk.f32.mxu0 %vm4708_vm0, %v4709_v12 }
  0xf3   : > { %v4072_v18 = vpop.f32.mrb[0].mxu1  ;;  %v972_v19 = vpop.f32.mrb[0].mxu0 }
  0xf4   : > { %v1060_v20 = vadd.f32 %v4072_v18, %v4927_v17  ;;  %v1054_v21 = vpop.f32.mrb[1].mxu1  ;;  %v4061_v22 = vpop.f32.mrb[1].mxu0  ;;  %v4949_v28 = vadd.f32 %v4940_v25, %v972_v19 }
  0xf5   : > { %v1055_v23 = vadd.f32 %v4927_v17, %v1054_v21 }
  0xf7   : > { %v4416_v26 = vpack.c.bf16 %v1060_v20, %v1055_v23  ;;  %v4942_v27 = vpack.i.bf16 %v1060_v20, %v1055_v23 }
  0xf9   : > { %4607 = vrot.lane.b32.xlu1 %v4942_v27, %s5495_s30  ;;  %4418 = vmatpush3.bf16.xpose.msk.msra.mxu1 %vm4933_vm3, %v4416_v26 }
  0xfa   : > { %4419 = vmatprep.subr.bf16.mxu1 %v4707_v5 }
  0xfc   : > { %v4083_v39 = vpop.f32.mrb[2].mxu0 }
  0xfd   : > { %1310 = vrot.lane.b32.xlu1 %v4949_v28, %s5495_s30  ;;  %v1135_v40 = vpop.f32.mrb[3].mxu0  ;;  %v1141_v47 = vadd.f32 %v4083_v39, %v4987_v46  ;;  %s5527_s30 = sld [smem:[#allocation3_spill]] }
  0xfe   : > { %v1136_v48 = vadd.f32 %v4987_v46, %v1135_v40 }
 0x100   : > { %4089 = vmatmul.mubr.msk.f32.vlgmr.msra.gmra.mrb[2].mxu1 %vm1144_vm2, %v4949_v28  ;;  %v4420_v49 = vpack.c.bf16 %v1141_v47, %v1136_v48  ;;  %v4991_v50 = vpack.i.bf16 %v1141_v47, %v1136_v48 }
 0x101   : > { %4095 = vmatprep.mubr.msk.f32.mxu1 %vm4708_vm0, %v4709_v12 }
 0x102   : > { %4421 = vmatpush3.bf16.msra.mxu1 %v4420_v49 }
 0x103   : > { %4422 = vmatprep.subr.bf16.mxu1 %v4707_v5  ;;  %s809_s3 = scalar_lea.vmem %s5527_s30, %s4892_s8 }
 0x16b   : > { %v4608_v52 = vpop.permute.xlu1 %4607 }
 0x16c   : > { %v4610_v53 = vunpack.i.h.bf16 %v4608_v52  ;;  %v4609_v54 = vunpack.i.l.bf16 %v4608_v52 }
 0x16e   : > { %v4423_v57 = vpack.c.bf16 %v4610_v53, %v4609_v54 }
 0x16f   : > { %v1311_v58 = vpop.permute.xlu1 %1310 }
 0x1d3   : > { %v1220_v35 = vpop.f32.mrb[2].mxu1 }
 0x1d4   : > { %v1224_v36 = vmul.f32 0.35355338, %v1220_v35  ;;  %v4090_v37 = vpop.f32.mrb[3].mxu1 }
 0x1d6   : > { %v1226_v38 = vsel %vm1225_vm4, %v1224_v36, -inf }
 0x1d7   : > { %1227 = vmax.xlane.f32.xlu0 %v1226_v38 }
 0x264   : > { %v1228_v41 = vpop.xlane.xlu0 %1227 }
 0x265   : > { %v1229_v42 = vsub.f32 %v1224_v36, %v1228_v41 }
 0x267   : > { %v1230_v43 = vmul.f32 1.442695, %v1229_v42 }
 0x269   : > { %4666 = vpow2.f32 %v1230_v43 }
 0x273   : > { %v4667_v44 = vpop.eup %4666 }
 0x274   : > { %v1232_v45 = vsel %vm1225_vm4, %v4667_v44, 0.0 }
 0x275   : > { %1233 = vadd.xlane.f32.xlu0 %v1232_v45 }
 0x302   : > { %v1234_v51 = vpop.xlane.xlu0 %1233 }
 0x303   : > { %4668 = vrcp.f32 %v1234_v51 }
 0x30d   : > { %v4669_v55 = vpop.eup %4668 }
 0x30e   : > { %v1236_v56 = vmul.f32 %v4669_v55, %v4667_v44 }
 0x310   : > { %4096 = vmatmul.mubr.msk.f32.vlgmr.msra.gmra.mrb[4].mxu1 %vm1225_vm4, %v1236_v56 }
 0x311   : > { %4425 = vmatpush3.bf16.xpose.msk.msra.mxu1 %vm4933_vm3, %v4423_v57  ;;  %4102 = vmatprep.mubr.msk.f32.mxu1 %vm4708_vm0, %v4709_v12 }
 0x312   : > { %4433 = vmatprep.subr.bf16.mxu1 %v4707_v5 }
 0x318   : > { %4103 = vmatmul.mubr.msk.f32.vlgmr.msra.gmra.mrb[6].mxu1 %vm1144_vm2, %v1311_v58 }
 0x319   : > { %4123 = vmatprep.mubr.msk.f32.mxu1 %vm4708_vm0, %v4709_v12 }
 0x3e3   : > { %v5003_v59 = vpop.f32.mrb[4].mxu1 }
 0x3e4   : > { %v4097_v60 = vpop.f32.mrb[5].mxu1 }
 0x3eb   : > { %v1388_v61 = vpop.f32.mrb[6].mxu1 }
 0x3ec   : > { %v1392_v62 = vmul.f32 0.35355338, %v1388_v61  ;;  %v4104_v63 = vpop.f32.mrb[7].mxu1 }
 0x3ee   : > { %v1393_v0 = vsel %vm1225_vm4, %v1392_v62, -inf }
 0x3ef   : > { %1394 = vmax.xlane.f32.xlu0 %v1393_v0 }
 0x405   : > { %4612 = vrot.lane.b32.xlu0 %v4991_v50, %s5526_s1 }
 0x409   : > { %4617 = vrot.lane.b32.xlu0 %v4942_v27, %s5501_s28 }
 0x40d   : > { %1485 = vrot.lane.b32.xlu0 %v4949_v28, %s5501_s28 }
 0x47c   : > { %v1395_v1 = vpop.xlane.xlu0 %1394 }
 0x47d   : > { %v1396_v2 = vsub.f32 %v1392_v62, %v1395_v1 }
 0x47f   : > { %v1397_v4 = vmul.f32 1.442695, %v1396_v2 }
 0x480   : > { %v4613_v6 = vpop.permute.xlu0 %4612 }
 0x481   : > { %4670 = vpow2.f32 %v1397_v4  ;;  %v4615_v7 = vunpack.i.h.bf16 %v4613_v6  ;;  %v4614_v10 = vunpack.i.l.bf16 %v4613_v6 }
 0x483   : > { %v4427_v11 = vpack.c.bf16 %v4615_v7, %v4614_v10 }
 0x484   : > { %v4618_v22 = vpop.permute.xlu0 %4617 }
 0x485   : > { %4428 = vmatpush3.bf16.msra.mxu0 %v4427_v11  ;;  %v4620_v26 = vunpack.i.h.bf16 %v4618_v22  ;;  %v4619_v29 = vunpack.i.l.bf16 %v4618_v22 }
 0x486   : > { %4429 = vmatprep.subr.bf16.mxu0 %v4707_v5 }
 0x487   : > { %v4430_v33 = vpack.c.bf16 %v4620_v26, %v4619_v29  ;;  %v852_v29 = vld [vmem:[%s5478_s13] sm:$0xff] }
 0x48b   : > { %v4671_v14 = vpop.eup %4670 }
 0x48c   : > { %v1399_v15 = vsel %vm1225_vm4, %v4671_v14, 0.0 }
 0x48d   : > { %1400 = vadd.xlane.f32.xlu1 %v1399_v15  ;;  %v843_v15 = vld [vmem:[%s5475_s10] sm:$0xff] }
 0x49e   : > { %4622 = vrot.lane.b32.xlu1 %v4991_v50, %s5501_s28  ;;  %s5529_s28 = sld [smem:[#allocation5_spill]] }
 0x4a2   : > { %4627 = vrot.lane.b32.xlu1 %v4942_v27, %s5499_s9  ;;  %v1486_v27 = vpop.permute.xlu0 %1485 }
 0x51a   : > { %v1401_v18 = vpop.xlane.xlu1 %1400 }
 0x51b   : > { %4672 = vrcp.f32 %v1401_v18  ;;  %v844_v18 = vld [vmem:[%s5475_s10 + $0x8] sm:$0xff] }
 0x51e   : > { %v4623_v19 = vpop.permute.xlu1 %4622 }
 0x51f   : > { %v4625_v20 = vunpack.i.h.bf16 %v4623_v19  ;;  %v4624_v21 = vunpack.i.l.bf16 %v4623_v19  ;;  %v845_v19 = vld [vmem:[%s5475_s10 + $0x10] sm:$0xff] }
 0x521   : > { %v4434_v23 = vpack.c.bf16 %v4625_v20, %v4624_v21  ;;  %v5060_v20 = vpack.c.bf16 %v844_v18, %v843_v15  ;;  %v846_v21 = vld [vmem:[%s5475_s10 + $0x18] sm:$0xff] }
 0x522   : > { %v4628_v47 = vpop.permute.xlu1 %4627  ;;  %v5066_v22 = vpack.c.bf16 %v846_v21, %v845_v19 }
 0x523   : > { %4435 = vmatpush3.bf16.msra.mxu1 %v4434_v23  ;;  %v4630_v49 = vunpack.i.h.bf16 %v4628_v47  ;;  %v4629_v51 = vunpack.i.l.bf16 %v4628_v47  ;;  %v858_v47 = vld [vmem:[%s5480_s15 + $0x8] sm:$0xff] }
 0x524   : > { %4436 = vmatprep.subr.bf16.mxu1 %v4707_v5 }
 0x525   : > { %v4673_v30 = vpop.eup %4672  ;;  %v4437_v54 = vpack.c.bf16 %v4630_v49, %v4629_v51 }
 0x526   : > { %v1403_v31 = vmul.f32 %v4673_v30, %v4671_v14  ;;  %v853_v30 = vld [vmem:[%s5478_s13 + $0x8] sm:$0xff] }
 0x528   : > { %4110 = vmatmul.mubr.msk.f32.vlgmr.msra.gmra.mrb[4].mxu0 %vm1225_vm4, %v1403_v31  ;;  %v5078_v31 = vpack.c.bf16 %v853_v30, %v852_v29 }
 0x529   : > { %4432 = vmatpush3.bf16.xpose.msk.msra.mxu0 %vm4933_vm3, %v4430_v33  ;;  %4116 = vmatprep.mubr.msk.f32.mxu0 %vm4708_vm0, %v4709_v12 }
 0x52a   : > { %4440 = vmatprep.subr.bf16.mxu0 %v4707_v5 }
 0x530   : > { %4117 = vmatmul.mubr.msk.f32.vlgmr.msra.gmra.mrb[6].mxu0 %vm1144_vm2, %v1486_v27 }
 0x531   : > { %4137 = vmatprep.mubr.msk.f32.mxu0 %vm4708_vm0, %v4709_v12 }
 0x5fb   : > { %v1481_v35 = vpop.f32.mrb[4].mxu0 }
 0x5fc   : > { %v4111_v36 = vpop.f32.mrb[5].mxu0 }
 0x5fd   : > { %v849_v36 = vld [vmem:[%s5477_s12 + $0x8] sm:$0xff] }
 0x603   : > { %v1563_v37 = vpop.f32.mrb[6].mxu0 }
 0x604   : > { %v1567_v38 = vmul.f32 0.35355338, %v1563_v37  ;;  %v4118_v39 = vpop.f32.mrb[7].mxu0 }
 0x606   : > { %v1568_v40 = vsel %vm1225_vm4, %v1567_v38, -inf }
 0x607   : > { %1569 = vmax.xlane.f32.xlu0 %v1568_v40 }
 0x694   : > { %v1570_v41 = vpop.xlane.xlu0 %1569 }
 0x695   : > { %v1571_v42 = vsub.f32 %v1567_v38, %v1570_v41  ;;  %v850_v41 = vld [vmem:[%s5477_s12 + $0x10] sm:$0xff] }
 0x697   : > { %v1572_v43 = vmul.f32 1.442695, %v1571_v42  ;;  %v851_v42 = vld [vmem:[%s5477_s12 + $0x18] sm:$0xff] }
 0x699   : > { %4674 = vpow2.f32 %v1572_v43 }
 0x6a3   : > { %v4675_v44 = vpop.eup %4674 }
 0x6a4   : > { %v1574_v45 = vsel %vm1225_vm4, %v4675_v44, 0.0 }
 0x6a5   : > { %1575 = vadd.xlane.f32.xlu1 %v1574_v45 }
 0x6b6   : > { %1658 = vrot.lane.b32.xlu1 %v4949_v28, %s5499_s9 }
 0x732   : > { %v1576_v48 = vpop.xlane.xlu1 %1575 }
 0x733   : > { %4676 = vrcp.f32 %v1576_v48  ;;  %v5163_v48 = vld [vmem:[%s5476_s11] ss:$0 sm:$0xff] }
 0x736   : > { %v1659_v55 = vpop.permute.xlu1 %1658 }
 0x73d   : > { %v4677_v52 = vpop.eup %4676 }
 0x73e   : > { %v1578_v53 = vmul.f32 %v4677_v52, %v4675_v44  ;;  %v5125_v44 = vld [vmem:[%s809_s3] sm:$0xff]  ;;  %s5532_s3 = smov 16  }
 0x740   : > { %4124 = vmatmul.mubr.msk.f32.vlgmr.msra.gmra.mrb[8].mxu1 %vm1225_vm4, %v1578_v53 }
 0x741   : > { %4439 = vmatpush3.bf16.xpose.msk.msra.mxu1 %vm4933_vm3, %v4437_v54  ;;  %4130 = vmatprep.mubr.msk.f32.mxu1 %vm4708_vm0, %v4709_v12  ;;  %v859_v54 = vld [vmem:[%s5480_s15 + $0x10] sm:$0xff] }
 0x742   : > { %4449 = vmatprep.subr.bf16.mxu1 %v4707_v5 }
 0x748   : > { %4131 = vmatmul.mubr.msk.f32.vlgmr.msra.gmra.mrb[10].mxu1 %vm1144_vm2, %v1659_v55  ;;  %v860_v55 = vld [vmem:[%s5480_s15 + $0x18] sm:$0xff] }
 0x749   : > { %4159 = vmatprep.mubr.msk.f32.mxu1 %vm4708_vm0, %v4709_v12  ;;  %4451 = vmatpush3.bf16.msra.mxu1 %v5078_v31 }
 0x74a   : > { %4452 = vmatprep.subr.bf16.mxu1 %v4707_v5 }
 0x813   : > { %v1654_v28 = vpop.f32.mrb[8].mxu1 }
 0x814   : > { %v4125_v56 = vpop.f32.mrb[9].mxu1 }
 0x81b   : > { %v1736_v57 = vpop.f32.mrb[10].mxu1 }
 0x81c   : > { %v1740_v58 = vmul.f32 0.35355338, %v1736_v57  ;;  %v4132_v60 = vpop.f32.mrb[11].mxu1 }
 0x81e   : > { %v1741_v61 = vsel %vm1225_vm4, %v1740_v58, -inf }
 0x81f   : > { %1742 = vmax.xlane.f32.xlu0 %v1741_v61 }
 0x835   : > { %4632 = vrot.lane.b32.xlu0 %v4991_v50, %s5499_s9  ;;  %s5528_s9 = sshll.u32 %s5536_s2, 4 }
 0x836   : > { %s819_s5 = scalar_lea.vmem %s5529_s28, %s5528_s9  ;;  %s5533_s9 = smov 8  }
 0x839   : > { %1832 = vrot.lane.b32.xlu0 %v1481_v35, %s5497_s0  ;;  %s5504_s0 = smov 24   ;;  %v848_v35 = vld [vmem:[%s5477_s12] sm:$0xff] }
 0x83a   : > { %v5090_v38 = vpack.c.bf16 %v849_v36, %v848_v35 }
 0x83d   : > { %1836 = vrot.lane.b32.xlu0 %v1654_v28, %s5498_s6  ;;  %v5176_v28 = vpack.c.bf16 %v860_v55, %v859_v54  ;;  %s5534_s6 = smov 24  }
 0x8ac   : > { %v1743_v62 = vpop.xlane.xlu0 %1742 }
 0x8ad   : > { %v1744_v63 = vsub.f32 %v1740_v58, %v1743_v62 }
 0x8af   : > { %v1745_v0 = vmul.f32 1.442695, %v1744_v63 }
 0x8b0   : > { %v4633_v1 = vpop.permute.xlu0 %4632 }
 0x8b1   : > { %4678 = vpow2.f32 %v1745_v0  ;;  %v4635_v2 = vunpack.i.h.bf16 %v4633_v1  ;;  %v4634_v4 = vunpack.i.l.bf16 %v4633_v1 }
 0x8b3   : > { %v4441_v6 = vpack.c.bf16 %v4635_v2, %v4634_v4 }
 0x8b4   : > { %v1833_v33 = vpop.permute.xlu0 %1832 }
 0x8b5   : > { %4442 = vmatpush3.bf16.msra.mxu0 %v4441_v6  ;;  %v1843_v37 = vsel %vm1144_vm2, %v5003_v59, %v1833_v33  ;;  %v5102_v59 = vpack.c.bf16 %v851_v42, %v850_v41  ;;  %v862_v6 = vld [vmem:[%s5480_s15 + $0x28] sm:$0xff] }
 0x8b6   : > { %4443 = vmatprep.subr.bf16.mxu0 %v4707_v5 }
 0x8b8   : > { %v1837_v27 = vpop.permute.xlu0 %1836 }
 0x8b9   : > { %v1844_v39 = vsel %vm1225_vm4, %v1843_v37, %v1837_v27 }
 0x8bb   : > { %v4679_v7 = vpop.eup %4678 }
 0x8bc   : > { %v1747_v50 = vsel %vm1225_vm4, %v4679_v7, 0.0 }
 0x8bd   : > { %1748 = vadd.xlane.f32.xlu1 %v1747_v50  ;;  %v864_v50 = vld [vmem:[%s5480_s15 + $0x38] sm:$0xff] }
 0x94a   : > { %v1749_v10 = vpop.xlane.xlu1 %1748 }
 0x94b   : > { %4680 = vrcp.f32 %v1749_v10 }
 0x955   : > { %v4681_v11 = vpop.eup %4680 }
 0x956   : > { %v1751_v14 = vmul.f32 %v4681_v11, %v4679_v7  ;;  %v5220_v11 = vld [vmem:[%s5479_s14] ss:$0 sm:$0xff] }
 0x958   : > { %4138 = vmatmul.mubr.msk.f32.vlgmr.msra.gmra.mrb[8].mxu0 %vm1225_vm4, %v1751_v14 }
 0x959   : > { %4148 = vmatprep.mubr.msk.f32.mxu0 %vm4708_vm0, %v4709_v12  ;;  %4445 = vmatpush3.bf16.msra.mxu0 %v5060_v20 }
 0x95a   : > { %4446 = vmatprep.subr.bf16.mxu0 %v4707_v5 }
 0x95d   : > { %4448 = vmatpush3.bf16.msra.mxu0 %v5066_v22 }
 0x95e   : > { %4455 = vmatprep.subr.bf16.mxu0 %v4707_v5 }
 0xa2b   : > { %v1827_v23 = vpop.f32.mrb[8].mxu0 }
 0xa2c   : > { %1840 = vrot.lane.b32.xlu0 %v1827_v23, %s5504_s0  ;;  %v4139_v26 = vpop.f32.mrb[9].mxu0  ;;  %s827_s0 = scalar_lea.vmem %s5490_s25, %s4892_s8 }
 0xa9e   : > { %v1841_v40 = vpop.permute.xlu0 %1840 }
 0xa9f   : > { %v1846_v43 = vsel %vm1845_vm5, %v1844_v39, %v1841_v40 }
 0xaa0   : > { %4149 = vmatmul.mubr.msk.f32.vlgmr.msra.gmra.mrb[10].mxu0 %vm902_vm1, %v1846_v43 }
 0xaa1   : > { %4457 = vmatpush3.bf16.msra.mxu0 %v5090_v38  ;;  %4170 = vmatprep.mubr.msk.f32.mxu0 %vm4708_vm0, %v4709_v12 }
 0xaa2   : > { %4458 = vmatprep.subr.bf16.mxu0 %v4707_v5 }
 0xaa5   : > { %4460 = vmatpush3.bf16.msra.mxu0 %v5102_v59 }
 0xaa6   : > { %4473 = vmatprep.subr.bf16.mxu0 %v4707_v5 }
 0xaa8   : > { %4171 = vmatmul.mubr.msk.f32.vlgmr.msra.gmra.mrb[12].mxu0 %vm902_vm1, %v4915_v16  ;;  %v5136_v16 = vld [vmem:[%s819_s5 + $0x8] sm:$0xff] }
 0xaa9   : > { %4475 = vmatpush3.bf16.msra.mxu0 %v4879_v9  ;;  %4200 = vmatprep.mubr.msk.f32.mxu0 %vm4708_vm0, %v4709_v12  ;;  %v5128_v9 = vld [vmem:[%s819_s5] sm:$0xff]  ;;  %s5531_s5 = smov 104  }
 0xaaa   : > { %4476 = vmatprep.subr.bf16.mxu0 %v4707_v5 }
 0xaad   : > { %4478 = vmatpush3.bf16.msra.mxu0 %v4896_v13  ;;  %v855_v13 = vld [vmem:[%s5478_s13 + $0x18] sm:$0xff] }
 0xaae   : > { %4480 = vmatprep.subr.bf16.mxu0 %v4863_v3 }
 0xab0   : > { %4201 = vmatmul.mubr.msk.f32.vlgmr.msra.gmra.mrb[14].mxu0 %vm902_vm1, %v5125_v44 }
 0xab1   : > { %4482 = vmatpush3.bf16.msra.mxu0 %v4863_v3  ;;  %4211 = vmatprep.mubr.msk.f32.mxu0 %vm902_vm1, %v5128_v9  ;;  %v854_v3 = vld [vmem:[%s5478_s13 + $0x10] sm:$0xff] }
 0xab2   : > { %4484 = vmatprep.subr.bf16.mxu0 %v4875_v8  ;;  %v5150_v45 = vpack.c.bf16 %v855_v13, %v854_v3 }
 0xab4   : > { %4454 = vmatpush3.bf16.msra.mxu1 %v5150_v45 }
 0xab5   : > { %4486 = vmatpush3.bf16.msra.mxu0 %v4875_v8  ;;  %4461 = vmatprep.subr.bf16.mxu1 %v4707_v5  ;;  %v857_v8 = vld [vmem:[%s5480_s15] sm:$0xff] }
 0xab6   : > { %4495 = vmatprep.subr.bf16.mxu0 %v4707_v5  ;;  %v5165_v51 = vpack.c.bf16 %v858_v47, %v857_v8 }
 0xab8   : > { %4212 = vmatmul.mubr.msk.f32.vlgmr.msra.gmra.mrb[16].mxu0 %vm902_vm1, %v5136_v16 }
 0xab9   : > { %4229 = vmatprep.mubr.msk.f32.mxu0 %vm4708_vm0, %v4709_v12 }
 0xb73   : > { %v1922_v49 = vpop.f32.mrb[10].mxu0 }
 0xb74   : > { %v1923_v52 = vadd.f32 %v5163_v48, %v1922_v49  ;;  %v4150_v53 = vpop.f32.mrb[11].mxu0 }
 0xb76   : > { %4160 = vmatmul.mubr.msk.f32.vlgmr.msra.gmra.mrb[12].mxu1 %vm902_vm1, %v1923_v52 }
 0xb77   : > { %4463 = vmatpush3.bf16.msra.mxu1 %v5165_v51  ;;  %4189 = vmatprep.mubr.msk.f32.mxu1 %vm4708_vm0, %v4709_v12 }
 0xb78   : > { %4464 = vmatprep.subr.bf16.mxu1 %v4707_v5 }
 0xb7b   : > { %v2065_v56 = vpop.f32.mrb[12].mxu0  ;;  %4466 = vmatpush3.bf16.msra.mxu1 %v5176_v28 }
 0xb7c   : > { %v4172_v57 = vpop.f32.mrb[13].mxu0  ;;  %4467 = vmatprep.subr.bf16.mxu1 %v4707_v5 }
 0xb83   : > { %v2230_v58 = vpop.f32.mrb[14].mxu0 }
 0xb84   : > { %v4202_v60 = vpop.f32.mrb[15].mxu0  ;;  %v5191_v4 = vadd.f32 %v4940_v25, %v2230_v58  ;;  %v863_v25 = vld [vmem:[%s5480_s15 + $0x30] sm:$0xff] }
 0xb85   : > { %v5213_v10 = vpack.c.bf16 %v864_v50, %v863_v25 }
 0xb8b   : > { %v4213_v61 = vpop.f32.mrb[16].mxu0 }
 0xb8c   : > { %v2312_v62 = vadd.f32 %v4213_v61, %v4927_v17  ;;  %v2306_v63 = vpop.f32.mrb[17].mxu0 }
 0xb8d   : > { %v2307_v0 = vadd.f32 %v4927_v17, %v2306_v63  ;;  %v861_v17 = vld [vmem:[%s5480_s15 + $0x20] sm:$0xff] }
 0xb8e   : > { %v5203_v7 = vpack.c.bf16 %v862_v6, %v861_v17 }
 0xb8f   : > { %v4496_v1 = vpack.c.bf16 %v2312_v62, %v2307_v0  ;;  %v5185_v2 = vpack.i.bf16 %v2312_v62, %v2307_v0 }
 0xb90   : > { %4469 = vmatpush3.bf16.msra.mxu1 %v5203_v7 }
 0xb91   : > { %4498 = vmatpush3.bf16.xpose.msk.msra.mxu0 %vm4933_vm3, %v4496_v1  ;;  %4470 = vmatprep.subr.bf16.mxu1 %v4707_v5 }
 0xb92   : > { %4506 = vmatprep.subr.bf16.mxu0 %v4707_v5 }
 0xb94   : > { %4472 = vmatpush3.bf16.msra.mxu1 %v5213_v10 }
 0xb95   : > { %4488 = vmatprep.subr.bf16.mxu1 %v4967_v32 }
 0xb98   : > { %4230 = vmatmul.mubr.msk.f32.vlgmr.msra.gmra.mrb[18].mxu0 %vm1144_vm2, %v5191_v4 }
 0xb99   : > { %4250 = vmatprep.mubr.msk.f32.mxu0 %vm4708_vm0, %v4709_v12 }
 0xc49   : > { %v1995_v14 = vpop.f32.mrb[12].mxu1 }
 0xc4a   : > { %v2066_v15 = vadd.f32 %v2065_v56, %v1995_v14  ;;  %v4161_v18 = vpop.f32.mrb[13].mxu1 }
 0xc4c   : > { %v2075_v19 = vadd.f32 %v5220_v11, %v2066_v15 }
 0xc4e   : > { %v2076_v21 = vmax.f32 %v2075_v19, 0.0 }
 0xc50   : > { %4190 = vmatmul.mubr.msk.f32.vlgmr.msra.gmra.mrb[14].mxu1 %vm2083_vm6, %v2076_v21 }
 0xc51   : > { %4490 = vmatpush3.bf16.msra.mxu1 %v4967_v32  ;;  %4222 = vmatprep.mubr.msk.f32.mxu1 %vm902_vm1, %v5128_v9 }
 0xc52   : > { %4492 = vmatprep.subr.bf16.mxu1 %v4972_v34 }
 0xc55   : > { %4494 = vmatpush3.bf16.msra.mxu1 %v4972_v34 }
 0xc56   : > { %4499 = vmatprep.subr.bf16.mxu1 %v4707_v5 }
 0xc58   : > { %4223 = vmatmul.mubr.msk.f32.vlgmr.msra.gmra.mrb[16].mxu1 %vm902_vm1, %v5136_v16 }
 0xc59   : > { %4236 = vmatprep.mubr.msk.f32.mxu1 %vm4708_vm0, %v4709_v12 }
 0xc6b   : > { %v2465_v23 = vpop.f32.mrb[18].mxu0 }
 0xc6c   : > { %v2469_v26 = vmul.f32 0.35355338, %v2465_v23  ;;  %v4231_v29 = vpop.f32.mrb[19].mxu0 }
 0xc6e   : > { %v2470_v32 = vsel %vm1225_vm4, %v2469_v26, -inf }
 0xc6f   : > { %2471 = vmax.xlane.f32.xlu1 %v2470_v32 }
 0xc80   : > { %4637 = vrot.lane.b32.xlu1 %v5185_v2, %s5526_s1 }
 0xc84   : > { %2554 = vrot.lane.b32.xlu1 %v5191_v4, %s5526_s1 }
 0xcfc   : > { %v2472_v34 = vpop.xlane.xlu1 %2471 }
 0xcfd   : > { %v2473_v30 = vsub.f32 %v2469_v26, %v2472_v34 }
 0xcff   : > { %v2474_v33 = vmul.f32 1.442695, %v2473_v30 }
 0xd00   : > { %v4638_v3 = vpop.permute.xlu1 %4637 }
 0xd01   : > { %4682 = vpow2.f32 %v2474_v33  ;;  %v4640_v13 = vunpack.i.h.bf16 %v4638_v3  ;;  %v4639_v8 = vunpack.i.l.bf16 %v4638_v3 }
 0xd03   : > { %v4503_v55 = vpack.c.bf16 %v4640_v13, %v4639_v8 }
 0xd04   : > { %v2555_v56 = vpop.permute.xlu1 %2554 }
 0xd0b   : > { %v4683_v27 = vpop.eup %4682 }
 0xd0c   : > { %v2476_v35 = vsel %vm1225_vm4, %v4683_v27, 0.0 }
 0xd0d   : > { %2477 = vadd.xlane.f32.xlu0 %v2476_v35 }
 0xd23   : > { %v5240_v36 = vpop.f32.mrb[14].mxu1 }
 0xd24   : > { %v4191_v37 = vpop.f32.mrb[15].mxu1 }
 0xd2b   : > { %v4224_v39 = vpop.f32.mrb[16].mxu1 }
 0xd2c   : > { %v2387_v40 = vadd.f32 %v4224_v39, %v4987_v46  ;;  %v2381_v41 = vpop.f32.mrb[17].mxu1 }
 0xd2d   : > { %v2382_v42 = vadd.f32 %v4987_v46, %v2381_v41 }
 0xd2f   : > { %v5244_v43 = vpack.i.bf16 %v2387_v40, %v2382_v42  ;;  %v4500_v9 = vpack.c.bf16 %v2387_v40, %v2382_v42 }
 0xd31   : > { %4642 = vrot.lane.b32.xlu0 %v5244_v43, %s5526_s1  ;;  %4501 = vmatpush3.bf16.msra.mxu1 %v4500_v9  ;;  %s5530_s1 = smov 112  }
 0xd32   : > { %4502 = vmatprep.subr.bf16.mxu1 %v4707_v5 }
 0xd9a   : > { %v2478_v16 = vpop.xlane.xlu0 %2477 }
 0xd9b   : > { %4684 = vrcp.f32 %v2478_v16 }
 0xda3   : > { %v4643_v47 = vpop.permute.xlu0 %4642 }
 0xda4   : > { %v4645_v49 = vunpack.i.h.bf16 %v4643_v47  ;;  %v4644_v52 = vunpack.i.l.bf16 %v4643_v47 }
 0xda5   : > { %v4685_v53 = vpop.eup %4684 }
 0xda6   : > { %v2480_v54 = vmul.f32 %v4685_v53, %v4683_v27  ;;  %v4507_v46 = vpack.c.bf16 %v4645_v49, %v4644_v52 }
 0xda8   : > { %4237 = vmatmul.mubr.msk.f32.vlgmr.msra.gmra.mrb[18].mxu1 %vm1225_vm4, %v2480_v54  ;;  %4508 = vmatpush3.bf16.msra.mxu0 %v4507_v46 }
 0xda9   : > { %4505 = vmatpush3.bf16.xpose.msk.msra.mxu1 %vm4933_vm3, %v4503_v55  ;;  %4243 = vmatprep.mubr.msk.f32.mxu1 %vm4708_vm0, %v4709_v12 }
 0xdaa   : > { %4509 = vmatprep.subr.bf16.mxu0 %v4707_v5  ;;  %4513 = vmatprep.subr.bf16.mxu1 %v4707_v5 }
 0xdb0   : > { %4244 = vmatmul.mubr.msk.f32.vlgmr.msra.gmra.mrb[20].mxu1 %vm1144_vm2, %v2555_v56 }
 0xdb1   : > { %4264 = vmatprep.mubr.msk.f32.mxu1 %vm4708_vm0, %v4709_v12 }
 0xe7b   : > { %v5259_v57 = vpop.f32.mrb[18].mxu1 }
 0xe7c   : > { %v4238_v58 = vpop.f32.mrb[19].mxu1 }
 0xe83   : > { %v2632_v60 = vpop.f32.mrb[20].mxu1 }
 0xe84   : > { %v2636_v61 = vmul.f32 0.35355338, %v2632_v60  ;;  %v4245_v62 = vpop.f32.mrb[21].mxu1 }
 0xe86   : > { %v2637_v63 = vsel %vm1225_vm4, %v2636_v61, -inf }
 0xe87   : > { %2638 = vmax.xlane.f32.xlu1 %v2637_v63 }
 0xe98   : > { %2729 = vrot.lane.b32.xlu1 %v5191_v4, %s5530_s1 }
 0xf14   : > { %v2639_v0 = vpop.xlane.xlu1 %2638 }
 0xf15   : > { %v2640_v1 = vsub.f32 %v2636_v61, %v2639_v0 }
 0xf17   : > { %v2641_v17 = vmul.f32 1.442695, %v2640_v1 }
 0xf18   : > { %v2730_v26 = vpop.permute.xlu1 %2729 }
 0xf19   : > { %4686 = vpow2.f32 %v2641_v17 }
 0xf23   : > { %v4687_v6 = vpop.eup %4686 }
 0xf24   : > { %v2643_v25 = vsel %vm1225_vm4, %v4687_v6, 0.0 }
 0xf25   : > { %2644 = vadd.xlane.f32.xlu0 %v2643_v25 }
 0xf3b   : > { %4647 = vrot.lane.b32.xlu0 %v5185_v2, %s5530_s1 }
 0xfb2   : > { %v2645_v50 = vpop.xlane.xlu0 %2644 }
 0xfb3   : > { %4688 = vrcp.f32 %v2645_v50 }
 0xfb6   : > { %v4648_v14 = vpop.permute.xlu0 %4647 }
 0xfb7   : > { %v4650_v15 = vunpack.i.h.bf16 %v4648_v14  ;;  %v4649_v18 = vunpack.i.l.bf16 %v4648_v14 }
 0xfb9   : > { %v4510_v23 = vpack.c.bf16 %v4650_v15, %v4649_v18 }
 0xfbd   : > { %v4689_v19 = vpop.eup %4688 }
 0xfbe   : > { %v2647_v21 = vmul.f32 %v4689_v19, %v4687_v6 }
 0xfc0   : > { %4251 = vmatmul.mubr.msk.f32.vlgmr.msra.gmra.mrb[20].mxu0 %vm1225_vm4, %v2647_v21 }
 0xfc1   : > { %4512 = vmatpush3.bf16.xpose.msk.msra.mxu0 %vm4933_vm3, %v4510_v23  ;;  %4257 = vmatprep.mubr.msk.f32.mxu0 %vm4708_vm0, %v4709_v12 }
 0xfc2   : > { %4520 = vmatprep.subr.bf16.mxu0 %v4707_v5 }
 0xfc8   : > { %4258 = vmatmul.mubr.msk.f32.vlgmr.msra.gmra.mrb[22].mxu0 %vm1144_vm2, %v2730_v26 }
 0xfc9   : > { %4278 = vmatprep.mubr.msk.f32.mxu0 %vm4708_vm0, %v4709_v12 }
0x1093   : > { %v5276_v29 = vpop.f32.mrb[20].mxu0 }
0x1094   : > { %v4252_v32 = vpop.f32.mrb[21].mxu0 }
0x109b   : > { %v2807_v34 = vpop.f32.mrb[22].mxu0 }
0x109c   : > { %v2811_v30 = vmul.f32 0.35355338, %v2807_v34  ;;  %v4259_v33 = vpop.f32.mrb[23].mxu0 }
0x109d   : > { %v873_v33 = vld [vmem:[%s5483_s18 + $0x18] sm:$0xff] }
0x109e   : > { %v2812_v27 = vsel %vm1225_vm4, %v2811_v30, -inf }
0x109f   : > { %2813 = vmax.xlane.f32.xlu0 %v2812_v27 }
0x10b5   : > { %4652 = vrot.lane.b32.xlu0 %v5244_v43, %s5530_s1 }
0x10b9   : > { %2902 = vrot.lane.b32.xlu0 %v5191_v4, %s5531_s5 }
0x112c   : > { %v2814_v35 = vpop.xlane.xlu0 %2813 }
0x112d   : > { %v2815_v37 = vsub.f32 %v2811_v30, %v2814_v35  ;;  %v872_v30 = vld [vmem:[%s5483_s18 + $0x10] sm:$0xff]  ;;  %v876_v35 = vld [vmem:[%s5485_s20 + $0x8] sm:$0xff] }
0x112e   : > { %v4557_v27 = vpack.c.bf16 %v873_v33, %v872_v30 }
0x112f   : > { %v2816_v39 = vmul.f32 1.442695, %v2815_v37 }
0x1130   : > { %v4653_v40 = vpop.permute.xlu0 %4652 }
0x1131   : > { %4690 = vpow2.f32 %v2816_v39  ;;  %v4655_v41 = vunpack.i.h.bf16 %v4653_v40  ;;  %v4654_v42 = vunpack.i.l.bf16 %v4653_v40  ;;  %v866_v39 = vld [vmem:[%s5482_s17] sm:$0xff]  ;;  %v867_v40 = vld [vmem:[%s5482_s17 + $0x8] sm:$0xff] }
0x1133   : > { %v4514_v9 = vpack.c.bf16 %v4655_v41, %v4654_v42  ;;  %v3855_v41 = vld [vmem:[%s5481_s16] ss:$0 sm:$0xff] }
0x1134   : > { %v2903_v54 = vpop.permute.xlu0 %2902 }
0x1135   : > { %4515 = vmatpush3.bf16.msra.mxu1 %v4514_v9 }
0x1136   : > { %4516 = vmatprep.subr.bf16.mxu1 %v4707_v5 }
0x113b   : > { %v4691_v16 = vpop.eup %4690 }
0x113c   : > { %v2818_v3 = vsel %vm1225_vm4, %v4691_v16, 0.0 }
0x113d   : > { %2819 = vadd.xlane.f32.xlu1 %v2818_v3  ;;  %v4560_v3 = vpack.c.bf16 %v867_v40, %v866_v39 }
0x114e   : > { %4657 = vrot.lane.b32.xlu1 %v5185_v2, %s5531_s5 }
0x11ca   : > { %v2820_v13 = vpop.xlane.xlu1 %2819 }
0x11cb   : > { %4692 = vrcp.f32 %v2820_v13 }
0x11ce   : > { %v4658_v4 = vpop.permute.xlu1 %4657 }
0x11cf   : > { %v4660_v8 = vunpack.i.h.bf16 %v4658_v4  ;;  %v4659_v47 = vunpack.i.l.bf16 %v4658_v4  ;;  %v868_v4 = vld [vmem:[%s5482_s17 + $0x10] sm:$0xff] }
0x11d1   : > { %v4517_v53 = vpack.c.bf16 %v4660_v8, %v4659_v47  ;;  %v869_v8 = vld [vmem:[%s5482_s17 + $0x18] sm:$0xff] }
0x11d2   : > { %v4563_v47 = vpack.c.bf16 %v869_v8, %v868_v4 }
0x11d5   : > { %v4693_v49 = vpop.eup %4692 }
0x11d6   : > { %v2822_v52 = vmul.f32 %v4693_v49, %v4691_v16  ;;  %v2154_v49 = vadd.f32 %v3855_v41, %v5240_v36  ;;  %v877_v36 = vld [vmem:[%s5485_s20 + $0x10] sm:$0xff] }
0x11d8   : > { %4265 = vmatmul.mubr.msk.f32.vlgmr.msra.gmra.mrb[22].mxu1 %vm1225_vm4, %v2822_v52  ;;  %v884_v52 = vld [vmem:[%s5486_s21 + $0x8] sm:$0xff] }
0x11d9   : > { %4519 = vmatpush3.bf16.xpose.msk.msra.mxu1 %vm4933_vm3, %v4517_v53  ;;  %4271 = vmatprep.mubr.msk.f32.mxu1 %vm4708_vm0, %v4709_v12 }
0x11da   : > { %4529 = vmatprep.subr.bf16.mxu1 %v4707_v5 }
0x11e0   : > { %4272 = vmatmul.mubr.msk.f32.vlgmr.msra.gmra.mrb[24].mxu1 %vm1144_vm2, %v2903_v54  ;;  %v4698_v54 = vld [vmem:[%s4909_s26] sm:$0xff] }
0x11e1   : > { %4531 = vmatpush3.bf16.msra.mxu1 %v5078_v31  ;;  %4300 = vmatprep.mubr.msk.f32.mxu1 %vm4708_vm0, %v4709_v12 }
0x11e2   : > { %4532 = vmatprep.subr.bf16.mxu1 %v4707_v5 }
0x11e5   : > { %4534 = vmatpush3.bf16.msra.mxu1 %v5150_v45 }
0x11e6   : > { %4541 = vmatprep.subr.bf16.mxu1 %v4707_v5 }
0x12ab   : > { %v2898_v24 = vpop.f32.mrb[22].mxu1 }
0x12ac   : > { %v4266_v2 = vpop.f32.mrb[23].mxu1 }
0x12ad   : > { %v878_v2 = vld [vmem:[%s5485_s20 + $0x18] sm:$0xff] }
0x12b3   : > { %v2980_v46 = vpop.f32.mrb[24].mxu1 }
0x12b4   : > { %v2984_v55 = vmul.f32 0.35355338, %v2980_v46  ;;  %v4273_v56 = vpop.f32.mrb[25].mxu1  ;;  %v885_v46 = vld [vmem:[%s5486_s21 + $0x10] sm:$0xff] }
0x12b5   : > { %v886_v56 = vld [vmem:[%s5486_s21 + $0x18] sm:$0xff] }
0x12b6   : > { %v2985_v58 = vsel %vm1225_vm4, %v2984_v55, -inf }
0x12b7   : > { %2986 = vmax.xlane.f32.xlu0 %v2985_v58  ;;  %v879_v58 = vld [vmem:[%s5485_s20 + $0x20] sm:$0xff] }
0x12cd   : > { %4662 = vrot.lane.b32.xlu0 %v5244_v43, %s5531_s5 }
0x12d1   : > { %3080 = vrot.lane.b32.xlu0 %v2898_v24, %s5532_s3  ;;  %v2157_v24 = vadd.f32 %v4698_v54, %v2154_v49 }
0x1344   : > { %v2987_v31 = vpop.xlane.xlu0 %2986 }
0x1345   : > { %v2988_v60 = vsub.f32 %v2984_v55, %v2987_v31  ;;  %v4569_v55 = vpack.c.bf16 %v878_v2, %v877_v36  ;;  %v880_v31 = vld [vmem:[%s5485_s20 + $0x28] sm:$0xff] }
0x1347   : > { %v2989_v61 = vmul.f32 1.442695, %v2988_v60  ;;  %v887_v60 = vld [vmem:[%s5486_s21 + $0x20] sm:$0xff] }
0x1348   : > { %v4663_v62 = vpop.permute.xlu0 %4662 }
0x1349   : > { %4694 = vpow2.f32 %v2989_v61  ;;  %v4665_v45 = vunpack.i.h.bf16 %v4663_v62  ;;  %v4664_v63 = vunpack.i.l.bf16 %v4663_v62  ;;  %v4572_v61 = vpack.c.bf16 %v880_v31, %v879_v58  ;;  %v888_v62 = vld [vmem:[%s5486_s21 + $0x28] sm:$0xff] }
0x134b   : > { %v4521_v0 = vpack.c.bf16 %v4665_v45, %v4664_v63  ;;  %v4584_v45 = vpack.c.bf16 %v888_v62, %v887_v60  ;;  %v881_v63 = vld [vmem:[%s5485_s20 + $0x30] sm:$0xff] }
0x134c   : > { %v3081_v18 = vpop.permute.xlu0 %3080 }
0x134d   : > { %4522 = vmatpush3.bf16.msra.mxu0 %v4521_v0  ;;  %v882_v0 = vld [vmem:[%s5485_s20 + $0x38] sm:$0xff] }
0x134e   : > { %4523 = vmatprep.subr.bf16.mxu0 %v4707_v5 }
0x1353   : > { %v4695_v1 = vpop.eup %4694 }
0x1354   : > { %v2991_v17 = vsel %vm1225_vm4, %v4695_v1, 0.0 }
0x1355   : > { %2992 = vadd.xlane.f32.xlu1 %v2991_v17  ;;  %v4575_v17 = vpack.c.bf16 %v882_v0, %v881_v63 }
0x1366   : > { %3076 = vrot.lane.b32.xlu1 %v5276_v29, %s5533_s9 }
0x13e2   : > { %v2993_v43 = vpop.xlane.xlu1 %2992 }
0x13e3   : > { %4696 = vrcp.f32 %v2993_v43  ;;  %v890_v43 = vld [vmem:[%s5486_s21 + $0x38] sm:$0xff] }
0x13e6   : > { %v3077_v15 = vpop.permute.xlu1 %3076 }
0x13e7   : > { %v3087_v19 = vsel %vm1144_vm2, %v5259_v57, %v3077_v15 }
0x13ed   : > { %v4697_v6 = vpop.eup %4696 }
0x13ee   : > { %v2995_v25 = vmul.f32 %v4697_v6, %v4695_v1  ;;  %v889_v1 = vld [vmem:[%s5486_s21 + $0x30] sm:$0xff] }
0x13ef   : > { %v4587_v6 = vpack.c.bf16 %v890_v43, %v889_v1 }
0x13f0   : > { %4279 = vmatmul.mubr.msk.f32.vlgmr.msra.gmra.mrb[24].mxu0 %vm1225_vm4, %v2995_v25 }
0x13f1   : > { %4525 = vmatpush3.bf16.msra.mxu0 %v5060_v20  ;;  %4289 = vmatprep.mubr.msk.f32.mxu0 %vm4708_vm0, %v4709_v12  ;;  %v3088_v20 = vsel %vm1225_vm4, %v3087_v19, %v3081_v18 }
0x13f2   : > { %4526 = vmatprep.subr.bf16.mxu0 %v4707_v5 }
0x13f5   : > { %4528 = vmatpush3.bf16.msra.mxu0 %v5066_v22 }
0x13f6   : > { %4535 = vmatprep.subr.bf16.mxu0 %v4707_v5 }
0x14c3   : > { %v3071_v50 = vpop.f32.mrb[24].mxu0 }
0x14c4   : > { %3084 = vrot.lane.b32.xlu0 %v3071_v50, %s5534_s6  ;;  %v4280_v14 = vpop.f32.mrb[25].mxu0 }
0x14c5   : > { %v3884_v14 = vld [vmem:[%s5484_s19] ss:$0 sm:$0xff] }
0x1536   : > { %v3085_v21 = vpop.permute.xlu0 %3084 }
0x1537   : > { %v3089_v23 = vsel %vm1845_vm5, %v3088_v20, %v3085_v21  ;;  %v3885_v21 = vld [vmem:[%s5487_s22] ss:$0 sm:$0xff] }
0x1538   : > { %4290 = vmatmul.mubr.msk.f32.vlgmr.msra.gmra.mrb[26].mxu0 %vm902_vm1, %v3089_v23  ;;  %v3887_v23 = vld [vmem:[%s5488_s23] ss:$0 sm:$0xff] }
0x1539   : > { %4537 = vmatpush3.bf16.msra.mxu0 %v5090_v38  ;;  %4311 = vmatprep.mubr.msk.f32.mxu0 %vm4708_vm0, %v4709_v12 }
0x153a   : > { %4538 = vmatprep.subr.bf16.mxu0 %v4707_v5 }
0x153d   : > { %4540 = vmatpush3.bf16.msra.mxu0 %v5102_v59 }
0x153e   : > { %4553 = vmatprep.subr.bf16.mxu0 %v4707_v5 }
0x1540   : > { %4312 = vmatmul.mubr.msk.f32.vlgmr.msra.gmra.mrb[28].mxu0 %vm902_vm1, %v5125_v44 }
0x1541   : > { %4341 = vmatprep.mubr.msk.f32.mxu0 %vm4708_vm0, %v4709_v12 }
0x160b   : > { %v3159_v22 = vpop.f32.mrb[26].mxu0 }
0x160c   : > { %v3160_v57 = vadd.f32 %v5163_v48, %v3159_v22  ;;  %v4291_v26 = vpop.f32.mrb[27].mxu0  ;;  %v870_v48 = vld [vmem:[%s5483_s18] sm:$0xff] }
0x160e   : > { %4301 = vmatmul.mubr.msk.f32.vlgmr.msra.gmra.mrb[26].mxu1 %vm902_vm1, %v3160_v57 }
0x160f   : > { %4543 = vmatpush3.bf16.msra.mxu1 %v5165_v51  ;;  %4330 = vmatprep.mubr.msk.f32.mxu1 %vm4708_vm0, %v4709_v12  ;;  %v871_v51 = vld [vmem:[%s5483_s18 + $0x8] sm:$0xff] }
0x1610   : > { %4544 = vmatprep.subr.bf16.mxu1 %v4707_v5 }
0x1613   : > { %4546 = vmatpush3.bf16.msra.mxu1 %v5176_v28  ;;  %v3302_v38 = vpop.f32.mrb[28].mxu0  ;;  %v4554_v28 = vpack.c.bf16 %v871_v51, %v870_v48 }
0x1614   : > { %4547 = vmatprep.subr.bf16.mxu1 %v4707_v5  ;;  %v4313_v59 = vpop.f32.mrb[29].mxu0 }
0x1615   : > { %4555 = vmatpush3.bf16.msra.mxu0 %v4554_v28 }
0x1616   : > { %4556 = vmatprep.subr.bf16.mxu0 %v4707_v5 }
0x1617   : > { %4549 = vmatpush3.bf16.msra.mxu1 %v5203_v7 }
0x1618   : > { %4550 = vmatprep.subr.bf16.mxu1 %v4707_v5 }
0x1619   : > { %4558 = vmatpush3.bf16.msra.mxu0 %v4557_v27 }
0x161a   : > { %4559 = vmatprep.subr.bf16.mxu0 %v4707_v5 }
0x161b   : > { %4552 = vmatpush3.bf16.msra.mxu1 %v5213_v10 }
0x161c   : > { %4565 = vmatprep.subr.bf16.mxu1 %v4707_v5 }
0x16e1   : > { %v3232_v29 = vpop.f32.mrb[26].mxu1 }
0x16e2   : > { %v3303_v7 = vadd.f32 %v3302_v38, %v3232_v29  ;;  %v4302_v32 = vpop.f32.mrb[27].mxu1 }
0x16e4   : > { %v3306_v34 = vadd.f32 %v5220_v11, %v3303_v7  ;;  %v875_v11 = vld [vmem:[%s5485_s20] sm:$0xff] }
0x16e5   : > { %v4566_v37 = vpack.c.bf16 %v876_v35, %v875_v11 }
0x16e6   : > { %v3307_v10 = vmax.f32 %v3306_v34, 0.0 }
0x16e8   : > { %4331 = vmatmul.mubr.msk.f32.vlgmr.msra.gmra.mrb[28].mxu1 %vm2083_vm6, %v3307_v10 }
0x16e9   : > { %4371 = vmatprep.mubr.msk.f32.mxu1 %vm4708_vm0, %v4709_v12  ;;  %4567 = vmatpush3.bf16.msra.mxu1 %v4566_v37 }
0x16ea   : > { %4568 = vmatprep.subr.bf16.mxu1 %v4707_v5 }
0x16ed   : > { %4570 = vmatpush3.bf16.msra.mxu1 %v4569_v55 }
0x16ee   : > { %4571 = vmatprep.subr.bf16.mxu1 %v4707_v5 }
0x16f1   : > { %4573 = vmatpush3.bf16.msra.mxu1 %v4572_v61 }
0x16f2   : > { %4574 = vmatprep.subr.bf16.mxu1 %v4707_v5 }
0x16f5   : > { %4576 = vmatpush3.bf16.msra.mxu1 %v4575_v17 }
0x17bb   : > { %v3377_v42 = vpop.f32.mrb[28].mxu1 }
0x17bc   : > { %v3378_v9 = vadd.f32 %v3855_v41, %v3377_v42  ;;  %v4332_v16 = vpop.f32.mrb[29].mxu1 }
0x17be   : > { %v3381_v13 = vadd.f32 %v3378_v9, %v5125_v44  ;;  %v883_v44 = vld [vmem:[%s5486_s21] sm:$0xff] }
0x17bf   : > { %v4578_v53 = vpack.c.bf16 %v884_v52, %v883_v44 }
0x17c0   : > { %4342 = vmatmul.mubr.msk.f32.vlgmr.msra.gmra.mrb[30].mxu0 %vm902_vm1, %v3381_v13 }
0x17c1   : > { %4561 = vmatpush3.bf16.msra.mxu0 %v4560_v3  ;;  %4352 = vmatprep.mubr.msk.f32.mxu0 %vm4708_vm0, %v4709_v12 }
0x17c2   : > { %4562 = vmatprep.subr.bf16.mxu0 %v4707_v5 }
0x17c5   : > { %4564 = vmatpush3.bf16.msra.mxu0 %v4563_v47 }
0x17c6   : > { %4577 = vmatprep.subr.bf16.mxu0 %v4707_v5 }
0x17c8   : > { %4353 = vmatmul.mubr.msk.f32.vlgmr.msra.gmra.mrb[32].mxu0 %vm902_vm1, %v2157_v24 }
0x17c9   : > { %4579 = vmatpush3.bf16.msra.mxu0 %v4578_v53  ;;  %4390 = vmatprep.mubr.msk.f32.mxu0 %vm4708_vm0, %v4709_v12  ;;  %v4581_v12 = vpack.c.bf16 %v886_v56, %v885_v46 }
0x17ca   : > { %4580 = vmatprep.subr.bf16.mxu0 %v4707_v5 }
0x17cd   : > { %4582 = vmatpush3.bf16.msra.mxu0 %v4581_v12 }
0x17ce   : > { %4583 = vmatprep.subr.bf16.mxu0 %v4707_v5 }
0x17d1   : > { %4585 = vmatpush3.bf16.msra.mxu0 %v4584_v45 }
0x17d2   : > { %4586 = vmatprep.subr.bf16.mxu0 %v4707_v5 }
0x17d5   : > { %4588 = vmatpush3.bf16.msra.mxu0 %v4587_v6 }
0x1893   : > { %v3451_v25 = vpop.f32.mrb[30].mxu0 }
0x1894   : > { %v4343_v50 = vpop.f32.mrb[31].mxu0 }
0x189b   : > { %v3524_v15 = vpop.f32.mrb[32].mxu0 }
0x189c   : > { %v3525_v18 = vadd.f32 %v3524_v15, %v3451_v25  ;;  %v4354_v19 = vpop.f32.mrb[33].mxu0 }
0x189e   : > { %v3534_v5 = vadd.f32 %v3884_v14, %v3525_v18 }
0x18a0   : > { %v3535_v20 = vmax.f32 %v3534_v5, 0.0 }
0x18a2   : > { %4372 = vmatmul.mubr.msk.f32.vlgmr.msra.gmra.mrb[30].mxu1 %vm2083_vm6, %v3535_v20  ;;  %4391 = vmatmul.mubr.msk.f32.vlgmr.msra.gmra.mrb[34].mxu0 %vm2083_vm6, %v3535_v20 }
0x1975   : > { %v3611_v22 = vpop.f32.mrb[30].mxu1  ;;  %v3688_v57 = vpop.f32.mrb[34].mxu0 }
0x1976   : > { %v3612_v26 = vadd.f32 %v3885_v21, %v3611_v22  ;;  %v3689_v38 = vadd.f32 %v3887_v23, %v3688_v57  ;;  %v4373_v59 = vpop.f32.mrb[31].mxu1  ;;  %v4392_v48 = vpop.f32.mrb[35].mxu0 }
0x1978   : > { %3615 = vst.msk [vmem:[%s823_s4] sm:$0xff] %vm902_vm1, %v3612_v26  ;;  %3692 = vst.msk [vmem:[%s827_s0] sm:$0xff] %vm902_vm1, %v3689_v38 }
0x1979 PF: > { %s36_s29 = sadd.s32 1, %s4705_s29  }
0x197a   : > { %p33_p4 = scmp.ge.s32.totalorder %s36_s29, 4  }
0x197c   :  { %35 = sbr.rel (!%p33_p4) target bundleno = 11 (0xb), region = 167 }

// kernel: hybrid_block_forward.4
= control target key start
LH: loop header
LB: loop body
LE: loop exit
PB: predicated region body
PF: predicated region fallthrough
CT: control target
= control target key end

     0   :  { %s8897_s6 = smov 1   ;;  %s8898_s10 = smov 2   ;;  %s10137_s0 = inlined_call_operand.smem [shape: u32[45], index: -1, kind: input, shape index: {}] }
   0x1   :  { %s8968_s5 = sld [smem:[%s10137_s0]]   ;;  %s8899_s14 = smov 3  }
   0x2   :  { %s8973_s9 = sld [smem:[%s10137_s0 + %s8897_s6]]   ;;  %s8900_s18 = smov 4  }
   0x3   :  { %s8978_s13 = sld [smem:[%s10137_s0 + %s8898_s10]]   ;;  %s8901_s22 = smov 5  }
   0x4   :  { %s8983_s17 = sld [smem:[%s10137_s0 + %s8899_s14]]   ;;  %s8902_s26 = smov 6  }
   0x5   :  { %s8988_s21 = sld [smem:[%s10137_s0 + %s8900_s18]]   ;;  %s8903_s30 = smov 7  }
   0x6   :  { %s8993_s25 = sld [smem:[%s10137_s0 + %s8901_s22]]   ;;  %s8904_s4 = smov 8  }
   0x7   :  { %10174 = sst [smem:[#allocation26_spill]] %s8968_s5  ;;  %s8905_s10 = smov 9  }
   0x8   :  { %10175 = sst [smem:[#allocation27_spill]] %s8973_s9  ;;  %s8906_s15 = smov 10  }
   0x9   :  { %s8998_s29 = sld [smem:[%s10137_s0 + %s8902_s26]]   ;;  %s8907_s20 = smov 11  }
   0xa   :  { %10176 = sst [smem:[#allocation28_spill]] %s8983_s17  ;;  %s8908_s26 = smov 12  }
   0xb   :  { %s9003_s3 = sld [smem:[%s10137_s0 + %s8903_s30]]   ;;  %s8909_s1 = smov 13  }
   0xc   :  { %10177 = sst [smem:[#allocation29_spill]] %s8993_s25  ;;  %s8910_s7 = smov 14  }
   0xd   :  { %s9008_s8 = sld [smem:[%s10137_s0 + %s8904_s4]]   ;;  %s8912_s22 = smov 16  }
   0xe   :  { %s9013_s14 = sld [smem:[%s10137_s0 + %s8905_s10]]   ;;  %s8913_s28 = smov 17  }
   0xf   :  { %10178 = sst [smem:[#allocation30_spill]] %s8998_s29  ;;  %s8935_s16 = smov 39  }
  0x10   :  { %s9018_s19 = sld [smem:[%s10137_s0 + %s8906_s15]]   ;;  %s8911_s15 = smov 15  }
  0x11   :  { %10179 = sst [smem:[#allocation31_spill]] %s9003_s3  ;;  %s8936_s23 = smov 40  }
  0x12   :  { %s9023_s24 = sld [smem:[%s10137_s0 + %s8907_s20]]   ;;  %s8938_s10 = smov 43  }
  0x13   :  { %10180 = sst [smem:[#allocation32_spill]] %s9008_s8 }
  0x14   :  { %10181 = sst [smem:[#allocation33_spill]] %s9013_s14 }
  0x15   :  { %s9028_s30 = sld [smem:[%s10137_s0 + %s8908_s26]]  }
  0x16   :  { %10182 = sst [smem:[#allocation34_spill]] %s9018_s19 }
  0x17   :  { %s9033_s6 = sld [smem:[%s10137_s0 + %s8909_s1]]   ;;  %s8937_s1 = smov 42  }
  0x18   :  { %10183 = sst [smem:[#allocation35_spill]] %s9023_s24 }
  0x19   :  { %s9038_s12 = sld [smem:[%s10137_s0 + %s8910_s7]]   ;;  %s8914_s7 = smov 18  }
  0x1a   :  { %s9043_s20 = sld [smem:[%s10137_s0 + %s8911_s15]]   ;;  %s8915_s15 = smov 19  }
  0x1b   :  { %10184 = sst [smem:[#allocation36_spill]] %s9028_s30 }
  0x1c   :  { %s9048_s27 = sld [smem:[%s10137_s0 + %s8912_s22]]   ;;  %s8916_s22 = smov 20  }
  0x1d   :  { %10185 = sst [smem:[#allocation37_spill]] %s9033_s6 }
  0x1e   :  { %s9053_s4 = sld [smem:[%s10137_s0 + %s8913_s28]]   ;;  %s8917_s28 = smov 21  }
  0x1f   :  { %10186 = sst [smem:[#allocation38_spill]] %s9038_s12 }
  0x20   :  { %10187 = sst [smem:[#allocation39_spill]] %s9043_s20 }
  0x21   :  { %s9058_s12 = sld [smem:[%s10137_s0 + %s8914_s7]]   ;;  %s8918_s7 = smov 22  }
  0x22   :  { %10188 = sst [smem:[#allocation40_spill]] %s9048_s27 }
  0x23   :  { %s9063_s20 = sld [smem:[%s10137_s0 + %s8915_s15]]   ;;  %s8919_s15 = smov 23  }
  0x24   :  { %10189 = sst [smem:[#allocation41_spill]] %s9053_s4 }
  0x25   :  { %s9068_s27 = sld [smem:[%s10137_s0 + %s8916_s22]]   ;;  %s8920_s22 = smov 24  }
  0x26   :  { %s9073_s4 = sld [smem:[%s10137_s0 + %s8917_s28]]   ;;  %s8921_s28 = smov 25  }
  0x27   :  { %10190 = sst [smem:[#allocation42_spill]] %s9058_s12 }
  0x28   :  { %s9078_s12 = sld [smem:[%s10137_s0 + %s8918_s7]]   ;;  %s8922_s7 = smov 26  }
  0x29   :  { %10191 = sst [smem:[#allocation43_spill]] %s9063_s20 }
  0x2a   :  { %s9083_s20 = sld [smem:[%s10137_s0 + %s8919_s15]]   ;;  %s8923_s15 = smov 27  }
  0x2b   :  { %10192 = sst [smem:[#allocation44_spill]] %s9068_s27 }
  0x2c   :  { %10193 = sst [smem:[#allocation45_spill]] %s9073_s4 }
  0x2d   :  { %s9088_s27 = sld [smem:[%s10137_s0 + %s8920_s22]]   ;;  %s8924_s22 = smov 28  }
  0x2e   :  { %s9093_s4 = sld [smem:[%s10137_s0 + %s8921_s28]]   ;;  %s8925_s28 = smov 29  }
  0x2f   :  { %s9098_s30 = sld [smem:[%s10137_s0 + %s8922_s7]]   ;;  %s8926_s7 = smov 30  }
  0x30   :  { %10194 = sst [smem:[#allocation46_spill]] %s9083_s20 }
  0x31   :  { %s9103_s20 = sld [smem:[%s10137_s0 + %s8923_s15]]   ;;  %s8927_s15 = smov 31  }
  0x32   :  { %s9113_s6 = sld [smem:[%s10137_s0 + %s8925_s28]]   ;;  %s8929_s28 = smov 33  }
  0x33   :  { %10195 = sst [smem:[#allocation47_spill]] %s9088_s27 }
  0x34   :  { %10196 = sst [smem:[#allocation48_spill]] %s9093_s4 }
  0x35   :  { %10197 = sst [smem:[#allocation49_spill]] %s9098_s30 }
  0x36   :  { %s9108_s27 = sld [smem:[%s10137_s0 + %s8924_s22]]   ;;  %s8928_s22 = smov 32  }
  0x37   :  { %s9118_s30 = sld [smem:[%s10137_s0 + %s8926_s7]]   ;;  %s8930_s7 = smov 34  }
  0x38   :  { %10198 = sst [smem:[#allocation50_spill]] %s9113_s6 }
  0x39   :  { %s9123_s14 = sld [smem:[%s10137_s0 + %s8927_s15]]   ;;  %s8931_s15 = smov 35  }
  0x3a   :  { %s9128_s19 = sld [smem:[%s10137_s0 + %s8928_s22]]   ;;  %s8932_s22 = smov 36  }
  0x3b   :  { %s9133_s24 = sld [smem:[%s10137_s0 + %s8929_s28]]   ;;  %s8933_s28 = smov 37  }
  0x3c   :  { %s9138_s8 = sld [smem:[%s10137_s0 + %s8930_s7]]   ;;  %s8934_s7 = smov 38  }
  0x3d   :  { %s9143_s3 = sld [smem:[%s10137_s0 + %s8931_s15]]  }
  0x3e   :  { %s7161_s17 = sld [smem:[%s10137_s0 + %s8934_s7]]  }
  0x3f   :  { %s9161_s25 = sld [smem:[%s10137_s0 + %s8935_s16]]   ;;  %s8939_s16 = smov 44  }
  0x40   :  { %10199 = sst [smem:[#allocation51_spill]] %s9128_s19 }
  0x41   :  { %10200 = sst [smem:[#allocation52_spill]] %s9133_s24 }
  0x42   :  { %s9148_s19 = sld [smem:[%s10137_s0 + %s8932_s22]]  }
  0x43   :  { %10201 = sst [smem:[#allocation53_spill]] %s9143_s3 }
  0x44   :  { %s9153_s24 = sld [smem:[%s10137_s0 + %s8933_s28]]   ;;  %v95_v0 = vstv %s7161_s17 }
  0x45   :  { %10203 = sst [smem:[#allocation55_spill]] %s9161_s25  ;;  %96 = vst [vmem:[#allocation2] sm:$0x1] %v95_v0 }
  0x46   :  { %s9166_s29 = sld [smem:[%s10137_s0 + %s8936_s23]]   ;;  %s8940_s23 = smov 41  }
  0x47   :  { %s9176_s9 = sld [smem:[%s10137_s0 + %s8938_s10]]  }
  0x48   :  { %s9181_s25 = sld [smem:[%s10137_s0 + %s8939_s16]]  }
  0x49   :  { %s7164_s28 = sld [smem:[%s10137_s0 + %s8940_s23]]  }
  0x4a   :  { %10202 = sst [smem:[#allocation54_spill]] %s9153_s24 }
  0x4b   :  { %s9171_s24 = sld [smem:[%s10137_s0 + %s8937_s1]]  }
  0x4f   :  { %v97_v1 = vstv %s7164_s28 }
  0x50   :  { %98 = vst [vmem:[#allocation3] sm:$0x1] %v97_v1 }
  0x51   :  { %99 = vsyncpa [#allocation5], 0 }
  0x52   :  { %100 = vsyncpa [#allocation7], 0 }
  0x53   :  { %101 = vsyncpa [#allocation10], 0 }
  0x54   :  { %102 = vsyncpa [#allocation13], 0 }
  0x55   :  { %103 = vsyncpa [#allocation16], 0 }
  0x56   :  { %104 = vsyncpa [#allocation19], 0  ;;  %s9186_s1 = smov 0  }
  0x57 LB: > { %s10204_s6 = sld [smem:[#allocation50_spill]]  ;;  %s10205_s4 = sld [smem:[#allocation48_spill]]  ;;  %s8895_s1 = sphi %s9186_s1, %s110_s1  }
  0x58   : > { %s10206_s3 = sld [smem:[#allocation53_spill]]  ;;  %s8941_s0 = smov [#allocation6]  }
  0x59   : > { %s1175_s17 = sshll.u32 %s8941_s0, 4  ;;  %s9192_s2 = sadd.s32 4294967295, %s8895_s1   ;;  %s9197_s17 = int_to_ptr.vmem [resolvable:$true] %s1175_s17 }
  0x5a   : > { %p7170_p0 = scmp.ge.s32.totalorder %s8895_s1, 1  ;;  %p1085_p1 = scmp.lt.s32.totalorder %s8895_s1, 3 }
  0x5b   : > { %p10154_p2 = scmp.eq.s32.totalorder %s9192_s2, 0  ;;  %s8942_s7 = smov [#allocation9]  }
  0x5c   : > { %p9199_p3 = pnand %p7170_p0, %p1085_p1  ;;  %s1200_s11 = sshll.u32 %s8942_s7, 4  ;;  %s9205_s11 = int_to_ptr.vmem [resolvable:$true] %s1200_s11 }
  0x5d   : > { %s8943_s16 = smov [#allocation12]   ;;  %s8944_s23 = smov [#allocation15]  }
  0x5e   : > { %s10207_s10 = scalar_select %p9199_p3, 1, 0 }
  0x5f   : > { %p8388_p4 = pneg %p9199_p3  ;;  %s1222_s15 = sshll.u32 %s8943_s16, 4  ;;  %s9213_s15 = int_to_ptr.vmem [resolvable:$true] %s1222_s15 }
  0x60   : > { %s1250_s22 = sshll.u32 %s8944_s23, 4  ;;  %s8585_s26 = scalar_lea.hbm %s10205_s4, 16  ;;  %s9215_s22 = int_to_ptr.vmem [resolvable:$true] %s1250_s22 }
  0x61   : > { %p9209_p5 = pnand %p10154_p2, %p8388_p4  ;;  %p8586_p6 = scmp.ne.s32.totalorder %s10205_s4, %s8585_s26 }
  0x62   : > { %p8592_p10 = scmp.lt.u32.totalorder %s8585_s26, %s10205_s4 }
  0x63   : > { %p9221_p7 = pneg %p9209_p5 }
  0x65   : > { %p8588_p8 = pnand %p9221_p7, %p8586_p6 }
  0x67   : > { %p8589_p9 = pneg %p8588_p8 }
  0x69   : > { %p8594_p11 = pnand %p8592_p10, %p8589_p9 }
  0x6b   : > { %8597 = shalt.err (!%p8594_p11)
}
  0x6c   : > { %s8598_s0 = scalar_lea.vmem %s9197_s17, 16  ;;  %s8605_s7 = scalar_lea.vmem %s9197_s17, 32 }
  0x6d   : > { %p8599_p12 = scmp.ne.s32.totalorder %s9197_s17, %s8598_s0  ;;  %p8606_p1 = scmp.lt.s32.totalorder %s9197_s17, %s9197_s17 }
  0x6e   : > { %p8607_p4 = scmp.lt.s32.totalorder %s8605_s7, %s8598_s0 }
  0x6f   : > { %p8601_p13 = pnand %p8599_p12, %p9221_p7 }
  0x70   : > { %p8608_p2 = por %p8607_p4, %p8606_p1 }
  0x71   : > { %p8602_p0 = pneg %p8601_p13 }
  0x73   : > { %p8609_p6 = pnand %p8608_p2, %p8602_p0 }
  0x75   : > { %8612 = shalt.err (!%p8609_p6)
}
  0x76   : > { %8394 = dma.hbm_to_vmem [thread:$0]  (!%p9209_p5), %s10205_s4, 16, %s9197_s17, [#allocation7]  }
  0x77   : > { %s8613_s16 = scalar_lea.hbm %s9108_s27, 16 }
  0x78   : > { %p8614_p8 = scmp.ne.s32.totalorder %s9108_s27, %s8613_s16  ;;  %p8620_p11 = scmp.lt.u32.totalorder %s8613_s16, %s9108_s27 }
  0x7a   : > { %p8616_p9 = pnand %p8614_p8, %p9221_p7 }
  0x7c   : > { %p8617_p10 = pneg %p8616_p9 }
  0x7e   : > { %p8622_p12 = pnand %p8620_p11, %p8617_p10 }
  0x80   : > { %8625 = shalt.err (!%p8622_p12)
}
  0x81   : > { %s8626_s23 = scalar_lea.vmem %s9205_s11, 16  ;;  %s8633_s26 = scalar_lea.vmem %s9205_s11, 32 }
  0x82   : > { %p8627_p2 = scmp.ne.s32.totalorder %s9205_s11, %s8626_s23  ;;  %p8634_p1 = scmp.lt.s32.totalorder %s9205_s11, %s9205_s11 }
  0x83   : > { %p8635_p4 = scmp.lt.s32.totalorder %s8633_s26, %s8626_s23 }
  0x84   : > { %p8629_p13 = pnand %p8627_p2, %p9221_p7 }
  0x85   : > { %p8636_p6 = por %p8635_p4, %p8634_p1 }
  0x86   : > { %p8630_p0 = pneg %p8629_p13 }
  0x88   : > { %p8637_p8 = pnand %p8636_p6, %p8630_p0 }
  0x8a   : > { %8640 = shalt.err (!%p8637_p8)
}
  0x8b   : > { %8400 = dma.hbm_to_vmem [thread:$0]  (!%p9209_p5), %s9108_s27, 16, %s9205_s11, [#allocation10]  }
  0x8c   : > { %s8641_s17 = scalar_lea.hbm %s9118_s30, 16 }
  0x8d   : > { %p8642_p9 = scmp.ne.s32.totalorder %s9118_s30, %s8641_s17  ;;  %p8648_p12 = scmp.lt.u32.totalorder %s8641_s17, %s9118_s30 }
  0x8f   : > { %p8644_p10 = pnand %p8642_p9, %p9221_p7 }
  0x91   : > { %p8645_p11 = pneg %p8644_p10 }
  0x93   : > { %p8650_p2 = pnand %p8648_p12, %p8645_p11 }
  0x95   : > { %8653 = shalt.err (!%p8650_p2)
}
  0x96   : > { %s8654_s0 = scalar_lea.vmem %s9213_s15, 16  ;;  %s8661_s7 = scalar_lea.vmem %s9213_s15, 32 }
  0x97   : > { %p8655_p13 = scmp.ne.s32.totalorder %s9213_s15, %s8654_s0  ;;  %p8662_p4 = scmp.lt.s32.totalorder %s9213_s15, %s9213_s15 }
  0x98   : > { %p8663_p6 = scmp.lt.s32.totalorder %s8661_s7, %s8654_s0 }
  0x99   : > { %p8657_p0 = pnand %p8655_p13, %p9221_p7 }
  0x9a   : > { %p8664_p8 = por %p8663_p6, %p8662_p4 }
  0x9b   : > { %p8658_p1 = pneg %p8657_p0 }
  0x9d   : > { %p8665_p9 = pnand %p8664_p8, %p8658_p1 }
  0x9f   : > { %8668 = shalt.err (!%p8665_p9)
}
  0xa0   : > { %8406 = dma.hbm_to_vmem [thread:$0]  (!%p9209_p5), %s9118_s30, 16, %s9213_s15, [#allocation13]  }
  0xa1   : > { %s8669_s11 = scalar_lea.hbm %s9138_s8, 16 }
  0xa2   : > { %p8670_p10 = scmp.ne.s32.totalorder %s9138_s8, %s8669_s11  ;;  %p8676_p2 = scmp.lt.u32.totalorder %s8669_s11, %s9138_s8 }
  0xa4   : > { %p8672_p11 = pnand %p8670_p10, %p9221_p7 }
  0xa6   : > { %p8673_p12 = pneg %p8672_p11 }
  0xa8   : > { %p8678_p13 = pnand %p8676_p2, %p8673_p12 }
  0xaa   : > { %8681 = shalt.err (!%p8678_p13)
}
  0xab   : > { %s8682_s16 = scalar_lea.vmem %s9215_s22, 16  ;;  %s8689_s23 = scalar_lea.vmem %s9215_s22, 32 }
  0xac   : > { %p8683_p0 = scmp.ne.s32.totalorder %s9215_s22, %s8682_s16  ;;  %p8690_p6 = scmp.lt.s32.totalorder %s9215_s22, %s9215_s22 }
  0xad   : > { %p8691_p8 = scmp.lt.s32.totalorder %s8689_s23, %s8682_s16 }
  0xae   : > { %p8685_p1 = pnand %p8683_p0, %p9221_p7 }
  0xaf   : > { %p8692_p9 = por %p8691_p8, %p8690_p6 }
  0xb0   : > { %p8686_p4 = pneg %p8685_p1 }
  0xb2   : > { %p8693_p10 = pnand %p8692_p9, %p8686_p4 }
  0xb4   : > { %8696 = shalt.err (!%p8693_p10)
}
  0xb5   : > { %8412 = dma.hbm_to_vmem [thread:$0]  (!%p9209_p5), %s9138_s8, 16, %s9215_s22, [#allocation16]  }
  0xb6   : > { %s8945_s15 = smov [#allocation4]   ;;  %s8946_s17 = smov [#allocation8]  }
  0xb7   : > { %s1158_s26 = sshll.u32 %s8945_s15, 4  ;;  %s1189_s0 = sshll.u32 %s8946_s17, 4  ;;  %s1159_s26 = int_to_ptr.vmem [resolvable:$true] %s1158_s26  ;;  %s1190_s0 = int_to_ptr.vmem [resolvable:$true] %s1189_s0 }
  0xb8   : > { %s8697_s7 = scalar_lea.hbm %s9078_s12, 16 }
  0xb9   : > { %p8698_p11 = scmp.ne.s32.totalorder %s9078_s12, %s8697_s7  ;;  %p8704_p13 = scmp.lt.u32.totalorder %s8697_s7, %s9078_s12 }
  0xbb   : > { %p8700_p12 = pnand %p8698_p11, %p9221_p7 }
  0xbd   : > { %p8701_p2 = pneg %p8700_p12 }
  0xbf   : > { %p8706_p0 = pnand %p8704_p13, %p8701_p2 }
  0xc1   : > { %8709 = shalt.err (!%p8706_p0)
}
  0xc2   : > { %s8710_s11 = scalar_lea.vmem %s1159_s26, 16  ;;  %s8717_s22 = scalar_lea.vmem %s1159_s26, 32 }
  0xc3   : > { %p8711_p1 = scmp.ne.s32.totalorder %s1159_s26, %s8710_s11  ;;  %p8718_p8 = scmp.lt.s32.totalorder %s1159_s26, %s1159_s26 }
  0xc4   : > { %p8719_p9 = scmp.lt.s32.totalorder %s8717_s22, %s8710_s11 }
  0xc5   : > { %p8713_p4 = pnand %p8711_p1, %p9221_p7 }
  0xc6   : > { %p8720_p10 = por %p8719_p9, %p8718_p8 }
  0xc7   : > { %p8714_p6 = pneg %p8713_p4 }
  0xc9   : > { %p8721_p3 = pnand %p8720_p10, %p8714_p6 }
  0xcb   : > { %8724 = shalt.err (!%p8721_p3)
}
  0xcc   : > { %8391 = dma.hbm_to_vmem [thread:$0]  (!%p9209_p5), %s9078_s12, 16, %s1159_s26, [#allocation5]  }
  0xcd   : > { %s8725_s16 = scalar_lea.hbm %s9103_s20, 16 }
  0xce   : > { %p8726_p11 = scmp.ne.s32.totalorder %s9103_s20, %s8725_s16  ;;  %p8732_p13 = scmp.lt.u32.totalorder %s8725_s16, %s9103_s20 }
  0xd0   : > { %p8728_p12 = pnand %p8726_p11, %p9221_p7 }
  0xd2   : > { %p8729_p2 = pneg %p8728_p12 }
  0xd4   : > { %p8734_p0 = pnand %p8732_p13, %p8729_p2 }
  0xd6   : > { %8737 = shalt.err (!%p8734_p0)
}
  0xd7   : > { %s8738_s23 = scalar_lea.vmem %s1190_s0, 16  ;;  %s8745_s15 = scalar_lea.vmem %s1190_s0, 32 }
  0xd8   : > { %p8739_p3 = scmp.ne.s32.totalorder %s1190_s0, %s8738_s23  ;;  %p8746_p6 = scmp.lt.s32.totalorder %s1190_s0, %s1190_s0 }
  0xd9   : > { %p8747_p8 = scmp.lt.s32.totalorder %s8745_s15, %s8738_s23 }
  0xda   : > { %p8741_p1 = pnand %p8739_p3, %p9221_p7 }
  0xdb   : > { %p8748_p9 = por %p8747_p8, %p8746_p6 }
  0xdc   : > { %p8742_p4 = pneg %p8741_p1 }
  0xde   : > { %p8749_p10 = pnand %p8748_p9, %p8742_p4 }
  0xe0   : > { %8752 = shalt.err (!%p8749_p10)
}
  0xe1   : > { %8397 = dma.hbm_to_vmem [thread:$0]  (!%p9209_p5), %s9103_s20, 16, %s1190_s0, [#allocation7]  }
  0xe2   : > { %s8947_s26 = smov [#allocation11]   ;;  %s8948_s7 = smov [#allocation14]  }
  0xe3   : > { %s1211_s17 = sshll.u32 %s8947_s26, 4  ;;  %s1233_s11 = sshll.u32 %s8948_s7, 4  ;;  %s1212_s17 = int_to_ptr.vmem [resolvable:$true] %s1211_s17  ;;  %s1234_s11 = int_to_ptr.vmem [resolvable:$true] %s1233_s11 }
  0xe4   : > { %s8753_s22 = scalar_lea.hbm %s10204_s6, 16 }
  0xe5   : > { %p8754_p11 = scmp.ne.s32.totalorder %s10204_s6, %s8753_s22  ;;  %p8760_p13 = scmp.lt.u32.totalorder %s8753_s22, %s10204_s6 }
  0xe7   : > { %p8756_p12 = pnand %p8754_p11, %p9221_p7 }
  0xe9   : > { %p8757_p2 = pneg %p8756_p12 }
  0xeb   : > { %p8762_p0 = pnand %p8760_p13, %p8757_p2 }
  0xed   : > { %8765 = shalt.err (!%p8762_p0)
}
  0xee   : > { %s8766_s16 = scalar_lea.vmem %s1212_s17, 16  ;;  %s8773_s0 = scalar_lea.vmem %s1212_s17, 32 }
  0xef   : > { %p8767_p3 = scmp.ne.s32.totalorder %s1212_s17, %s8766_s16  ;;  %p8774_p6 = scmp.lt.s32.totalorder %s1212_s17, %s1212_s17 }
  0xf0   : > { %p8775_p8 = scmp.lt.s32.totalorder %s8773_s0, %s8766_s16 }
  0xf1   : > { %p8769_p1 = pnand %p8767_p3, %p9221_p7 }
  0xf2   : > { %p8776_p9 = por %p8775_p8, %p8774_p6 }
  0xf3   : > { %p8770_p4 = pneg %p8769_p1 }
  0xf5   : > { %p8777_p10 = pnand %p8776_p9, %p8770_p4 }
  0xf7   : > { %8780 = shalt.err (!%p8777_p10)
}
  0xf8   : > { %8403 = dma.hbm_to_vmem [thread:$0]  (!%p9209_p5), %s10204_s6, 16, %s1212_s17, [#allocation10]  }
  0xf9   : > { %s8781_s23 = scalar_lea.hbm %s9123_s14, 16 }
  0xfa   : > { %p8782_p11 = scmp.ne.s32.totalorder %s9123_s14, %s8781_s23  ;;  %p8788_p13 = scmp.lt.u32.totalorder %s8781_s23, %s9123_s14 }
  0xfc   : > { %p8784_p12 = pnand %p8782_p11, %p9221_p7 }
  0xfe   : > { %p8785_p2 = pneg %p8784_p12 }
 0x100   : > { %p8790_p0 = pnand %p8788_p13, %p8785_p2 }
 0x102   : > { %8793 = shalt.err (!%p8790_p0)
}
 0x103   : > { %s8794_s15 = scalar_lea.vmem %s1234_s11, 16  ;;  %s8801_s26 = scalar_lea.vmem %s1234_s11, 32 }
 0x104   : > { %p8795_p3 = scmp.ne.s32.totalorder %s1234_s11, %s8794_s15  ;;  %p8802_p6 = scmp.lt.s32.totalorder %s1234_s11, %s1234_s11 }
 0x105   : > { %p8803_p8 = scmp.lt.s32.totalorder %s8801_s26, %s8794_s15 }
 0x106   : > { %p8797_p1 = pnand %p8795_p3, %p9221_p7 }
 0x107   : > { %p8804_p9 = por %p8803_p8, %p8802_p6 }
 0x108   : > { %p8798_p4 = pneg %p8797_p1 }
 0x10a   : > { %p8805_p10 = pnand %p8804_p9, %p8798_p4 }
 0x10c   : > { %8808 = shalt.err (!%p8805_p10)
}
 0x10d   : > { %8409 = dma.hbm_to_vmem [thread:$0]  (!%p9209_p5), %s9123_s14, 16, %s1234_s11, [#allocation13]  }
 0x10e   : > { %s8949_s17 = smov [#allocation17]   ;;  %s8950_s22 = smov [#allocation18]  }
 0x10f   : > { %s1261_s7 = sshll.u32 %s8949_s17, 4  ;;  %s1272_s16 = sshll.u32 %s8950_s22, 4  ;;  %s1262_s7 = int_to_ptr.vmem [resolvable:$true] %s1261_s7  ;;  %s1273_s16 = int_to_ptr.vmem [resolvable:$true] %s1272_s16 }
 0x110   : > { %s8809_s0 = scalar_lea.hbm %s10206_s3, 16 }
 0x111   : > { %p8810_p11 = scmp.ne.s32.totalorder %s10206_s3, %s8809_s0  ;;  %p8816_p13 = scmp.lt.u32.totalorder %s8809_s0, %s10206_s3 }
 0x113   : > { %p8812_p12 = pnand %p8810_p11, %p9221_p7 }
 0x115   : > { %p8813_p2 = pneg %p8812_p12 }
 0x117   : > { %p8818_p0 = pnand %p8816_p13, %p8813_p2 }
 0x119   : > { %8821 = shalt.err (!%p8818_p0)
}
 0x11a   : > { %s8822_s23 = scalar_lea.vmem %s1262_s7, 16  ;;  %s8829_s11 = scalar_lea.vmem %s1262_s7, 32 }
 0x11b   : > { %p8823_p3 = scmp.ne.s32.totalorder %s1262_s7, %s8822_s23  ;;  %p8830_p6 = scmp.lt.s32.totalorder %s1262_s7, %s1262_s7 }
 0x11c   : > { %p8831_p8 = scmp.lt.s32.totalorder %s8829_s11, %s8822_s23 }
 0x11d   : > { %p8825_p1 = pnand %p8823_p3, %p9221_p7 }
 0x11e   : > { %p8832_p9 = por %p8831_p8, %p8830_p6 }
 0x11f   : > { %p8826_p4 = pneg %p8825_p1 }
 0x121   : > { %p8833_p10 = pnand %p8832_p9, %p8826_p4 }
 0x123   : > { %8836 = shalt.err (!%p8833_p10)
}
 0x124   : > { %8415 = dma.hbm_to_vmem [thread:$0]  (!%p9209_p5), %s10206_s3, 16, %s1262_s7, [#allocation16]  }
 0x125   : > { %s8837_s15 = scalar_lea.hbm %s9148_s19, 16 }
 0x126   : > { %p8838_p11 = scmp.ne.s32.totalorder %s9148_s19, %s8837_s15  ;;  %p8844_p13 = scmp.lt.u32.totalorder %s8837_s15, %s9148_s19 }
 0x128   : > { %p8840_p12 = pnand %p8838_p11, %p9221_p7 }
 0x12a   : > { %p8841_p2 = pneg %p8840_p12 }
 0x12c   : > { %p8846_p0 = pnand %p8844_p13, %p8841_p2 }
 0x12e   : > { %8849 = shalt.err (!%p8846_p0)
}
 0x12f   : > { %s8850_s26 = scalar_lea.vmem %s1273_s16, 16  ;;  %s8857_s17 = scalar_lea.vmem %s1273_s16, 32 }
 0x130   : > { %p8851_p3 = scmp.ne.s32.totalorder %s1273_s16, %s8850_s26  ;;  %p8858_p6 = scmp.lt.s32.totalorder %s1273_s16, %s1273_s16 }
 0x131   : > { %p8859_p8 = scmp.lt.s32.totalorder %s8857_s17, %s8850_s26 }
 0x132   : > { %p8853_p1 = pnand %p8851_p3, %p9221_p7 }
 0x133   : > { %p8860_p9 = por %p8859_p8, %p8858_p6 }
 0x134   : > { %p8854_p4 = pneg %p8853_p1 }
 0x136   : > { %p8861_p10 = pnand %p8860_p9, %p8854_p4 }
 0x138   : > { %8864 = shalt.err (!%p8861_p10)
}
 0x139   : > { %8418 = dma.hbm_to_vmem [thread:$0]  (!%p9209_p5), %s9148_s19, 16, %s1273_s16, [#allocation19]  }
 0x13a   : > { %p10210_p11 = scmp.ne.s32.totalorder %s10207_s10, 0 }
 0x13b   : > { %p10211_p12 = scmp.eq.s32.totalorder (!%p10210_p11), %s9192_s2, 0 }
 0x13c   : > { %1314 = sbr.rel (%p10210_p11) target bundleno = 6458 (0x193a), region = 188 }
 0x143   : > { %8870 = dma.done.wait (%p10211_p12), [#allocation5], 16   ;;  %p10212_p2 = pmov %p10211_p12 }
 0x145   : > { %8872 = vsyncadd (%p10212_p2), [#allocation5], 4294967280  ;;  %p10213_p7 = pmov %p10212_p2 }
 0x146   : > { %p10214_p13 = pmov %p10212_p2 }
 0x147   : > { %8874 = dma.done.wait (%p10213_p7), [#allocation7], 32  }
 0x148   : > { %8876 = vsyncadd (%p10214_p13), [#allocation7], 4294967264  ;;  %p10215_p0 = pmov %p10212_p2 }
 0x14a   : > { %8878 = dma.done.wait (%p10215_p0), [#allocation10], 32   ;;  %p10216_p5 = pmov %p10215_p0 }
 0x14b   : > { %p10217_p3 = pmov %p10215_p0 }
 0x14c   : > { %8880 = vsyncadd (%p10216_p5), [#allocation10], 4294967264 }
 0x14d   : > { %8882 = dma.done.wait (%p10217_p3), [#allocation13], 32   ;;  %p10218_p1 = pmov %p10215_p0 }
 0x14e   : > { %p10219_p4 = pmov %p10215_p0 }
 0x14f   : > { %8884 = vsyncadd (%p10218_p1), [#allocation13], 4294967264 }
 0x150   : > { %8886 = dma.done.wait (%p10219_p4), [#allocation16], 32   ;;  %p10220_p6 = pmov %p10215_p0 }
 0x151   : > { %p10221_p8 = pmov %p10215_p0 }
 0x152   : > { %8888 = vsyncadd (%p10220_p6), [#allocation16], 4294967264 }
 0x153   : > { %8890 = dma.done.wait (%p10221_p8), [#allocation19], 16   ;;  %p10222_p9 = pmov %p10215_p0 }
 0x154   : > { %p1466_p10 = scmp.lt.s32.totalorder %s9192_s2, 1  ;;  %v8951_v2 = vmov 0.0|0.0   ;;  %s10223_s5 = sld [smem:[#allocation26_spill]]  ;;  %vm8952_vm0 = vmmov 0   ;;  %v8953_v3 = vmov 0.0   ;;  %v1486_v4 = vld [vmem:[%s8978_s13] sm:$0xff] }
 0x155   : > { %8892 = vsyncadd (%p10222_p9), [#allocation19], 4294967280  ;;  %8114 = vmatprep.subr.bf16.mxu0 %v8951_v2  ;;  %7559 = vmatprep.mubr.msk.f32.mxu0 %vm8952_vm0, %v8953_v3  ;;  %v1487_v5 = vld [vmem:[%s8978_s13 + $0x8] sm:$0xff]  ;;  %v1488_v6 = vld [vmem:[%s8978_s13 + $0x10] sm:$0xff]  ;;  %s10224_s18 = sld [smem:[#allocation27_spill]]  ;;  %s10225_s7 = sld [smem:[#allocation30_spill]] }
 0x156   : > { %7589 = vmatprep.subr.mxu1 %v8953_v3  ;;  %7591 = vmatprep.mubr.msk.f32.mxu1 %vm8952_vm0, %v8953_v3  ;;  %s10257_s2 = smov (!%p1466_p10, %s9192_s2), 1  ;;  %v9384_v7 = vpack.c.bf16 %v1487_v5, %v1486_v4  ;;  %v1489_v8 = vld [vmem:[%s8978_s13 + $0x18] sm:$0xff]  ;;  %v1491_v10 = vld [vmem:[%s8988_s21] sm:$0xff]  ;;  %v1492_v11 = vld [vmem:[%s8988_s21 + $0x8] sm:$0xff]  ;;  %vm1603_vm1 = vcmask 261120   ;;  %s10226_s22 = sld [smem:[#allocation29_spill]] }
 0x157   : > { %s9387_s10 = sshll.u32 %s10257_s2, 3  ;;  %v9390_v9 = vpack.c.bf16 %v1489_v8, %v1488_v6  ;;  %v9400_v13 = vpack.c.bf16 %v1492_v11, %v1491_v10  ;;  %v1493_v14 = vld [vmem:[%s8988_s21 + $0x10] sm:$0xff]  ;;  %v1494_v15 = vld [vmem:[%s8988_s21 + $0x18] sm:$0xff]  ;;  %s10227_s16 = sld [smem:[#allocation28_spill]]  ;;  %vm1832_vm2 = vcmask 64512   ;;  %vm2506_vm3 = vcmask 130048  }
 0x158   : > { %8116 = vmatpush3.bf16.msra.mxu0 %v9384_v7  ;;  %v9408_v16 = vpack.c.bf16 %v1494_v15, %v1493_v14  ;;  %s10228_s0 = sld [smem:[#allocation31_spill]]  ;;  %s10160_s23 = smov 112   ;;  %vm2508_vm4 = vcmask 195584   ;;  %vm2746_vm5 = vcmask 523264   ;;  %vm6897_vm6 = vcmask 7168  }
 0x159   : > { %8117 = vmatprep.subr.bf16.mxu0 %v8951_v2  ;;  %s10167_s11 = smov 120   ;;  %s10158_s15 = smov 104  }
 0x15a   : > { %s1469_s28 = scalar_lea.vmem %s10223_s5, %s9387_s10  ;;  %s10229_s26 = sld [smem:[#allocation32_spill]] }
 0x15b   : > { %v9398_v12 = vld [vmem:[%s1469_s28] sm:$0xff]  ;;  %s9415_s2 = scalar_lea.vmem %s10224_s18, %s9387_s10  ;;  %v1497_v18 = vld [vmem:[%s10225_s7 + $0x8] sm:$0xff]  ;;  %v1498_v21 = vld [vmem:[%s10225_s7 + $0x10] sm:$0xff]  ;;  %s10230_s17 = sld [smem:[#allocation35_spill]] }
 0x15c   : > { %8119 = vmatpush3.bf16.msra.mxu0 %v9390_v9  ;;  %v1496_v17 = vld [vmem:[%s10225_s7] sm:$0xff]  ;;  %v1499_v22 = vld [vmem:[%s10225_s7 + $0x18] sm:$0xff]  ;;  %s10164_s18 = smov 8   ;;  %s10231_s28 = sld [smem:[#allocation34_spill]] }
 0x15d   : > { %8120 = vmatprep.subr.bf16.mxu0 %v8951_v2  ;;  %v9421_v19 = vld [vmem:[%s9415_s2] sm:$0xff]  ;;  %v9423_v20 = vpack.c.bf16 %v1497_v18, %v1496_v17  ;;  %v9434_v23 = vpack.c.bf16 %v1499_v22, %v1498_v21  ;;  %s10245_s3 = smov 120   ;;  %s10247_s4 = sld [smem:[#allocation47_spill]] }
 0x15e   : > { %v9443_v26 = vld [vmem:[%s10226_s22] ss:$0 sm:$0xff]  ;;  %s10162_s22 = smov 16   ;;  %s10248_s5 = sld [smem:[#allocation46_spill]] }
 0x15f   : > { %7560 = vmatmul.mubr.msk.f32.vlgmr.msra.gmra.mrb[0].mxu0 %vm1603_vm1, %v9398_v12  ;;  %v9447_v30 = vld [vmem:[%s10227_s16] ss:$0 sm:$0xff]  ;;  %s10156_s16 = smov 24   ;;  %s10249_s6 = smov 8  }
 0x160   : > { %8122 = vmatpush3.bf16.msra.mxu0 %v9400_v13  ;;  %7570 = vmatprep.mubr.msk.f32.mxu0 %vm8952_vm0, %v8953_v3  ;;  %v9462_v32 = vld [vmem:[%s10228_s0] ss:$0 sm:$0xff]  ;;  %s10232_s0 = sld [smem:[#allocation33_spill]]  ;;  %s10250_s7 = smov 16  }
 0x161   : > { %8123 = vmatprep.subr.bf16.mxu0 %v8951_v2 }
 0x164   : > { %8125 = vmatpush3.bf16.msra.mxu0 %v9408_v16 }
 0x165   : > { %8126 = vmatprep.subr.bf16.mxu0 %v8951_v2 }
 0x167   : > { %7571 = vmatmul.mubr.msk.f32.vlgmr.msra.gmra.mrb[2].mxu0 %vm1603_vm1, %v9421_v19 }
 0x168   : > { %8128 = vmatpush3.bf16.msra.mxu0 %v9423_v20  ;;  %7581 = vmatprep.mubr.msk.f32.mxu0 %vm8952_vm0, %v8953_v3 }
 0x169   : > { %8129 = vmatprep.subr.bf16.mxu0 %v8951_v2 }
 0x16c   : > { %8131 = vmatpush3.bf16.msra.mxu0 %v9434_v23 }
 0x16d   : > { %7584 = vmatprep.subr.mxu0 %v8953_v3 }
 0x16f   : > { %7582 = vmatmul.mubr.msk.f32.vlgmr.msra.gmra.mrb[4].mxu0 %vm1603_vm1, %v9421_v19 }
 0x170   : > { %7586 = vmatprep.mubr.msk.f32.mxu0 %vm8952_vm0, %v8953_v3 }
 0x232   : > { %v1673_v24 = vpop.f32.mrb[0].mxu0 }
 0x233   : > { %v7561_v25 = vpop.f32.mrb[1].mxu0  ;;  %v1674_v31 = vadd.f32 %v9447_v30, %v1673_v24 }
 0x23a   : > { %v1752_v27 = vpop.f32.mrb[2].mxu0 }
 0x23b   : > { %v1753_v28 = vadd.f32 %v9443_v26, %v1752_v27  ;;  %v7572_v29 = vpop.f32.mrb[3].mxu0 }
 0x23d   : > { %2163 = vrot.lane.b32.xlu1 %v1753_v28, %s10160_s23  ;;  %1996 = vrot.lane.b32.xlu0 %v1753_v28, %s10167_s11 }
 0x23e   : > { %7585 = vmatpush3.xpose.msk.msra.mxu0 %vm1832_vm2, %v1753_v28 }
 0x23f   : > { %7594 = vmatprep.subr.mxu0 %v8953_v3 }
 0x241   : > { %7587 = vmatmul.mubr.msk.f32.vlgmr.msra.gmra.mrb[6].mxu0 %vm1832_vm2, %v1674_v31  ;;  %2161 = vrot.lane.b32.xlu1 %v1674_v31, %s10160_s23 }
 0x242   : > { %1994 = vrot.lane.b32.xlu0 %v1674_v31, %s10167_s11  ;;  %7596 = vmatprep.mubr.msk.f32.mxu0 %vm8952_vm0, %v8953_v3  ;;  %v1828_v33 = vpop.f32.mrb[4].mxu0 }
 0x243   : > { %v9465_v34 = vadd.f32 %v9462_v32, %v1828_v33  ;;  %v7583_v35 = vpop.f32.mrb[5].mxu0 }
 0x245   : > { %2327 = vrot.lane.b32.xlu1 %v1674_v31, %s10158_s15  ;;  %7590 = vmatpush3.msra.mxu1 %v9465_v34 }
 0x246   : > { %2329 = vrot.lane.b32.xlu0 %v1753_v28, %s10158_s15  ;;  %7599 = vmatprep.subr.mxu1 %v8953_v3 }
 0x2af   : > { %v1997_v36 = vpop.permute.xlu0 %1996  ;;  %v2164_v37 = vpop.permute.xlu1 %2163 }
 0x2b0   : > { %7595 = vmatpush3.xpose.msk.msra.mxu0 %vm1832_vm2, %v1997_v36 }
 0x2b1   : > { %7604 = vmatprep.subr.mxu0 %v8953_v3 }
 0x2b3   : > { %v2162_v39 = vpop.permute.xlu1 %2161 }
 0x2b4   : > { %v1995_v38 = vpop.permute.xlu0 %1994 }
 0x2b5   : > { %7597 = vmatmul.mubr.msk.f32.vlgmr.msra.gmra.mrb[8].mxu0 %vm1832_vm2, %v1995_v38 }
 0x2b6   : > { %7605 = vmatpush3.xpose.msk.msra.mxu0 %vm1832_vm2, %v2164_v37  ;;  %7606 = vmatprep.mubr.msk.f32.mxu0 %vm8952_vm0, %v8953_v3 }
 0x2b7   : > { %7614 = vmatprep.subr.mxu0 %v8953_v3  ;;  %v2328_v41 = vpop.permute.xlu1 %2327 }
 0x2b8   : > { %v2330_v40 = vpop.permute.xlu0 %2329 }
 0x2b9   : > { %7607 = vmatmul.mubr.msk.f32.vlgmr.msra.gmra.mrb[10].mxu0 %vm1832_vm2, %v2162_v39 }
 0x2ba   : > { %7615 = vmatpush3.xpose.msk.msra.mxu0 %vm1832_vm2, %v2330_v40  ;;  %7616 = vmatprep.mubr.msk.f32.mxu0 %vm8952_vm0, %v8953_v3 }
 0x2bb   : > { %8132 = vmatprep.subr.bf16.mxu0 %v8951_v2 }
 0x2bd   : > { %7617 = vmatmul.mubr.msk.f32.vlgmr.msra.gmra.mrb[12].mxu0 %vm1832_vm2, %v2328_v41 }
 0x2be   : > { %7632 = vmatprep.mubr.msk.f32.mxu0 %vm8952_vm0, %v8953_v3 }
 0x314   : > { %v1905_v42 = vpop.f32.mrb[6].mxu0 }
 0x315   : > { %v1909_v43 = vmul.f32 0.35355338, %v1905_v42  ;;  %v7588_v44 = vpop.f32.mrb[7].mxu0 }
 0x316   : > { %v1501_v44 = vld [vmem:[%s10229_s26] sm:$0xff] }
 0x317   : > { %v1910_v45 = vsel %vm1832_vm2, %v1909_v43, -inf }
 0x318   : > { %1911 = vmax.xlane.f32.xlu0 %v1910_v45  ;;  %v1502_v45 = vld [vmem:[%s10229_s26 + $0x8] sm:$0xff] }
 0x388   : > { %v2068_v46 = vpop.f32.mrb[8].mxu0 }
 0x389   : > { %v2072_v47 = vmul.f32 0.35355338, %v2068_v46  ;;  %v7598_v48 = vpop.f32.mrb[9].mxu0  ;;  %v9515_v46 = vpack.c.bf16 %v1502_v45, %v1501_v44 }
 0x38a   : > { %v1504_v48 = vld [vmem:[%s10229_s26 + $0x18] sm:$0xff] }
 0x38b   : > { %v2073_v49 = vsel %vm1832_vm2, %v2072_v47, -inf  ;;  %8134 = vmatpush3.bf16.msra.mxu0 %v9515_v46 }
 0x38c   : > { %2074 = vmax.xlane.f32.xlu1 %v2073_v49  ;;  %v2235_v50 = vpop.f32.mrb[10].mxu0  ;;  %8135 = vmatprep.subr.bf16.mxu0 %v8951_v2 }
 0x38d   : > { %v2239_v51 = vmul.f32 0.35355338, %v2235_v50  ;;  %v7608_v52 = vpop.f32.mrb[11].mxu0 }
 0x38f   : > { %v2240_v53 = vsel %vm1832_vm2, %v2239_v51, -inf }
 0x390   : > { %2241 = vmax.xlane.f32.xlu0 %v2240_v53  ;;  %v2401_v54 = vpop.f32.mrb[12].mxu0 }
 0x391   : > { %v2405_v55 = vmul.f32 0.35355338, %v2401_v54  ;;  %v7618_v56 = vpop.f32.mrb[13].mxu0 }
 0x392   : > { %v1510_v56 = vld [vmem:[%s10230_s17] sm:$0xff] }
 0x393   : > { %v2406_v57 = vsel %vm1832_vm2, %v2405_v55, -inf }
 0x394   : > { %2407 = vmax.xlane.f32.xlu0 %v2406_v57  ;;  %v1511_v57 = vld [vmem:[%s10230_s17 + $0x8] sm:$0xff] }
 0x39d   : > { %2085 = vrot.lane.b32.xlu1 %v9465_v34, %s10167_s11 }
 0x3a5   : > { %v1912_v58 = vpop.xlane.xlu0 %1911 }
 0x3a6   : > { %v1913_v59 = vsub.f32 %v1909_v43, %v1912_v58  ;;  %v9530_v58 = vpack.c.bf16 %v1511_v57, %v1510_v56 }
 0x3a8   : > { %v1914_v60 = vmul.f32 1.442695, %v1913_v59 }
 0x3aa   : > { %8510 = vpow2.f32 %v1914_v60  ;;  %v1506_v60 = vld [vmem:[%s10231_s28] sm:$0xff] }
 0x3b4   : > { %v8511_v61 = vpop.eup %8510 }
 0x3b5   : > { %v1916_v62 = vsel %vm1832_vm2, %v8511_v61, 0.0 }
 0x3c1   : > { %1917 = vadd.xlane.f32.xlu1 %v1916_v62 }
 0x419   : > { %v2075_v63 = vpop.xlane.xlu1 %2074 }
 0x41a   : > { %v2076_v0 = vsub.f32 %v2072_v47, %v2075_v63  ;;  %v1503_v47 = vld [vmem:[%s10229_s26 + $0x10] sm:$0xff] }
 0x41b   : > { %v9521_v49 = vpack.c.bf16 %v1504_v48, %v1503_v47 }
 0x41c   : > { %v2077_v1 = vmul.f32 1.442695, %v2076_v0 }
 0x41d   : > { %v2242_v4 = vpop.xlane.xlu0 %2241  ;;  %v2086_v24 = vpop.permute.xlu1 %2085  ;;  %8137 = vmatpush3.bf16.msra.mxu0 %v9521_v49 }
 0x41e   : > { %8512 = vpow2.f32 %v2077_v1  ;;  %v2243_v5 = vsub.f32 %v2239_v51, %v2242_v4  ;;  %8144 = vmatprep.subr.bf16.mxu0 %v8951_v2 }
 0x420   : > { %v2244_v6 = vmul.f32 1.442695, %v2243_v5  ;;  %v1508_v5 = vld [vmem:[%s10231_s28 + $0x10] sm:$0xff] }
 0x421   : > { %v2408_v8 = vpop.xlane.xlu0 %2407 }
 0x422   : > { %8514 = vpow2.f32 %v2244_v6  ;;  %v2409_v10 = vsub.f32 %v2405_v55, %v2408_v8  ;;  %v1509_v6 = vld [vmem:[%s10231_s28 + $0x18] sm:$0xff] }
 0x424   : > { %v2410_v11 = vmul.f32 1.442695, %v2409_v10  ;;  %v9545_v10 = vpack.c.bf16 %v1509_v6, %v1508_v5 }
 0x426   : > { %8516 = vpow2.f32 %v2410_v11 }
 0x428   : > { %v8513_v14 = vpop.eup %8512 }
 0x429   : > { %v2079_v15 = vsel %vm1832_vm2, %v8513_v14, 0.0 }
 0x42a   : > { %2080 = vadd.xlane.f32.xlu0 %v2079_v15 }
 0x42c   : > { %v8515_v17 = vpop.eup %8514 }
 0x42d   : > { %v2246_v18 = vsel %vm1832_vm2, %v8515_v17, 0.0 }
 0x42e   : > { %2247 = vadd.xlane.f32.xlu1 %v2246_v18 }
 0x430   : > { %v8517_v21 = vpop.eup %8516 }
 0x431   : > { %v2412_v22 = vsel %vm1832_vm2, %v8517_v21, 0.0 }
 0x432   : > { %2413 = vadd.xlane.f32.xlu0 %v2412_v22 }
 0x43f   : > { %2417 = vrot.lane.b32.xlu1 %v9465_v34, %s10158_s15 }
 0x448   : > { %2251 = vrot.lane.b32.xlu0 %v9465_v34, %s10160_s23 }
 0x44e   : > { %v1918_v25 = vpop.xlane.xlu1 %1917 }
 0x44f   : > { %8518 = vrcp.f32 %v1918_v25 }
 0x459   : > { %v8519_v27 = vpop.eup %8518 }
 0x45a   : > { %v1920_v28 = vmul.f32 %v8519_v27, %v8511_v61  ;;  %v1507_v61 = vld [vmem:[%s10231_s28 + $0x8] sm:$0xff] }
 0x45b   : > { %v9537_v0 = vpack.c.bf16 %v1507_v61, %v1506_v60 }
 0x45c   : > { %7592 = vmatmul.mubr.msk.f32.vlgmr.msra.gmra.mrb[0].mxu1 %vm1832_vm2, %v1920_v28 }
 0x45d   : > { %7600 = vmatpush3.msra.mxu1 %v2086_v24  ;;  %7601 = vmatprep.mubr.msk.f32.mxu1 %vm8952_vm0, %v8953_v3 }
 0x45e   : > { %7609 = vmatprep.subr.mxu1 %v8953_v3 }
 0x4b7   : > { %v2081_v29 = vpop.xlane.xlu0 %2080 }
 0x4b8   : > { %8520 = vrcp.f32 %v2081_v29 }
 0x4bb   : > { %v2248_v31 = vpop.xlane.xlu1 %2247 }
 0x4bc   : > { %8522 = vrcp.f32 %v2248_v31 }
 0x4bf   : > { %v2414_v33 = vpop.xlane.xlu0 %2413  ;;  %v2418_v39 = vpop.permute.xlu1 %2417 }
 0x4c0   : > { %8524 = vrcp.f32 %v2414_v33 }
 0x4c2   : > { %v8521_v34 = vpop.eup %8520 }
 0x4c3   : > { %v2083_v35 = vmul.f32 %v8521_v34, %v8513_v14  ;;  %v2252_v36 = vpop.permute.xlu0 %2251 }
 0x4c5   : > { %7602 = vmatmul.mubr.msk.f32.vlgmr.msra.gmra.mrb[2].mxu1 %vm1832_vm2, %v2083_v35 }
 0x4c6   : > { %v8523_v37 = vpop.eup %8522  ;;  %7610 = vmatpush3.msra.mxu1 %v2252_v36  ;;  %7611 = vmatprep.mubr.msk.f32.mxu1 %vm8952_vm0, %v8953_v3 }
 0x4c7   : > { %v2250_v38 = vmul.f32 %v8523_v37, %v8515_v17  ;;  %7619 = vmatprep.subr.mxu1 %v8953_v3 }
 0x4c9   : > { %7612 = vmatmul.mubr.msk.f32.vlgmr.msra.gmra.mrb[4].mxu1 %vm1832_vm2, %v2250_v38 }
 0x4ca   : > { %v8525_v40 = vpop.eup %8524  ;;  %7620 = vmatpush3.msra.mxu1 %v2418_v39  ;;  %7621 = vmatprep.mubr.msk.f32.mxu1 %vm8952_vm0, %v8953_v3 }
 0x4cb   : > { %v2416_v41 = vmul.f32 %v8525_v40, %v8517_v21  ;;  %8138 = vmatprep.subr.bf16.mxu1 %v8951_v2 }
 0x4cd   : > { %7622 = vmatmul.mubr.msk.f32.vlgmr.msra.gmra.mrb[6].mxu1 %vm1832_vm2, %v2416_v41 }
 0x4ce   : > { %7643 = vmatprep.mubr.msk.f32.mxu1 %vm8952_vm0, %v8953_v3  ;;  %8140 = vmatpush3.bf16.msra.mxu1 %v9530_v58 }
 0x4cf   : > { %8141 = vmatprep.subr.bf16.mxu1 %v8951_v2 }
 0x52f   : > { %v1990_v42 = vpop.f32.mrb[0].mxu1 }
 0x530   : > { %v7593_v43 = vpop.f32.mrb[1].mxu1 }
 0x598   : > { %v2157_v50 = vpop.f32.mrb[2].mxu1 }
 0x599   : > { %2494 = vrot.lane.b32.xlu1 %v2157_v50, %s10164_s18  ;;  %v7603_v51 = vpop.f32.mrb[3].mxu1 }
 0x59c   : > { %v2323_v52 = vpop.f32.mrb[4].mxu1 }
 0x59d   : > { %2498 = vrot.lane.b32.xlu0 %v2323_v52, %s10162_s22  ;;  %v7613_v53 = vpop.f32.mrb[5].mxu1 }
 0x5a0   : > { %v2489_v54 = vpop.f32.mrb[6].mxu1 }
 0x5a1   : > { %2502 = vrot.lane.b32.xlu1 %v2489_v54, %s10156_s16  ;;  %v7623_v55 = vpop.f32.mrb[7].mxu1  ;;  %s10233_s16 = sld [smem:[#allocation37_spill]] }
 0x5a7   : > { %v1515_v29 = vld [vmem:[%s10233_s16] sm:$0xff]  ;;  %v1516_v31 = vld [vmem:[%s10233_s16 + $0x8] sm:$0xff]  ;;  %v1517_v33 = vld [vmem:[%s10233_s16 + $0x10] sm:$0xff] }
 0x5a8   : > { %v9592_v34 = vpack.c.bf16 %v1516_v31, %v1515_v29  ;;  %v1518_v35 = vld [vmem:[%s10233_s16 + $0x18] sm:$0xff]  ;;  %v1520_v36 = vld [vmem:[%s10233_s16 + $0x28] sm:$0xff]  ;;  %v1521_v38 = vld [vmem:[%s10233_s16 + $0x30] sm:$0xff] }
 0x5a9   : > { %v1522_v39 = vld [vmem:[%s10233_s16 + $0x38] sm:$0xff] }
 0x5aa   : > { %v9618_v40 = vpack.c.bf16 %v1522_v39, %v1521_v38 }
 0x60b   : > { %v2495_v59 = vpop.permute.xlu1 %2494 }
 0x60c   : > { %v2505_v63 = vsel %vm1832_vm2, %v1990_v42, %v2495_v59 }
 0x60f   : > { %v2499_v62 = vpop.permute.xlu0 %2498 }
 0x610   : > { %v2507_v1 = vsel %vm2506_vm3, %v2505_v63, %v2499_v62 }
 0x613   : > { %v2503_v4 = vpop.permute.xlu1 %2502 }
 0x614   : > { %v2509_v8 = vsel %vm2508_vm4, %v2507_v1, %v2503_v4 }
 0x615   : > { %7633 = vmatmul.mubr.msk.f32.vlgmr.msra.gmra.mrb[14].mxu0 %vm1603_vm1, %v2509_v8 }
 0x616   : > { %8146 = vmatpush3.bf16.msra.mxu0 %v9537_v0  ;;  %7654 = vmatprep.mubr.msk.f32.mxu0 %vm8952_vm0, %v8953_v3 }
 0x617   : > { %8147 = vmatprep.subr.bf16.mxu0 %v8951_v2 }
 0x61a   : > { %8149 = vmatpush3.bf16.msra.mxu0 %v9545_v10 }
 0x61b   : > { %8162 = vmatprep.subr.bf16.mxu0 %v8951_v2 }
 0x61d   : > { %7655 = vmatmul.mubr.msk.f32.vlgmr.msra.gmra.mrb[16].mxu0 %vm1603_vm1, %v9398_v12 }
 0x61e   : > { %8164 = vmatpush3.bf16.msra.mxu0 %v9384_v7  ;;  %7684 = vmatprep.mubr.msk.f32.mxu0 %vm8952_vm0, %v8953_v3  ;;  %v1512_v7 = vld [vmem:[%s10230_s17 + $0x10] sm:$0xff] }
 0x61f   : > { %8165 = vmatprep.subr.bf16.mxu0 %v8951_v2 }
 0x622   : > { %8167 = vmatpush3.bf16.msra.mxu0 %v9390_v9  ;;  %v1513_v9 = vld [vmem:[%s10230_s17 + $0x18] sm:$0xff] }
 0x623   : > { %8168 = vmatprep.subr.bf16.mxu0 %v8951_v2  ;;  %v9574_v11 = vpack.c.bf16 %v1513_v9, %v1512_v7 }
 0x625   : > { %7685 = vmatmul.mubr.msk.f32.vlgmr.msra.gmra.mrb[18].mxu0 %vm1603_vm1, %v9421_v19  ;;  %8143 = vmatpush3.bf16.msra.mxu1 %v9574_v11 }
 0x626   : > { %8170 = vmatpush3.bf16.msra.mxu0 %v9400_v13  ;;  %7695 = vmatprep.mubr.msk.f32.mxu0 %vm8952_vm0, %v8953_v3  ;;  %v9579_v13 = vld [vmem:[%s10232_s0] ss:$0 sm:$0xff]  ;;  %s10234_s0 = sld [smem:[#allocation36_spill]] }
 0x627   : > { %8171 = vmatprep.subr.bf16.mxu0 %v8951_v2  ;;  %8150 = vmatprep.subr.bf16.mxu1 %v8951_v2 }
 0x62a   : > { %8173 = vmatpush3.bf16.msra.mxu0 %v9408_v16 }
 0x62b   : > { %7709 = vmatprep.subr.mxu0 %v8953_v3 }
 0x62c   : > { %v9642_v48 = vld [vmem:[%s10234_s0] ss:$0 sm:$0xff]  ;;  %s10235_s0 = sld [smem:[#allocation39_spill]] }
 0x62d   : > { %7696 = vmatmul.mubr.msk.f32.vlgmr.msra.gmra.mrb[20].mxu0 %vm1603_vm1, %v9398_v12 }
 0x62e   : > { %7711 = vmatprep.mubr.msk.f32.mxu0 %vm8952_vm0, %v8953_v3 }
 0x6e8   : > { %v2585_v16 = vpop.f32.mrb[14].mxu0 }
 0x6e9   : > { %v2586_v14 = vadd.f32 %v9579_v13, %v2585_v16  ;;  %v7634_v15 = vpop.f32.mrb[15].mxu0 }
 0x6eb   : > { %7644 = vmatmul.mubr.msk.f32.vlgmr.msra.gmra.mrb[8].mxu1 %vm1603_vm1, %v2586_v14 }
 0x6ec   : > { %7673 = vmatprep.mubr.msk.f32.mxu1 %vm8952_vm0, %v8953_v3  ;;  %8152 = vmatpush3.bf16.msra.mxu1 %v9592_v34 }
 0x6ed   : > { %8153 = vmatprep.subr.bf16.mxu1 %v8951_v2 }
 0x6f0   : > { %v2728_v17 = vpop.f32.mrb[16].mxu0 }
 0x6f1   : > { %v7656_v18 = vpop.f32.mrb[17].mxu0 }
 0x6f8   : > { %v2887_v21 = vpop.f32.mrb[18].mxu0 }
 0x6f9   : > { %v2888_v22 = vadd.f32 %v9447_v30, %v2887_v21  ;;  %v7686_v24 = vpop.f32.mrb[19].mxu0  ;;  %v1519_v30 = vld [vmem:[%s10233_s16 + $0x20] sm:$0xff] }
 0x6fa   : > { %v9612_v37 = vpack.c.bf16 %v1520_v36, %v1519_v30 }
 0x6fb   : > { %3192 = vrot.lane.b32.xlu1 %v2888_v22, %s10167_s11 }
 0x6ff   : > { %3359 = vrot.lane.b32.xlu1 %v2888_v22, %s10160_s23 }
 0x700   : > { %v2957_v25 = vpop.f32.mrb[20].mxu0 }
 0x701   : > { %v2958_v27 = vadd.f32 %v9443_v26, %v2957_v25  ;;  %v7697_v28 = vpop.f32.mrb[21].mxu0  ;;  %v9599_v26 = vpack.c.bf16 %v1518_v35, %v1517_v33 }
 0x703   : > { %3525 = vrot.lane.b32.xlu1 %v2888_v22, %s10158_s15  ;;  %3194 = vrot.lane.b32.xlu0 %v2958_v27, %s10167_s11 }
 0x704   : > { %7710 = vmatpush3.xpose.msk.msra.mxu0 %vm1832_vm2, %v2958_v27  ;;  %8155 = vmatpush3.bf16.msra.mxu1 %v9599_v26 }
 0x705   : > { %7719 = vmatprep.subr.mxu0 %v8953_v3  ;;  %8156 = vmatprep.subr.bf16.mxu1 %v8951_v2 }
 0x707   : > { %7712 = vmatmul.mubr.msk.f32.vlgmr.msra.gmra.mrb[22].mxu0 %vm1832_vm2, %v2888_v22  ;;  %3361 = vrot.lane.b32.xlu0 %v2958_v27, %s10160_s23 }
 0x708   : > { %7721 = vmatprep.mubr.msk.f32.mxu0 %vm8952_vm0, %v8953_v3  ;;  %8158 = vmatpush3.bf16.msra.mxu1 %v9612_v37 }
 0x709   : > { %8159 = vmatprep.subr.bf16.mxu1 %v8951_v2 }
 0x70b   : > { %3527 = vrot.lane.b32.xlu0 %v2958_v27, %s10158_s15 }
 0x70c   : > { %8161 = vmatpush3.bf16.msra.mxu1 %v9618_v40 }
 0x70d   : > { %8174 = vmatprep.subr.bf16.mxu1 %v8951_v2 }
 0x76d   : > { %v3193_v41 = vpop.permute.xlu1 %3192 }
 0x771   : > { %v3360_v44 = vpop.permute.xlu1 %3359 }
 0x775   : > { %v3195_v42 = vpop.permute.xlu0 %3194  ;;  %v3526_v47 = vpop.permute.xlu1 %3525 }
 0x776   : > { %7720 = vmatpush3.xpose.msk.msra.mxu0 %vm1832_vm2, %v3195_v42 }
 0x777   : > { %7729 = vmatprep.subr.mxu0 %v8953_v3 }
 0x779   : > { %v3362_v43 = vpop.permute.xlu0 %3361  ;;  %7722 = vmatmul.mubr.msk.f32.vlgmr.msra.gmra.mrb[24].mxu0 %vm1832_vm2, %v3193_v41 }
 0x77a   : > { %7730 = vmatpush3.xpose.msk.msra.mxu0 %vm1832_vm2, %v3362_v43  ;;  %7731 = vmatprep.mubr.msk.f32.mxu0 %vm8952_vm0, %v8953_v3 }
 0x77b   : > { %7739 = vmatprep.subr.mxu0 %v8953_v3 }
 0x77d   : > { %v3528_v45 = vpop.permute.xlu0 %3527  ;;  %7732 = vmatmul.mubr.msk.f32.vlgmr.msra.gmra.mrb[26].mxu0 %vm1832_vm2, %v3360_v44 }
 0x77e   : > { %7740 = vmatpush3.xpose.msk.msra.mxu0 %vm1832_vm2, %v3528_v45  ;;  %7741 = vmatprep.mubr.msk.f32.mxu0 %vm8952_vm0, %v8953_v3 }
 0x77f   : > { %8180 = vmatprep.subr.bf16.mxu0 %v8951_v2 }
 0x781   : > { %7742 = vmatmul.mubr.msk.f32.vlgmr.msra.gmra.mrb[28].mxu0 %vm1832_vm2, %v3526_v47 }
 0x782   : > { %8182 = vmatpush3.bf16.msra.mxu0 %v9515_v46  ;;  %7757 = vmatprep.mubr.msk.f32.mxu0 %vm8952_vm0, %v8953_v3 }
 0x783   : > { %8183 = vmatprep.subr.bf16.mxu0 %v8951_v2 }
 0x786   : > { %8185 = vmatpush3.bf16.msra.mxu0 %v9521_v49 }
 0x787   : > { %8192 = vmatprep.subr.bf16.mxu0 %v8951_v2 }
 0x7be   : > { %v2658_v50 = vpop.f32.mrb[8].mxu1 }
 0x7bf   : > { %v2729_v51 = vadd.f32 %v2728_v17, %v2658_v50  ;;  %v7645_v52 = vpop.f32.mrb[9].mxu1 }
 0x7c1   : > { %v2738_v53 = vadd.f32 %v9642_v48, %v2729_v51 }
 0x7c3   : > { %v2739_v54 = vmax.f32 %v2738_v53, 0.0 }
 0x7c5   : > { %7674 = vmatmul.mubr.msk.f32.vlgmr.msra.gmra.mrb[10].mxu1 %vm2746_vm5, %v2739_v54 }
 0x7c6   : > { %8176 = vmatpush3.bf16.msra.mxu1 %v9423_v20  ;;  %7706 = vmatprep.mubr.msk.f32.mxu1 %vm8952_vm0, %v8953_v3 }
 0x7c7   : > { %8177 = vmatprep.subr.bf16.mxu1 %v8951_v2 }
 0x7ca   : > { %8179 = vmatpush3.bf16.msra.mxu1 %v9434_v23 }
 0x7cb   : > { %7714 = vmatprep.subr.mxu1 %v8953_v3 }
 0x7cd   : > { %7707 = vmatmul.mubr.msk.f32.vlgmr.msra.gmra.mrb[12].mxu1 %vm1603_vm1, %v9398_v12 }
 0x7ce   : > { %7716 = vmatprep.mubr.msk.f32.mxu1 %vm8952_vm0, %v8953_v3 }
 0x7da   : > { %v3103_v46 = vpop.f32.mrb[22].mxu0 }
 0x7db   : > { %v3107_v49 = vmul.f32 0.35355338, %v3103_v46  ;;  %v7713_v55 = vpop.f32.mrb[23].mxu0 }
 0x7dd   : > { %v3108_v20 = vsel %vm1832_vm2, %v3107_v49, -inf }
 0x7de   : > { %3109 = vmax.xlane.f32.xlu0 %v3108_v20 }
 0x84c   : > { %v3266_v56 = vpop.f32.mrb[24].mxu0 }
 0x84d   : > { %v3270_v57 = vmul.f32 0.35355338, %v3266_v56  ;;  %v7723_v59 = vpop.f32.mrb[25].mxu0 }
 0x84f   : > { %v3271_v60 = vsel %vm1832_vm2, %v3270_v57, -inf }
 0x850   : > { %3272 = vmax.xlane.f32.xlu1 %v3271_v60  ;;  %v3433_v23 = vpop.f32.mrb[26].mxu0 }
 0x851   : > { %v3437_v61 = vmul.f32 0.35355338, %v3433_v23  ;;  %v7733_v62 = vpop.f32.mrb[27].mxu0 }
 0x853   : > { %v3438_v63 = vsel %vm1832_vm2, %v3437_v61, -inf }
 0x854   : > { %3439 = vmax.xlane.f32.xlu0 %v3438_v63  ;;  %v3599_v1 = vpop.f32.mrb[28].mxu0 }
 0x855   : > { %v3603_v4 = vmul.f32 0.35355338, %v3599_v1  ;;  %v7743_v5 = vpop.f32.mrb[29].mxu0 }
 0x857   : > { %v3604_v6 = vsel %vm1832_vm2, %v3603_v4, -inf }
 0x858   : > { %3605 = vmax.xlane.f32.xlu0 %v3604_v6 }
 0x86b   : > { %v3110_v8 = vpop.xlane.xlu0 %3109 }
 0x86c   : > { %v3111_v7 = vsub.f32 %v3107_v49, %v3110_v8 }
 0x86e   : > { %v3112_v9 = vmul.f32 1.442695, %v3111_v7 }
 0x870   : > { %8526 = vpow2.f32 %v3112_v9  ;;  %v1524_v9 = vld [vmem:[%s10235_s0] sm:$0xff] }
 0x87a   : > { %v8527_v16 = vpop.eup %8526 }
 0x87b   : > { %v3114_v14 = vsel %vm1832_vm2, %v8527_v16, 0.0 }
 0x87c   : > { %3115 = vadd.xlane.f32.xlu1 %v3114_v14 }
 0x898   : > { %v9661_v15 = vpop.f32.mrb[10].mxu1 }
 0x899   : > { %v7675_v17 = vpop.f32.mrb[11].mxu1 }
 0x89a   : > { %v1526_v17 = vld [vmem:[%s10235_s0 + $0x10] sm:$0xff] }
 0x8a0   : > { %v3027_v18 = vpop.f32.mrb[12].mxu1 }
 0x8a1   : > { %v3028_v21 = vadd.f32 %v9462_v32, %v3027_v18  ;;  %v7708_v22 = vpop.f32.mrb[13].mxu1  ;;  %v1527_v18 = vld [vmem:[%s10235_s0 + $0x18] sm:$0xff] }
 0x8a3   : > { %7715 = vmatpush3.msra.mxu1 %v3028_v21  ;;  %3283 = vrot.lane.b32.xlu1 %v3028_v21, %s10167_s11 }
 0x8a4   : > { %7724 = vmatprep.subr.mxu1 %v8953_v3 }
 0x8dd   : > { %v3273_v24 = vpop.xlane.xlu1 %3272 }
 0x8de   : > { %v3274_v25 = vsub.f32 %v3270_v57, %v3273_v24 }
 0x8e0   : > { %v3275_v27 = vmul.f32 1.442695, %v3274_v25 }
 0x8e1   : > { %v3440_v28 = vpop.xlane.xlu0 %3439 }
 0x8e2   : > { %8528 = vpow2.f32 %v3275_v27  ;;  %v3441_v29 = vsub.f32 %v3437_v61, %v3440_v28 }
 0x8e4   : > { %v3442_v31 = vmul.f32 1.442695, %v3441_v29 }
 0x8e5   : > { %v3606_v33 = vpop.xlane.xlu0 %3605 }
 0x8e6   : > { %8530 = vpow2.f32 %v3442_v31  ;;  %v3607_v35 = vsub.f32 %v3603_v4, %v3606_v33 }
 0x8e8   : > { %v3608_v30 = vmul.f32 1.442695, %v3607_v35 }
 0x8ea   : > { %8532 = vpow2.f32 %v3608_v30 }
 0x8ec   : > { %v8529_v36 = vpop.eup %8528 }
 0x8ed   : > { %v3277_v32 = vsel %vm1832_vm2, %v8529_v36, 0.0 }
 0x8ee   : > { %3278 = vadd.xlane.f32.xlu0 %v3277_v32 }
 0x8f0   : > { %v8531_v38 = vpop.eup %8530 }
 0x8f1   : > { %v3444_v39 = vsel %vm1832_vm2, %v8531_v38, 0.0 }
 0x8f2   : > { %3445 = vadd.xlane.f32.xlu1 %v3444_v39 }
 0x8f4   : > { %v8533_v41 = vpop.eup %8532 }
 0x8f5   : > { %v3610_v42 = vsel %vm1832_vm2, %v8533_v41, 0.0 }
 0x8f6   : > { %3611 = vadd.xlane.f32.xlu0 %v3610_v42 }
 0x903   : > { %3615 = vrot.lane.b32.xlu1 %v3028_v21, %s10158_s15  ;;  %s10236_s15 = smov 24  }
 0x909   : > { %v3116_v43 = vpop.xlane.xlu1 %3115 }
 0x90a   : > { %8534 = vrcp.f32 %v3116_v43 }
 0x90c   : > { %3449 = vrot.lane.b32.xlu0 %v3028_v21, %s10160_s23  ;;  %s10237_s23 = sld [smem:[#allocation38_spill]]  ;;  %v9715_v21 = vpack.c.bf16 %v1527_v18, %v1526_v17 }
 0x914   : > { %v8535_v44 = vpop.eup %8534 }
 0x915   : > { %v3118_v45 = vmul.f32 %v8535_v44, %v8527_v16  ;;  %v3284_v47 = vpop.permute.xlu1 %3283  ;;  %v1525_v16 = vld [vmem:[%s10235_s0 + $0x8] sm:$0xff]  ;;  %s10241_s0 = smov 112  }
 0x916   : > { %v9704_v14 = vpack.c.bf16 %v1525_v16, %v1524_v9 }
 0x917   : > { %7717 = vmatmul.mubr.msk.f32.vlgmr.msra.gmra.mrb[14].mxu1 %vm1832_vm2, %v3118_v45 }
 0x918   : > { %7725 = vmatpush3.msra.mxu1 %v3284_v47  ;;  %7726 = vmatprep.mubr.msk.f32.mxu1 %vm8952_vm0, %v8953_v3 }
 0x919   : > { %7734 = vmatprep.subr.mxu1 %v8953_v3 }
 0x97b   : > { %v3279_v50 = vpop.xlane.xlu0 %3278 }
 0x97c   : > { %8536 = vrcp.f32 %v3279_v50 }
 0x97f   : > { %v3446_v51 = vpop.xlane.xlu1 %3445 }
 0x980   : > { %8538 = vrcp.f32 %v3446_v51 }
 0x983   : > { %v3612_v52 = vpop.xlane.xlu0 %3611  ;;  %v3616_v20 = vpop.permute.xlu1 %3615 }
 0x984   : > { %8540 = vrcp.f32 %v3612_v52 }
 0x986   : > { %v8537_v53 = vpop.eup %8536 }
 0x987   : > { %v3281_v54 = vmul.f32 %v8537_v53, %v8529_v36  ;;  %v3450_v46 = vpop.permute.xlu0 %3449 }
 0x989   : > { %7727 = vmatmul.mubr.msk.f32.vlgmr.msra.gmra.mrb[16].mxu1 %vm1832_vm2, %v3281_v54 }
 0x98a   : > { %v8539_v49 = vpop.eup %8538  ;;  %7735 = vmatpush3.msra.mxu1 %v3450_v46  ;;  %7736 = vmatprep.mubr.msk.f32.mxu1 %vm8952_vm0, %v8953_v3 }
 0x98b   : > { %v3448_v55 = vmul.f32 %v8539_v49, %v8531_v38  ;;  %7744 = vmatprep.subr.mxu1 %v8953_v3 }
 0x98d   : > { %7737 = vmatmul.mubr.msk.f32.vlgmr.msra.gmra.mrb[18].mxu1 %vm1832_vm2, %v3448_v55 }
 0x98e   : > { %v8541_v56 = vpop.eup %8540  ;;  %7745 = vmatpush3.msra.mxu1 %v3616_v20  ;;  %7746 = vmatprep.mubr.msk.f32.mxu1 %vm8952_vm0, %v8953_v3 }
 0x98f   : > { %v3614_v57 = vmul.f32 %v8541_v56, %v8533_v41  ;;  %8186 = vmatprep.subr.bf16.mxu1 %v8951_v2 }
 0x991   : > { %7747 = vmatmul.mubr.msk.f32.vlgmr.msra.gmra.mrb[20].mxu1 %vm1832_vm2, %v3614_v57 }
 0x992   : > { %8188 = vmatpush3.bf16.msra.mxu1 %v9530_v58  ;;  %7768 = vmatprep.mubr.msk.f32.mxu1 %vm8952_vm0, %v8953_v3 }
 0x993   : > { %8189 = vmatprep.subr.bf16.mxu1 %v8951_v2 }
 0x996   : > { %8191 = vmatpush3.bf16.msra.mxu1 %v9574_v11 }
 0x997   : > { %8198 = vmatprep.subr.bf16.mxu1 %v8951_v2 }
 0x9ea   : > { %v3188_v59 = vpop.f32.mrb[14].mxu1 }
 0x9eb   : > { %v7718_v60 = vpop.f32.mrb[15].mxu1 }
 0xa5c   : > { %v3355_v23 = vpop.f32.mrb[16].mxu1 }
 0xa5d   : > { %3692 = vrot.lane.b32.xlu1 %v3355_v23, %s10164_s18  ;;  %v7728_v61 = vpop.f32.mrb[17].mxu1  ;;  %s10240_s18 = sld [smem:[#allocation42_spill]] }
 0xa60   : > { %v3521_v62 = vpop.f32.mrb[18].mxu1 }
 0xa61   : > { %3696 = vrot.lane.b32.xlu0 %v3521_v62, %s10162_s22  ;;  %v7738_v58 = vpop.f32.mrb[19].mxu1  ;;  %s10238_s22 = sld [smem:[#allocation41_spill]] }
 0xa64   : > { %v3687_v63 = vpop.f32.mrb[20].mxu1 }
 0xa65   : > { %3700 = vrot.lane.b32.xlu1 %v3687_v63, %s10236_s15  ;;  %v7748_v1 = vpop.f32.mrb[21].mxu1 }
 0xa67   : > { %v1529_v22 = vld [vmem:[%s10238_s22] sm:$0xff]  ;;  %v1530_v24 = vld [vmem:[%s10238_s22 + $0x8] sm:$0xff]  ;;  %v1531_v27 = vld [vmem:[%s10238_s22 + $0x10] sm:$0xff] }
 0xa68   : > { %v9725_v25 = vpack.c.bf16 %v1530_v24, %v1529_v22  ;;  %v1532_v28 = vld [vmem:[%s10238_s22 + $0x18] sm:$0xff] }
 0xacf   : > { %v3693_v11 = vpop.permute.xlu1 %3692 }
 0xad0   : > { %v3703_v5 = vsel %vm1832_vm2, %v3188_v59, %v3693_v11 }
 0xad3   : > { %v3697_v4 = vpop.permute.xlu0 %3696 }
 0xad4   : > { %v3704_v6 = vsel %vm2506_vm3, %v3703_v5, %v3697_v4 }
 0xad7   : > { %v3701_v8 = vpop.permute.xlu1 %3700 }
 0xad8   : > { %v3705_v7 = vsel %vm2508_vm4, %v3704_v6, %v3701_v8 }
 0xad9   : > { %7758 = vmatmul.mubr.msk.f32.vlgmr.msra.gmra.mrb[30].mxu0 %vm1603_vm1, %v3705_v7 }
 0xada   : > { %8194 = vmatpush3.bf16.msra.mxu0 %v9537_v0  ;;  %7779 = vmatprep.mubr.msk.f32.mxu0 %vm8952_vm0, %v8953_v3  ;;  %v9710_v0 = vld [vmem:[%s10237_s23] ss:$0 sm:$0xff]  ;;  %s10239_s23 = sld [smem:[#allocation40_spill]] }
 0xadb   : > { %8195 = vmatprep.subr.bf16.mxu0 %v8951_v2 }
 0xade   : > { %8197 = vmatpush3.bf16.msra.mxu0 %v9545_v10  ;;  %v2817_v10 = vadd.f32 %v9710_v0, %v9661_v15  ;;  %v9736_v15 = vpack.c.bf16 %v1532_v28, %v1531_v27 }
 0xadf   : > { %8210 = vmatprep.subr.bf16.mxu0 %v8951_v2 }
 0xae1   : > { %7780 = vmatmul.mubr.msk.f32.vlgmr.msra.gmra.mrb[32].mxu0 %vm1603_vm1, %v9421_v19  ;;  %v9728_v19 = vadd.f32 %v2817_v10, %v9398_v12 }
 0xae2   : > { %8212 = vmatpush3.bf16.msra.mxu0 %v9704_v14  ;;  %7809 = vmatprep.mubr.msk.f32.mxu0 %vm8952_vm0, %v8953_v3 }
 0xae3   : > { %8213 = vmatprep.subr.bf16.mxu0 %v8951_v2 }
 0xae6   : > { %8215 = vmatpush3.bf16.msra.mxu0 %v9715_v21 }
 0xae7   : > { %8216 = vmatprep.subr.bf16.mxu0 %v8951_v2 }
 0xae9   : > { %7810 = vmatmul.mubr.msk.f32.vlgmr.msra.gmra.mrb[34].mxu0 %vm1603_vm1, %v9728_v19 }
 0xaea   : > { %8218 = vmatpush3.bf16.msra.mxu0 %v9725_v25  ;;  %7820 = vmatprep.mubr.msk.f32.mxu0 %vm8952_vm0, %v8953_v3 }
 0xaeb   : > { %8219 = vmatprep.subr.bf16.mxu0 %v8951_v2 }
 0xaee   : > { %8221 = vmatpush3.bf16.msra.mxu0 %v9736_v15 }
 0xaef   : > { %7834 = vmatprep.subr.mxu0 %v8953_v3 }
 0xaf1   : > { %7821 = vmatmul.mubr.msk.f32.vlgmr.msra.gmra.mrb[36].mxu0 %vm1603_vm1, %v9728_v19 }
 0xaf2   : > { %7836 = vmatprep.mubr.msk.f32.mxu0 %vm8952_vm0, %v8953_v3 }
 0xbac   : > { %v3775_v12 = vpop.f32.mrb[30].mxu0 }
 0xbad   : > { %v3776_v29 = vadd.f32 %v9579_v13, %v3775_v12  ;;  %v7759_v31 = vpop.f32.mrb[31].mxu0  ;;  %v9758_v13 = vld [vmem:[%s10239_s23] ss:$0 sm:$0xff]  ;;  %s10242_s23 = smov 104  }
 0xbaf   : > { %7769 = vmatmul.mubr.msk.f32.vlgmr.msra.gmra.mrb[22].mxu1 %vm1603_vm1, %v3776_v29 }
 0xbb0   : > { %8200 = vmatpush3.bf16.msra.mxu1 %v9592_v34  ;;  %7798 = vmatprep.mubr.msk.f32.mxu1 %vm8952_vm0, %v8953_v3 }
 0xbb1   : > { %8201 = vmatprep.subr.bf16.mxu1 %v8951_v2 }
 0xbb4   : > { %v3918_v33 = vpop.f32.mrb[32].mxu0  ;;  %8203 = vmatpush3.bf16.msra.mxu1 %v9599_v26  ;;  %v9765_v26 = vld [vmem:[%s10240_s18] ss:$0 sm:$0xff]  ;;  %s10243_s18 = sld [smem:[#allocation43_spill]] }
 0xbb5   : > { %v7781_v35 = vpop.f32.mrb[33].mxu0  ;;  %8204 = vmatprep.subr.bf16.mxu1 %v8951_v2 }
 0xbb8   : > { %8206 = vmatpush3.bf16.msra.mxu1 %v9612_v37 }
 0xbb9   : > { %8207 = vmatprep.subr.bf16.mxu1 %v8951_v2 }
 0xbba   : > { %v1534_v51 = vld [vmem:[%s10243_s18] sm:$0xff]  ;;  %v1535_v52 = vld [vmem:[%s10243_s18 + $0x8] sm:$0xff]  ;;  %v1536_v49 = vld [vmem:[%s10243_s18 + $0x10] sm:$0xff] }
 0xbbb   : > { %v9796_v54 = vpack.c.bf16 %v1535_v52, %v1534_v51  ;;  %v1537_v55 = vld [vmem:[%s10243_s18 + $0x18] sm:$0xff] }
 0xbbc   : > { %v4073_v30 = vpop.f32.mrb[34].mxu0  ;;  %8209 = vmatpush3.bf16.msra.mxu1 %v9618_v40  ;;  %v9802_v20 = vpack.c.bf16 %v1537_v55, %v1536_v49 }
 0xbbd   : > { %v4074_v34 = vadd.f32 %v9758_v13, %v4073_v30  ;;  %v7811_v36 = vpop.f32.mrb[35].mxu0  ;;  %8222 = vmatprep.subr.bf16.mxu1 %v8951_v2 }
 0xbbf   : > { %4390 = vrot.lane.b32.xlu1 %v4074_v34, %s10167_s11 }
 0xbc3   : > { %4557 = vrot.lane.b32.xlu1 %v4074_v34, %s10241_s0 }
 0xbc4   : > { %v4149_v32 = vpop.f32.mrb[36].mxu0 }
 0xbc5   : > { %v4150_v37 = vadd.f32 %v9765_v26, %v4149_v32  ;;  %v7822_v38 = vpop.f32.mrb[37].mxu0 }
 0xbc7   : > { %4723 = vrot.lane.b32.xlu1 %v4074_v34, %s10242_s23  ;;  %4392 = vrot.lane.b32.xlu0 %v4150_v37, %s10167_s11  ;;  %s10244_s11 = sld [smem:[#allocation44_spill]] }
 0xbc8   : > { %7835 = vmatpush3.xpose.msk.msra.mxu0 %vm1832_vm2, %v4150_v37 }
 0xbc9   : > { %7844 = vmatprep.subr.mxu0 %v8953_v3 }
 0xbcb   : > { %7837 = vmatmul.mubr.msk.f32.vlgmr.msra.gmra.mrb[38].mxu0 %vm1832_vm2, %v4074_v34  ;;  %4559 = vrot.lane.b32.xlu0 %v4150_v37, %s10241_s0 }
 0xbcc   : > { %7846 = vmatprep.mubr.msk.f32.mxu0 %vm8952_vm0, %v8953_v3 }
 0xbcd   : > { %v9821_v24 = vld [vmem:[%s10244_s11] ss:$0 sm:$0xff]  ;;  %s10246_s11 = sld [smem:[#allocation45_spill]] }
 0xbcf   : > { %4725 = vrot.lane.b32.xlu0 %v4150_v37, %s10242_s23 }
 0xc31   : > { %v4391_v40 = vpop.permute.xlu1 %4390 }
 0xc35   : > { %v4558_v42 = vpop.permute.xlu1 %4557 }
 0xc39   : > { %v4393_v39 = vpop.permute.xlu0 %4392  ;;  %v4724_v44 = vpop.permute.xlu1 %4723 }
 0xc3a   : > { %7845 = vmatpush3.xpose.msk.msra.mxu0 %vm1832_vm2, %v4393_v39 }
 0xc3b   : > { %7854 = vmatprep.subr.mxu0 %v8953_v3 }
 0xc3d   : > { %v4560_v41 = vpop.permute.xlu0 %4559  ;;  %7847 = vmatmul.mubr.msk.f32.vlgmr.msra.gmra.mrb[40].mxu0 %vm1832_vm2, %v4391_v40 }
 0xc3e   : > { %7855 = vmatpush3.xpose.msk.msra.mxu0 %vm1832_vm2, %v4560_v41  ;;  %7856 = vmatprep.mubr.msk.f32.mxu0 %vm8952_vm0, %v8953_v3 }
 0xc3f   : > { %7864 = vmatprep.subr.mxu0 %v8953_v3 }
 0xc41   : > { %v4726_v43 = vpop.permute.xlu0 %4725  ;;  %7857 = vmatmul.mubr.msk.f32.vlgmr.msra.gmra.mrb[42].mxu0 %vm1832_vm2, %v4558_v42 }
 0xc42   : > { %7865 = vmatpush3.xpose.msk.msra.mxu0 %vm1832_vm2, %v4726_v43  ;;  %7866 = vmatprep.mubr.msk.f32.mxu0 %vm8952_vm0, %v8953_v3 }
 0xc43   : > { %8228 = vmatprep.subr.bf16.mxu0 %v8951_v2 }
 0xc45   : > { %7867 = vmatmul.mubr.msk.f32.vlgmr.msra.gmra.mrb[44].mxu0 %vm1832_vm2, %v4724_v44 }
 0xc46   : > { %7882 = vmatprep.mubr.msk.f32.mxu0 %vm8952_vm0, %v8953_v3 }
 0xc82   : > { %v3848_v45 = vpop.f32.mrb[22].mxu1 }
 0xc83   : > { %v3919_v47 = vadd.f32 %v3918_v33, %v3848_v45  ;;  %v7770_v50 = vpop.f32.mrb[23].mxu1 }
 0xc85   : > { %v3922_v53 = vadd.f32 %v9642_v48, %v3919_v47 }
 0xc87   : > { %v3923_v46 = vmax.f32 %v3922_v53, 0.0 }
 0xc89   : > { %7799 = vmatmul.mubr.msk.f32.vlgmr.msra.gmra.mrb[24].mxu1 %vm2746_vm5, %v3923_v46 }
 0xc8a   : > { %8224 = vmatpush3.bf16.msra.mxu1 %v9796_v54  ;;  %7831 = vmatprep.mubr.msk.f32.mxu1 %vm8952_vm0, %v8953_v3 }
 0xc8b   : > { %8225 = vmatprep.subr.bf16.mxu1 %v8951_v2 }
 0xc8e   : > { %8227 = vmatpush3.bf16.msra.mxu1 %v9802_v20 }
 0xc8f   : > { %7839 = vmatprep.subr.mxu1 %v8953_v3 }
 0xc91   : > { %7832 = vmatmul.mubr.msk.f32.vlgmr.msra.gmra.mrb[26].mxu1 %vm1603_vm1, %v9728_v19 }
 0xc92   : > { %7841 = vmatprep.mubr.msk.f32.mxu1 %vm8952_vm0, %v8953_v3 }
 0xc9e   : > { %v4301_v48 = vpop.f32.mrb[38].mxu0 }
 0xc9f   : > { %v4305_v56 = vmul.f32 0.35355338, %v4301_v48  ;;  %v7838_v57 = vpop.f32.mrb[39].mxu0 }
 0xca1   : > { %v4306_v59 = vsel %vm1832_vm2, %v4305_v56, -inf }
 0xca2   : > { %4307 = vmax.xlane.f32.xlu0 %v4306_v59 }
 0xd10   : > { %v4464_v60 = vpop.f32.mrb[40].mxu0 }
 0xd11   : > { %v4468_v23 = vmul.f32 0.35355338, %v4464_v60  ;;  %v7848_v61 = vpop.f32.mrb[41].mxu0 }
 0xd13   : > { %v4469_v62 = vsel %vm1832_vm2, %v4468_v23, -inf }
 0xd14   : > { %4470 = vmax.xlane.f32.xlu1 %v4469_v62  ;;  %v4631_v58 = vpop.f32.mrb[42].mxu0  ;;  %v1539_v62 = vld [vmem:[%s10246_s11] sm:$0xff] }
 0xd15   : > { %v4635_v63 = vmul.f32 0.35355338, %v4631_v58  ;;  %v7858_v1 = vpop.f32.mrb[43].mxu0  ;;  %v1540_v58 = vld [vmem:[%s10246_s11 + $0x8] sm:$0xff] }
 0xd16   : > { %v1541_v1 = vld [vmem:[%s10246_s11 + $0x10] sm:$0xff] }
 0xd17   : > { %v4636_v11 = vsel %vm1832_vm2, %v4635_v63, -inf }
 0xd18   : > { %4637 = vmax.xlane.f32.xlu0 %v4636_v11  ;;  %v4797_v4 = vpop.f32.mrb[44].mxu0  ;;  %v1542_v11 = vld [vmem:[%s10246_s11 + $0x18] sm:$0xff] }
 0xd19   : > { %v4801_v5 = vmul.f32 0.35355338, %v4797_v4  ;;  %v7868_v6 = vpop.f32.mrb[45].mxu0  ;;  %v9854_v4 = vpack.c.bf16 %v1542_v11, %v1541_v1 }
 0xd1b   : > { %v4802_v8 = vsel %vm1832_vm2, %v4801_v5, -inf }
 0xd1c   : > { %4803 = vmax.xlane.f32.xlu0 %v4802_v8 }
 0xd2f   : > { %v4308_v7 = vpop.xlane.xlu0 %4307 }
 0xd30   : > { %v4309_v9 = vsub.f32 %v4305_v56, %v4308_v7 }
 0xd32   : > { %v4310_v16 = vmul.f32 1.442695, %v4309_v9 }
 0xd34   : > { %8542 = vpow2.f32 %v4310_v16 }
 0xd3e   : > { %v8543_v17 = vpop.eup %8542 }
 0xd3f   : > { %v4312_v18 = vsel %vm1832_vm2, %v8543_v17, 0.0 }
 0xd40   : > { %4313 = vadd.xlane.f32.xlu1 %v4312_v18  ;;  %v1549_v18 = vld [vmem:[%s10247_s4 + $0x8] sm:$0xff] }
 0xd5c   : > { %v9818_v10 = vpop.f32.mrb[24].mxu1 }
 0xd5d   : > { %v7800_v22 = vpop.f32.mrb[25].mxu1 }
 0xd64   : > { %v4225_v27 = vpop.f32.mrb[26].mxu1 }
 0xd65   : > { %v4226_v28 = vadd.f32 %v9821_v24, %v4225_v27  ;;  %v7833_v12 = vpop.f32.mrb[27].mxu1 }
 0xd66   : > { %v1545_v12 = vld [vmem:[%s10248_s5 + $0x8] sm:$0xff] }
 0xd67   : > { %7840 = vmatpush3.msra.mxu1 %v4226_v28  ;;  %4481 = vrot.lane.b32.xlu1 %v4226_v28, %s10245_s3 }
 0xd68   : > { %7849 = vmatprep.subr.mxu1 %v8953_v3 }
 0xda1   : > { %v4471_v29 = vpop.xlane.xlu1 %4470 }
 0xda2   : > { %v4472_v31 = vsub.f32 %v4468_v23, %v4471_v29 }
 0xda4   : > { %v4473_v33 = vmul.f32 1.442695, %v4472_v31 }
 0xda5   : > { %v4638_v35 = vpop.xlane.xlu0 %4637 }
 0xda6   : > { %8544 = vpow2.f32 %v4473_v33  ;;  %v4639_v30 = vsub.f32 %v4635_v63, %v4638_v35  ;;  %v9848_v63 = vpack.c.bf16 %v1540_v58, %v1539_v62 }
 0xda8   : > { %v4640_v34 = vmul.f32 1.442695, %v4639_v30  ;;  %8230 = vmatpush3.bf16.msra.mxu0 %v9848_v63 }
 0xda9   : > { %v4804_v36 = vpop.xlane.xlu0 %4803  ;;  %8231 = vmatprep.subr.bf16.mxu0 %v8951_v2 }
 0xdaa   : > { %8546 = vpow2.f32 %v4640_v34  ;;  %v4805_v32 = vsub.f32 %v4801_v5, %v4804_v36  ;;  %v1546_v34 = vld [vmem:[%s10248_s5 + $0x10] sm:$0xff]  ;;  %v1547_v36 = vld [vmem:[%s10248_s5 + $0x18] sm:$0xff] }
 0xdac   : > { %v4806_v37 = vmul.f32 1.442695, %v4805_v32  ;;  %8233 = vmatpush3.bf16.msra.mxu0 %v9854_v4 }
 0xdad   : > { %8240 = vmatprep.subr.bf16.mxu0 %v8951_v2 }
 0xdae   : > { %8548 = vpow2.f32 %v4806_v37  ;;  %v9878_v37 = vpack.c.bf16 %v1547_v36, %v1546_v34 }
 0xdb0   : > { %v8545_v38 = vpop.eup %8544 }
 0xdb1   : > { %v4475_v40 = vsel %vm1832_vm2, %v8545_v38, 0.0 }
 0xdb2   : > { %4476 = vadd.xlane.f32.xlu0 %v4475_v40  ;;  %v8584_v40 = vld [vmem:[%s9415_s2] sm:$0xff]  ;;  %s10251_s2 = sld [smem:[#allocation49_spill]] }
 0xdb4   : > { %v8547_v39 = vpop.eup %8546 }
 0xdb5   : > { %v4642_v41 = vsel %vm1832_vm2, %v8547_v39, 0.0 }
 0xdb6   : > { %4643 = vadd.xlane.f32.xlu1 %v4642_v41 }
 0xdb8   : > { %v8549_v42 = vpop.eup %8548 }
 0xdb9   : > { %v4808_v43 = vsel %vm1832_vm2, %v8549_v42, 0.0 }
 0xdba   : > { %4809 = vadd.xlane.f32.xlu0 %v4808_v43 }
 0xdc7   : > { %4813 = vrot.lane.b32.xlu1 %v4226_v28, %s10242_s23 }
 0xdcd   : > { %v4314_v44 = vpop.xlane.xlu1 %4313 }
 0xdce   : > { %8550 = vrcp.f32 %v4314_v44 }
 0xdd0   : > { %4647 = vrot.lane.b32.xlu0 %v4226_v28, %s10241_s0  ;;  %v1544_v28 = vld [vmem:[%s10248_s5] sm:$0xff] }
 0xdd1   : > { %v9870_v33 = vpack.c.bf16 %v1545_v12, %v1544_v28 }
 0xdd8   : > { %v8551_v45 = vpop.eup %8550 }
 0xdd9   : > { %v4316_v47 = vmul.f32 %v8551_v45, %v8543_v17  ;;  %v4482_v50 = vpop.permute.xlu1 %4481  ;;  %v1548_v17 = vld [vmem:[%s10247_s4] sm:$0xff] }
 0xdda   : > { %v9863_v22 = vpack.c.bf16 %v1549_v18, %v1548_v17 }
 0xddb   : > { %7842 = vmatmul.mubr.msk.f32.vlgmr.msra.gmra.mrb[28].mxu1 %vm1832_vm2, %v4316_v47 }
 0xddc   : > { %7850 = vmatpush3.msra.mxu1 %v4482_v50  ;;  %7851 = vmatprep.mubr.msk.f32.mxu1 %vm8952_vm0, %v8953_v3 }
 0xddd   : > { %7859 = vmatprep.subr.mxu1 %v8953_v3 }
 0xe3f   : > { %v4477_v51 = vpop.xlane.xlu0 %4476 }
 0xe40   : > { %8552 = vrcp.f32 %v4477_v51 }
 0xe43   : > { %v4644_v52 = vpop.xlane.xlu1 %4643 }
 0xe44   : > { %8554 = vrcp.f32 %v4644_v52 }
 0xe47   : > { %v4810_v53 = vpop.xlane.xlu0 %4809  ;;  %v4814_v57 = vpop.permute.xlu1 %4813 }
 0xe48   : > { %8556 = vrcp.f32 %v4810_v53  ;;  %v1553_v53 = vld [vmem:[%s10251_s2] sm:$0xff] }
 0xe4a   : > { %v8553_v46 = vpop.eup %8552 }
 0xe4b   : > { %v4479_v49 = vmul.f32 %v8553_v46, %v8545_v38  ;;  %v4648_v55 = vpop.permute.xlu0 %4647  ;;  %v3994_v38 = vadd.f32 %v9710_v0, %v9818_v10  ;;  %v1551_v0 = vld [vmem:[%s10247_s4 + $0x18] sm:$0xff]  ;;  %v1554_v46 = vld [vmem:[%s10251_s2 + $0x8] sm:$0xff] }
 0xe4d   : > { %7852 = vmatmul.mubr.msk.f32.vlgmr.msra.gmra.mrb[30].mxu1 %vm1832_vm2, %v4479_v49  ;;  %v1555_v49 = vld [vmem:[%s10251_s2 + $0x10] sm:$0xff] }
 0xe4e   : > { %v8555_v48 = vpop.eup %8554  ;;  %7860 = vmatpush3.msra.mxu1 %v4648_v55  ;;  %7861 = vmatprep.mubr.msk.f32.mxu1 %vm8952_vm0, %v8953_v3  ;;  %v9929_v55 = vpack.c.bf16 %v1554_v46, %v1553_v53 }
 0xe4f   : > { %v4646_v56 = vmul.f32 %v8555_v48, %v8547_v39  ;;  %7869 = vmatprep.subr.mxu1 %v8953_v3  ;;  %v9895_v39 = vadd.f32 %v8584_v40, %v3994_v38  ;;  %v1556_v48 = vld [vmem:[%s10251_s2 + $0x18] sm:$0xff] }
 0xe51   : > { %7862 = vmatmul.mubr.msk.f32.vlgmr.msra.gmra.mrb[32].mxu1 %vm1832_vm2, %v4646_v56  ;;  %v1558_v56 = vld [vmem:[%s10251_s2 + $0x28] sm:$0xff] }
 0xe52   : > { %v8557_v59 = vpop.eup %8556  ;;  %7870 = vmatpush3.msra.mxu1 %v4814_v57  ;;  %7871 = vmatprep.mubr.msk.f32.mxu1 %vm8952_vm0, %v8953_v3 }
 0xe53   : > { %v4812_v60 = vmul.f32 %v8557_v59, %v8549_v42  ;;  %8234 = vmatprep.subr.bf16.mxu1 %v8951_v2  ;;  %v1559_v59 = vld [vmem:[%s10251_s2 + $0x30] sm:$0xff] }
 0xe55   : > { %7872 = vmatmul.mubr.msk.f32.vlgmr.msra.gmra.mrb[34].mxu1 %vm1832_vm2, %v4812_v60  ;;  %v1560_v60 = vld [vmem:[%s10251_s2 + $0x38] sm:$0xff] }
 0xe56   : > { %7893 = vmatprep.mubr.msk.f32.mxu1 %vm8952_vm0, %v8953_v3  ;;  %8236 = vmatpush3.bf16.msra.mxu1 %v9863_v22 }
 0xe57   : > { %8237 = vmatprep.subr.bf16.mxu1 %v8951_v2 }
 0xeae   : > { %v4386_v23 = vpop.f32.mrb[28].mxu1 }
 0xeaf   : > { %v7843_v61 = vpop.f32.mrb[29].mxu1 }
 0xf20   : > { %v4553_v5 = vpop.f32.mrb[30].mxu1 }
 0xf21   : > { %4890 = vrot.lane.b32.xlu1 %v4553_v5, %s10249_s6  ;;  %v7853_v6 = vpop.f32.mrb[31].mxu1 }
 0xf22   : > { %v9978_v6 = vld [vmem:[#allocation6] ss:$0 sm:$0xff] }
 0xf24   : > { %v4719_v8 = vpop.f32.mrb[32].mxu1 }
 0xf25   : > { %4894 = vrot.lane.b32.xlu0 %v4719_v8, %s10250_s7  ;;  %v7863_v7 = vpop.f32.mrb[33].mxu1 }
 0xf28   : > { %v4885_v9 = vpop.f32.mrb[34].mxu1 }
 0xf29   : > { %4898 = vrot.lane.b32.xlu1 %v4885_v9, %s10236_s15  ;;  %v7873_v16 = vpop.f32.mrb[35].mxu1 }
 0xf93   : > { %v4891_v27 = vpop.permute.xlu1 %4890 }
 0xf94   : > { %v4901_v31 = vsel %vm1832_vm2, %v4386_v23, %v4891_v27  ;;  %v9955_v23 = vpack.c.bf16 %v1560_v60, %v1559_v59 }
 0xf97   : > { %v4895_v29 = vpop.permute.xlu0 %4894 }
 0xf98   : > { %v4902_v35 = vsel %vm2506_vm3, %v4901_v31, %v4895_v29 }
 0xf9b   : > { %v4899_v30 = vpop.permute.xlu1 %4898 }
 0xf9c   : > { %v4903_v32 = vsel %vm2508_vm4, %v4902_v35, %v4899_v30 }
 0xf9d   : > { %7883 = vmatmul.mubr.msk.f32.vlgmr.msra.gmra.mrb[46].mxu0 %vm1603_vm1, %v4903_v32 }
 0xf9e   : > { %8242 = vmatpush3.bf16.msra.mxu0 %v9870_v33  ;;  %7904 = vmatprep.mubr.msk.f32.mxu0 %vm8952_vm0, %v8953_v3 }
 0xf9f   : > { %8243 = vmatprep.subr.bf16.mxu0 %v8951_v2 }
 0xfa2   : > { %8245 = vmatpush3.bf16.msra.mxu0 %v9878_v37 }
 0xfa3   : > { %8258 = vmatprep.subr.bf16.mxu0 %v8951_v2 }
 0xfa5   : > { %7905 = vmatmul.mubr.msk.f32.vlgmr.msra.gmra.mrb[48].mxu0 %vm1603_vm1, %v9728_v19 }
 0xfa6   : > { %8260 = vmatpush3.bf16.msra.mxu0 %v9704_v14  ;;  %7934 = vmatprep.mubr.msk.f32.mxu0 %vm8952_vm0, %v8953_v3  ;;  %v1550_v14 = vld [vmem:[%s10247_s4 + $0x10] sm:$0xff] }
 0xfa7   : > { %8261 = vmatprep.subr.bf16.mxu0 %v8951_v2 }
 0xfaa   : > { %8263 = vmatpush3.bf16.msra.mxu0 %v9715_v21  ;;  %v9912_v21 = vpack.c.bf16 %v1551_v0, %v1550_v14 }
 0xfab   : > { %8264 = vmatprep.subr.bf16.mxu0 %v8951_v2 }
 0xfac   : > { %8239 = vmatpush3.bf16.msra.mxu1 %v9912_v21 }
 0xfad   : > { %7935 = vmatmul.mubr.msk.f32.vlgmr.msra.gmra.mrb[50].mxu0 %vm1603_vm1, %v9895_v39  ;;  %8246 = vmatprep.subr.bf16.mxu1 %v8951_v2 }
 0xfae   : > { %8266 = vmatpush3.bf16.msra.mxu0 %v9725_v25  ;;  %7945 = vmatprep.mubr.msk.f32.mxu0 %vm8952_vm0, %v8953_v3  ;;  %v9916_v25 = vld [vmem:[#allocation4] ss:$0 sm:$0xff] }
 0xfaf   : > { %8267 = vmatprep.subr.bf16.mxu0 %v8951_v2 }
 0xfb2   : > { %8269 = vmatpush3.bf16.msra.mxu0 %v9736_v15 }
 0xfb3   : > { %7959 = vmatprep.subr.mxu0 %v8953_v3 }
 0xfb5   : > { %7946 = vmatmul.mubr.msk.f32.vlgmr.msra.gmra.mrb[52].mxu0 %vm1603_vm1, %v9895_v39 }
 0xfb6   : > { %7961 = vmatprep.mubr.msk.f32.mxu0 %vm8952_vm0, %v8953_v3 }
0x1070   : > { %v4979_v15 = vpop.f32.mrb[46].mxu0 }
0x1071   : > { %v4980_v10 = vadd.f32 %v9916_v25, %v4979_v15  ;;  %v7884_v41 = vpop.f32.mrb[47].mxu0 }
0x1072   : > { %v9997_v41 = vld [vmem:[#allocation8] ss:$0 sm:$0xff] }
0x1073   : > { %7894 = vmatmul.mubr.msk.f32.vlgmr.msra.gmra.mrb[36].mxu1 %vm1603_vm1, %v4980_v10 }
0x1074   : > { %7923 = vmatprep.mubr.msk.f32.mxu1 %vm8952_vm0, %v8953_v3  ;;  %8248 = vmatpush3.bf16.msra.mxu1 %v9929_v55 }
0x1075   : > { %8249 = vmatprep.subr.bf16.mxu1 %v8951_v2 }
0x1078   : > { %v5122_v42 = vpop.f32.mrb[48].mxu0 }
0x1079   : > { %v7906_v43 = vpop.f32.mrb[49].mxu0 }
0x1080   : > { %v5283_v44 = vpop.f32.mrb[50].mxu0 }
0x1081   : > { %v5284_v45 = vadd.f32 %v9758_v13, %v5283_v44  ;;  %v7936_v47 = vpop.f32.mrb[51].mxu0  ;;  %v9936_v13 = vpack.c.bf16 %v1556_v48, %v1555_v49 }
0x1083   : > { %5588 = vrot.lane.b32.xlu1 %v5284_v45, %s10245_s3  ;;  %8251 = vmatpush3.bf16.msra.mxu1 %v9936_v13 }
0x1084   : > { %8252 = vmatprep.subr.bf16.mxu1 %v8951_v2 }
0x1087   : > { %5755 = vrot.lane.b32.xlu1 %v5284_v45, %s10241_s0 }
0x1088   : > { %v5353_v50 = vpop.f32.mrb[52].mxu0 }
0x1089   : > { %v5354_v51 = vadd.f32 %v9765_v26, %v5353_v50  ;;  %v7947_v52 = vpop.f32.mrb[53].mxu0  ;;  %v1557_v26 = vld [vmem:[%s10251_s2 + $0x20] sm:$0xff]  ;;  %s1477_s2 = scalar_lea.vmem %s9171_s24, %s9387_s10 }
0x108a   : > { %v9947_v57 = vpack.c.bf16 %v1558_v56, %v1557_v26 }
0x108b   : > { %5921 = vrot.lane.b32.xlu1 %v5284_v45, %s10242_s23  ;;  %5590 = vrot.lane.b32.xlu0 %v5354_v51, %s10245_s3 }
0x108c   : > { %7960 = vmatpush3.xpose.msk.msra.mxu0 %vm1832_vm2, %v5354_v51  ;;  %8254 = vmatpush3.bf16.msra.mxu1 %v9947_v57 }
0x108d   : > { %7969 = vmatprep.subr.mxu0 %v8953_v3  ;;  %8255 = vmatprep.subr.bf16.mxu1 %v8951_v2 }
0x108f   : > { %7962 = vmatmul.mubr.msk.f32.vlgmr.msra.gmra.mrb[54].mxu0 %vm1832_vm2, %v5284_v45  ;;  %5757 = vrot.lane.b32.xlu0 %v5354_v51, %s10241_s0 }
0x1090   : > { %7971 = vmatprep.mubr.msk.f32.mxu0 %vm8952_vm0, %v8953_v3  ;;  %8257 = vmatpush3.bf16.msra.mxu1 %v9955_v23 }
0x1091   : > { %8270 = vmatprep.subr.bf16.mxu1 %v8951_v2 }
0x1093   : > { %5923 = vrot.lane.b32.xlu0 %v5354_v51, %s10242_s23 }
0x10f5   : > { %v5589_v61 = vpop.permute.xlu1 %5588 }
0x10f9   : > { %v5756_v1 = vpop.permute.xlu1 %5755 }
0x10fd   : > { %v5591_v62 = vpop.permute.xlu0 %5590  ;;  %v5922_v5 = vpop.permute.xlu1 %5921 }
0x10fe   : > { %7970 = vmatpush3.xpose.msk.msra.mxu0 %vm1832_vm2, %v5591_v62 }
0x10ff   : > { %7979 = vmatprep.subr.mxu0 %v8953_v3 }
0x1101   : > { %v5758_v58 = vpop.permute.xlu0 %5757  ;;  %7972 = vmatmul.mubr.msk.f32.vlgmr.msra.gmra.mrb[56].mxu0 %vm1832_vm2, %v5589_v61 }
0x1102   : > { %7980 = vmatpush3.xpose.msk.msra.mxu0 %vm1832_vm2, %v5758_v58  ;;  %7981 = vmatprep.mubr.msk.f32.mxu0 %vm8952_vm0, %v8953_v3 }
0x1103   : > { %7989 = vmatprep.subr.mxu0 %v8953_v3 }
0x1105   : > { %v5924_v11 = vpop.permute.xlu0 %5923  ;;  %7982 = vmatmul.mubr.msk.f32.vlgmr.msra.gmra.mrb[58].mxu0 %vm1832_vm2, %v5756_v1 }
0x1106   : > { %7990 = vmatpush3.xpose.msk.msra.mxu0 %vm1832_vm2, %v5924_v11  ;;  %7991 = vmatprep.mubr.msk.f32.mxu0 %vm8952_vm0, %v8953_v3 }
0x1107   : > { %8276 = vmatprep.subr.bf16.mxu0 %v8951_v2 }
0x1109   : > { %7992 = vmatmul.mubr.msk.f32.vlgmr.msra.gmra.mrb[60].mxu0 %vm1832_vm2, %v5922_v5 }
0x110a   : > { %8278 = vmatpush3.bf16.msra.mxu0 %v9848_v63  ;;  %8007 = vmatprep.mubr.msk.f32.mxu0 %vm8952_vm0, %v8953_v3 }
0x110b   : > { %8279 = vmatprep.subr.bf16.mxu0 %v8951_v2 }
0x110e   : > { %8281 = vmatpush3.bf16.msra.mxu0 %v9854_v4 }
0x110f   : > { %8288 = vmatprep.subr.bf16.mxu0 %v8951_v2 }
0x1146   : > { %v5052_v8 = vpop.f32.mrb[36].mxu1 }
0x1147   : > { %v5123_v7 = vadd.f32 %v5122_v42, %v5052_v8  ;;  %v7895_v9 = vpop.f32.mrb[37].mxu1 }
0x1149   : > { %v5132_v16 = vadd.f32 %v9978_v6, %v5123_v7 }
0x114b   : > { %v5133_v17 = vmax.f32 %v5132_v16, 0.0 }
0x114d   : > { %7924 = vmatmul.mubr.msk.f32.vlgmr.msra.gmra.mrb[38].mxu1 %vm2746_vm5, %v5133_v17 }
0x114e   : > { %8272 = vmatpush3.bf16.msra.mxu1 %v9796_v54  ;;  %7956 = vmatprep.mubr.msk.f32.mxu1 %vm8952_vm0, %v8953_v3 }
0x114f   : > { %8273 = vmatprep.subr.bf16.mxu1 %v8951_v2 }
0x1152   : > { %8275 = vmatpush3.bf16.msra.mxu1 %v9802_v20 }
0x1153   : > { %7964 = vmatprep.subr.mxu1 %v8953_v3 }
0x1155   : > { %7957 = vmatmul.mubr.msk.f32.vlgmr.msra.gmra.mrb[40].mxu1 %vm1603_vm1, %v9895_v39 }
0x1156   : > { %7966 = vmatprep.mubr.msk.f32.mxu1 %vm8952_vm0, %v8953_v3 }
0x1162   : > { %v5499_v63 = vpop.f32.mrb[54].mxu0 }
0x1163   : > { %v5503_v4 = vmul.f32 0.35355338, %v5499_v63  ;;  %v7963_v18 = vpop.f32.mrb[55].mxu0 }
0x1165   : > { %v5504_v54 = vsel %vm1832_vm2, %v5503_v4, -inf }
0x1166   : > { %5505 = vmax.xlane.f32.xlu0 %v5504_v54 }
0x11d4   : > { %v5662_v27 = vpop.f32.mrb[56].mxu0 }
0x11d5   : > { %v5666_v28 = vmul.f32 0.35355338, %v5662_v27  ;;  %v7973_v12 = vpop.f32.mrb[57].mxu0 }
0x11d7   : > { %v5667_v29 = vsel %vm1832_vm2, %v5666_v28, -inf }
0x11d8   : > { %5668 = vmax.xlane.f32.xlu1 %v5667_v29  ;;  %v5829_v20 = vpop.f32.mrb[58].mxu0 }
0x11d9   : > { %v5833_v31 = vmul.f32 0.35355338, %v5829_v20  ;;  %v7983_v35 = vpop.f32.mrb[59].mxu0 }
0x11db   : > { %v5834_v30 = vsel %vm1832_vm2, %v5833_v31, -inf }
0x11dc   : > { %5835 = vmax.xlane.f32.xlu0 %v5834_v30  ;;  %v5995_v34 = vpop.f32.mrb[60].mxu0 }
0x11dd   : > { %v5999_v36 = vmul.f32 0.35355338, %v5995_v34  ;;  %v7993_v32 = vpop.f32.mrb[61].mxu0 }
0x11df   : > { %v6000_v38 = vsel %vm1832_vm2, %v5999_v36, -inf }
0x11e0   : > { %6001 = vmax.xlane.f32.xlu0 %v6000_v38 }
0x11f3   : > { %v5506_v40 = vpop.xlane.xlu0 %5505 }
0x11f4   : > { %v5507_v14 = vsub.f32 %v5503_v4, %v5506_v40 }
0x11f6   : > { %v5508_v0 = vmul.f32 1.442695, %v5507_v14 }
0x11f8   : > { %8558 = vpow2.f32 %v5508_v0 }
0x1202   : > { %v8559_v15 = vpop.eup %8558 }
0x1203   : > { %v5510_v10 = vsel %vm1832_vm2, %v8559_v15, 0.0 }
0x1204   : > { %5511 = vadd.xlane.f32.xlu1 %v5510_v10 }
0x1220   : > { %v5209_v42 = vpop.f32.mrb[38].mxu1 }
0x1221   : > { %v5210_v43 = vadd.f32 %v9997_v41, %v5209_v42  ;;  %v7925_v44 = vpop.f32.mrb[39].mxu1 }
0x1223   : > { %v10003_v45 = vadd.f32 %v5210_v43, %v9728_v19 }
0x1225   : > { %6394 = vst.msk [vmem:[%s1477_s2] sm:$0xff] %vm1603_vm1, %v10003_v45 }
0x1228   : > { %v5423_v47 = vpop.f32.mrb[40].mxu1 }
0x1229   : > { %v5424_v50 = vadd.f32 %v9821_v24, %v5423_v47  ;;  %v7958_v51 = vpop.f32.mrb[41].mxu1 }
0x122b   : > { %7965 = vmatpush3.msra.mxu1 %v5424_v50  ;;  %5679 = vrot.lane.b32.xlu1 %v5424_v50, %s10245_s3  ;;  %s10252_s3 = sld [smem:[#allocation52_spill]] }
0x122c   : > { %7974 = vmatprep.subr.mxu1 %v8953_v3 }
0x1231   : > { %v1571_v51 = vld [vmem:[%s10252_s3 + $0x8] sm:$0xff] }
0x1265   : > { %v5669_v52 = vpop.xlane.xlu1 %5668 }
0x1266   : > { %v5670_v53 = vsub.f32 %v5666_v28, %v5669_v52  ;;  %v1572_v52 = vld [vmem:[%s10252_s3 + $0x10] sm:$0xff] }
0x1268   : > { %v5671_v46 = vmul.f32 1.442695, %v5670_v53  ;;  %v1573_v53 = vld [vmem:[%s10252_s3 + $0x18] sm:$0xff] }
0x1269   : > { %v5836_v49 = vpop.xlane.xlu0 %5835 }
0x126a   : > { %8560 = vpow2.f32 %v5671_v46  ;;  %v5837_v48 = vsub.f32 %v5833_v31, %v5836_v49 }
0x126c   : > { %v5838_v19 = vmul.f32 1.442695, %v5837_v48 }
0x126d   : > { %v6002_v26 = vpop.xlane.xlu0 %6001 }
0x126e   : > { %8562 = vpow2.f32 %v5838_v19  ;;  %v6003_v56 = vsub.f32 %v5999_v36, %v6002_v26 }
0x1270   : > { %v6004_v59 = vmul.f32 1.442695, %v6003_v56 }
0x1272   : > { %8564 = vpow2.f32 %v6004_v59 }
0x1274   : > { %v8561_v60 = vpop.eup %8560 }
0x1275   : > { %v5673_v24 = vsel %vm1832_vm2, %v8561_v60, 0.0 }
0x1276   : > { %5674 = vadd.xlane.f32.xlu0 %v5673_v24 }
0x1278   : > { %v8563_v61 = vpop.eup %8562 }
0x1279   : > { %v5840_v62 = vsel %vm1832_vm2, %v8563_v61, 0.0 }
0x127a   : > { %5841 = vadd.xlane.f32.xlu1 %v5840_v62 }
0x127c   : > { %v8565_v58 = vpop.eup %8564 }
0x127d   : > { %v6006_v1 = vsel %vm1832_vm2, %v8565_v58, 0.0 }
0x127e   : > { %6007 = vadd.xlane.f32.xlu0 %v6006_v1 }
0x128b   : > { %6011 = vrot.lane.b32.xlu1 %v5424_v50, %s10242_s23  ;;  %s1485_s23 = scalar_lea.vmem %s9181_s25, %s9387_s10 }
0x1291   : > { %v5512_v11 = vpop.xlane.xlu1 %5511 }
0x1292   : > { %8566 = vrcp.f32 %v5512_v11 }
0x1294   : > { %5845 = vrot.lane.b32.xlu0 %v5424_v50, %s10241_s0  ;;  %s10255_s0 = sld [smem:[#allocation55_spill]] }
0x129c   : > { %v8567_v5 = vpop.eup %8566 }
0x129d   : > { %v5514_v8 = vmul.f32 %v8567_v5, %v8559_v15  ;;  %v5680_v7 = vpop.permute.xlu1 %5679 }
0x129f   : > { %7967 = vmatmul.mubr.msk.f32.vlgmr.msra.gmra.mrb[42].mxu1 %vm1832_vm2, %v5514_v8 }
0x12a0   : > { %7975 = vmatpush3.msra.mxu1 %v5680_v7  ;;  %7976 = vmatprep.mubr.msk.f32.mxu1 %vm8952_vm0, %v8953_v3 }
0x12a1   : > { %7984 = vmatprep.subr.mxu1 %v8953_v3 }
0x1303   : > { %v5675_v9 = vpop.xlane.xlu0 %5674 }
0x1304   : > { %8568 = vrcp.f32 %v5675_v9 }
0x1307   : > { %v5842_v16 = vpop.xlane.xlu1 %5841 }
0x1308   : > { %8570 = vrcp.f32 %v5842_v16 }
0x130b   : > { %v6008_v17 = vpop.xlane.xlu0 %6007  ;;  %v6012_v28 = vpop.permute.xlu1 %6011 }
0x130c   : > { %8572 = vrcp.f32 %v6008_v17 }
0x130e   : > { %v8569_v63 = vpop.eup %8568 }
0x130f   : > { %v5677_v4 = vmul.f32 %v8569_v63, %v8561_v60  ;;  %v5846_v18 = vpop.permute.xlu0 %5845 }
0x1311   : > { %7977 = vmatmul.mubr.msk.f32.vlgmr.msra.gmra.mrb[44].mxu1 %vm1832_vm2, %v5677_v4 }
0x1312   : > { %v8571_v54 = vpop.eup %8570  ;;  %7985 = vmatpush3.msra.mxu1 %v5846_v18  ;;  %7986 = vmatprep.mubr.msk.f32.mxu1 %vm8952_vm0, %v8953_v3 }
0x1313   : > { %v5844_v27 = vmul.f32 %v8571_v54, %v8563_v61  ;;  %7994 = vmatprep.subr.mxu1 %v8953_v3 }
0x1315   : > { %7987 = vmatmul.mubr.msk.f32.vlgmr.msra.gmra.mrb[46].mxu1 %vm1832_vm2, %v5844_v27 }
0x1316   : > { %v8573_v12 = vpop.eup %8572  ;;  %7995 = vmatpush3.msra.mxu1 %v6012_v28  ;;  %7996 = vmatprep.mubr.msk.f32.mxu1 %vm8952_vm0, %v8953_v3 }
0x1317   : > { %v6010_v29 = vmul.f32 %v8573_v12, %v8565_v58  ;;  %8282 = vmatprep.subr.bf16.mxu1 %v8951_v2 }
0x1319   : > { %7997 = vmatmul.mubr.msk.f32.vlgmr.msra.gmra.mrb[48].mxu1 %vm1832_vm2, %v6010_v29 }
0x131a   : > { %8284 = vmatpush3.bf16.msra.mxu1 %v9863_v22  ;;  %8018 = vmatprep.mubr.msk.f32.mxu1 %vm8952_vm0, %v8953_v3 }
0x131b   : > { %8285 = vmatprep.subr.bf16.mxu1 %v8951_v2 }
0x131e   : > { %8287 = vmatpush3.bf16.msra.mxu1 %v9912_v21 }
0x131f   : > { %8294 = vmatprep.subr.bf16.mxu1 %v8951_v2 }
0x1372   : > { %v5584_v20 = vpop.f32.mrb[42].mxu1 }
0x1373   : > { %v7968_v31 = vpop.f32.mrb[43].mxu1 }
0x13e4   : > { %v5751_v35 = vpop.f32.mrb[44].mxu1 }
0x13e5   : > { %6088 = vrot.lane.b32.xlu1 %v5751_v35, %s10249_s6  ;;  %v7978_v30 = vpop.f32.mrb[45].mxu1  ;;  %s1481_s6 = scalar_lea.vmem %s9176_s9, %s9387_s10 }
0x13e8   : > { %v5917_v34 = vpop.f32.mrb[46].mxu1 }
0x13e9   : > { %6092 = vrot.lane.b32.xlu0 %v5917_v34, %s10250_s7  ;;  %v7988_v36 = vpop.f32.mrb[47].mxu1  ;;  %s10253_s7 = sld [smem:[#allocation51_spill]] }
0x13ec   : > { %v6083_v22 = vpop.f32.mrb[48].mxu1 }
0x13ed   : > { %6096 = vrot.lane.b32.xlu1 %v6083_v22, %s10236_s15  ;;  %v7998_v32 = vpop.f32.mrb[49].mxu1  ;;  %s10254_s15 = sld [smem:[#allocation54_spill]] }
0x1457   : > { %v6089_v38 = vpop.permute.xlu1 %6088 }
0x1458   : > { %v6099_v21 = vsel %vm1832_vm2, %v5584_v20, %v6089_v38 }
0x145b   : > { %v6093_v40 = vpop.permute.xlu0 %6092 }
0x145c   : > { %v6100_v14 = vsel %vm2506_vm3, %v6099_v21, %v6093_v40 }
0x145f   : > { %v6097_v0 = vpop.permute.xlu1 %6096 }
0x1460   : > { %v6101_v15 = vsel %vm2508_vm4, %v6100_v14, %v6097_v0 }
0x1461   : > { %8008 = vmatmul.mubr.msk.f32.vlgmr.msra.gmra.mrb[62].mxu0 %vm1603_vm1, %v6101_v15  ;;  %v7288_v15 = vld [vmem:[#allocation12] ss:$0 sm:$0xff] }
0x1462   : > { %8290 = vmatpush3.bf16.msra.mxu0 %v9870_v33  ;;  %8029 = vmatprep.mubr.msk.f32.mxu0 %vm8952_vm0, %v8953_v3 }
0x1463   : > { %8291 = vmatprep.subr.bf16.mxu0 %v8951_v2 }
0x1466   : > { %8293 = vmatpush3.bf16.msra.mxu0 %v9878_v37 }
0x1467   : > { %8306 = vmatprep.subr.bf16.mxu0 %v8951_v2 }
0x1469   : > { %8030 = vmatmul.mubr.msk.f32.vlgmr.msra.gmra.mrb[64].mxu0 %vm1603_vm1, %v9895_v39 }
0x146a   : > { %8059 = vmatprep.mubr.msk.f32.mxu0 %vm8952_vm0, %v8953_v3 }
0x1534   : > { %v6171_v10 = vpop.f32.mrb[62].mxu0 }
0x1535   : > { %v6172_v42 = vadd.f32 %v9916_v25, %v6171_v10  ;;  %v8009_v43 = vpop.f32.mrb[63].mxu0 }
0x1537   : > { %8019 = vmatmul.mubr.msk.f32.vlgmr.msra.gmra.mrb[50].mxu1 %vm1603_vm1, %v6172_v42  ;;  %v7289_v42 = vld [vmem:[#allocation14] ss:$0 sm:$0xff] }
0x1538   : > { %8296 = vmatpush3.bf16.msra.mxu1 %v9929_v55  ;;  %8048 = vmatprep.mubr.msk.f32.mxu1 %vm8952_vm0, %v8953_v3 }
0x1539   : > { %8297 = vmatprep.subr.bf16.mxu1 %v8951_v2 }
0x153c   : > { %v6314_v33 = vpop.f32.mrb[64].mxu0  ;;  %8299 = vmatpush3.bf16.msra.mxu1 %v9936_v13  ;;  %v1570_v13 = vld [vmem:[%s10252_s3] sm:$0xff] }
0x153d   : > { %v8031_v37 = vpop.f32.mrb[65].mxu0  ;;  %8300 = vmatprep.subr.bf16.mxu1 %v8951_v2 }
0x153e   : > { %v1566_v37 = vld [vmem:[%s10253_s7] sm:$0xff] }
0x1540   : > { %8302 = vmatpush3.bf16.msra.mxu1 %v9947_v57  ;;  %v8307_v57 = vpack.c.bf16 %v1571_v51, %v1570_v13  ;;  %v1568_v13 = vld [vmem:[%s10253_s7 + $0x10] sm:$0xff]  ;;  %v1569_v51 = vld [vmem:[%s10253_s7 + $0x18] sm:$0xff] }
0x1541   : > { %8303 = vmatprep.subr.bf16.mxu1 %v8951_v2 }
0x1542   : > { %8308 = vmatpush3.bf16.msra.mxu0 %v8307_v57 }
0x1543   : > { %8309 = vmatprep.subr.bf16.mxu0 %v8951_v2 }
0x1544   : > { %8305 = vmatpush3.bf16.msra.mxu1 %v9955_v23  ;;  %v8310_v23 = vpack.c.bf16 %v1573_v53, %v1572_v52  ;;  %v7287_v52 = vld [vmem:[#allocation11] ss:$0 sm:$0xff]  ;;  %v8316_v53 = vpack.c.bf16 %v1569_v51, %v1568_v13  ;;  %v1588_v51 = vld [vmem:[%s10255_s0 + $0x10] sm:$0xff] }
0x1545   : > { %8318 = vmatprep.subr.bf16.mxu1 %v8951_v2 }
0x1546   : > { %8311 = vmatpush3.bf16.msra.mxu0 %v8310_v23 }
0x1547   : > { %8312 = vmatprep.subr.bf16.mxu0 %v8951_v2 }
0x160a   : > { %v6244_v25 = vpop.f32.mrb[50].mxu1 }
0x160b   : > { %v6315_v55 = vadd.f32 %v6314_v33, %v6244_v25  ;;  %v8020_v44 = vpop.f32.mrb[51].mxu1  ;;  %v1567_v25 = vld [vmem:[%s10253_s7 + $0x8] sm:$0xff] }
0x160d   : > { %v6318_v47 = vadd.f32 %v9978_v6, %v6315_v55  ;;  %v6396_v6 = vsel %vm1603_vm1, %v10003_v45, 0.0  ;;  %v7286_v55 = vld [vmem:[#allocation9] ss:$0 sm:$0xff] }
0x160e   : > { %v6397_v46 = vrot.slane %v6396_v6, 4 }
0x160f   : > { %v6319_v50 = vmax.f32 %v6318_v47, 0.0  ;;  %v8313_v47 = vpack.c.bf16 %v1567_v25, %v1566_v37  ;;  %v1592_v25 = vld [vmem:[%s9166_s29 + $0x10] sm:$0xff] }
0x1610   : > { %v6398_v49 = vadd.f32 %v6397_v46, %v6396_v6  ;;  %v1577_v46 = vld [vmem:[%s10254_s15] sm:$0xff] }
0x1611   : > { %8049 = vmatmul.mubr.msk.f32.vlgmr.msra.gmra.mrb[52].mxu1 %vm2746_vm5, %v6319_v50 }
0x1612   : > { %8089 = vmatprep.mubr.msk.f32.mxu1 %vm8952_vm0, %v8953_v3  ;;  %v6399_v48 = vrot.slane %v6398_v49, 2 }
0x1614   : > { %v6400_v19 = vadd.f32 %v6399_v48, %v6398_v49  ;;  %v1578_v49 = vld [vmem:[%s10254_s15 + $0x8] sm:$0xff] }
0x1615   : > { %v8319_v48 = vpack.c.bf16 %v1578_v49, %v1577_v46 }
0x1616   : > { %v6401_v26 = vrot.slane %v6400_v19, 1 }
0x1617   : > { %8320 = vmatpush3.bf16.msra.mxu1 %v8319_v48 }
0x1618   : > { %v6402_v56 = vadd.f32 %v6401_v26, %v6400_v19  ;;  %8321 = vmatprep.subr.bf16.mxu1 %v8951_v2  ;;  %v1579_v19 = vld [vmem:[%s10254_s15 + $0x10] sm:$0xff]  ;;  %v1580_v26 = vld [vmem:[%s10254_s15 + $0x18] sm:$0xff] }
0x161a   : > { %v6404_v59 = vmul.f32 0.125, %v6402_v56  ;;  %v8322_v56 = vpack.c.bf16 %v1580_v26, %v1579_v19 }
0x161c   : > { %v6405_v60 = vsub.f32 %v10003_v45, %v6404_v59  ;;  %8323 = vmatpush3.bf16.msra.mxu1 %v8322_v56  ;;  %v1581_v59 = vld [vmem:[%s10254_s15 + $0x20] sm:$0xff] }
0x161d   : > { %8324 = vmatprep.subr.bf16.mxu1 %v8951_v2 }
0x161e   : > { %v6406_v61 = vmul.f32 %v6405_v60, %v6405_v60 }
0x1620   : > { %v6407_v11 = vsel %vm1603_vm1, %v6406_v61, 0.0  ;;  %v1583_v61 = vld [vmem:[%s10254_s15 + $0x30] sm:$0xff] }
0x1621   : > { %v6408_v7 = vrot.slane %v6407_v11, 4 }
0x1623   : > { %v6409_v17 = vadd.f32 %v6408_v7, %v6407_v11 }
0x1625   : > { %v6410_v4 = vrot.slane %v6409_v17, 2 }
0x16e4   : > { %v6389_v24 = vpop.f32.mrb[52].mxu1 }
0x16e5   : > { %v6390_v62 = vadd.f32 %v9997_v41, %v6389_v24  ;;  %v8050_v58 = vpop.f32.mrb[53].mxu1 }
0x16e7   : > { %v10080_v1 = vadd.f32 %v6390_v62, %v9895_v39  ;;  %v6411_v39 = vadd.f32 %v6410_v4, %v6409_v17  ;;  %v1584_v62 = vld [vmem:[%s10254_s15 + $0x38] sm:$0xff] }
0x16e8   : > { %v8328_v58 = vpack.c.bf16 %v1584_v62, %v1583_v61 }
0x16e9   : > { %6395 = vst.msk [vmem:[%s1481_s6] sm:$0xff] %vm1603_vm1, %v10080_v1  ;;  %v6433_v5 = vsel %vm1603_vm1, %v10080_v1, 0.0  ;;  %v6412_v12 = vrot.slane %v6411_v39, 1 }
0x16ea   : > { %v6434_v8 = vrot.slane %v6433_v5, 4 }
0x16eb   : > { %v6413_v35 = vadd.f32 %v6412_v12, %v6411_v39 }
0x16ec   : > { %v6435_v9 = vadd.f32 %v6434_v8, %v6433_v5  ;;  %v7292_v8 = vld [vmem:[#allocation15] ss:$0 sm:$0xff] }
0x16ed   : > { %v6414_v36 = vmul.f32 0.125, %v6413_v35 }
0x16ee   : > { %v6436_v16 = vrot.slane %v6435_v9, 2 }
0x16ef   : > { %v6415_v38 = vadd.f32 0.001, %v6414_v36 }
0x16f0   : > { %v6437_v63 = vadd.f32 %v6436_v16, %v6435_v9 }
0x16f1   : > { %8574 = vrsqrt.f32 %v6415_v38 }
0x16f2   : > { %v6438_v41 = vrot.slane %v6437_v63, 1 }
0x16f4   : > { %v6439_v18 = vadd.f32 %v6438_v41, %v6437_v63 }
0x16f6   : > { %v6440_v54 = vmul.f32 0.125, %v6439_v18 }
0x16f8   : > { %v6441_v27 = vsub.f32 %v10080_v1, %v6440_v54 }
0x16fa   : > { %v6442_v28 = vmul.f32 %v6441_v27, %v6441_v27 }
0x16fb   : > { %v8575_v14 = vpop.eup %8574 }
0x16fc   : > { %v6443_v29 = vsel %vm1603_vm1, %v6442_v28, 0.0  ;;  %v6417_v43 = vmul.f32 %v8575_v14, %v6405_v60  ;;  %v1582_v60 = vld [vmem:[%s10254_s15 + $0x28] sm:$0xff] }
0x16fd   : > { %v6444_v20 = vrot.slane %v6443_v29, 4  ;;  %v8325_v24 = vpack.c.bf16 %v1582_v60, %v1581_v59 }
0x16fe   : > { %v6424_v57 = vmul.f32 %v7286_v55, %v6417_v43  ;;  %v1593_v55 = vld [vmem:[%s9166_s29 + $0x18] sm:$0xff] }
0x16ff   : > { %v6445_v31 = vadd.f32 %v6444_v20, %v6443_v29  ;;  %8326 = vmatpush3.bf16.msra.mxu1 %v8325_v24 }
0x1700   : > { %v6431_v23 = vadd.f32 %v7287_v52, %v6424_v57  ;;  %8327 = vmatprep.subr.bf16.mxu1 %v8951_v2  ;;  %v1589_v57 = vld [vmem:[%s10255_s0 + $0x18] sm:$0xff] }
0x1701   : > { %v6446_v30 = vrot.slane %v6445_v31, 2  ;;  %v8340_v52 = vpack.c.bf16 %v1589_v57, %v1588_v51 }
0x1702   : > { %v6432_v6 = vmax.f32 %v6431_v23, 0.0  ;;  %v7299_v23 = vld [vmem:[#allocation3] ss:$0 sm:$0xff] }
0x1703   : > { %v6447_v34 = vadd.f32 %v6446_v30, %v6445_v31  ;;  %8329 = vmatpush3.bf16.msra.mxu1 %v8328_v58 }
0x1704   : > { %8330 = vmatprep.subr.bf16.mxu1 %v8951_v2 }
0x1705   : > { %v6448_v22 = vrot.slane %v6447_v34, 1 }
0x1707   : > { %v6449_v32 = vadd.f32 %v6448_v22, %v6447_v34 }
0x1709   : > { %v6450_v40 = vmul.f32 0.125, %v6449_v32 }
0x170b   : > { %v6451_v21 = vadd.f32 0.001, %v6450_v40 }
0x170d   : > { %8576 = vrsqrt.f32 %v6451_v21  ;;  %v7293_v21 = vld [vmem:[#allocation17] ss:$0 sm:$0xff] }
0x1717   : > { %v8577_v0 = vpop.eup %8576 }
0x1718   : > { %v6453_v10 = vmul.f32 %v8577_v0, %v6441_v27  ;;  %v7294_v0 = vld [vmem:[#allocation18] ss:$0 sm:$0xff] }
0x171a   : > { %v6460_v33 = vmul.f32 %v7288_v15, %v6453_v10  ;;  %v1590_v10 = vld [vmem:[%s9166_s29] sm:$0xff] }
0x171c   : > { %v6467_v44 = vadd.f32 %v7289_v42, %v6460_v33  ;;  %v1591_v42 = vld [vmem:[%s9166_s29 + $0x8] sm:$0xff] }
0x171d   : > { %v8331_v33 = vpack.c.bf16 %v1591_v42, %v1590_v10 }
0x171e   : > { %v6468_v50 = vmax.f32 %v6467_v44, 0.0  ;;  %v8334_v44 = vpack.c.bf16 %v1593_v55, %v1592_v25 }
0x1720   : > { %8060 = vmatmul.mubr.msk.f32.vlgmr.msra.gmra.mrb[66].mxu0 %vm1603_vm1, %v6468_v50  ;;  %v1587_v50 = vld [vmem:[%s10255_s0 + $0x8] sm:$0xff] }
0x1721   : > { %8314 = vmatpush3.bf16.msra.mxu0 %v8313_v47  ;;  %8070 = vmatprep.mubr.msk.f32.mxu0 %vm8952_vm0, %v8953_v3  ;;  %v1586_v47 = vld [vmem:[%s10255_s0] sm:$0xff] }
0x1722   : > { %8315 = vmatprep.subr.bf16.mxu0 %v8951_v2  ;;  %v8337_v13 = vpack.c.bf16 %v1587_v50, %v1586_v47 }
0x1725   : > { %8317 = vmatpush3.bf16.msra.mxu0 %v8316_v53  ;;  %v7295_v53 = vld [vmem:[#allocation2] ss:$0 sm:$0xff] }
0x1728   : > { %8071 = vmatmul.mubr.msk.f32.vlgmr.msra.gmra.mrb[68].mxu0 %vm1603_vm1, %v6432_v6  ;;  %v8342_v6 = vadd.f32 %v7299_v23, %v7295_v53 }
0x17f3   : > { %v6538_v11 = vpop.f32.mrb[66].mxu0 }
0x17f4   : > { %v8061_v5 = vpop.f32.mrb[67].mxu0 }
0x17fb   : > { %v6611_v7 = vpop.f32.mrb[68].mxu0 }
0x17fc   : > { %v6612_v9 = vadd.f32 %v6611_v7, %v6538_v11  ;;  %v8072_v16 = vpop.f32.mrb[69].mxu0 }
0x17fe   : > { %v6621_v17 = vadd.f32 %v7292_v8, %v6612_v9 }
0x1800   : > { %v6622_v63 = vsel %vm2746_vm5, %v6621_v17, 0.0 }
0x1801   : > { %v6623_v41 = vrot.slane %v6622_v63, 4 }
0x1803   : > { %v6624_v4 = vadd.f32 %v6623_v41, %v6622_v63 }
0x1805   : > { %v6625_v18 = vrot.slane %v6624_v4, 2 }
0x1807   : > { %v6626_v54 = vadd.f32 %v6625_v18, %v6624_v4 }
0x1809   : > { %v6627_v39 = vrot.slane %v6626_v54, 1 }
0x180b   : > { %v6628_v27 = vadd.f32 %v6627_v39, %v6626_v54 }
0x180d   : > { %v6629_v28 = vmul.f32 0.125, %v6628_v27 }
0x180f   : > { %v6630_v12 = vsub.f32 %v6621_v17, %v6629_v28 }
0x1811   : > { %v6631_v29 = vmul.f32 %v6630_v12, %v6630_v12 }
0x1813   : > { %v6632_v20 = vsel %vm2746_vm5, %v6631_v29, 0.0 }
0x1814   : > { %v6633_v31 = vrot.slane %v6632_v20, 4 }
0x1816   : > { %v6634_v35 = vadd.f32 %v6633_v31, %v6632_v20 }
0x1818   : > { %v6635_v30 = vrot.slane %v6634_v35, 2 }
0x181a   : > { %v6636_v34 = vadd.f32 %v6635_v30, %v6634_v35 }
0x181c   : > { %v6637_v36 = vrot.slane %v6636_v34, 1 }
0x181e   : > { %v6638_v22 = vadd.f32 %v6637_v36, %v6636_v34 }
0x1820   : > { %v6639_v32 = vmul.f32 0.125, %v6638_v22 }
0x1822   : > { %v6640_v38 = vadd.f32 0.001, %v6639_v32 }
0x1824   : > { %8578 = vrsqrt.f32 %v6640_v38 }
0x182e   : > { %v8579_v40 = vpop.eup %8578 }
0x182f   : > { %v6642_v14 = vmul.f32 %v8579_v40, %v6630_v12 }
0x1831   : > { %v6649_v15 = vmul.f32 %v7293_v21, %v6642_v14 }
0x1833   : > { %v6656_v43 = vadd.f32 %v7294_v0, %v6649_v15 }
0x1835   : > { %v6657_v37 = vmax.f32 %v6656_v43, 0.0 }
0x1837   : > { %8090 = vmatmul.mubr.msk.f32.vlgmr.msra.gmra.mrb[54].mxu1 %vm2746_vm5, %v6657_v37 }
0x1838   : > { %8332 = vmatpush3.bf16.msra.mxu1 %v8331_v33  ;;  %8100 = vmatprep.mubr.msk.f32.mxu1 %vm8952_vm0, %v8953_v3 }
0x1839   : > { %8333 = vmatprep.subr.bf16.mxu1 %v8951_v2 }
0x183c   : > { %8335 = vmatpush3.bf16.msra.mxu1 %v8334_v44 }
0x183d   : > { %8336 = vmatprep.subr.bf16.mxu1 %v8951_v2 }
0x183f   : > { %8101 = vmatmul.mubr.msk.f32.vlgmr.msra.gmra.mrb[54].mxu1 %vm1603_vm1, %v10080_v1 }
0x1840   : > { %8338 = vmatpush3.bf16.msra.mxu1 %v8337_v13  ;;  %8111 = vmatprep.mubr.msk.f32.mxu1 %vm8952_vm0, %v8953_v3 }
0x1841   : > { %8339 = vmatprep.subr.bf16.mxu1 %v8951_v2 }
0x1844   : > { %8341 = vmatpush3.bf16.msra.mxu1 %v8340_v52 }
0x1847   : > { %8112 = vmatmul.mubr.msk.f32.vlgmr.msra.gmra.mrb[54].mxu1 %vm1603_vm1, %v10003_v45 }
0x191a   : > { %v6879_v46 = vpop.f32.mrb[54].mxu1 }
0x191b   : > { %v8343_v49 = vadd.f32 %v8342_v6, %v6879_v46  ;;  %v8113_v48 = vpop.f32.mrb[55].mxu1 }
0x191d   : > { %v6891_v1 = vsub.f32 0.0, %v8343_v49 }
0x191f   : > { %v6892_v19 = vmul.f32 1.442695, %v6891_v1 }
0x1921   : > { %8580 = vpow2.f32 %v6892_v19 }
0x192b   : > { %v8581_v26 = vpop.eup %8580 }
0x192c   : > { %v6894_v56 = vadd.f32 1.0, %v8581_v26 }
0x192e   : > { %8582 = vrcp.f32 %v6894_v56 }
0x1938   : > { %v8583_v3 = vpop.eup %8582 }
0x1939   : > { %6898 = vst.msk [vmem:[%s1485_s23] sm:$0xff] %vm6897_vm6, %v8583_v3 }
0x193a PF: > { %s110_s1 = sadd.s32 1, %s8895_s1  }
0x193b   : > { %p107_p11 = scmp.ge.s32.totalorder %s110_s1, 4  }
0x193d   :  { %109 = sbr.rel (!%p107_p11) target bundleno = 87 (0x57), region = 330 }
0x1944   :  { %6946 = vsyncpa [#allocation5], 1 }
0x1945   :  { %6948 = vsyncpa [#allocation5 + $0x1], 1 }
0x1946   :  { %6949 = vsyncpa [#allocation7], 1 }
0x1947   :  { %6950 = vsyncpa [#allocation10], 1 }
0x1948   :  { %6951 = vsyncpa [#allocation13], 1 }
0x1949   :  { %6952 = vsyncpa [#allocation16], 1 }
0x194a   :  { %6953 = vsyncpa [#allocation19], 1 }

</bundles_post_ra>
